<compile_context>
chip_gen: v6e
topology: v6e:2x2x1
jax: 0.10.0
libtpu: 0.0.40
codegen_flags: <defaults>
</compile_context>

<pallas_src>
import numpy as np
import jax
import jax.numpy as jnp
from jax.experimental import pallas as pl
from jax.experimental.pallas import tpu as pltpu

OUT_H, OUT_W = 1080, 1920


# ----------------------------------------------------------------------------
# Static interpolation matrices (host-side, align_corners=True)
# ----------------------------------------------------------------------------
def _bilinear_matrix(out_size, in_size):
    """Interpolation matrix M (out_size, in_size) for align_corners=True."""
    if in_size == 1 or out_size == 1:
        m = np.zeros((out_size, in_size), np.float32)
        m[:, 0] = 1.0
        return m
    src = np.arange(out_size, dtype=np.float64) * (in_size - 1) / (out_size - 1)
    i0 = np.clip(np.floor(src).astype(np.int64), 0, in_size - 1)
    i1 = np.minimum(i0 + 1, in_size - 1)
    w1 = (src - i0).astype(np.float32)
    w0 = 1.0 - w1
    m = np.zeros((out_size, in_size), np.float32)
    m[np.arange(out_size), i0] += w0
    m[np.arange(out_size), i1] += w1
    return m


def _build_folded_matrices(h1, w1):
    """Fold (x4 upsample) -> (ConvT 2x2 s2 pixel interleave) -> (final resize).

    Per axis:  G_k[u, p'] = sum_p M_final[u, 2p+k] * M_x4[p, p'],  k in {0,1}
    stacked as G[u, k*h1 + p'].  Rows of G sum to 1, so constant biases folded
    into the small per-batch tensor pass through exactly.
    """
    mh4 = _bilinear_matrix(4 * h1, h1)             # (4*h1, h1)
    mw4 = _bilinear_matrix(4 * w1, w1)
    mh = _bilinear_matrix(OUT_H, 8 * h1)           # (1080, 8*h1)
    mw = _bilinear_matrix(OUT_W, 8 * w1)           # (1920, 8*w1)
    gh = np.concatenate([mh[:, kh::2] @ mh4 for kh in (0, 1)], axis=1)  # (1080, 2*h1)
    gw = np.concatenate([mw[:, kw::2] @ mw4 for kw in (0, 1)], axis=1)  # (1920, 2*w1)
    return gh.astype(np.float32), gw.astype(np.float32)


# ----------------------------------------------------------------------------
# Pallas kernel: fused (row-tile of GH) @ SW + sigmoid, bf16 writeback
# ----------------------------------------------------------------------------
def _head_kernel(gh_ref, sw_ref, o_ref):
    """o = sigmoid(gh_tile @ sw) for one (batch, row-tile).

    gh_ref : (TH, KPAD)      bf16, row-tile of the folded H matrix (zero-padded K)
    sw_ref : (1, KPAD, Wout) bf16, per-batch S @ GW^T with all biases folded in
    o_ref  : (1, TH, Wout)   bf16
    """
    acc = jnp.dot(gh_ref[...], sw_ref[0], preferred_element_type=jnp.float32)
    # sigmoid(x) = 0.5 * tanh(0.5 * x) + 0.5 : single EUP op, bounded in [0, 1].
    o_ref[0] = (0.5 * jnp.tanh(0.5 * acc) + 0.5).astype(o_ref.dtype)


def _pick_row_tile(out_h, max_tile=360):
    """Largest divisor of out_h that is a multiple of 8 and <= max_tile."""
    cands = [t for t in range(8, min(max_tile, out_h) + 1, 8) if out_h % t == 0]
    return max(cands) if cands else out_h


def _resize_sigmoid(gh_pad, sw_pad):
    """sigmoid(GH @ SW) -> (N, 1080, 1920) bfloat16, row-tiled Pallas kernel."""
    n, kpad, wout = sw_pad.shape
    out_h = gh_pad.shape[0]
    th = _pick_row_tile(out_h)                     # 1080 -> 360, grid (N, 3)
    grid = (n, out_h // th)

    return pl.pallas_call(
        _head_kernel,
        out_shape=jax.ShapeDtypeStruct((n, out_h, wout), jnp.bfloat16),
        grid=grid,
        in_specs=[
            pl.BlockSpec((th, kpad), lambda b, h: (h, 0)),
            pl.BlockSpec((1, kpad, wout), lambda b, h: (b, 0, 0)),
        ],
        out_specs=pl.BlockSpec((1, th, wout), lambda b, h: (b, h, 0)),
        compiler_params=pltpu.CompilerParams(
            dimension_semantics=("parallel", "parallel")),
    )(gh_pad, sw_pad)


# ----------------------------------------------------------------------------
# Forward pass of the segmentation head
# ----------------------------------------------------------------------------
def fishnet150_seg_forward(x, params):
    """Head of FishNet150_seg_model.forward.

    x : (N, 66, Hx, Wx) feature map from the fishnet trunk.
    Returns sigmoid probabilities at (N, 1080, 1920) in bfloat16 (caller may
    upcast; the kernel is HBM-write bound so bf16 writeback halves its cost).
    """
    n, _, hx, wx = x.shape
    h1, w1 = 2 * hx, 2 * wx                        # spatial size after ConvT #1
    k = 2 * h1                                     # folded contraction dim
    kpad = max(128, ((k + 127) // 128) * 128)

    w2, b2, w3, b3 = params["w2"], params["b2"], params["w3"], params["b3"]

    # Static folded interpolation matrices (trace-time constants).
    gh, gw = _build_folded_matrices(h1, w1)        # (1080, 2*h1), (1920, 2*w1)
    gh_full = np.zeros((OUT_H, kpad), np.float32)
    gh_full[:, :k] = gh
    gh_pad = jnp.asarray(gh_full, dtype=jnp.bfloat16)
    gw = jnp.asarray(gw)

    # ---- tiny XLA prologue: exact fold of the three linear layers ----------
    # W23[ci,ah,aw,kh,kw] = sum_c w2[ci,c,ah,aw] * w3[c,0,kh,kw]
    w23 = jnp.einsum('icab,ckl->iabkl', w2, w3[:, 0])
    b23 = jnp.einsum('c,ckl->kl', b2, w3[:, 0])    # b2 pushed through ConvT #2
    # S[n, kh, 2y+ah, kw, 2z+aw] = sum_ci x[n,ci,y,z]*W23[ci,ah,aw,kh,kw] + b23 + b3
    s = jnp.einsum('niyz,iabkl->nkyalzb', x, w23)
    s = s.reshape(n, 2, h1, 2, w1) + b23[None, :, None, :, None] + b3[0]
    s = s.reshape(n, 2 * h1, 2 * w1)
    # Hoist the first resize matmul out of the kernel: SW = S @ GW^T
    sw = jnp.einsum('nab,vb->nav', s, gw)          # (N, 2*h1, 1920)
    sw_pad = jnp.pad(sw, ((0, 0), (0, kpad - k), (0, 0))).astype(jnp.bfloat16)

    out = _resize_sigmoid(gh_pad, sw_pad)          # (N, 1080, 1920) bf16
    # torch.squeeze after the (N,1,H,W) interpolate; sigmoid fused in-kernel.
    return jnp.squeeze(out)


# ----------------------------------------------------------------------------
# Straightforward JAX reference (un-folded), for correctness checking
# ----------------------------------------------------------------------------
def _conv_transpose_2x2_s2(x, w, b):
    """ConvTranspose2d(Cin, Cout, kernel_size=2, stride=2) with bias, NCHW."""
    n, cin, h, wd = x.shape
    cout = w.shape[1]
    x_flat = jnp.transpose(x, (0, 2, 3, 1)).reshape(n * h * wd, cin)
    y = x_flat @ w.reshape(cin, cout * 4) + jnp.repeat(b, 4)[None, :]
    y = y.reshape(n, h, wd, cout, 2, 2)
    return jnp.transpose(y, (0, 3, 1, 4, 2, 5)).reshape(n, cout, 2 * h, 2 * wd)


def _reference_forward(x, params):
    y = _conv_transpose_2x2_s2(x, params["w2"], params["b2"])
    _, _, h, w = y.shape
    mh4 = jnp.asarray(_bilinear_matrix(4 * h, h))
    mw4 = jnp.asarray(_bilinear_matrix(4 * w, w))
    y = jnp.einsum('ph,nchw,qw->ncpq', mh4, y, mw4)
    y = _conv_transpose_2x2_s2(y, params["w3"], params["b3"])
    mh = jnp.asarray(_bilinear_matrix(OUT_H, y.shape[2]))
    mw = jnp.asarray(_bilinear_matrix(OUT_W, y.shape[3]))
    z = jnp.einsum('ah,nhw,bw->nab', mh, y[:, 0], mw)
    return jax.nn.sigmoid(z)


# ----------------------------------------------------------------------------
# Main
# ----------------------------------------------------------------------------
if __name__ == "__main__":
    key = jax.random.PRNGKey(0)
    k_x, k_w2, k_b2, k_w3, k_b3 = jax.random.split(key, 5)

    # Small synthetic shapes: N=2, 66-channel 4x4 feature map from the trunk.
    x = jax.random.normal(k_x, (2, 66, 4, 4), dtype=jnp.float32)
    params = {
        # ConvTranspose2d(66, 6, kernel_size=2, stride=2)
        "w2": 0.05 * jax.random.normal(k_w2, (66, 6, 2, 2), dtype=jnp.float32),
        "b2": 0.05 * jax.random.normal(k_b2, (6,), dtype=jnp.float32),
        # ConvTranspose2d(6, 1, kernel_size=2, stride=2)
        "w3": 0.05 * jax.random.normal(k_w3, (6, 1, 2, 2), dtype=jnp.float32),
        "b3": 0.05 * jax.random.normal(k_b3, (1,), dtype=jnp.float32),
    }

    out = jax.jit(fishnet150_seg_forward)(x, params)
    out = jax.block_until_ready(out)
    assert out.shape == (2, 1080, 1920), out.shape
    assert out.dtype == jnp.bfloat16, out.dtype

    ref = jax.block_until_ready(jax.jit(_reference_forward)(x, params))

    out_f32 = out.astype(jnp.float32)
    assert bool(jnp.all(jnp.isfinite(out_f32)))
    assert bool(jnp.all((out_f32 >= 0.0) & (out_f32 <= 1.0)))   # tanh form is bounded
    max_err = float(jnp.max(jnp.abs(out_f32 - ref)))
    assert max_err < 2e-2, f"max abs error vs reference: {max_err}"
    print("KERNEL_OK")
</pallas_src>

<mosaic_0001>
module attributes {stable_mosaic.version = 11 : i64} {
  func.func @_head_kernel(%arg0: i32, %arg1: i32, %arg2: memref<360x128xbf16, #tpu.memory_space<vmem>>, %arg3: memref<1x128x1920xbf16, #tpu.memory_space<vmem>>, %arg4: memref<1x360x1920xbf16, #tpu.memory_space<vmem>>) attributes {dimension_semantics = [#tpu.dimension_semantics<parallel>, #tpu.dimension_semantics<parallel>], iteration_bounds = array<i64: 2, 3>, scalar_prefetch = 0 : i64, scratch_operands = 0 : i64, tpu.core_type = #tpu.core_type<tc>, window_params = [{transform_indices = @transform_0, window_bounds = array<i64: 360, 128>}, {transform_indices = @transform_1, window_bounds = array<i64: 1, 128, 1920>}, {transform_indices = @transform_2, window_bounds = array<i64: 1, 360, 1920>}]} {
    %c0 = arith.constant 0 : index
    %c0_0 = arith.constant 0 : index
    %0 = vector.load %arg2[%c0, %c0_0] : memref<360x128xbf16, #tpu.memory_space<vmem>>, vector<360x128xbf16>
    %c0_1 = arith.constant 0 : index
    %c0_2 = arith.constant 0 : index
    %c0_3 = arith.constant 0 : index
    %1 = vector.load %arg3[%c0_1, %c0_2, %c0_3] : memref<1x128x1920xbf16, #tpu.memory_space<vmem>>, vector<1x128x1920xbf16>
    %2 = vector.shape_cast %1 : vector<1x128x1920xbf16> to vector<128x1920xbf16>
    %cst = arith.constant dense<0.000000e+00> : vector<360x1920xf32>
    %3 = tpu.matmul %0, %2, %cst {dimension_numbers = #tpu.dot_dimension_numbers<[1], [0], [0], [1], [0, 0, 1, 1], [], []>} : vector<360x128xbf16>, vector<128x1920xbf16>, vector<360x1920xf32> -> vector<360x1920xf32>
    %cst_4 = arith.constant 5.000000e-01 : f32
    %4 = vector.broadcast %cst_4 : f32 to vector<360x1920xf32>
    %5 = arith.mulf %4, %3 : vector<360x1920xf32>
    %6 = math.tanh %5 : vector<360x1920xf32>
    %cst_5 = arith.constant 5.000000e-01 : f32
    %7 = vector.broadcast %cst_5 : f32 to vector<360x1920xf32>
    %8 = arith.mulf %7, %6 : vector<360x1920xf32>
    %cst_6 = arith.constant 5.000000e-01 : f32
    %9 = vector.broadcast %cst_6 : f32 to vector<360x1920xf32>
    %10 = arith.addf %8, %9 : vector<360x1920xf32>
    %11 = arith.truncf %10 : vector<360x1920xf32> to vector<360x1920xbf16>
    %c0_7 = arith.constant 0 : index
    %c0_8 = arith.constant 0 : index
    %c0_9 = arith.constant 0 : index
    %12 = vector.load %arg4[%c0_7, %c0_8, %c0_9] : memref<1x360x1920xbf16, #tpu.memory_space<vmem>>, vector<1x360x1920xbf16>
    %13 = vector.shape_cast %12 : vector<1x360x1920xbf16> to vector<360x1920xbf16>
    %14 = vector.shape_cast %11 : vector<360x1920xbf16> to vector<1x360x1920xbf16>
    tpu.vector_store %arg4[%c0_7, %c0_8, %c0_9], %14 {strides = array<i32>} : memref<1x360x1920xbf16, #tpu.memory_space<vmem>>, vector<1x360x1920xbf16>,
    return
  }
  func.func @transform_0(%arg0: i32, %arg1: i32) -> (i32, i32) {
    %c0_i32 = arith.constant 0 : i32
    %c0_i32_0 = arith.constant 0 : i32
    return %arg1, %c0_i32 : i32, i32
  }
  func.func @transform_1(%arg0: i32, %arg1: i32) -> (i32, i32, i32) {
    %c0_i32 = arith.constant 0 : i32
    %c0_i32_0 = arith.constant 0 : i32
    %c0_i32_1 = arith.constant 0 : i32
    return %arg0, %c0_i32, %c0_i32_0 : i32, i32, i32
  }
  func.func @transform_2(%arg0: i32, %arg1: i32) -> (i32, i32, i32) {
    %c0_i32 = arith.constant 0 : i32
    %c0_i32_0 = arith.constant 0 : i32
    return %arg0, %arg1, %c0_i32 : i32, i32, i32
  }
}

</mosaic_0001>

<bundles_post_ra>
// kernel: fishnet150_seg_forward.1
= control target key start
LH: loop header
LB: loop body
LE: loop exit
PB: predicated region body
PF: predicated region fallthrough
CT: control target
= control target key end

     0   :  { %7 = vsyncpa [#allocation3], 0  ;;  %s14142_s0 = inlined_call_operand.hbm [shape: bf16[1080,128], index: 0, kind: input, shape index: {}]   ;;  %s14143_s1 = inlined_call_operand.vmem [shape: bf16[2,128,1920], index: 1, kind: input, shape index: {}]   ;;  %s14144_s2 = inlined_call_operand.hbm [shape: bf16[2,1080,1920], index: 2, kind: output, shape index: {}]  }
   0x1   :  { %9 = vsyncpa [#allocation3 + $0x1], 0 }
   0x2   :  { %10 = vsyncpa [#allocation4], 0 }
   0x3   :  { %12 = vsyncpa [#allocation4 + $0x1], 0  ;;  %s11332_s9 = smov 0   ;;  %s11334_s10 = smov 0  }
   0x4   :  { %s11336_s11 = smov 0   ;;  %s11338_s12 = smov 0  }
   0x5   :  { %s11340_s13 = smov 0   ;;  %s11342_s14 = smov 0  }
   0x6   :  { %s11344_s15 = smov 0   ;;  %s11346_s16 = smov 0  }
   0x7   :  { %s11348_s17 = smov 0   ;;  %s11350_s18 = smov 0  }
   0x8   :  { %s11352_s19 = smov 0  }
   0x9 LB: > { %14155 = sst [smem:[#allocation8_spill]] %s11302_s18  ;;  %s8420_s20 = sadd.s32 4294967295, %s11306_s19   ;;  %s11306_s19 = sphi %s11352_s19, %s18_s19   ;;  %s11302_s18 = sphi %s11350_s18, %s14245_s18   ;;  %s11298_s17 = sphi %s11348_s17, %s14253_s17   ;;  %s11294_s16 = sphi %s11346_s16, %s14243_s16   ;;  %s11290_s15 = sphi %s11344_s15, %s14252_s15   ;;  %s11286_s14 = sphi %s11342_s14, %s14251_s14   ;;  %s11282_s13 = sphi %s11340_s13, %s14250_s13   ;;  %s11278_s12 = sphi %s11338_s12, %s14249_s12   ;;  %s11274_s11 = sphi %s11336_s11, %s14248_s11   ;;  %s11270_s10 = sphi %s11334_s10, %s14247_s10   ;;  %s11266_s9 = sphi %s11332_s9, %s14246_s9  }
   0xa   : > { %s8421_s21 = sadd.s32 4294967294, %s11306_s19   ;;  %s27_s22 = sadd.s32 1, %s11298_s17 }
   0xb   : > { %s30_s23 = sadd.s32 1, %s11302_s18  ;;  %p28_p0 = scmp.ge.s32.totalorder %s27_s22, 3 }
   0xc   : > { %s37_s24 = sadd.s32 1, %s11286_s14  ;;  %p44_p1 = scmp.ne.s32.totalorder %s11286_s14, %s11282_s13 }
   0xd   : > { %p45_p2 = scmp.eq.s32.totalorder %s11306_s19, 0  ;;  %s14255_s22 = smov (%p28_p0, %s27_s22), 0 }
   0xe   : > { %14156 = sst [smem:[#allocation9_spill]] %s14255_s22  ;;  %s14257_s23 = smov (!%p28_p0, %s30_s23), %s11302_s18 }
   0xf   : > { %s34_s25 = ssub.s32 %s11298_s17, %s14255_s22  ;;  %p11398_p3 = por %p45_p2, %p44_p1 }
  0x10   : > { %p32_p4 = scmp.ge.s32.totalorder %s14257_s23, 2  ;;  %p35_p5 = scmp.eq.s32.totalorder %s34_s25, 0 }
  0x11   : > { %p50_p6 = scmp.ne.s32.totalorder %s11282_s13, %s11278_s12  ;;  %p51_p7 = scmp.eq.s32.totalorder %s8420_s20, 0 }
  0x12   : > { %s14259_s23 = smov (%p32_p4, %s14257_s23), 0  ;;  %s91_s3 = sadd.s32 1, %s11274_s11 }
  0x13   : > { %14158 = sst [smem:[#allocation10_spill]] %s14259_s23  ;;  %p11408_p8 = por %p51_p7, %p50_p6 }
  0x14   : > { %s11406_s27 = scalar_select %p35_p5, %s11286_s14, %s37_s24  }
  0x15   : > { %s86_s29 = ssub.s32 %s11302_s18, %s14259_s23  ;;  %p101_p10 = scmp.ne.s32.totalorder %s11274_s11, %s11270_s10 }
  0x16   : > { %s88_s30 = sor.u32 %s86_s29, %s34_s25  ;;  %p102_p11 = scmp.eq.s32.totalorder %s8420_s20, 5 }
  0x17   : > { %p89_p9 = scmp.eq.s32.totalorder %s88_s30, 0  ;;  %p107_p12 = scmp.ne.s32.totalorder %s11270_s10, %s11266_s9 }
  0x18   : > { %p11422_p13 = por %p102_p11, %p101_p10  ;;  %p108_p0 = scmp.eq.s32.totalorder %s8421_s21, 5 }
  0x19   : > { %s11420_s4 = scalar_select %p89_p9, %s11274_s11, %s91_s3  }
  0x1a   : > { %p9451_p1 = scmp.lt.s32.totalorder %s11306_s19, 6  ;;  %p11427_p2 = por %p108_p0, %p107_p12 }
  0x1b   : > { %s128_s7 = sand.u32 1, %s11286_s14   ;;  %s8933_s12 = smul.u32 2880, %s11298_s17 }
  0x1c   : > { %s9433_s8 = smul.u32 180, %s128_s7  ;;  %p11435_p4 = pnand %p9451_p1, %p11398_p3 }
  0x1d   : > { %s138_s29 = scalar_lea.hbm %s14142_s0, %s8933_s12  ;;  %p8425_p5 = scmp.ge.s32.totalorder %s11306_s19, 1 }
  0x1e   : > { %s132_s30 = scalar_lea.vmem [#allocation2], %s9433_s8  ;;  %s129_s3 = scalar_lea.sflag [#allocation3], %s128_s7 }
  0x1f   : > { %s139_s21 = sshll.u32 %s132_s30, 4  ;;  %p11160_p6 = pneg %p11435_p4  ;;  %s140_s21 = int_to_ptr.vmem [resolvable:$true] %s139_s21 }
  0x20   : > { %s11171_s23 = scalar_lea.vmem %s140_s21, 2880  ;;  %s11308_s26 = smov [#allocation2]  }
  0x21   : > { %p11172_p7 = scmp.ne.s32.totalorder %s140_s21, %s11171_s23  ;;  %s11176_s22 = sshll.u32 %s11308_s26, 4  ;;  %s11177_s22 = int_to_ptr.vmem [resolvable:$false] %s11176_s22 }
  0x22   : > { %s11178_s18 = scalar_lea.vmem %s11177_s22, 5760  ;;  %p11179_p3 = scmp.lt.s32.totalorder %s140_s21, %s11177_s22 }
  0x23   : > { %p11174_p9 = pnand %p11172_p7, %p11160_p6  ;;  %p11180_p11 = scmp.lt.s32.totalorder %s11178_s18, %s11171_s23 }
  0x25   : > { %p11175_p10 = pneg %p11174_p9  ;;  %p11181_p12 = por %p11180_p11, %p11179_p3 }
  0x27   : > { %p11182_p0 = pnand %p11181_p12, %p11175_p10 }
  0x29   : > { %11185 = shalt.err (!%p11182_p0)
}
  0x2a   : > { %s11309_s8 = smov 64   ;;  %s11310_s7 = smov 4  }
  0x2b   : > { %9446 = dma.hbm_to_vmem [thread:$0]  (!%p11435_p4), %s138_s29, 2880, %s140_s21, %s129_s3, %s11309_s8, %s11309_s8, %s11310_s7  }
  0x2c   : > { %p155_p1 = scmp.lt.s32.totalorder %s11306_s19, 7 }
  0x2e   : > { %p156_p6 = pnand %p8425_p5, %p155_p1 }
  0x30   : > { %159 = sbr.rel (%p156_p6) target bundleno = 1101 (0x44d), region = 28 }
  0x35   : > { %s161_s12 = sand.u32 1, %s11282_s13  }
  0x36   : > { %s9434_s20 = smul.u32 180, %s161_s12  ;;  %s162_s22 = scalar_lea.sflag [#allocation3], %s161_s12 }
  0x38   : > { %s11451_s18 = scalar_lea.vmem [#allocation2], %s9434_s20 }
  0x39   : > { %11257 = dma.done.wait (%p11408_p8), %s162_s22, 2880  }
  0x3a   : > { %11259 = vsyncadd (%p11408_p8), %s162_s22, 4294964416  ;;  %p192_p7 = scmp.lt.s32.totalorder %s11294_s16, 1  ;;  %v14150_v0 = vmov 0   ;;  %v11501_v35 = vld [vmem:[%s11451_s18] sm:$0xff]   ;;  %v11516_v44 = vld [vmem:[%s11451_s18 + $0x8] sm:$0xff]   ;;  %s188_s28 = sand.u32 1, %s11270_s10  }
  0x3b   : > { %1148 = vmatprep.mubr.bf16.mxu0 %v14150_v0  ;;  %1409 = vmatprep.mubr.bf16.mxu1 %v14150_v0  ;;  %v11531_v53 = vld [vmem:[%s11451_s18 + $0x10] sm:$0xff]   ;;  %v11544_v60 = vld [vmem:[%s11451_s18 + $0x18] sm:$0xff]   ;;  %s11678_s21 = smul.u32 2700, %s188_s28  ;;  %vm11313_vm0 = vmmov 0  }
  0x3c   : > { %s193_s23 = scalar_select %p192_p7, %s11294_s16, 1 }
  0x3d   : > { %s11683_s3 = scalar_lea.vmem [#allocation5], %s11678_s21  ;;  %s9452_s26 = smul.u32 675, %s11290_s15 }
  0x3e   : > { %s9436_s24 = smul.u32 960, %s193_s23  ;;  %s8321_s12 = sshll.u32 %s11683_s3, 4  ;;  %s14072_s12 = int_to_ptr.vmem [resolvable:$true] %s8321_s12 }
  0x3f   : > { %s9438_s8 = smul.u32 2025, %s11294_s16  ;;  %s11186_s23 = scalar_lea.vmem %s14072_s12, 43200 }
  0x40   : > { %s11464_s30 = scalar_lea.vmem %s14143_s1, %s9436_s24  ;;  %p11187_p8 = scmp.ne.s32.totalorder %s14072_s12, %s11186_s23 }
  0x41   : > { %v9549_v1 = vld [vmem:[%s11464_s30 + $0x34c] ss:$60 sps:$4 sm:$0xff]   ;;  %v9551_v2 = vld [vmem:[%s11464_s30 + $0x354] ss:$60 sps:$4 sm:$0xff]   ;;  %v9557_v6 = vld [vmem:[%s11464_s30 + $0x2dc] ss:$60 sps:$4 sm:$0xff]   ;;  %s8318_s7 = sadd.s32 %s9452_s26, %s9438_s8 }
  0x42   : > { %1116 = vmatprep.subr.bf16.mxu0 %v9549_v1  ;;  %v9553_v3 = vld [vmem:[%s11464_s30 + $0x348] ss:$60 sps:$4 sm:$0xff]   ;;  %v9554_v4 = vld [vmem:[%s11464_s30 + $0x350] ss:$60 sps:$4 sm:$0xff]   ;;  %1377 = vmatprep.subr.bf16.mxu1 %v9551_v2  ;;  %v9560_v8 = vld [vmem:[%s11464_s30 + $0x2d8] ss:$60 sps:$4 sm:$0xff]   ;;  %p11188_p4 = pnand %p11187_p8, %p11422_p13 }
  0x43   : > { %v9555_v5 = vld [vmem:[%s11464_s30 + $0x2d4] ss:$60 sps:$4 sm:$0xff]   ;;  %1117 = vmatpush1.bf16.msra.mxu0 %v9553_v3  ;;  %1378 = vmatpush1.bf16.msra.mxu1 %v9554_v4  ;;  %v9561_v9 = vld [vmem:[%s11464_s30 + $0x25c] ss:$60 sps:$4 sm:$0xff]   ;;  %v9563_v10 = vld [vmem:[%s11464_s30 + $0x264] ss:$60 sps:$4 sm:$0xff]  }
  0x44   : > { %v9559_v7 = vld [vmem:[%s11464_s30 + $0x2d0] ss:$60 sps:$4 sm:$0xff]   ;;  %1118 = vmatprep.subr.bf16.mxu0 %v9555_v5  ;;  %1379 = vmatprep.subr.bf16.mxu1 %v9557_v6  ;;  %v9565_v11 = vld [vmem:[%s11464_s30 + $0x258] ss:$60 sps:$4 sm:$0xff]   ;;  %v9566_v12 = vld [vmem:[%s11464_s30 + $0x260] ss:$60 sps:$4 sm:$0xff]   ;;  %p11189_p5 = pneg %p11188_p4 }
  0x45   : > { %v9567_v13 = vld [vmem:[%s11464_s30 + $0x1e4] ss:$60 sps:$4 sm:$0xff]   ;;  %v9569_v14 = vld [vmem:[%s11464_s30 + $0x1ec] ss:$60 sps:$4 sm:$0xff]   ;;  %v9575_v18 = vld [vmem:[%s11464_s30 + $0x174] ss:$60 sps:$4 sm:$0xff]  }
  0x46   : > { %v9571_v15 = vld [vmem:[%s11464_s30 + $0x1e0] ss:$60 sps:$4 sm:$0xff]   ;;  %v9572_v16 = vld [vmem:[%s11464_s30 + $0x1e8] ss:$60 sps:$4 sm:$0xff]   ;;  %v9578_v20 = vld [vmem:[%s11464_s30 + $0x170] ss:$60 sps:$4 sm:$0xff]  }
  0x47   : > { %1119 = vmatpush1.bf16.msra.mxu0 %v9559_v7  ;;  %1380 = vmatpush1.bf16.msra.mxu1 %v9560_v8  ;;  %v9573_v17 = vld [vmem:[%s11464_s30 + $0x16c] ss:$60 sps:$4 sm:$0xff]   ;;  %v9579_v21 = vld [vmem:[%s11464_s30 + $0xf4] ss:$60 sps:$4 sm:$0xff]   ;;  %v9581_v22 = vld [vmem:[%s11464_s30 + $0xfc] ss:$60 sps:$4 sm:$0xff]  }
  0x48   : > { %1120 = vmatprep.subr.bf16.mxu0 %v9561_v9  ;;  %1381 = vmatprep.subr.bf16.mxu1 %v9563_v10  ;;  %v9577_v19 = vld [vmem:[%s11464_s30 + $0x168] ss:$60 sps:$4 sm:$0xff]   ;;  %v9583_v23 = vld [vmem:[%s11464_s30 + $0xf0] ss:$60 sps:$4 sm:$0xff]   ;;  %v9584_v24 = vld [vmem:[%s11464_s30 + $0xf8] ss:$60 sps:$4 sm:$0xff]  }
  0x49   : > { %v9585_v25 = vld [vmem:[%s11464_s30 + $0x7c] ss:$60 sps:$4 sm:$0xff]   ;;  %v9587_v26 = vld [vmem:[%s11464_s30 + $0x84] ss:$60 sps:$4 sm:$0xff]   ;;  %v9593_v30 = vld [vmem:[%s11464_s30 + $0xc] ss:$60 sps:$4 sm:$0xff]  }
  0x4a   : > { %v9589_v27 = vld [vmem:[%s11464_s30 + $0x78] ss:$60 sps:$4 sm:$0xff]   ;;  %v9590_v28 = vld [vmem:[%s11464_s30 + $0x80] ss:$60 sps:$4 sm:$0xff]   ;;  %v9596_v32 = vld [vmem:[%s11464_s30 + $0x8] ss:$60 sps:$4 sm:$0xff]  }
  0x4b   : > { %1121 = vmatpush1.bf16.msra.mxu0 %v9565_v11  ;;  %1382 = vmatpush1.bf16.msra.mxu1 %v9566_v12  ;;  %v9591_v29 = vld [vmem:[%s11464_s30 + $0x4] ss:$60 sps:$4 sm:$0xff]   ;;  %v9600_v33 = vld [vmem:[%s11464_s30 + $0x35c] ss:$60 sps:$4 sm:$0xff]   ;;  %v9612_v40 = vld [vmem:[%s11464_s30 + $0x2ec] ss:$60 sps:$4 sm:$0xff]  }
  0x4c   : > { %1122 = vmatprep.subr.bf16.mxu0 %v9567_v13  ;;  %1383 = vmatprep.subr.bf16.mxu1 %v9569_v14  ;;  %v9595_v31 = vld [vmem:[%s11464_s30] ss:$60 sps:$4 sm:$0xff]   ;;  %v9598_v36 = vld [vmem:[%s11464_s30 + $0x358] ss:$60 sps:$4 sm:$0xff]   ;;  %v9610_v41 = vld [vmem:[%s11464_s30 + $0x2e8] ss:$60 sps:$4 sm:$0xff]  }
  0x4d   : > { %v9603_v34 = vld [vmem:[%s11464_s30 + $0x364] ss:$60 sps:$4 sm:$0xff]   ;;  %v9617_v42 = vld [vmem:[%s11464_s30 + $0x26c] ss:$60 sps:$4 sm:$0xff]   ;;  %v9621_v43 = vld [vmem:[%s11464_s30 + $0x274] ss:$60 sps:$4 sm:$0xff]  }
  0x4e   : > { %v9601_v37 = vld [vmem:[%s11464_s30 + $0x360] ss:$60 sps:$4 sm:$0xff]   ;;  %v9615_v45 = vld [vmem:[%s11464_s30 + $0x268] ss:$60 sps:$4 sm:$0xff]   ;;  %v9619_v46 = vld [vmem:[%s11464_s30 + $0x270] ss:$60 sps:$4 sm:$0xff]  }
  0x4f   : > { %1123 = vmatpush1.bf16.msra.mxu0 %v9571_v15  ;;  %1384 = vmatpush1.bf16.msra.mxu1 %v9572_v16  ;;  %v9608_v38 = vld [vmem:[%s11464_s30 + $0x2e4] ss:$60 sps:$4 sm:$0xff]   ;;  %v9626_v47 = vld [vmem:[%s11464_s30 + $0x1f4] ss:$60 sps:$4 sm:$0xff]   ;;  %v9629_v48 = vld [vmem:[%s11464_s30 + $0x1fc] ss:$60 sps:$4 sm:$0xff]  }
  0x50   : > { %1124 = vmatprep.subr.bf16.mxu0 %v9573_v17  ;;  %1385 = vmatprep.subr.bf16.mxu1 %v9575_v18  ;;  %v9606_v39 = vld [vmem:[%s11464_s30 + $0x2e0] ss:$60 sps:$4 sm:$0xff]   ;;  %v9624_v49 = vld [vmem:[%s11464_s30 + $0x1f0] ss:$60 sps:$4 sm:$0xff]   ;;  %v9627_v50 = vld [vmem:[%s11464_s30 + $0x1f8] ss:$60 sps:$4 sm:$0xff]  }
  0x51   : > { %v9635_v51 = vld [vmem:[%s11464_s30 + $0x17c] ss:$60 sps:$4 sm:$0xff]   ;;  %v9638_v52 = vld [vmem:[%s11464_s30 + $0x184] ss:$60 sps:$4 sm:$0xff]   ;;  %v9647_v58 = vld [vmem:[%s11464_s30 + $0x10c] ss:$60 sps:$4 sm:$0xff]  }
  0x52   : > { %v9633_v54 = vld [vmem:[%s11464_s30 + $0x178] ss:$60 sps:$4 sm:$0xff]   ;;  %v9636_v55 = vld [vmem:[%s11464_s30 + $0x180] ss:$60 sps:$4 sm:$0xff]   ;;  %v9645_v59 = vld [vmem:[%s11464_s30 + $0x108] ss:$60 sps:$4 sm:$0xff]  }
  0x53   : > { %1125 = vmatpush1.bf16.msra.mxu0 %v9577_v19  ;;  %1386 = vmatpush1.bf16.msra.mxu1 %v9578_v20  ;;  %v9644_v56 = vld [vmem:[%s11464_s30 + $0x104] ss:$60 sps:$4 sm:$0xff]   ;;  %v9653_v61 = vld [vmem:[%s11464_s30 + $0x8c] ss:$60 sps:$4 sm:$0xff]   ;;  %v9656_v63 = vld [vmem:[%s11464_s30 + $0x94] ss:$60 sps:$4 sm:$0xff]  }
  0x54   : > { %1126 = vmatprep.subr.bf16.mxu0 %v9579_v21  ;;  %1387 = vmatprep.subr.bf16.mxu1 %v9581_v22  ;;  %v9642_v57 = vld [vmem:[%s11464_s30 + $0x100] ss:$60 sps:$4 sm:$0xff]   ;;  %v9651_v62 = vld [vmem:[%s11464_s30 + $0x88] ss:$60 sps:$4 sm:$0xff]   ;;  %v9654_v1 = vld [vmem:[%s11464_s30 + $0x90] ss:$60 sps:$4 sm:$0xff]  }
  0x55   : > { %v11555_v2 = vld [vmem:[%s11451_s18 + $0x20] sm:$0xff]   ;;  %v9660_v3 = vld [vmem:[%s11464_s30 + $0x10] ss:$60 sps:$4 sm:$0xff]   ;;  %s8930_s20 = sshll.u32 %s8318_s7, 6  ;;  %s11314_s24 = smov [#allocation5]  }
  0x56   : > { %v9662_v4 = vld [vmem:[%s11464_s30 + $0x14] ss:$60 sps:$4 sm:$0xff]   ;;  %v9665_v6 = vld [vmem:[%s11464_s30 + $0x1c] ss:$60 sps:$4 sm:$0xff]   ;;  %v9670_v10 = vld [vmem:[%s11464_s30 + $0x36c] ss:$60 sps:$4 sm:$0xff]   ;;  %s14077_s22 = scalar_lea.hbm %s14144_s2, %s8930_s20 }
  0x57   : > { %1127 = vmatpush1.bf16.msra.mxu0 %v9583_v23  ;;  %1388 = vmatpush1.bf16.msra.mxu1 %v9584_v24  ;;  %v9663_v5 = vld [vmem:[%s11464_s30 + $0x18] ss:$60 sps:$4 sm:$0xff]   ;;  %v11566_v7 = vld [vmem:[%s11451_s18 + $0x28] sm:$0xff]   ;;  %s11190_s25 = sshll.u32 %s11314_s24, 4  ;;  %s11191_s25 = int_to_ptr.vmem [resolvable:$false] %s11190_s25 }
  0x58   : > { %1128 = vmatprep.subr.bf16.mxu0 %v9585_v25  ;;  %1389 = vmatprep.subr.bf16.mxu1 %v9587_v26  ;;  %v11573_v8 = vld [vmem:[%s11451_s18 + $0x30] sm:$0xff]   ;;  %v11580_v9 = vld [vmem:[%s11451_s18 + $0x38] sm:$0xff]   ;;  %v11589_v12 = vld [vmem:[%s11451_s18 + $0x40] sm:$0xff]   ;;  %s11192_s29 = scalar_lea.vmem %s11191_s25, 86400  ;;  %p11193_p9 = scmp.lt.s32.totalorder %s14072_s12, %s11191_s25 }
  0x59   : > { %v9673_v11 = vld [vmem:[%s11464_s30 + $0x374] ss:$60 sps:$4 sm:$0xff]   ;;  %v9630_v13 = vld [vmem:[%s11451_s18 + $0x48] sm:$0xff]   ;;  %p11194_p10 = scmp.lt.s32.totalorder %s11192_s29, %s11186_s23 }
  0x5a   : > { %v9631_v14 = vld [vmem:[%s11451_s18 + $0x50] sm:$0xff]   ;;  %v9632_v15 = vld [vmem:[%s11451_s18 + $0x58] sm:$0xff]   ;;  %v9639_v16 = vld [vmem:[%s11451_s18 + $0x60] sm:$0xff]  }
  0x5b   : > { %1129 = vmatpush1.bf16.msra.mxu0 %v9589_v27  ;;  %1390 = vmatpush1.bf16.msra.mxu1 %v9590_v28  ;;  %v9640_v17 = vld [vmem:[%s11451_s18 + $0x68] sm:$0xff]   ;;  %v9641_v18 = vld [vmem:[%s11451_s18 + $0x70] sm:$0xff]   ;;  %v9648_v19 = vld [vmem:[%s11451_s18 + $0x78] sm:$0xff]   ;;  %p11195_p3 = por %p11194_p10, %p11193_p9 }
  0x5c   : > { %1130 = vmatprep.subr.bf16.mxu0 %v9591_v29  ;;  %1391 = vmatprep.subr.bf16.mxu1 %v9593_v30  ;;  %v9649_v20 = vld [vmem:[%s11451_s18 + $0x80] sm:$0xff]   ;;  %v9650_v21 = vld [vmem:[%s11451_s18 + $0x88] sm:$0xff]   ;;  %v9657_v22 = vld [vmem:[%s11451_s18 + $0x90] sm:$0xff]  }
  0x5d   : > { %v9658_v23 = vld [vmem:[%s11451_s18 + $0x98] sm:$0xff]   ;;  %v9659_v24 = vld [vmem:[%s11451_s18 + $0xa0] sm:$0xff]   ;;  %v9666_v25 = vld [vmem:[%s11451_s18 + $0xa8] sm:$0xff]   ;;  %p11196_p11 = pnand %p11195_p3, %p11189_p5 }
  0x5e   : > { %v9667_v26 = vld [vmem:[%s11451_s18 + $0xb0] ss:$0 sps:$4 sm:$0xff]   ;;  %v9679_v30 = vld [vmem:[%s11464_s30 + $0x2fc] ss:$60 sps:$4 sm:$0xff]  }
  0x5f   : > { %1131 = vmatpush1.bf16.msra.mxu0 %v9595_v31  ;;  %1392 = vmatpush1.bf16.msra.mxu1 %v9596_v32  ;;  %v9668_v27 = vld [vmem:[%s11464_s30 + $0x368] ss:$60 sps:$4 sm:$0xff]   ;;  %v9671_v28 = vld [vmem:[%s11464_s30 + $0x370] ss:$60 sps:$4 sm:$0xff]   ;;  %v9677_v32 = vld [vmem:[%s11464_s30 + $0x2f8] ss:$60 sps:$4 sm:$0xff]  }
  0x60   : > { %1638 = vmatprep.subr.bf16.mxu0 %v9600_v33  ;;  %1899 = vmatprep.subr.bf16.mxu1 %v9603_v34  ;;  %v9676_v29 = vld [vmem:[%s11464_s30 + $0x2f4] ss:$60 sps:$4 sm:$0xff]   ;;  %v9682_v33 = vld [vmem:[%s11464_s30 + $0x27c] ss:$60 sps:$4 sm:$0xff]   ;;  %v9685_v34 = vld [vmem:[%s11464_s30 + $0x284] ss:$60 sps:$4 sm:$0xff]  }
  0x61   : > { %v9674_v31 = vld [vmem:[%s11464_s30 + $0x2f0] ss:$60 sps:$4 sm:$0xff]  }
  0x62   : > { %1149 = vmatmul.mubr.bf16.vlgmr.msra.gmra.mxu0 %v11501_v35  ;;  %1410 = vmatmul.mubr.bf16.vlgmr.msra.gmra.mxu1 %v11501_v35 }
  0x63   : > { %1639 = vmatpush1.bf16.msra.mxu0 %v9598_v36  ;;  %1900 = vmatpush1.bf16.msra.mxu1 %v9601_v37  ;;  %v9680_v36 = vld [vmem:[%s11464_s30 + $0x278] ss:$60 sps:$4 sm:$0xff]   ;;  %v9683_v37 = vld [vmem:[%s11464_s30 + $0x280] ss:$60 sps:$4 sm:$0xff]  }
  0x64   : > { %1158 = vmatprep.mubr.bf16.mxu0 %v14150_v0  ;;  %1419 = vmatprep.mubr.bf16.mxu1 %v14150_v0 }
  0x65   : > { %1640 = vmatprep.subr.bf16.mxu0 %v9608_v38  ;;  %1901 = vmatprep.subr.bf16.mxu1 %v9612_v40  ;;  %v9691_v38 = vld [vmem:[%s11464_s30 + $0x20c] ss:$60 sps:$4 sm:$0xff]  }
  0x67   : > { %1641 = vmatpush1.bf16.msra.mxu0 %v9606_v39  ;;  %1902 = vmatpush1.bf16.msra.mxu1 %v9610_v41 }
  0x68   : > { %1642 = vmatprep.subr.bf16.mxu0 %v9617_v42  ;;  %1903 = vmatprep.subr.bf16.mxu1 %v9621_v43 }
  0x6a   : > { %1159 = vmatmul.mubr.bf16.gmra.mxu0 %v11516_v44  ;;  %1420 = vmatmul.mubr.bf16.gmra.mxu1 %v11516_v44 }
  0x6b   : > { %1168 = vmatprep.mubr.bf16.mxu0 %v14150_v0  ;;  %1429 = vmatprep.mubr.bf16.mxu1 %v14150_v0 }
  0x6c   : > { %1643 = vmatpush1.bf16.msra.mxu0 %v9615_v45  ;;  %1904 = vmatpush1.bf16.msra.mxu1 %v9619_v46  ;;  %v9686_v46 = vld [vmem:[%s11464_s30 + $0x200] ss:$60 sps:$4 sm:$0xff]  }
  0x6d   : > { %1644 = vmatprep.subr.bf16.mxu0 %v9626_v47  ;;  %1905 = vmatprep.subr.bf16.mxu1 %v9629_v48  ;;  %v9689_v47 = vld [vmem:[%s11464_s30 + $0x208] ss:$60 sps:$4 sm:$0xff]  }
  0x70   : > { %1645 = vmatpush1.bf16.msra.mxu0 %v9624_v49  ;;  %1906 = vmatpush1.bf16.msra.mxu1 %v9627_v50  ;;  %v9697_v50 = vld [vmem:[%s11464_s30 + $0x194] ss:$60 sps:$4 sm:$0xff]  }
  0x71   : > { %1646 = vmatprep.subr.bf16.mxu0 %v9635_v51  ;;  %1907 = vmatprep.subr.bf16.mxu1 %v9638_v52 }
  0x72   : > { %1169 = vmatmul.mubr.bf16.gmra.mxu0 %v11531_v53  ;;  %1430 = vmatmul.mubr.bf16.gmra.mxu1 %v11531_v53 }
  0x73   : > { %1178 = vmatprep.mubr.bf16.mxu0 %v14150_v0  ;;  %1439 = vmatprep.mubr.bf16.mxu1 %v14150_v0 }
  0x74   : > { %1647 = vmatpush1.bf16.msra.mxu0 %v9633_v54  ;;  %1908 = vmatpush1.bf16.msra.mxu1 %v9636_v55 }
  0x75   : > { %1648 = vmatprep.subr.bf16.mxu0 %v9644_v56  ;;  %1909 = vmatprep.subr.bf16.mxu1 %v9647_v58  ;;  %v9692_v58 = vld [vmem:[%s11464_s30 + $0x188] ss:$60 sps:$4 sm:$0xff]  }
  0x78   : > { %1649 = vmatpush1.bf16.msra.mxu0 %v9642_v57  ;;  %1910 = vmatpush1.bf16.msra.mxu1 %v9645_v59  ;;  %v9695_v59 = vld [vmem:[%s11464_s30 + $0x190] ss:$60 sps:$4 sm:$0xff]  }
  0x79   : > { %1650 = vmatprep.subr.bf16.mxu0 %v9653_v61  ;;  %1911 = vmatprep.subr.bf16.mxu1 %v9656_v63 }
  0x7a   : > { %1179 = vmatmul.mubr.bf16.gmra.mxu0 %v11544_v60  ;;  %1440 = vmatmul.mubr.bf16.gmra.mxu1 %v11544_v60 }
  0x7b   : > { %1188 = vmatprep.mubr.bf16.mxu0 %v14150_v0  ;;  %1449 = vmatprep.mubr.bf16.mxu1 %v14150_v0 }
  0x7c   : > { %1651 = vmatpush1.bf16.msra.mxu0 %v9651_v62  ;;  %1912 = vmatpush1.bf16.msra.mxu1 %v9654_v1 }
  0x7d   : > { %1652 = vmatprep.subr.bf16.mxu0 %v9662_v4  ;;  %1913 = vmatprep.subr.bf16.mxu1 %v9665_v6 }
  0x80   : > { %1653 = vmatpush1.bf16.msra.mxu0 %v9660_v3  ;;  %1914 = vmatpush1.bf16.msra.mxu1 %v9663_v5 }
  0x81   : > { %2160 = vmatprep.subr.bf16.mxu0 %v9670_v10  ;;  %2421 = vmatprep.subr.bf16.mxu1 %v9673_v11 }
  0x82   : > { %1189 = vmatmul.mubr.bf16.gmra.mxu0 %v11555_v2  ;;  %1450 = vmatmul.mubr.bf16.gmra.mxu1 %v11555_v2 }
  0x83   : > { %1198 = vmatprep.mubr.bf16.mxu0 %v14150_v0  ;;  %1459 = vmatprep.mubr.bf16.mxu1 %v14150_v0 }
  0x8a   : > { %1199 = vmatmul.mubr.bf16.gmra.mxu0 %v11566_v7  ;;  %1460 = vmatmul.mubr.bf16.gmra.mxu1 %v11566_v7 }
  0x8b   : > { %1208 = vmatprep.mubr.bf16.mxu0 %v14150_v0  ;;  %1469 = vmatprep.mubr.bf16.mxu1 %v14150_v0 }
  0x92   : > { %1209 = vmatmul.mubr.bf16.gmra.mxu0 %v11573_v8  ;;  %1470 = vmatmul.mubr.bf16.gmra.mxu1 %v11573_v8 }
  0x93   : > { %1218 = vmatprep.mubr.bf16.mxu0 %v14150_v0  ;;  %1479 = vmatprep.mubr.bf16.mxu1 %v14150_v0 }
  0x9a   : > { %1219 = vmatmul.mubr.bf16.gmra.mxu0 %v11580_v9  ;;  %1480 = vmatmul.mubr.bf16.gmra.mxu1 %v11580_v9 }
  0x9b   : > { %1228 = vmatprep.mubr.bf16.mxu0 %v14150_v0  ;;  %1489 = vmatprep.mubr.bf16.mxu1 %v14150_v0 }
  0xa2   : > { %1229 = vmatmul.mubr.bf16.gmra.mxu0 %v11589_v12  ;;  %1490 = vmatmul.mubr.bf16.gmra.mxu1 %v11589_v12 }
  0xa3   : > { %1238 = vmatprep.mubr.bf16.mxu0 %v14150_v0  ;;  %1499 = vmatprep.mubr.bf16.mxu1 %v14150_v0 }
  0xaa   : > { %1239 = vmatmul.mubr.bf16.gmra.mxu0 %v9630_v13  ;;  %1500 = vmatmul.mubr.bf16.gmra.mxu1 %v9630_v13 }
  0xab   : > { %1248 = vmatprep.mubr.bf16.mxu0 %v14150_v0  ;;  %1509 = vmatprep.mubr.bf16.mxu1 %v14150_v0 }
  0xb2   : > { %1249 = vmatmul.mubr.bf16.gmra.mxu0 %v9631_v14  ;;  %1510 = vmatmul.mubr.bf16.gmra.mxu1 %v9631_v14 }
  0xb3   : > { %1258 = vmatprep.mubr.bf16.mxu0 %v14150_v0  ;;  %1519 = vmatprep.mubr.bf16.mxu1 %v14150_v0 }
  0xba   : > { %1259 = vmatmul.mubr.bf16.gmra.mxu0 %v9632_v15  ;;  %1520 = vmatmul.mubr.bf16.gmra.mxu1 %v9632_v15 }
  0xbb   : > { %1268 = vmatprep.mubr.bf16.mxu0 %v14150_v0  ;;  %1529 = vmatprep.mubr.bf16.mxu1 %v14150_v0 }
  0xc2   : > { %1269 = vmatmul.mubr.bf16.gmra.mxu0 %v9639_v16  ;;  %1530 = vmatmul.mubr.bf16.gmra.mxu1 %v9639_v16 }
  0xc3   : > { %1278 = vmatprep.mubr.bf16.mxu0 %v14150_v0  ;;  %1539 = vmatprep.mubr.bf16.mxu1 %v14150_v0 }
  0xca   : > { %1279 = vmatmul.mubr.bf16.gmra.mxu0 %v9640_v17  ;;  %1540 = vmatmul.mubr.bf16.gmra.mxu1 %v9640_v17 }
  0xcb   : > { %1288 = vmatprep.mubr.bf16.mxu0 %v14150_v0  ;;  %1549 = vmatprep.mubr.bf16.mxu1 %v14150_v0 }
  0xd2   : > { %1289 = vmatmul.mubr.bf16.gmra.mxu0 %v9641_v18  ;;  %1550 = vmatmul.mubr.bf16.gmra.mxu1 %v9641_v18  ;;  %v9698_v18 = vld [vmem:[%s11464_s30 + $0x110] ss:$60 sps:$4 sm:$0xff]  }
  0xd3   : > { %1298 = vmatprep.mubr.bf16.mxu0 %v14150_v0  ;;  %1559 = vmatprep.mubr.bf16.mxu1 %v14150_v0 }
  0xda   : > { %1299 = vmatmul.mubr.bf16.gmra.mxu0 %v9648_v19  ;;  %1560 = vmatmul.mubr.bf16.gmra.mxu1 %v9648_v19  ;;  %v9700_v19 = vld [vmem:[%s11464_s30 + $0x114] ss:$60 sps:$4 sm:$0xff]  }
  0xdb   : > { %1308 = vmatprep.mubr.bf16.mxu0 %v14150_v0  ;;  %1569 = vmatprep.mubr.bf16.mxu1 %v14150_v0 }
  0xe2   : > { %1309 = vmatmul.mubr.bf16.gmra.mxu0 %v9649_v20  ;;  %1570 = vmatmul.mubr.bf16.gmra.mxu1 %v9649_v20 }
  0xe3   : > { %1318 = vmatprep.mubr.bf16.mxu0 %v14150_v0  ;;  %1579 = vmatprep.mubr.bf16.mxu1 %v14150_v0 }
  0xea   : > { %1319 = vmatmul.mubr.bf16.gmra.mxu0 %v9650_v21  ;;  %1580 = vmatmul.mubr.bf16.gmra.mxu1 %v9650_v21 }
  0xeb   : > { %1328 = vmatprep.mubr.bf16.mxu0 %v14150_v0  ;;  %1589 = vmatprep.mubr.bf16.mxu1 %v14150_v0 }
  0xf2   : > { %1329 = vmatmul.mubr.bf16.gmra.mxu0 %v9657_v22  ;;  %1590 = vmatmul.mubr.bf16.gmra.mxu1 %v9657_v22  ;;  %v9701_v22 = vld [vmem:[%s11464_s30 + $0x118] ss:$60 sps:$4 sm:$0xff]  }
  0xf3   : > { %1338 = vmatprep.mubr.bf16.mxu0 %v14150_v0  ;;  %1599 = vmatprep.mubr.bf16.mxu1 %v14150_v0 }
  0xfa   : > { %1339 = vmatmul.mubr.bf16.gmra.mxu0 %v9658_v23  ;;  %1600 = vmatmul.mubr.bf16.gmra.mxu1 %v9658_v23  ;;  %v9703_v23 = vld [vmem:[%s11464_s30 + $0x11c] ss:$60 sps:$4 sm:$0xff]  }
  0xfb   : > { %1348 = vmatprep.mubr.bf16.mxu0 %v14150_v0  ;;  %1609 = vmatprep.mubr.bf16.mxu1 %v14150_v0 }
 0x102   : > { %1349 = vmatmul.mubr.bf16.gmra.mxu0 %v9659_v24  ;;  %1610 = vmatmul.mubr.bf16.gmra.mxu1 %v9659_v24 }
 0x103   : > { %1358 = vmatprep.mubr.bf16.mxu0 %v14150_v0  ;;  %1619 = vmatprep.mubr.bf16.mxu1 %v14150_v0 }
 0x10a   : > { %1359 = vmatmul.mubr.bf16.gmra.mxu0 %v9666_v25  ;;  %1620 = vmatmul.mubr.bf16.gmra.mxu1 %v9666_v25 }
 0x10b   : > { %1368 = vmatprep.mubr.bf16.mxu0 %v14150_v0  ;;  %1629 = vmatprep.mubr.bf16.mxu1 %v14150_v0 }
 0x112   : > { %1369 = vmatmul.mubr.bf16.gmra.mxu0 %v9667_v26  ;;  %1630 = vmatmul.mubr.bf16.gmra.mxu1 %v9667_v26 }
 0x113   : > { %1670 = vmatprep.mubr.bf16.mxu0 %v14150_v0  ;;  %1931 = vmatprep.mubr.bf16.mxu1 %v14150_v0 }
 0x11a   : > { %1671 = vmatmul.mubr.bf16.vlgmr.msra.gmra.mxu0 %v11501_v35  ;;  %1932 = vmatmul.mubr.bf16.vlgmr.msra.gmra.mxu1 %v11501_v35  ;;  %v9688_v35 = vld [vmem:[%s11464_s30 + $0x204] ss:$60 sps:$4 sm:$0xff]  }
 0x11b   : > { %2161 = vmatpush1.bf16.msra.mxu0 %v9668_v27  ;;  %2422 = vmatpush1.bf16.msra.mxu1 %v9671_v28 }
 0x11c   : > { %1680 = vmatprep.mubr.bf16.mxu0 %v14150_v0  ;;  %1941 = vmatprep.mubr.bf16.mxu1 %v14150_v0 }
 0x11d   : > { %2162 = vmatprep.subr.bf16.mxu0 %v9676_v29  ;;  %2423 = vmatprep.subr.bf16.mxu1 %v9679_v30 }
 0x11f   : > { %2163 = vmatpush1.bf16.msra.mxu0 %v9674_v31  ;;  %2424 = vmatpush1.bf16.msra.mxu1 %v9677_v32 }
 0x120   : > { %2164 = vmatprep.subr.bf16.mxu0 %v9682_v33  ;;  %2425 = vmatprep.subr.bf16.mxu1 %v9685_v34 }
 0x122   : > { %v1150_v39 = vpop.f32.mrf.mxu0  ;;  %v1411_v40 = vpop.f32.mrf.mxu1  ;;  %1681 = vmatmul.mubr.bf16.gmra.mxu0 %v11516_v44  ;;  %1942 = vmatmul.mubr.bf16.gmra.mxu1 %v11516_v44  ;;  %v9694_v44 = vld [vmem:[%s11464_s30 + $0x18c] ss:$60 sps:$4 sm:$0xff]  }
 0x123   : > { %v3159_v41 = vmul.f32 0.5, %v1150_v39  ;;  %v3161_v42 = vmul.f32 0.5, %v1411_v40  ;;  %1690 = vmatprep.mubr.bf16.mxu0 %v14150_v0  ;;  %1951 = vmatprep.mubr.bf16.mxu1 %v14150_v0 }
 0x124   : > { %v1152_v43 = vpop.f32.mrf.mxu0  ;;  %v1413_v45 = vpop.f32.mrf.mxu1  ;;  %2165 = vmatpush1.bf16.msra.mxu0 %v9680_v36  ;;  %2426 = vmatpush1.bf16.msra.mxu1 %v9683_v37 }
 0x125   : > { %9748 = vtanh.f32 %v3159_v41  ;;  %v3160_v48 = vmul.f32 0.5, %v1152_v43  ;;  %v3162_v49 = vmul.f32 0.5, %v1413_v45  ;;  %2166 = vmatprep.subr.bf16.mxu0 %v9688_v35  ;;  %2427 = vmatprep.subr.bf16.mxu1 %v9691_v38 }
 0x126   : > { %9750 = vtanh.f32 %v3161_v42  ;;  %v1154_v51 = vpop.f32.mrf.mxu0  ;;  %v1415_v52 = vpop.f32.mrf.mxu1 }
 0x127   : > { %9752 = vtanh.f32 %v3160_v48  ;;  %v3174_v54 = vmul.f32 0.5, %v1154_v51  ;;  %v3176_v55 = vmul.f32 0.5, %v1415_v52 }
 0x128   : > { %9754 = vtanh.f32 %v3162_v49  ;;  %v1156_v56 = vpop.f32.mrf.mxu0  ;;  %v1417_v57 = vpop.f32.mrf.mxu1  ;;  %2167 = vmatpush1.bf16.msra.mxu0 %v9686_v46  ;;  %2428 = vmatpush1.bf16.msra.mxu1 %v9689_v47 }
 0x129   : > { %9756 = vtanh.f32 %v3174_v54  ;;  %v3175_v61 = vmul.f32 0.5, %v1156_v56  ;;  %v3177_v62 = vmul.f32 0.5, %v1417_v57  ;;  %2168 = vmatprep.subr.bf16.mxu0 %v9694_v44  ;;  %2429 = vmatprep.subr.bf16.mxu1 %v9697_v50 }
 0x12a   : > { %9758 = vtanh.f32 %v3176_v55  ;;  %v1160_v63 = vpop.f32.mrf.mxu0  ;;  %v1421_v1 = vpop.f32.mrf.mxu1  ;;  %1691 = vmatmul.mubr.bf16.gmra.mxu0 %v11531_v53  ;;  %1952 = vmatmul.mubr.bf16.gmra.mxu1 %v11531_v53 }
 0x12b   : > { %9760 = vtanh.f32 %v3175_v61  ;;  %v3189_v3 = vmul.f32 0.5, %v1160_v63  ;;  %v3191_v4 = vmul.f32 0.5, %v1421_v1  ;;  %1700 = vmatprep.mubr.bf16.mxu0 %v14150_v0  ;;  %1961 = vmatprep.mubr.bf16.mxu1 %v14150_v0 }
 0x12c   : > { %9762 = vtanh.f32 %v3177_v62  ;;  %v1162_v5 = vpop.f32.mrf.mxu0  ;;  %v1423_v6 = vpop.f32.mrf.mxu1  ;;  %2169 = vmatpush1.bf16.msra.mxu0 %v9692_v58  ;;  %2430 = vmatpush1.bf16.msra.mxu1 %v9695_v59 }
 0x12d   : > { %9764 = vtanh.f32 %v3189_v3  ;;  %v3190_v10 = vmul.f32 0.5, %v1162_v5  ;;  %v3192_v11 = vmul.f32 0.5, %v1423_v6  ;;  %2170 = vmatprep.subr.bf16.mxu0 %v9700_v19  ;;  %2431 = vmatprep.subr.bf16.mxu1 %v9703_v23 }
 0x12e   : > { %9766 = vtanh.f32 %v3191_v4  ;;  %v1164_v53 = vpop.f32.mrf.mxu0  ;;  %v1425_v13 = vpop.f32.mrf.mxu1 }
 0x12f   : > { %9768 = vtanh.f32 %v3190_v10  ;;  %v3204_v14 = vmul.f32 0.5, %v1164_v53  ;;  %v3206_v15 = vmul.f32 0.5, %v1425_v13 }
 0x130   : > { %9770 = vtanh.f32 %v3192_v11  ;;  %v1166_v16 = vpop.f32.mrf.mxu0  ;;  %v1427_v17 = vpop.f32.mrf.mxu1  ;;  %2171 = vmatpush1.bf16.msra.mxu0 %v9698_v18  ;;  %2432 = vmatpush1.bf16.msra.mxu1 %v9701_v22 }
 0x131   : > { %9772 = vtanh.f32 %v3204_v14  ;;  %v3205_v20 = vmul.f32 0.5, %v1166_v16  ;;  %v3207_v21 = vmul.f32 0.5, %v1427_v17 }
 0x132   : > { %v9749_v24 = vpop.eup %9748  ;;  %9774 = vtanh.f32 %v3206_v15  ;;  %v1170_v25 = vpop.f32.mrf.mxu0  ;;  %1701 = vmatmul.mubr.bf16.gmra.mxu0 %v11544_v60  ;;  %1962 = vmatmul.mubr.bf16.gmra.mxu1 %v11544_v60 }
 0x133   : > { %v1431_v26 = vpop.f32.mrf.mxu1  ;;  %v9751_v27 = vpop.eup %9750  ;;  %v4509_v28 = vmul.f32 0.5, %v9749_v24  ;;  %9776 = vtanh.f32 %v3205_v20  ;;  %v3219_v29 = vmul.f32 0.5, %v1170_v25  ;;  %1710 = vmatprep.mubr.bf16.mxu0 %v14150_v0  ;;  %1971 = vmatprep.mubr.bf16.mxu1 %v14150_v0 }
 0x134   : > { %v3221_v30 = vmul.f32 0.5, %v1431_v26  ;;  %v9753_v31 = vpop.eup %9752  ;;  %v4511_v32 = vmul.f32 0.5, %v9751_v27  ;;  %9778 = vtanh.f32 %v3207_v21  ;;  %v1172_v33 = vpop.f32.mrf.mxu0 }
 0x135   : > { %v1433_v34 = vpop.f32.mrf.mxu1  ;;  %v9755_v60 = vpop.eup %9754  ;;  %v5184_v36 = vadd.f32 0.5, %v4509_v28  ;;  %v4510_v37 = vmul.f32 0.5, %v9753_v31  ;;  %9780 = vtanh.f32 %v3219_v29  ;;  %v3220_v35 = vmul.f32 0.5, %v1172_v33 }
 0x136   : > { %v9757_v38 = vpop.eup %9756  ;;  %v5186_v39 = vadd.f32 0.5, %v4511_v32  ;;  %v4512_v40 = vmul.f32 0.5, %v9755_v60  ;;  %9782 = vtanh.f32 %v3221_v30  ;;  %v3222_v41 = vmul.f32 0.5, %v1433_v34  ;;  %v1174_v42 = vpop.f32.mrf.mxu0 }
 0x137   : > { %v1435_v43 = vpop.f32.mrf.mxu1  ;;  %v9759_v45 = vpop.eup %9758  ;;  %v5185_v46 = vadd.f32 0.5, %v4510_v37  ;;  %v4524_v47 = vmul.f32 0.5, %v9757_v38  ;;  %9784 = vtanh.f32 %v3220_v35  ;;  %v3234_v48 = vmul.f32 0.5, %v1174_v42 }
 0x138   : > { %v9761_v49 = vpop.eup %9760  ;;  %v5187_v44 = vadd.f32 0.5, %v4512_v40  ;;  %v4526_v50 = vmul.f32 0.5, %v9759_v45  ;;  %9786 = vtanh.f32 %v3222_v41  ;;  %v3236_v51 = vmul.f32 0.5, %v1435_v43  ;;  %v1176_v52 = vpop.f32.mrf.mxu0 }
 0x139   : > { %v1437_v54 = vpop.f32.mrf.mxu1  ;;  %v9763_v55 = vpop.eup %9762  ;;  %v8934_v56 = vpack.c.bf16 %v5185_v46, %v5184_v36  ;;  %v5199_v57 = vadd.f32 0.5, %v4524_v47  ;;  %v4525_v58 = vmul.f32 0.5, %v9761_v49  ;;  %9788 = vtanh.f32 %v3234_v48 }
 0x13a   : > { %v9765_v59 = vpop.eup %9764  ;;  %v8935_v61 = vpack.c.bf16 %v5187_v44, %v5186_v39  ;;  %v5201_v62 = vadd.f32 0.5, %v4526_v50  ;;  %v4527_v63 = vmul.f32 0.5, %v9763_v55  ;;  %9790 = vtanh.f32 %v3236_v51  ;;  %v1180_v1 = vpop.f32.mrf.mxu0  ;;  %1711 = vmatmul.mubr.bf16.gmra.mxu0 %v11555_v2  ;;  %1972 = vmatmul.mubr.bf16.gmra.mxu1 %v11555_v2 }
 0x13b   : > { %v1441_v3 = vpop.f32.mrf.mxu1  ;;  %v9767_v4 = vpop.eup %9766  ;;  %7944 = vst [vmem:[%s11683_s3] sm:$0xff] %v8934_v56  ;;  %v5200_v5 = vadd.f32 0.5, %v4525_v58  ;;  %v4539_v6 = vmul.f32 0.5, %v9765_v59  ;;  %v3235_v10 = vmul.f32 0.5, %v1176_v52  ;;  %v3237_v11 = vmul.f32 0.5, %v1437_v54  ;;  %1720 = vmatprep.mubr.bf16.mxu0 %v14150_v0  ;;  %1981 = vmatprep.mubr.bf16.mxu1 %v14150_v0 }
 0x13c   : > { %v9769_v53 = vpop.eup %9768  ;;  %7945 = vst [vmem:[%s11683_s3 + $0x8] sm:$0xff] %v8935_v61  ;;  %v5202_v13 = vadd.f32 0.5, %v4527_v63  ;;  %v4541_v14 = vmul.f32 0.5, %v9767_v4  ;;  %v3249_v15 = vmul.f32 0.5, %v1180_v1  ;;  %v3251_v2 = vmul.f32 0.5, %v1441_v3  ;;  %v1182_v16 = vpop.f32.mrf.mxu0 }
 0x13d   : > { %v1443_v17 = vpop.f32.mrf.mxu1  ;;  %v9771_v18 = vpop.eup %9770  ;;  %v8942_v19 = vpack.c.bf16 %v5200_v5, %v5199_v57  ;;  %v5214_v20 = vadd.f32 0.5, %v4539_v6  ;;  %v4540_v21 = vmul.f32 0.5, %v9769_v53  ;;  %9792 = vtanh.f32 %v3235_v10 }
 0x13e   : > { %v9773_v22 = vpop.eup %9772  ;;  %v8943_v23 = vpack.c.bf16 %v5202_v13, %v5201_v62  ;;  %v5216_v24 = vadd.f32 0.5, %v4541_v14  ;;  %v4542_v25 = vmul.f32 0.5, %v9771_v18  ;;  %9794 = vtanh.f32 %v3237_v11  ;;  %v1184_v26 = vpop.f32.mrf.mxu0 }
 0x13f   : > { %v1445_v27 = vpop.f32.mrf.mxu1  ;;  %v9775_v28 = vpop.eup %9774  ;;  %7952 = vst [vmem:[%s11683_s3 + $0x3c] sm:$0xff] %v8942_v19  ;;  %v5215_v29 = vadd.f32 0.5, %v4540_v21  ;;  %v4554_v30 = vmul.f32 0.5, %v9773_v22  ;;  %9796 = vtanh.f32 %v3249_v15  ;;  %v3250_v31 = vmul.f32 0.5, %v1182_v16 }
 0x140   : > { %v9777_v32 = vpop.eup %9776  ;;  %7953 = vst [vmem:[%s11683_s3 + $0x44] sm:$0xff] %v8943_v23  ;;  %v5217_v33 = vadd.f32 0.5, %v4542_v25  ;;  %v4556_v34 = vmul.f32 0.5, %v9775_v28  ;;  %9798 = vtanh.f32 %v3251_v2  ;;  %v3252_v60 = vmul.f32 0.5, %v1443_v17  ;;  %v1186_v36 = vpop.f32.mrf.mxu0 }
 0x141   : > { %v1447_v37 = vpop.f32.mrf.mxu1  ;;  %v9779_v35 = vpop.eup %9778  ;;  %v8950_v38 = vpack.c.bf16 %v5215_v29, %v5214_v20  ;;  %v5229_v39 = vadd.f32 0.5, %v4554_v30  ;;  %v4555_v40 = vmul.f32 0.5, %v9777_v32  ;;  %9800 = vtanh.f32 %v3250_v31 }
 0x142   : > { %v9781_v41 = vpop.eup %9780  ;;  %v8951_v42 = vpack.c.bf16 %v5217_v33, %v5216_v24  ;;  %v5231_v43 = vadd.f32 0.5, %v4556_v34  ;;  %v4557_v45 = vmul.f32 0.5, %v9779_v35  ;;  %9802 = vtanh.f32 %v3252_v60  ;;  %v1190_v46 = vpop.f32.mrf.mxu0  ;;  %1721 = vmatmul.mubr.bf16.gmra.mxu0 %v11566_v7  ;;  %1982 = vmatmul.mubr.bf16.gmra.mxu1 %v11566_v7 }
 0x143   : > { %v1451_v47 = vpop.f32.mrf.mxu1  ;;  %v9783_v48 = vpop.eup %9782  ;;  %7960 = vst [vmem:[%s11683_s3 + $0x78] sm:$0xff] %v8950_v38  ;;  %v5230_v49 = vadd.f32 0.5, %v4555_v40  ;;  %v4569_v44 = vmul.f32 0.5, %v9781_v41  ;;  %v3264_v50 = vmul.f32 0.5, %v1184_v26  ;;  %v3266_v51 = vmul.f32 0.5, %v1445_v27  ;;  %1730 = vmatprep.mubr.bf16.mxu0 %v14150_v0  ;;  %1991 = vmatprep.mubr.bf16.mxu1 %v14150_v0 }
 0x144   : > { %v9785_v52 = vpop.eup %9784  ;;  %7961 = vst [vmem:[%s11683_s3 + $0x80] sm:$0xff] %v8951_v42  ;;  %v5232_v54 = vadd.f32 0.5, %v4557_v45  ;;  %v4571_v55 = vmul.f32 0.5, %v9783_v48  ;;  %v3265_v56 = vmul.f32 0.5, %v1186_v36  ;;  %v3267_v57 = vmul.f32 0.5, %v1447_v37  ;;  %v1192_v58 = vpop.f32.mrf.mxu0 }
 0x145   : > { %v1453_v59 = vpop.f32.mrf.mxu1  ;;  %v9787_v7 = vpop.eup %9786  ;;  %v8958_v61 = vpack.c.bf16 %v5230_v49, %v5229_v39  ;;  %v5244_v62 = vadd.f32 0.5, %v4569_v44  ;;  %v4570_v63 = vmul.f32 0.5, %v9785_v52  ;;  %9804 = vtanh.f32 %v3264_v50  ;;  %v9704_v37 = vld [vmem:[%s11464_s30 + $0x98] ss:$60 sps:$4 sm:$0xff]   ;;  %v9709_v52 = vld [vmem:[%s11464_s30 + $0xa4] ss:$60 sps:$4 sm:$0xff]  }
 0x146   : > { %v9789_v1 = vpop.eup %9788  ;;  %v8959_v3 = vpack.c.bf16 %v5232_v54, %v5231_v43  ;;  %v5246_v4 = vadd.f32 0.5, %v4571_v55  ;;  %v4572_v5 = vmul.f32 0.5, %v9787_v7  ;;  %9806 = vtanh.f32 %v3266_v51  ;;  %v1194_v6 = vpop.f32.mrf.mxu0  ;;  %v9706_v41 = vld [vmem:[%s11464_s30 + $0x9c] ss:$60 sps:$4 sm:$0xff]   ;;  %2433 = vmatprep.subr.bf16.mxu1 %v9709_v52 }
 0x147   : > { %v1455_v10 = vpop.f32.mrf.mxu1  ;;  %v9791_v11 = vpop.eup %9790  ;;  %7968 = vst [vmem:[%s11683_s3 + $0xb4] sm:$0xff] %v8958_v61  ;;  %v5245_v53 = vadd.f32 0.5, %v4570_v63  ;;  %v4584_v13 = vmul.f32 0.5, %v9789_v1  ;;  %9808 = vtanh.f32 %v3265_v56  ;;  %v3279_v14 = vmul.f32 0.5, %v1190_v46  ;;  %2172 = vmatprep.subr.bf16.mxu0 %v9706_v41 }
 0x148   : > { %7969 = vst [vmem:[%s11683_s3 + $0xbc] sm:$0xff] %v8959_v3  ;;  %v5247_v15 = vadd.f32 0.5, %v4572_v5  ;;  %v4586_v2 = vmul.f32 0.5, %v9791_v11  ;;  %9810 = vtanh.f32 %v3267_v57  ;;  %v3281_v16 = vmul.f32 0.5, %v1451_v47  ;;  %v1196_v17 = vpop.f32.mrf.mxu0  ;;  %2173 = vmatpush1.bf16.msra.mxu0 %v9704_v37 }
 0x149   : > { %v1457_v18 = vpop.f32.mrf.mxu1  ;;  %v8966_v19 = vpack.c.bf16 %v5245_v53, %v5244_v62  ;;  %v5259_v20 = vadd.f32 0.5, %v4584_v13  ;;  %9812 = vtanh.f32 %v3279_v14  ;;  %v3280_v21 = vmul.f32 0.5, %v1192_v58 }
 0x14a   : > { %v9793_v22 = vpop.eup %9792  ;;  %v8967_v23 = vpack.c.bf16 %v5247_v15, %v5246_v4  ;;  %v5261_v24 = vadd.f32 0.5, %v4586_v2  ;;  %9814 = vtanh.f32 %v3281_v16  ;;  %v3282_v25 = vmul.f32 0.5, %v1453_v59  ;;  %v1200_v26 = vpop.f32.mrf.mxu0  ;;  %1731 = vmatmul.mubr.bf16.gmra.mxu0 %v11573_v8  ;;  %1992 = vmatmul.mubr.bf16.gmra.mxu1 %v11573_v8  ;;  %v9707_v59 = vld [vmem:[%s11464_s30 + $0xa0] ss:$60 sps:$4 sm:$0xff]  }
 0x14b   : > { %v1461_v27 = vpop.f32.mrf.mxu1  ;;  %v9795_v28 = vpop.eup %9794  ;;  %7976 = vst [vmem:[%s11683_s3 + $0xf0] sm:$0xff] %v8966_v19  ;;  %v4585_v29 = vmul.f32 0.5, %v9793_v22  ;;  %9816 = vtanh.f32 %v3280_v21  ;;  %v3294_v30 = vmul.f32 0.5, %v1194_v6  ;;  %v3296_v31 = vmul.f32 0.5, %v1455_v10  ;;  %1740 = vmatprep.mubr.bf16.mxu0 %v14150_v0  ;;  %2001 = vmatprep.mubr.bf16.mxu1 %v14150_v0 }
 0x14c   : > { %v9797_v32 = vpop.eup %9796  ;;  %7977 = vst [vmem:[%s11683_s3 + $0xf8] sm:$0xff] %v8967_v23  ;;  %v4587_v33 = vmul.f32 0.5, %v9795_v28  ;;  %9818 = vtanh.f32 %v3282_v25  ;;  %v3295_v34 = vmul.f32 0.5, %v1196_v17  ;;  %v3297_v60 = vmul.f32 0.5, %v1457_v18  ;;  %v1202_v36 = vpop.f32.mrf.mxu0  ;;  %2434 = vmatpush1.bf16.msra.mxu1 %v9707_v59 }
 0x14d   : > { %v1463_v8 = vpop.f32.mrf.mxu1  ;;  %v9799_v35 = vpop.eup %9798  ;;  %v5260_v38 = vadd.f32 0.5, %v4585_v29  ;;  %v4599_v39 = vmul.f32 0.5, %v9797_v32  ;;  %9820 = vtanh.f32 %v3294_v30  ;;  %v3309_v40 = vmul.f32 0.5, %v1200_v26 }
 0x14e   : > { %v9801_v42 = vpop.eup %9800  ;;  %v5262_v43 = vadd.f32 0.5, %v4587_v33  ;;  %v4601_v45 = vmul.f32 0.5, %v9799_v35  ;;  %9822 = vtanh.f32 %v3296_v31  ;;  %v3311_v46 = vmul.f32 0.5, %v1461_v27  ;;  %v1204_v47 = vpop.f32.mrf.mxu0 }
 0x14f   : > { %v1465_v48 = vpop.f32.mrf.mxu1  ;;  %v9803_v49 = vpop.eup %9802  ;;  %v8974_v44 = vpack.c.bf16 %v5260_v38, %v5259_v20  ;;  %v5274_v50 = vadd.f32 0.5, %v4599_v39  ;;  %v4600_v51 = vmul.f32 0.5, %v9801_v42  ;;  %9824 = vtanh.f32 %v3295_v34 }
 0x150   : > { %v8975_v54 = vpack.c.bf16 %v5262_v43, %v5261_v24  ;;  %v5276_v55 = vadd.f32 0.5, %v4601_v45  ;;  %v4602_v56 = vmul.f32 0.5, %v9803_v49  ;;  %9826 = vtanh.f32 %v3297_v60  ;;  %v1206_v57 = vpop.f32.mrf.mxu0 }
 0x151   : > { %v1467_v58 = vpop.f32.mrf.mxu1  ;;  %7984 = vst [vmem:[%s11683_s3 + $0x12c] sm:$0xff] %v8974_v44  ;;  %v5275_v7 = vadd.f32 0.5, %v4600_v51  ;;  %9828 = vtanh.f32 %v3309_v40  ;;  %v3310_v61 = vmul.f32 0.5, %v1202_v36  ;;  %v3312_v62 = vmul.f32 0.5, %v1463_v8 }
 0x152   : > { %v9805_v63 = vpop.eup %9804  ;;  %7985 = vst [vmem:[%s11683_s3 + $0x134] sm:$0xff] %v8975_v54  ;;  %v5277_v1 = vadd.f32 0.5, %v4602_v56  ;;  %9830 = vtanh.f32 %v3311_v46  ;;  %v3324_v3 = vmul.f32 0.5, %v1204_v47  ;;  %v3326_v4 = vmul.f32 0.5, %v1465_v48  ;;  %v1210_v5 = vpop.f32.mrf.mxu0  ;;  %1741 = vmatmul.mubr.bf16.gmra.mxu0 %v11580_v9  ;;  %2002 = vmatmul.mubr.bf16.gmra.mxu1 %v11580_v9 }
 0x153   : > { %v1471_v6 = vpop.f32.mrf.mxu1  ;;  %v9807_v10 = vpop.eup %9806  ;;  %v8982_v11 = vpack.c.bf16 %v5275_v7, %v5274_v50  ;;  %v4614_v53 = vmul.f32 0.5, %v9805_v63  ;;  %9832 = vtanh.f32 %v3310_v61  ;;  %v3325_v13 = vmul.f32 0.5, %v1206_v57  ;;  %1750 = vmatprep.mubr.bf16.mxu0 %v14150_v0  ;;  %2011 = vmatprep.mubr.bf16.mxu1 %v14150_v0 }
 0x154   : > { %v9809_v14 = vpop.eup %9808  ;;  %v8983_v15 = vpack.c.bf16 %v5277_v1, %v5276_v55  ;;  %v4616_v2 = vmul.f32 0.5, %v9807_v10  ;;  %9834 = vtanh.f32 %v3312_v62  ;;  %v3327_v16 = vmul.f32 0.5, %v1467_v58  ;;  %v1212_v17 = vpop.f32.mrf.mxu0 }
 0x155   : > { %v1473_v18 = vpop.f32.mrf.mxu1  ;;  %v9811_v9 = vpop.eup %9810  ;;  %7992 = vst [vmem:[%s11683_s3 + $0x168] sm:$0xff] %v8982_v11  ;;  %v5289_v19 = vadd.f32 0.5, %v4614_v53  ;;  %v4615_v20 = vmul.f32 0.5, %v9809_v14  ;;  %9836 = vtanh.f32 %v3324_v3  ;;  %v3339_v21 = vmul.f32 0.5, %v1210_v5  ;;  %v9712_v53 = vld [vmem:[%s11464_s30 + $0x24] ss:$60 sps:$4 sm:$0xff]  }
 0x156   : > { %v9813_v22 = vpop.eup %9812  ;;  %7993 = vst [vmem:[%s11683_s3 + $0x170] sm:$0xff] %v8983_v15  ;;  %v5291_v23 = vadd.f32 0.5, %v4616_v2  ;;  %v4617_v24 = vmul.f32 0.5, %v9811_v9  ;;  %9838 = vtanh.f32 %v3326_v4  ;;  %v3341_v25 = vmul.f32 0.5, %v1471_v6  ;;  %v1214_v26 = vpop.f32.mrf.mxu0  ;;  %v9710_v9 = vld [vmem:[%s11464_s30 + $0x20] ss:$60 sps:$4 sm:$0xff]   ;;  %2174 = vmatprep.subr.bf16.mxu0 %v9712_v53 }
 0x157   : > { %v1475_v27 = vpop.f32.mrf.mxu1  ;;  %v9815_v28 = vpop.eup %9814  ;;  %v5290_v29 = vadd.f32 0.5, %v4615_v20  ;;  %v4629_v30 = vmul.f32 0.5, %v9813_v22  ;;  %9840 = vtanh.f32 %v3325_v13  ;;  %v3340_v31 = vmul.f32 0.5, %v1212_v17  ;;  %2175 = vmatpush1.bf16.msra.mxu0 %v9710_v9 }
 0x158   : > { %v9817_v32 = vpop.eup %9816  ;;  %v5292_v33 = vadd.f32 0.5, %v4617_v24  ;;  %v4631_v34 = vmul.f32 0.5, %v9815_v28  ;;  %9842 = vtanh.f32 %v3327_v16  ;;  %v3342_v60 = vmul.f32 0.5, %v1473_v18  ;;  %v1216_v36 = vpop.f32.mrf.mxu0  ;;  %v9715_v24 = vld [vmem:[%s11464_s30 + $0x2c] ss:$60 sps:$4 sm:$0xff]  }
 0x159   : > { %v1477_v8 = vpop.f32.mrf.mxu1  ;;  %v9819_v37 = vpop.eup %9818  ;;  %v8990_v35 = vpack.c.bf16 %v5290_v29, %v5289_v19  ;;  %v5304_v38 = vadd.f32 0.5, %v4629_v30  ;;  %v4630_v39 = vmul.f32 0.5, %v9817_v32  ;;  %9844 = vtanh.f32 %v3339_v21  ;;  %2435 = vmatprep.subr.bf16.mxu1 %v9715_v24 }
 0x15a   : > { %v9821_v40 = vpop.eup %9820  ;;  %v8991_v41 = vpack.c.bf16 %v5292_v33, %v5291_v23  ;;  %v5306_v42 = vadd.f32 0.5, %v4631_v34  ;;  %v4632_v43 = vmul.f32 0.5, %v9819_v37  ;;  %9846 = vtanh.f32 %v3341_v25  ;;  %v1220_v45 = vpop.f32.mrf.mxu0  ;;  %1751 = vmatmul.mubr.bf16.gmra.mxu0 %v11589_v12  ;;  %2012 = vmatmul.mubr.bf16.gmra.mxu1 %v11589_v12  ;;  %v9713_v23 = vld [vmem:[%s11464_s30 + $0x28] ss:$60 sps:$4 sm:$0xff]  }
 0x15b   : > { %v1481_v46 = vpop.f32.mrf.mxu1  ;;  %v9823_v47 = vpop.eup %9822  ;;  %8000 = vst [vmem:[%s11683_s3 + $0x1a4] sm:$0xff] %v8990_v35  ;;  %v5305_v48 = vadd.f32 0.5, %v4630_v39  ;;  %v4644_v49 = vmul.f32 0.5, %v9821_v40  ;;  %9848 = vtanh.f32 %v3340_v31  ;;  %v3354_v44 = vmul.f32 0.5, %v1214_v26  ;;  %1760 = vmatprep.mubr.bf16.mxu0 %v14150_v0  ;;  %2021 = vmatprep.mubr.bf16.mxu1 %v14150_v0  ;;  %v11098_v31 = vld [vmem:[%s11451_s18 + $0x48] sm:$0xff]  }
 0x15c   : > { %v9825_v50 = vpop.eup %9824  ;;  %8001 = vst [vmem:[%s11683_s3 + $0x1ac] sm:$0xff] %v8991_v41  ;;  %v5307_v51 = vadd.f32 0.5, %v4632_v43  ;;  %v4646_v52 = vmul.f32 0.5, %v9823_v47  ;;  %9850 = vtanh.f32 %v3342_v60  ;;  %v3356_v54 = vmul.f32 0.5, %v1475_v27  ;;  %v1222_v55 = vpop.f32.mrf.mxu0  ;;  %2436 = vmatpush1.bf16.msra.mxu1 %v9713_v23 }
 0x15d   : > { %v1483_v56 = vpop.f32.mrf.mxu1  ;;  %v9827_v12 = vpop.eup %9826  ;;  %v8998_v57 = vpack.c.bf16 %v5305_v48, %v5304_v38  ;;  %v5319_v58 = vadd.f32 0.5, %v4644_v49  ;;  %v4645_v59 = vmul.f32 0.5, %v9825_v50  ;;  %9852 = vtanh.f32 %v3354_v44 }
 0x15e   : > { %v9829_v7 = vpop.eup %9828  ;;  %v8999_v61 = vpack.c.bf16 %v5307_v51, %v5306_v42  ;;  %v5321_v62 = vadd.f32 0.5, %v4646_v52  ;;  %v4647_v63 = vmul.f32 0.5, %v9827_v12  ;;  %9854 = vtanh.f32 %v3356_v54  ;;  %v11723_v1 = vpop.f32.mrf.mxu0 }
 0x15f   : > { %v11725_v3 = vpop.f32.mrf.mxu1  ;;  %v9831_v4 = vpop.eup %9830  ;;  %8008 = vst [vmem:[%s11683_s3 + $0x1e0] sm:$0xff] %v8998_v57  ;;  %v5320_v5 = vadd.f32 0.5, %v4645_v59  ;;  %v4659_v6 = vmul.f32 0.5, %v9829_v7  ;;  %v3355_v10 = vmul.f32 0.5, %v1216_v36  ;;  %v3357_v11 = vmul.f32 0.5, %v1477_v8 }
 0x160   : > { %v9833_v13 = vpop.eup %9832  ;;  %8009 = vst [vmem:[%s11683_s3 + $0x1e8] sm:$0xff] %v8999_v61  ;;  %v5322_v14 = vadd.f32 0.5, %v4647_v63  ;;  %v4661_v15 = vmul.f32 0.5, %v9831_v4  ;;  %v3369_v2 = vmul.f32 0.5, %v1220_v45  ;;  %v3371_v16 = vmul.f32 0.5, %v1481_v46  ;;  %v1226_v17 = vpop.f32.mrf.mxu0 }
 0x161   : > { %v1487_v18 = vpop.f32.mrf.mxu1  ;;  %v9835_v19 = vpop.eup %9834  ;;  %v9006_v20 = vpack.c.bf16 %v5320_v5, %v5319_v58  ;;  %v5334_v21 = vadd.f32 0.5, %v4659_v6  ;;  %v4660_v22 = vmul.f32 0.5, %v9833_v13  ;;  %9856 = vtanh.f32 %v3355_v10  ;;  %v11099_v13 = vld [vmem:[%s11451_s18 + $0x50] sm:$0xff]  }
 0x162   : > { %v9837_v25 = vpop.eup %9836  ;;  %v9007_v26 = vpack.c.bf16 %v5322_v14, %v5321_v62  ;;  %v5336_v27 = vadd.f32 0.5, %v4661_v15  ;;  %v4662_v28 = vmul.f32 0.5, %v9835_v19  ;;  %9858 = vtanh.f32 %v3357_v11  ;;  %v11733_v29 = vpop.f32.mrf.mxu0  ;;  %1761 = vmatmul.mubr.bf16.gmra.mxu0 %v11098_v31  ;;  %2022 = vmatmul.mubr.bf16.gmra.mxu1 %v11098_v31 }
 0x163   : > { %v11735_v30 = vpop.f32.mrf.mxu1  ;;  %v9839_v32 = vpop.eup %9838  ;;  %8016 = vst [vmem:[%s11683_s3 + $0x21c] sm:$0xff] %v9006_v20  ;;  %v5335_v33 = vadd.f32 0.5, %v4660_v22  ;;  %v4674_v34 = vmul.f32 0.5, %v9837_v25  ;;  %9860 = vtanh.f32 %v3369_v2  ;;  %v3370_v60 = vmul.f32 0.5, %v1222_v55  ;;  %1770 = vmatprep.mubr.bf16.mxu0 %v14150_v0  ;;  %2031 = vmatprep.mubr.bf16.mxu1 %v14150_v0 }
 0x164   : > { %v9841_v36 = vpop.eup %9840  ;;  %8017 = vst [vmem:[%s11683_s3 + $0x224] sm:$0xff] %v9007_v26  ;;  %v5337_v8 = vadd.f32 0.5, %v4662_v28  ;;  %v4676_v37 = vmul.f32 0.5, %v9839_v32  ;;  %9862 = vtanh.f32 %v3371_v16  ;;  %v3372_v35 = vmul.f32 0.5, %v1483_v56  ;;  %v11742_v38 = vpop.f32.mrf.mxu0 }
 0x165   : > { %v11744_v39 = vpop.f32.mrf.mxu1  ;;  %v9843_v40 = vpop.eup %9842  ;;  %v9014_v41 = vpack.c.bf16 %v5335_v33, %v5334_v21  ;;  %v5349_v42 = vadd.f32 0.5, %v4674_v34  ;;  %v4675_v43 = vmul.f32 0.5, %v9841_v36  ;;  %9864 = vtanh.f32 %v3370_v60 }
 0x166   : > { %v9845_v45 = vpop.eup %9844  ;;  %v9015_v46 = vpack.c.bf16 %v5337_v8, %v5336_v27  ;;  %v5351_v47 = vadd.f32 0.5, %v4676_v37  ;;  %v4677_v48 = vmul.f32 0.5, %v9843_v40  ;;  %9866 = vtanh.f32 %v3372_v35  ;;  %v1234_v49 = vpop.f32.mrf.mxu0 }
 0x167   : > { %v1495_v44 = vpop.f32.mrf.mxu1  ;;  %v9847_v50 = vpop.eup %9846  ;;  %8024 = vst [vmem:[%s11683_s3 + $0x258] sm:$0xff] %v9014_v41  ;;  %v5350_v51 = vadd.f32 0.5, %v4675_v43  ;;  %v4689_v52 = vmul.f32 0.5, %v9845_v45  ;;  %v3384_v54 = vmul.f32 0.5, %v11723_v1  ;;  %v3386_v55 = vmul.f32 0.5, %v11725_v3 }
 0x168   : > { %v9849_v56 = vpop.eup %9848  ;;  %8025 = vst [vmem:[%s11683_s3 + $0x260] sm:$0xff] %v9015_v46  ;;  %v5352_v12 = vadd.f32 0.5, %v4677_v48  ;;  %v4691_v57 = vmul.f32 0.5, %v9847_v50  ;;  %v3385_v58 = vmul.f32 0.5, %v1226_v17  ;;  %v3387_v59 = vmul.f32 0.5, %v1487_v18  ;;  %v1236_v7 = vpop.f32.mrf.mxu0 }
 0x169   : > { %v1497_v61 = vpop.f32.mrf.mxu1  ;;  %v9851_v62 = vpop.eup %9850  ;;  %v9022_v63 = vpack.c.bf16 %v5350_v51, %v5349_v42  ;;  %v5364_v4 = vadd.f32 0.5, %v4689_v52  ;;  %v4690_v5 = vmul.f32 0.5, %v9849_v56  ;;  %9868 = vtanh.f32 %v3384_v54 }
 0x16a   : > { %v9853_v6 = vpop.eup %9852  ;;  %v9023_v10 = vpack.c.bf16 %v5352_v12, %v5351_v47  ;;  %v5366_v1 = vadd.f32 0.5, %v4691_v57  ;;  %v4692_v3 = vmul.f32 0.5, %v9851_v62  ;;  %9870 = vtanh.f32 %v3386_v55  ;;  %v1240_v11 = vpop.f32.mrf.mxu0  ;;  %1771 = vmatmul.mubr.bf16.gmra.mxu0 %v11099_v13  ;;  %2032 = vmatmul.mubr.bf16.gmra.mxu1 %v11099_v13 }
 0x16b   : > { %v1501_v53 = vpop.f32.mrf.mxu1  ;;  %v9855_v14 = vpop.eup %9854  ;;  %8032 = vst [vmem:[%s11683_s3 + $0x294] sm:$0xff] %v9022_v63  ;;  %v5365_v15 = vadd.f32 0.5, %v4690_v5  ;;  %v4704_v2 = vmul.f32 0.5, %v9853_v6  ;;  %9872 = vtanh.f32 %v3385_v58  ;;  %v3399_v16 = vmul.f32 0.5, %v11733_v29  ;;  %1780 = vmatprep.mubr.bf16.mxu0 %v14150_v0  ;;  %2041 = vmatprep.mubr.bf16.mxu1 %v14150_v0 }
 0x16c   : > { %8033 = vst [vmem:[%s11683_s3 + $0x29c] sm:$0xff] %v9023_v10  ;;  %v5367_v17 = vadd.f32 0.5, %v4692_v3  ;;  %v4706_v18 = vmul.f32 0.5, %v9855_v14  ;;  %9874 = vtanh.f32 %v3387_v59  ;;  %v3401_v9 = vmul.f32 0.5, %v11735_v30  ;;  %v1242_v19 = vpop.f32.mrf.mxu0 }
 0x16d   : > { %v1503_v20 = vpop.f32.mrf.mxu1  ;;  %v9030_v21 = vpack.c.bf16 %v5365_v15, %v5364_v4  ;;  %v5379_v22 = vadd.f32 0.5, %v4704_v2  ;;  %9876 = vtanh.f32 %v3399_v16  ;;  %v3400_v23 = vmul.f32 0.5, %v11742_v38 }
 0x16e   : > { %v9857_v24 = vpop.eup %9856  ;;  %v9031_v25 = vpack.c.bf16 %v5367_v17, %v5366_v1  ;;  %v5381_v26 = vadd.f32 0.5, %v4706_v18  ;;  %9878 = vtanh.f32 %v3401_v9  ;;  %v3402_v27 = vmul.f32 0.5, %v11744_v39  ;;  %v1244_v28 = vpop.f32.mrf.mxu0 }
 0x16f   : > { %v1505_v29 = vpop.f32.mrf.mxu1  ;;  %v9859_v31 = vpop.eup %9858  ;;  %8040 = vst [vmem:[%s11683_s3 + $0x2d0] sm:$0xff] %v9030_v21  ;;  %v4705_v32 = vmul.f32 0.5, %v9857_v24  ;;  %9880 = vtanh.f32 %v3400_v23  ;;  %v3414_v30 = vmul.f32 0.5, %v1234_v49  ;;  %v3416_v33 = vmul.f32 0.5, %v1495_v44  ;;  %v11100_v49 = vld [vmem:[%s11451_s18 + $0x58] sm:$0xff]  }
 0x170   : > { %v9861_v34 = vpop.eup %9860  ;;  %8041 = vst [vmem:[%s11683_s3 + $0x2d8] sm:$0xff] %v9031_v25  ;;  %v4707_v60 = vmul.f32 0.5, %v9859_v31  ;;  %9882 = vtanh.f32 %v3402_v27  ;;  %v3415_v36 = vmul.f32 0.5, %v1236_v7  ;;  %v3417_v8 = vmul.f32 0.5, %v1497_v61  ;;  %v1246_v37 = vpop.f32.mrf.mxu0 }
 0x171   : > { %v1507_v35 = vpop.f32.mrf.mxu1  ;;  %v9863_v38 = vpop.eup %9862  ;;  %v5380_v40 = vadd.f32 0.5, %v4705_v32  ;;  %v4719_v39 = vmul.f32 0.5, %v9861_v34  ;;  %9884 = vtanh.f32 %v3414_v30  ;;  %v3429_v41 = vmul.f32 0.5, %v1240_v11 }
 0x172   : > { %v9865_v42 = vpop.eup %9864  ;;  %v5382_v43 = vadd.f32 0.5, %v4707_v60  ;;  %v4721_v45 = vmul.f32 0.5, %v9863_v38  ;;  %9886 = vtanh.f32 %v3416_v33  ;;  %v3431_v46 = vmul.f32 0.5, %v1501_v53  ;;  %v1250_v47 = vpop.f32.mrf.mxu0  ;;  %1781 = vmatmul.mubr.bf16.gmra.mxu0 %v11100_v49  ;;  %2042 = vmatmul.mubr.bf16.gmra.mxu1 %v11100_v49 }
 0x173   : > { %v1511_v48 = vpop.f32.mrf.mxu1  ;;  %v9867_v44 = vpop.eup %9866  ;;  %v9038_v50 = vpack.c.bf16 %v5380_v40, %v5379_v22  ;;  %v5394_v51 = vadd.f32 0.5, %v4719_v39  ;;  %v4720_v52 = vmul.f32 0.5, %v9865_v42  ;;  %9888 = vtanh.f32 %v3415_v36  ;;  %1790 = vmatprep.mubr.bf16.mxu0 %v14150_v0  ;;  %2051 = vmatprep.mubr.bf16.mxu1 %v14150_v0  ;;  %v9718_v40 = vld [vmem:[%s11464_s30 + $0x37c] ss:$60 sps:$4 sm:$0xff]  }
 0x174   : > { %v9039_v54 = vpack.c.bf16 %v5382_v43, %v5381_v26  ;;  %v5396_v55 = vadd.f32 0.5, %v4721_v45  ;;  %v4722_v56 = vmul.f32 0.5, %v9867_v44  ;;  %9890 = vtanh.f32 %v3417_v8  ;;  %v1252_v12 = vpop.f32.mrf.mxu0  ;;  %v11101_v26 = vld [vmem:[%s11451_s18 + $0x60] sm:$0xff]   ;;  %2682 = vmatprep.subr.bf16.mxu0 %v9718_v40 }
 0x175   : > { %v1513_v57 = vpop.f32.mrf.mxu1  ;;  %8048 = vst [vmem:[%s11683_s3 + $0x30c] sm:$0xff] %v9038_v50  ;;  %v5395_v58 = vadd.f32 0.5, %v4720_v52  ;;  %9892 = vtanh.f32 %v3429_v41  ;;  %v3430_v59 = vmul.f32 0.5, %v1242_v19  ;;  %v3432_v7 = vmul.f32 0.5, %v1503_v20 }
 0x176   : > { %v9869_v61 = vpop.eup %9868  ;;  %8049 = vst [vmem:[%s11683_s3 + $0x314] sm:$0xff] %v9039_v54  ;;  %v5397_v62 = vadd.f32 0.5, %v4722_v56  ;;  %9894 = vtanh.f32 %v3431_v46  ;;  %v3444_v63 = vmul.f32 0.5, %v1244_v28  ;;  %v3446_v4 = vmul.f32 0.5, %v1505_v29  ;;  %v1254_v5 = vpop.f32.mrf.mxu0 }
 0x177   : > { %v11766_v6 = vpop.f32.mrf.mxu1  ;;  %v9871_v10 = vpop.eup %9870  ;;  %v9046_v1 = vpack.c.bf16 %v5395_v58, %v5394_v51  ;;  %v4734_v3 = vmul.f32 0.5, %v9869_v61  ;;  %9896 = vtanh.f32 %v3430_v59  ;;  %v3445_v11 = vmul.f32 0.5, %v1246_v37 }
 0x178   : > { %v9873_v53 = vpop.eup %9872  ;;  %v9047_v13 = vpack.c.bf16 %v5397_v62, %v5396_v55  ;;  %v4736_v14 = vmul.f32 0.5, %v9871_v10  ;;  %9898 = vtanh.f32 %v3432_v7  ;;  %v3447_v15 = vmul.f32 0.5, %v1507_v35  ;;  %v11768_v2 = vpop.f32.mrf.mxu0 }
 0x179   : > { %v11770_v16 = vpop.f32.mrf.mxu1  ;;  %v9875_v17 = vpop.eup %9874  ;;  %8056 = vst [vmem:[%s11683_s3 + $0x348] sm:$0xff] %v9046_v1  ;;  %v5409_v18 = vadd.f32 0.5, %v4734_v3  ;;  %v4735_v9 = vmul.f32 0.5, %v9873_v53  ;;  %9900 = vtanh.f32 %v3444_v63  ;;  %v3459_v19 = vmul.f32 0.5, %v1250_v47 }
 0x17a   : > { %v9877_v20 = vpop.eup %9876  ;;  %8057 = vst [vmem:[%s11683_s3 + $0x350] sm:$0xff] %v9047_v13  ;;  %v5411_v21 = vadd.f32 0.5, %v4736_v14  ;;  %v4737_v22 = vmul.f32 0.5, %v9875_v17  ;;  %9902 = vtanh.f32 %v3446_v4  ;;  %v3461_v23 = vmul.f32 0.5, %v1511_v48  ;;  %v11774_v24 = vpop.f32.mrf.mxu0  ;;  %1791 = vmatmul.mubr.bf16.gmra.mxu0 %v11101_v26  ;;  %2052 = vmatmul.mubr.bf16.gmra.mxu1 %v11101_v26 }
 0x17b   : > { %v11776_v25 = vpop.f32.mrf.mxu1  ;;  %v9879_v27 = vpop.eup %9878  ;;  %v5410_v28 = vadd.f32 0.5, %v4735_v9  ;;  %v4749_v29 = vmul.f32 0.5, %v9877_v20  ;;  %9904 = vtanh.f32 %v3445_v11  ;;  %v3460_v31 = vmul.f32 0.5, %v1252_v12  ;;  %1800 = vmatprep.mubr.bf16.mxu0 %v14150_v0  ;;  %2061 = vmatprep.mubr.bf16.mxu1 %v14150_v0 }
 0x17c   : > { %v9881_v32 = vpop.eup %9880  ;;  %v5412_v30 = vadd.f32 0.5, %v4737_v22  ;;  %v4751_v33 = vmul.f32 0.5, %v9879_v27  ;;  %9906 = vtanh.f32 %v3447_v15  ;;  %v3462_v34 = vmul.f32 0.5, %v1513_v57  ;;  %v11781_v60 = vpop.f32.mrf.mxu0 }
 0x17d   : > { %v11783_v36 = vpop.f32.mrf.mxu1  ;;  %v9883_v8 = vpop.eup %9882  ;;  %v9054_v37 = vpack.c.bf16 %v5410_v28, %v5409_v18  ;;  %v5424_v35 = vadd.f32 0.5, %v4749_v29  ;;  %v4750_v38 = vmul.f32 0.5, %v9881_v32  ;;  %9908 = vtanh.f32 %v3459_v19 }
 0x17e   : > { %v9885_v39 = vpop.eup %9884  ;;  %v9055_v41 = vpack.c.bf16 %v5412_v30, %v5411_v21  ;;  %v5426_v42 = vadd.f32 0.5, %v4751_v33  ;;  %v4752_v43 = vmul.f32 0.5, %v9883_v8  ;;  %9910 = vtanh.f32 %v3461_v23  ;;  %v11786_v45 = vpop.f32.mrf.mxu0 }
 0x17f   : > { %v11788_v46 = vpop.f32.mrf.mxu1  ;;  %v9887_v47 = vpop.eup %9886  ;;  %8064 = vst [vmem:[%s11683_s3 + $0x384] sm:$0xff] %v9054_v37  ;;  %v5425_v48 = vadd.f32 0.5, %v4750_v38  ;;  %v4764_v49 = vmul.f32 0.5, %v9885_v39  ;;  %9912 = vtanh.f32 %v3460_v31  ;;  %v3474_v44 = vmul.f32 0.5, %v1254_v5 }
 0x180   : > { %v9889_v50 = vpop.eup %9888  ;;  %8065 = vst [vmem:[%s11683_s3 + $0x38c] sm:$0xff] %v9055_v41  ;;  %v5427_v51 = vadd.f32 0.5, %v4752_v43  ;;  %v4766_v52 = vmul.f32 0.5, %v9887_v47  ;;  %9914 = vtanh.f32 %v3462_v34  ;;  %v3476_v54 = vmul.f32 0.5, %v11766_v6  ;;  %v11793_v55 = vpop.f32.mrf.mxu0  ;;  %v11102_v6 = vld [vmem:[%s11451_s18 + $0x68] sm:$0xff]  }
 0x181   : > { %v11795_v56 = vpop.f32.mrf.mxu1  ;;  %v9891_v12 = vpop.eup %9890  ;;  %v9062_v57 = vpack.c.bf16 %v5425_v48, %v5424_v35  ;;  %v5439_v58 = vadd.f32 0.5, %v4764_v49  ;;  %v4765_v59 = vmul.f32 0.5, %v9889_v50  ;;  %9916 = vtanh.f32 %v3474_v44 }
 0x182   : > { %v9893_v7 = vpop.eup %9892  ;;  %v9063_v61 = vpack.c.bf16 %v5427_v51, %v5426_v42  ;;  %v5441_v62 = vadd.f32 0.5, %v4766_v52  ;;  %v4767_v63 = vmul.f32 0.5, %v9891_v12  ;;  %9918 = vtanh.f32 %v3476_v54  ;;  %v11797_v4 = vpop.f32.mrf.mxu0  ;;  %1801 = vmatmul.mubr.bf16.gmra.mxu0 %v11102_v6  ;;  %2062 = vmatmul.mubr.bf16.gmra.mxu1 %v11102_v6 }
 0x183   : > { %v11799_v5 = vpop.f32.mrf.mxu1  ;;  %v9895_v10 = vpop.eup %9894  ;;  %8072 = vst [vmem:[%s11683_s3 + $0x3c0] sm:$0xff] %v9062_v57  ;;  %v5440_v1 = vadd.f32 0.5, %v4765_v59  ;;  %v4779_v3 = vmul.f32 0.5, %v9893_v7  ;;  %v3475_v11 = vmul.f32 0.5, %v11768_v2  ;;  %v3477_v53 = vmul.f32 0.5, %v11770_v16  ;;  %1810 = vmatprep.mubr.bf16.mxu0 %v14150_v0  ;;  %2071 = vmatprep.mubr.bf16.mxu1 %v14150_v0 }
 0x184   : > { %v9897_v13 = vpop.eup %9896  ;;  %8073 = vst [vmem:[%s11683_s3 + $0x3c8] sm:$0xff] %v9063_v61  ;;  %v5442_v14 = vadd.f32 0.5, %v4767_v63  ;;  %v4781_v15 = vmul.f32 0.5, %v9895_v10  ;;  %v3489_v17 = vmul.f32 0.5, %v11774_v24  ;;  %v3491_v18 = vmul.f32 0.5, %v11776_v25  ;;  %v11810_v9 = vpop.f32.mrf.mxu0 }
 0x185   : > { %v11812_v19 = vpop.f32.mrf.mxu1  ;;  %v9899_v2 = vpop.eup %9898  ;;  %v9070_v20 = vpack.c.bf16 %v5440_v1, %v5439_v58  ;;  %v5454_v16 = vadd.f32 0.5, %v4779_v3  ;;  %v4780_v21 = vmul.f32 0.5, %v9897_v13  ;;  %9920 = vtanh.f32 %v3475_v11 }
 0x186   : > { %v9901_v22 = vpop.eup %9900  ;;  %v9071_v23 = vpack.c.bf16 %v5442_v14, %v5441_v62  ;;  %v5456_v26 = vadd.f32 0.5, %v4781_v15  ;;  %v4782_v27 = vmul.f32 0.5, %v9899_v2  ;;  %9922 = vtanh.f32 %v3477_v53  ;;  %v11814_v28 = vpop.f32.mrf.mxu0 }
 0x187   : > { %v11816_v24 = vpop.f32.mrf.mxu1  ;;  %v9903_v25 = vpop.eup %9902  ;;  %8080 = vst [vmem:[%s11683_s3 + $0x3fc] sm:$0xff] %v9070_v20  ;;  %v5455_v29 = vadd.f32 0.5, %v4780_v21  ;;  %v4794_v31 = vmul.f32 0.5, %v9901_v22  ;;  %9924 = vtanh.f32 %v3489_v17  ;;  %v3490_v32 = vmul.f32 0.5, %v11781_v60 }
 0x188   : > { %v9905_v30 = vpop.eup %9904  ;;  %8081 = vst [vmem:[%s11683_s3 + $0x404] sm:$0xff] %v9071_v23  ;;  %v5457_v33 = vadd.f32 0.5, %v4782_v27  ;;  %v4796_v34 = vmul.f32 0.5, %v9903_v25  ;;  %9926 = vtanh.f32 %v3491_v18  ;;  %v3492_v8 = vmul.f32 0.5, %v11783_v36  ;;  %v11822_v37 = vpop.f32.mrf.mxu0  ;;  %v11103_v36 = vld [vmem:[%s11451_s18 + $0x70] sm:$0xff]  }
 0x189   : > { %v11824_v35 = vpop.f32.mrf.mxu1  ;;  %v9907_v38 = vpop.eup %9906  ;;  %v9078_v40 = vpack.c.bf16 %v5455_v29, %v5454_v16  ;;  %v5469_v39 = vadd.f32 0.5, %v4794_v31  ;;  %v4795_v41 = vmul.f32 0.5, %v9905_v30  ;;  %9928 = vtanh.f32 %v3490_v32  ;;  %v11104_v31 = vld [vmem:[%s11451_s18 + $0x78] sm:$0xff]  }
 0x18a   : > { %v9909_v42 = vpop.eup %9908  ;;  %v9079_v60 = vpack.c.bf16 %v5457_v33, %v5456_v26  ;;  %v5471_v43 = vadd.f32 0.5, %v4796_v34  ;;  %v4797_v47 = vmul.f32 0.5, %v9907_v38  ;;  %9930 = vtanh.f32 %v3492_v8  ;;  %v11826_v48 = vpop.f32.mrf.mxu0  ;;  %1811 = vmatmul.mubr.bf16.gmra.mxu0 %v11103_v36  ;;  %2072 = vmatmul.mubr.bf16.gmra.mxu1 %v11103_v36 }
 0x18b   : > { %v11828_v49 = vpop.f32.mrf.mxu1  ;;  %v9911_v44 = vpop.eup %9910  ;;  %8088 = vst [vmem:[%s11683_s3 + $0x438] sm:$0xff] %v9078_v40  ;;  %v5470_v50 = vadd.f32 0.5, %v4795_v41  ;;  %v4809_v51 = vmul.f32 0.5, %v9909_v42  ;;  %v3504_v52 = vmul.f32 0.5, %v11786_v45  ;;  %v3506_v54 = vmul.f32 0.5, %v11788_v46  ;;  %1820 = vmatprep.mubr.bf16.mxu0 %v14150_v0  ;;  %2081 = vmatprep.mubr.bf16.mxu1 %v14150_v0 }
 0x18c   : > { %v9913_v12 = vpop.eup %9912  ;;  %8089 = vst [vmem:[%s11683_s3 + $0x440] sm:$0xff] %v9079_v60  ;;  %v5472_v57 = vadd.f32 0.5, %v4797_v47  ;;  %v4811_v58 = vmul.f32 0.5, %v9911_v44  ;;  %v3505_v59 = vmul.f32 0.5, %v11793_v55  ;;  %v3507_v7 = vmul.f32 0.5, %v11795_v56  ;;  %v11839_v61 = vpop.f32.mrf.mxu0 }
 0x18d   : > { %v11841_v62 = vpop.f32.mrf.mxu1  ;;  %v9915_v45 = vpop.eup %9914  ;;  %v9086_v63 = vpack.c.bf16 %v5470_v50, %v5469_v39  ;;  %v5484_v46 = vadd.f32 0.5, %v4809_v51  ;;  %v4810_v6 = vmul.f32 0.5, %v9913_v12  ;;  %9932 = vtanh.f32 %v3504_v52 }
 0x18e   : > { %v9917_v10 = vpop.eup %9916  ;;  %v9087_v1 = vpack.c.bf16 %v5472_v57, %v5471_v43  ;;  %v5486_v3 = vadd.f32 0.5, %v4811_v58  ;;  %v4812_v11 = vmul.f32 0.5, %v9915_v45  ;;  %9934 = vtanh.f32 %v3506_v54  ;;  %v11843_v53 = vpop.f32.mrf.mxu0 }
 0x18f   : > { %v11845_v55 = vpop.f32.mrf.mxu1  ;;  %v9919_v56 = vpop.eup %9918  ;;  %8096 = vst [vmem:[%s11683_s3 + $0x474] sm:$0xff] %v9086_v63  ;;  %v5485_v13 = vadd.f32 0.5, %v4810_v6  ;;  %v4824_v14 = vmul.f32 0.5, %v9917_v10  ;;  %9936 = vtanh.f32 %v3505_v59  ;;  %v3519_v15 = vmul.f32 0.5, %v11797_v4 }
 0x190   : > { %8097 = vst [vmem:[%s11683_s3 + $0x47c] sm:$0xff] %v9087_v1  ;;  %v5487_v17 = vadd.f32 0.5, %v4812_v11  ;;  %v4826_v18 = vmul.f32 0.5, %v9919_v56  ;;  %9938 = vtanh.f32 %v3507_v7  ;;  %v3521_v2 = vmul.f32 0.5, %v11799_v5  ;;  %v11851_v20 = vpop.f32.mrf.mxu0 }
 0x191   : > { %v11853_v16 = vpop.f32.mrf.mxu1  ;;  %v9094_v21 = vpack.c.bf16 %v5485_v13, %v5484_v46  ;;  %v5499_v22 = vadd.f32 0.5, %v4824_v14  ;;  %9940 = vtanh.f32 %v3519_v15  ;;  %v3520_v23 = vmul.f32 0.5, %v11810_v9 }
 0x192   : > { %v9921_v26 = vpop.eup %9920  ;;  %v9095_v27 = vpack.c.bf16 %v5487_v17, %v5486_v3  ;;  %v5501_v4 = vadd.f32 0.5, %v4826_v18  ;;  %9942 = vtanh.f32 %v3521_v2  ;;  %v3522_v25 = vmul.f32 0.5, %v11812_v19  ;;  %v11857_v29 = vpop.f32.mrf.mxu0  ;;  %1821 = vmatmul.mubr.bf16.gmra.mxu0 %v11104_v31  ;;  %2082 = vmatmul.mubr.bf16.gmra.mxu1 %v11104_v31  ;;  %v11105_v3 = vld [vmem:[%s11451_s18 + $0x80] sm:$0xff]  }
 0x193   : > { %v11859_v5 = vpop.f32.mrf.mxu1  ;;  %v9923_v32 = vpop.eup %9922  ;;  %8104 = vst [vmem:[%s11683_s3 + $0x4b0] sm:$0xff] %v9094_v21  ;;  %v4825_v30 = vmul.f32 0.5, %v9921_v26  ;;  %9944 = vtanh.f32 %v3520_v23  ;;  %v3534_v9 = vmul.f32 0.5, %v11814_v28  ;;  %v3536_v33 = vmul.f32 0.5, %v11816_v24  ;;  %1830 = vmatprep.mubr.bf16.mxu0 %v14150_v0  ;;  %2091 = vmatprep.mubr.bf16.mxu1 %v14150_v0 }
 0x194   : > { %v9925_v19 = vpop.eup %9924  ;;  %8105 = vst [vmem:[%s11683_s3 + $0x4b8] sm:$0xff] %v9095_v27  ;;  %v4827_v34 = vmul.f32 0.5, %v9923_v32  ;;  %9946 = vtanh.f32 %v3522_v25  ;;  %v3535_v8 = vmul.f32 0.5, %v11822_v37  ;;  %v3537_v38 = vmul.f32 0.5, %v11824_v35  ;;  %v11870_v40 = vpop.f32.mrf.mxu0 }
 0x195   : > { %v11872_v39 = vpop.f32.mrf.mxu1  ;;  %v9927_v41 = vpop.eup %9926  ;;  %v5500_v28 = vadd.f32 0.5, %v4825_v30  ;;  %v4839_v42 = vmul.f32 0.5, %v9925_v19  ;;  %9948 = vtanh.f32 %v3534_v9  ;;  %v3549_v24 = vmul.f32 0.5, %v11826_v48 }
 0x196   : > { %v9929_v60 = vpop.eup %9928  ;;  %v5502_v43 = vadd.f32 0.5, %v4827_v34  ;;  %v4841_v47 = vmul.f32 0.5, %v9927_v41  ;;  %9950 = vtanh.f32 %v3536_v33  ;;  %v3551_v36 = vmul.f32 0.5, %v11828_v49  ;;  %v11876_v37 = vpop.f32.mrf.mxu0 }
 0x197   : > { %v11878_v35 = vpop.f32.mrf.mxu1  ;;  %v9931_v44 = vpop.eup %9930  ;;  %v9102_v50 = vpack.c.bf16 %v5500_v28, %v5499_v22  ;;  %v5514_v51 = vadd.f32 0.5, %v4839_v42  ;;  %v4840_v52 = vmul.f32 0.5, %v9929_v60  ;;  %9952 = vtanh.f32 %v3535_v8 }
 0x198   : > { %v9103_v54 = vpack.c.bf16 %v5502_v43, %v5501_v4  ;;  %v5516_v12 = vadd.f32 0.5, %v4841_v47  ;;  %v4842_v48 = vmul.f32 0.5, %v9931_v44  ;;  %9954 = vtanh.f32 %v3537_v38  ;;  %v11880_v57 = vpop.f32.mrf.mxu0 }
 0x199   : > { %v11882_v58 = vpop.f32.mrf.mxu1  ;;  %8112 = vst [vmem:[%s11683_s3 + $0x4ec] sm:$0xff] %v9102_v50  ;;  %v5515_v49 = vadd.f32 0.5, %v4840_v52  ;;  %9956 = vtanh.f32 %v3549_v24  ;;  %v3550_v59 = vmul.f32 0.5, %v11839_v61  ;;  %v3552_v7 = vmul.f32 0.5, %v11841_v62 }
 0x19a   : > { %v9933_v45 = vpop.eup %9932  ;;  %8113 = vst [vmem:[%s11683_s3 + $0x4f4] sm:$0xff] %v9103_v54  ;;  %v5517_v63 = vadd.f32 0.5, %v4842_v48  ;;  %9958 = vtanh.f32 %v3551_v36  ;;  %v3564_v46 = vmul.f32 0.5, %v11843_v53  ;;  %v3566_v6 = vmul.f32 0.5, %v11845_v55  ;;  %v11890_v10 = vpop.f32.mrf.mxu0  ;;  %1831 = vmatmul.mubr.bf16.gmra.mxu0 %v11105_v3  ;;  %2092 = vmatmul.mubr.bf16.gmra.mxu1 %v11105_v3 }
 0x19b   : > { %v11892_v1 = vpop.f32.mrf.mxu1  ;;  %v9935_v11 = vpop.eup %9934  ;;  %v9110_v61 = vpack.c.bf16 %v5515_v49, %v5514_v51  ;;  %v4854_v56 = vmul.f32 0.5, %v9933_v45  ;;  %9960 = vtanh.f32 %v3550_v59  ;;  %v3565_v62 = vmul.f32 0.5, %v11851_v20  ;;  %1840 = vmatprep.mubr.bf16.mxu0 %v14150_v0  ;;  %2101 = vmatprep.mubr.bf16.mxu1 %v14150_v0 }
 0x19c   : > { %v9937_v53 = vpop.eup %9936  ;;  %v9111_v55 = vpack.c.bf16 %v5517_v63, %v5516_v12  ;;  %v4856_v13 = vmul.f32 0.5, %v9935_v11  ;;  %9962 = vtanh.f32 %v3552_v7  ;;  %v3567_v14 = vmul.f32 0.5, %v11853_v16  ;;  %v11899_v15 = vpop.f32.mrf.mxu0 }
 0x19d   : > { %v11901_v17 = vpop.f32.mrf.mxu1  ;;  %v9939_v18 = vpop.eup %9938  ;;  %8120 = vst [vmem:[%s11683_s3 + $0x528] sm:$0xff] %v9110_v61  ;;  %v5529_v2 = vadd.f32 0.5, %v4854_v56  ;;  %v4855_v21 = vmul.f32 0.5, %v9937_v53  ;;  %9964 = vtanh.f32 %v3564_v46  ;;  %v3579_v20 = vmul.f32 0.5, %v11857_v29 }
 0x19e   : > { %v9941_v22 = vpop.eup %9940  ;;  %8121 = vst [vmem:[%s11683_s3 + $0x530] sm:$0xff] %v9111_v55  ;;  %v5531_v23 = vadd.f32 0.5, %v4856_v13  ;;  %v4857_v26 = vmul.f32 0.5, %v9939_v18  ;;  %9966 = vtanh.f32 %v3566_v6  ;;  %v3581_v27 = vmul.f32 0.5, %v11859_v5  ;;  %v11907_v4 = vpop.f32.mrf.mxu0 }
 0x19f   : > { %v11909_v16 = vpop.f32.mrf.mxu1  ;;  %v9943_v25 = vpop.eup %9942  ;;  %v5530_v31 = vadd.f32 0.5, %v4855_v21  ;;  %v4869_v32 = vmul.f32 0.5, %v9941_v22  ;;  %9968 = vtanh.f32 %v3565_v62  ;;  %v3580_v30 = vmul.f32 0.5, %v11870_v40 }
 0x1a0   : > { %v9945_v9 = vpop.eup %9944  ;;  %v5532_v33 = vadd.f32 0.5, %v4857_v26  ;;  %v4871_v29 = vmul.f32 0.5, %v9943_v25  ;;  %9970 = vtanh.f32 %v3567_v14  ;;  %v3582_v19 = vmul.f32 0.5, %v11872_v39  ;;  %v11913_v34 = vpop.f32.mrf.mxu0  ;;  %v11106_v39 = vld [vmem:[%s11451_s18 + $0x88] sm:$0xff]  }
 0x1a1   : > { %v11915_v5 = vpop.f32.mrf.mxu1  ;;  %v9947_v8 = vpop.eup %9946  ;;  %v9118_v38 = vpack.c.bf16 %v5530_v31, %v5529_v2  ;;  %v5544_v41 = vadd.f32 0.5, %v4869_v32  ;;  %v4870_v28 = vmul.f32 0.5, %v9945_v9  ;;  %9972 = vtanh.f32 %v3579_v20 }
 0x1a2   : > { %v9949_v42 = vpop.eup %9948  ;;  %v9119_v24 = vpack.c.bf16 %v5532_v33, %v5531_v23  ;;  %v5546_v40 = vadd.f32 0.5, %v4871_v29  ;;  %v4872_v60 = vmul.f32 0.5, %v9947_v8  ;;  %9974 = vtanh.f32 %v3581_v27  ;;  %v11917_v43 = vpop.f32.mrf.mxu0  ;;  %1841 = vmatmul.mubr.bf16.gmra.mxu0 %v11106_v39  ;;  %2102 = vmatmul.mubr.bf16.gmra.mxu1 %v11106_v39 }
 0x1a3   : > { %v11919_v47 = vpop.f32.mrf.mxu1  ;;  %v9951_v36 = vpop.eup %9950  ;;  %8128 = vst [vmem:[%s11683_s3 + $0x564] sm:$0xff] %v9118_v38  ;;  %v5545_v44 = vadd.f32 0.5, %v4870_v28  ;;  %v4884_v50 = vmul.f32 0.5, %v9949_v42  ;;  %9976 = vtanh.f32 %v3580_v30  ;;  %v3594_v51 = vmul.f32 0.5, %v11876_v37  ;;  %1850 = vmatprep.mubr.bf16.mxu0 %v14150_v0  ;;  %2111 = vmatprep.mubr.bf16.mxu1 %v14150_v0 }
 0x1a4   : > { %v9953_v52 = vpop.eup %9952  ;;  %8129 = vst [vmem:[%s11683_s3 + $0x56c] sm:$0xff] %v9119_v24  ;;  %v5547_v54 = vadd.f32 0.5, %v4872_v60  ;;  %v4886_v12 = vmul.f32 0.5, %v9951_v36  ;;  %9978 = vtanh.f32 %v3582_v19  ;;  %v3596_v48 = vmul.f32 0.5, %v11878_v35  ;;  %v11928_v49 = vpop.f32.mrf.mxu0 }
 0x1a5   : > { %v11930_v59 = vpop.f32.mrf.mxu1  ;;  %v9955_v7 = vpop.eup %9954  ;;  %v9126_v45 = vpack.c.bf16 %v5545_v44, %v5544_v41  ;;  %v5559_v63 = vadd.f32 0.5, %v4884_v50  ;;  %v4885_v37 = vmul.f32 0.5, %v9953_v52  ;;  %9980 = vtanh.f32 %v3594_v51 }
 0x1a6   : > { %v9957_v46 = vpop.eup %9956  ;;  %v9127_v6 = vpack.c.bf16 %v5547_v54, %v5546_v40  ;;  %v5561_v3 = vadd.f32 0.5, %v4886_v12  ;;  %v4887_v11 = vmul.f32 0.5, %v9955_v7  ;;  %9982 = vtanh.f32 %v3596_v48  ;;  %v11932_v61 = vpop.f32.mrf.mxu0 }
 0x1a7   : > { %v11934_v56 = vpop.f32.mrf.mxu1  ;;  %v9959_v35 = vpop.eup %9958  ;;  %8136 = vst [vmem:[%s11683_s3 + $0x5a0] sm:$0xff] %v9126_v45  ;;  %v5560_v62 = vadd.f32 0.5, %v4885_v37  ;;  %v4899_v53 = vmul.f32 0.5, %v9957_v46  ;;  %v3595_v55 = vmul.f32 0.5, %v11880_v57  ;;  %v3597_v13 = vmul.f32 0.5, %v11882_v58 }
 0x1a8   : > { %v9961_v14 = vpop.eup %9960  ;;  %8137 = vst [vmem:[%s11683_s3 + $0x5a8] sm:$0xff] %v9127_v6  ;;  %v5562_v18 = vadd.f32 0.5, %v4887_v11  ;;  %v4901_v2 = vmul.f32 0.5, %v9959_v35  ;;  %v3609_v21 = vmul.f32 0.5, %v11890_v10  ;;  %v3611_v20 = vmul.f32 0.5, %v11892_v1  ;;  %v11942_v22 = vpop.f32.mrf.mxu0  ;;  %v11107_v1 = vld [vmem:[%s11451_s18 + $0x90] sm:$0xff]  }
 0x1a9   : > { %v11944_v23 = vpop.f32.mrf.mxu1  ;;  %v9963_v26 = vpop.eup %9962  ;;  %v9134_v27 = vpack.c.bf16 %v5560_v62, %v5559_v63  ;;  %v5574_v25 = vadd.f32 0.5, %v4899_v53  ;;  %v4900_v57 = vmul.f32 0.5, %v9961_v14  ;;  %9984 = vtanh.f32 %v3595_v55 }
 0x1aa   : > { %v9965_v58 = vpop.eup %9964  ;;  %v9135_v31 = vpack.c.bf16 %v5562_v18, %v5561_v3  ;;  %v5576_v32 = vadd.f32 0.5, %v4901_v2  ;;  %v4902_v30 = vmul.f32 0.5, %v9963_v26  ;;  %9986 = vtanh.f32 %v3597_v13  ;;  %v11946_v10 = vpop.f32.mrf.mxu0  ;;  %1851 = vmatmul.mubr.bf16.gmra.mxu0 %v11107_v1  ;;  %2112 = vmatmul.mubr.bf16.gmra.mxu1 %v11107_v1 }
 0x1ab   : > { %v11948_v9 = vpop.f32.mrf.mxu1  ;;  %v9967_v33 = vpop.eup %9966  ;;  %8144 = vst [vmem:[%s11683_s3 + $0x5dc] sm:$0xff] %v9134_v27  ;;  %v5575_v29 = vadd.f32 0.5, %v4900_v57  ;;  %v4914_v19 = vmul.f32 0.5, %v9965_v58  ;;  %9988 = vtanh.f32 %v3609_v21  ;;  %v3610_v8 = vmul.f32 0.5, %v11899_v15  ;;  %1860 = vmatprep.mubr.bf16.mxu0 %v14150_v0  ;;  %2121 = vmatprep.mubr.bf16.mxu1 %v14150_v0 }
 0x1ac   : > { %v9969_v38 = vpop.eup %9968  ;;  %8145 = vst [vmem:[%s11683_s3 + $0x5e4] sm:$0xff] %v9135_v31  ;;  %v5577_v41 = vadd.f32 0.5, %v4902_v30  ;;  %v4916_v28 = vmul.f32 0.5, %v9967_v33  ;;  %9990 = vtanh.f32 %v3611_v20  ;;  %v3612_v42 = vmul.f32 0.5, %v11901_v17  ;;  %v11957_v24 = vpop.f32.mrf.mxu0 }
 0x1ad   : > { %v11959_v40 = vpop.f32.mrf.mxu1  ;;  %v9971_v60 = vpop.eup %9970  ;;  %v9142_v39 = vpack.c.bf16 %v5575_v29, %v5574_v25  ;;  %v5589_v36 = vadd.f32 0.5, %v4914_v19  ;;  %v4915_v15 = vmul.f32 0.5, %v9969_v38  ;;  %9992 = vtanh.f32 %v3610_v8 }
 0x1ae   : > { %v9973_v44 = vpop.eup %9972  ;;  %v9143_v50 = vpack.c.bf16 %v5577_v41, %v5576_v32  ;;  %v5591_v51 = vadd.f32 0.5, %v4916_v28  ;;  %v4917_v52 = vmul.f32 0.5, %v9971_v60  ;;  %9994 = vtanh.f32 %v3612_v42  ;;  %v11961_v54 = vpop.f32.mrf.mxu0 }
 0x1af   : > { %v11963_v12 = vpop.f32.mrf.mxu1  ;;  %v9975_v17 = vpop.eup %9974  ;;  %8152 = vst [vmem:[%s11683_s3 + $0x618] sm:$0xff] %v9142_v39  ;;  %v5590_v48 = vadd.f32 0.5, %v4915_v15  ;;  %v4929_v7 = vmul.f32 0.5, %v9973_v44  ;;  %v3624_v45 = vmul.f32 0.5, %v11907_v4  ;;  %v3626_v63 = vmul.f32 0.5, %v11909_v16 }
 0x1b0   : > { %v9977_v37 = vpop.eup %9976  ;;  %8153 = vst [vmem:[%s11683_s3 + $0x620] sm:$0xff] %v9143_v50  ;;  %v5592_v46 = vadd.f32 0.5, %v4917_v52  ;;  %v4931_v6 = vmul.f32 0.5, %v9975_v17  ;;  %v3625_v3 = vmul.f32 0.5, %v11913_v34  ;;  %v3627_v11 = vmul.f32 0.5, %v11915_v5  ;;  %v11971_v35 = vpop.f32.mrf.mxu0  ;;  %v11108_v5 = vld [vmem:[%s11451_s18 + $0x98] sm:$0xff]  }
 0x1b1   : > { %v11973_v62 = vpop.f32.mrf.mxu1  ;;  %v9979_v53 = vpop.eup %9978  ;;  %v9150_v55 = vpack.c.bf16 %v5590_v48, %v5589_v36  ;;  %v5604_v13 = vadd.f32 0.5, %v4929_v7  ;;  %v4930_v4 = vmul.f32 0.5, %v9977_v37  ;;  %9996 = vtanh.f32 %v3624_v45 }
 0x1b2   : > { %v9981_v16 = vpop.eup %9980  ;;  %v9151_v14 = vpack.c.bf16 %v5592_v46, %v5591_v51  ;;  %v5606_v18 = vadd.f32 0.5, %v4931_v6  ;;  %v4932_v2 = vmul.f32 0.5, %v9979_v53  ;;  %9998 = vtanh.f32 %v3626_v63  ;;  %v11975_v34 = vpop.f32.mrf.mxu0  ;;  %1861 = vmatmul.mubr.bf16.gmra.mxu0 %v11108_v5  ;;  %2122 = vmatmul.mubr.bf16.gmra.mxu1 %v11108_v5 }
 0x1b3   : > { %v11977_v21 = vpop.f32.mrf.mxu1  ;;  %v9983_v20 = vpop.eup %9982  ;;  %8160 = vst [vmem:[%s11683_s3 + $0x654] sm:$0xff] %v9150_v55  ;;  %v5605_v26 = vadd.f32 0.5, %v4930_v4  ;;  %v4944_v27 = vmul.f32 0.5, %v9981_v16  ;;  %10000 = vtanh.f32 %v3625_v3  ;;  %v3639_v25 = vmul.f32 0.5, %v11917_v43  ;;  %1870 = vmatprep.mubr.bf16.mxu0 %v14150_v0  ;;  %2131 = vmatprep.mubr.bf16.mxu1 %v14150_v0 }
 0x1b4   : > { %8161 = vst [vmem:[%s11683_s3 + $0x65c] sm:$0xff] %v9151_v14  ;;  %v5607_v57 = vadd.f32 0.5, %v4932_v2  ;;  %v4946_v58 = vmul.f32 0.5, %v9983_v20  ;;  %10002 = vtanh.f32 %v3627_v11  ;;  %v3641_v31 = vmul.f32 0.5, %v11919_v47  ;;  %v11986_v32 = vpop.f32.mrf.mxu0 }
 0x1b5   : > { %v11988_v30 = vpop.f32.mrf.mxu1  ;;  %v9158_v1 = vpack.c.bf16 %v5605_v26, %v5604_v13  ;;  %v5619_v33 = vadd.f32 0.5, %v4944_v27  ;;  %10004 = vtanh.f32 %v3639_v25  ;;  %v3640_v43 = vmul.f32 0.5, %v11928_v49 }
 0x1b6   : > { %v9985_v29 = vpop.eup %9984  ;;  %v9159_v19 = vpack.c.bf16 %v5607_v57, %v5606_v18  ;;  %v5621_v8 = vadd.f32 0.5, %v4946_v58  ;;  %10006 = vtanh.f32 %v3641_v31  ;;  %v3642_v38 = vmul.f32 0.5, %v11930_v59  ;;  %v11992_v41 = vpop.f32.mrf.mxu0 }
 0x1b7   : > { %v11994_v28 = vpop.f32.mrf.mxu1  ;;  %v9987_v47 = vpop.eup %9986  ;;  %8168 = vst [vmem:[%s11683_s3 + $0x690] sm:$0xff] %v9158_v1  ;;  %v4945_v42 = vmul.f32 0.5, %v9985_v29  ;;  %10008 = vtanh.f32 %v3640_v43  ;;  %v3654_v60 = vmul.f32 0.5, %v11932_v61  ;;  %v3656_v39 = vmul.f32 0.5, %v11934_v56 }
 0x1b8   : > { %v9989_v36 = vpop.eup %9988  ;;  %8169 = vst [vmem:[%s11683_s3 + $0x698] sm:$0xff] %v9159_v19  ;;  %v4947_v49 = vmul.f32 0.5, %v9987_v47  ;;  %10010 = vtanh.f32 %v3642_v38  ;;  %v3655_v15 = vmul.f32 0.5, %v11942_v22  ;;  %v3657_v59 = vmul.f32 0.5, %v11944_v23  ;;  %v12002_v44 = vpop.f32.mrf.mxu0  ;;  %v11109_v23 = vld [vmem:[%s11451_s18 + $0xa0] sm:$0xff]  }
 0x1b9   : > { %v12004_v50 = vpop.f32.mrf.mxu1  ;;  %v9991_v51 = vpop.eup %9990  ;;  %v5620_v52 = vadd.f32 0.5, %v4945_v42  ;;  %v4959_v17 = vmul.f32 0.5, %v9989_v36  ;;  %10012 = vtanh.f32 %v3654_v60  ;;  %v3669_v61 = vmul.f32 0.5, %v11946_v10  ;;  %v11110_v60 = vld [vmem:[%s11451_s18 + $0xa8] sm:$0xff]  }
 0x1ba   : > { %v9993_v56 = vpop.eup %9992  ;;  %v5622_v48 = vadd.f32 0.5, %v4947_v49  ;;  %v4961_v7 = vmul.f32 0.5, %v9991_v51  ;;  %10014 = vtanh.f32 %v3656_v39  ;;  %v3671_v45 = vmul.f32 0.5, %v11948_v9  ;;  %v12008_v22 = vpop.f32.mrf.mxu0  ;;  %1871 = vmatmul.mubr.bf16.gmra.mxu0 %v11109_v23  ;;  %2132 = vmatmul.mubr.bf16.gmra.mxu1 %v11109_v23 }
 0x1bb   : > { %v12010_v63 = vpop.f32.mrf.mxu1  ;;  %v9995_v37 = vpop.eup %9994  ;;  %v9166_v46 = vpack.c.bf16 %v5620_v52, %v5619_v33  ;;  %v5634_v6 = vadd.f32 0.5, %v4959_v17  ;;  %v4960_v3 = vmul.f32 0.5, %v9993_v56  ;;  %10016 = vtanh.f32 %v3655_v15  ;;  %1880 = vmatprep.mubr.bf16.mxu0 %v14150_v0  ;;  %2141 = vmatprep.mubr.bf16.mxu1 %v14150_v0 }
 0x1bc   : > { %v9167_v10 = vpack.c.bf16 %v5622_v48, %v5621_v8  ;;  %v5636_v9 = vadd.f32 0.5, %v4961_v7  ;;  %v4962_v11 = vmul.f32 0.5, %v9995_v37  ;;  %10018 = vtanh.f32 %v3657_v59  ;;  %v12015_v53 = vpop.f32.mrf.mxu0 }
 0x1bd   : > { %v12017_v55 = vpop.f32.mrf.mxu1  ;;  %8176 = vst [vmem:[%s11683_s3 + $0x6cc] sm:$0xff] %v9166_v46  ;;  %v5635_v13 = vadd.f32 0.5, %v4960_v3  ;;  %10020 = vtanh.f32 %v3669_v61  ;;  %v3670_v4 = vmul.f32 0.5, %v11957_v24  ;;  %v3672_v16 = vmul.f32 0.5, %v11959_v40 }
 0x1be   : > { %v9997_v14 = vpop.eup %9996  ;;  %8177 = vst [vmem:[%s11683_s3 + $0x6d4] sm:$0xff] %v9167_v10  ;;  %v5637_v18 = vadd.f32 0.5, %v4962_v11  ;;  %10022 = vtanh.f32 %v3671_v45  ;;  %v3684_v2 = vmul.f32 0.5, %v11961_v54  ;;  %v3686_v5 = vmul.f32 0.5, %v11963_v12  ;;  %v12025_v20 = vpop.f32.mrf.mxu0 }
 0x1bf   : > { %v12027_v26 = vpop.f32.mrf.mxu1  ;;  %v9999_v27 = vpop.eup %9998  ;;  %v9174_v25 = vpack.c.bf16 %v5635_v13, %v5634_v6  ;;  %v4974_v57 = vmul.f32 0.5, %v9997_v14  ;;  %10024 = vtanh.f32 %v3670_v4  ;;  %v3685_v24 = vmul.f32 0.5, %v11971_v35 }
 0x1c0   : > { %v10001_v40 = vpop.eup %10000  ;;  %v9175_v58 = vpack.c.bf16 %v5637_v18, %v5636_v9  ;;  %v4976_v31 = vmul.f32 0.5, %v9999_v27  ;;  %10026 = vtanh.f32 %v3672_v16  ;;  %v3687_v54 = vmul.f32 0.5, %v11973_v62  ;;  %v12031_v1 = vpop.f32.mrf.mxu0 }
 0x1c1   : > { %v12033_v12 = vpop.f32.mrf.mxu1  ;;  %v10003_v33 = vpop.eup %10002  ;;  %8184 = vst [vmem:[%s11683_s3 + $0x708] sm:$0xff] %v9174_v25  ;;  %v5649_v43 = vadd.f32 0.5, %v4974_v57  ;;  %v4975_v29 = vmul.f32 0.5, %v10001_v40  ;;  %10028 = vtanh.f32 %v3684_v2  ;;  %v3699_v19 = vmul.f32 0.5, %v11975_v34 }
 0x1c2   : > { %v10005_v8 = vpop.eup %10004  ;;  %8185 = vst [vmem:[%s11683_s3 + $0x710] sm:$0xff] %v9175_v58  ;;  %v5651_v35 = vadd.f32 0.5, %v4976_v31  ;;  %v4977_v38 = vmul.f32 0.5, %v10003_v33  ;;  %10030 = vtanh.f32 %v3686_v5  ;;  %v3701_v47 = vmul.f32 0.5, %v11977_v21  ;;  %v12039_v62 = vpop.f32.mrf.mxu0  ;;  %1881 = vmatmul.mubr.bf16.gmra.mxu0 %v11110_v60  ;;  %2142 = vmatmul.mubr.bf16.gmra.mxu1 %v11110_v60 }
 0x1c3   : > { %v12041_v42 = vpop.f32.mrf.mxu1  ;;  %v10007_v39 = vpop.eup %10006  ;;  %v5650_v36 = vadd.f32 0.5, %v4975_v29  ;;  %v4989_v49 = vmul.f32 0.5, %v10005_v8  ;;  %10032 = vtanh.f32 %v3685_v24  ;;  %v3700_v34 = vmul.f32 0.5, %v11986_v32  ;;  %1890 = vmatprep.mubr.bf16.mxu0 %v14150_v0  ;;  %2151 = vmatprep.mubr.bf16.mxu1 %v14150_v0 }
 0x1c4   : > { %v10009_v15 = vpop.eup %10008  ;;  %v5652_v59 = vadd.f32 0.5, %v4977_v38  ;;  %v4991_v21 = vmul.f32 0.5, %v10007_v39  ;;  %10034 = vtanh.f32 %v3687_v54  ;;  %v3702_v51 = vmul.f32 0.5, %v11988_v30  ;;  %v12048_v52 = vpop.f32.mrf.mxu0 }
 0x1c5   : > { %v12050_v17 = vpop.f32.mrf.mxu1  ;;  %v10011_v61 = vpop.eup %10010  ;;  %v9182_v56 = vpack.c.bf16 %v5650_v36, %v5649_v43  ;;  %v5664_v48 = vadd.f32 0.5, %v4989_v49  ;;  %v4990_v7 = vmul.f32 0.5, %v10009_v15  ;;  %10036 = vtanh.f32 %v3699_v19 }
 0x1c6   : > { %v10013_v32 = vpop.eup %10012  ;;  %v9183_v45 = vpack.c.bf16 %v5652_v59, %v5651_v35  ;;  %v5666_v23 = vadd.f32 0.5, %v4991_v21  ;;  %v4992_v37 = vmul.f32 0.5, %v10011_v61  ;;  %10038 = vtanh.f32 %v3701_v47  ;;  %v12052_v46 = vpop.f32.mrf.mxu0 }
 0x1c7   : > { %v12054_v6 = vpop.f32.mrf.mxu1  ;;  %v10015_v30 = vpop.eup %10014  ;;  %8192 = vst [vmem:[%s11683_s3 + $0x744] sm:$0xff] %v9182_v56  ;;  %v5665_v3 = vadd.f32 0.5, %v4990_v7  ;;  %v5004_v10 = vmul.f32 0.5, %v10013_v32  ;;  %10040 = vtanh.f32 %v3700_v34  ;;  %v3714_v9 = vmul.f32 0.5, %v11992_v41  ;;  %v9716_v32 = vld [vmem:[%s11464_s30 + $0x378] ss:$60 sps:$4 sm:$0xff]  }
 0x1c8   : > { %v10017_v11 = vpop.eup %10016  ;;  %8193 = vst [vmem:[%s11683_s3 + $0x74c] sm:$0xff] %v9183_v45  ;;  %v5667_v13 = vadd.f32 0.5, %v4992_v37  ;;  %v5006_v4 = vmul.f32 0.5, %v10015_v30  ;;  %10042 = vtanh.f32 %v3702_v51  ;;  %v3716_v16 = vmul.f32 0.5, %v11994_v28  ;;  %v12060_v14 = vpop.f32.mrf.mxu0  ;;  %v11111_v28 = vld [vmem:[%s11451_s18 + $0xb0] ss:$0 sps:$4 sm:$0xff]  }
 0x1c9   : > { %v12062_v18 = vpop.f32.mrf.mxu1  ;;  %v10019_v2 = vpop.eup %10018  ;;  %v9190_v5 = vpack.c.bf16 %v5665_v3, %v5664_v48  ;;  %v5679_v27 = vadd.f32 0.5, %v5004_v10  ;;  %v5005_v25 = vmul.f32 0.5, %v10017_v11  ;;  %10044 = vtanh.f32 %v3714_v9  ;;  %v9722_v9 = vld [vmem:[%s11464_s30 + $0x304] ss:$60 sps:$4 sm:$0xff]  }
 0x1ca   : > { %v10021_v57 = vpop.eup %10020  ;;  %v9191_v41 = vpack.c.bf16 %v5667_v13, %v5666_v23  ;;  %v5681_v24 = vadd.f32 0.5, %v5006_v4  ;;  %v5007_v40 = vmul.f32 0.5, %v10019_v2  ;;  %10046 = vtanh.f32 %v3716_v16  ;;  %v12064_v58 = vpop.f32.mrf.mxu0  ;;  %1891 = vmatmul.mubr.bf16.gmra.mxu0 %v11111_v28  ;;  %2152 = vmatmul.mubr.bf16.gmra.mxu1 %v11111_v28 }
 0x1cb   : > { %v12066_v31 = vpop.f32.mrf.mxu1  ;;  %v10023_v54 = vpop.eup %10022  ;;  %8200 = vst [vmem:[%s11683_s3 + $0x780] sm:$0xff] %v9190_v5  ;;  %v5680_v33 = vadd.f32 0.5, %v5005_v25  ;;  %v5019_v43 = vmul.f32 0.5, %v10021_v57  ;;  %v3715_v29 = vmul.f32 0.5, %v12002_v44  ;;  %v3717_v19 = vmul.f32 0.5, %v12004_v50  ;;  %2192 = vmatprep.mubr.bf16.mxu0 %v14150_v0  ;;  %2453 = vmatprep.mubr.bf16.mxu1 %v14150_v0  ;;  %v11112_v57 = vld [vmem:[%s11451_s18] sm:$0xff]  }
 0x1cc   : > { %v10025_v8 = vpop.eup %10024  ;;  %8201 = vst [vmem:[%s11683_s3 + $0x788] sm:$0xff] %v9191_v41  ;;  %v5682_v35 = vadd.f32 0.5, %v5007_v40  ;;  %v5021_v38 = vmul.f32 0.5, %v10023_v54  ;;  %v3729_v47 = vmul.f32 0.5, %v12008_v22  ;;  %v3731_v60 = vmul.f32 0.5, %v12010_v63  ;;  %v12077_v39 = vpop.f32.mrf.mxu0 }
 0x1cd   : > { %v12079_v36 = vpop.f32.mrf.mxu1  ;;  %v10027_v44 = vpop.eup %10026  ;;  %v9198_v49 = vpack.c.bf16 %v5680_v33, %v5679_v27  ;;  %v5694_v50 = vadd.f32 0.5, %v5019_v43  ;;  %v5020_v34 = vmul.f32 0.5, %v10025_v8  ;;  %10048 = vtanh.f32 %v3715_v29  ;;  %v9720_v33 = vld [vmem:[%s11464_s30 + $0x300] ss:$60 sps:$4 sm:$0xff]  }
 0x1ce   : > { %v10029_v15 = vpop.eup %10028  ;;  %v9199_v59 = vpack.c.bf16 %v5682_v35, %v5681_v24  ;;  %v5696_v21 = vadd.f32 0.5, %v5021_v38  ;;  %v5022_v51 = vmul.f32 0.5, %v10027_v44  ;;  %10050 = vtanh.f32 %v3717_v19  ;;  %v12081_v22 = vpop.f32.mrf.mxu0 }
 0x1cf   : > { %v12083_v63 = vpop.f32.mrf.mxu1  ;;  %v10031_v61 = vpop.eup %10030  ;;  %8208 = vst [vmem:[%s11683_s3 + $0x7bc] sm:$0xff] %v9198_v49  ;;  %v5695_v56 = vadd.f32 0.5, %v5020_v34  ;;  %v5034_v48 = vmul.f32 0.5, %v10029_v15  ;;  %10052 = vtanh.f32 %v3729_v47  ;;  %v3730_v7 = vmul.f32 0.5, %v12015_v53 }
 0x1d0   : > { %v10033_v45 = vpop.eup %10032  ;;  %8209 = vst [vmem:[%s11683_s3 + $0x7c4] sm:$0xff] %v9199_v59  ;;  %v5697_v23 = vadd.f32 0.5, %v5022_v51  ;;  %v5036_v37 = vmul.f32 0.5, %v10031_v61  ;;  %10054 = vtanh.f32 %v3731_v60  ;;  %v3732_v30 = vmul.f32 0.5, %v12017_v55  ;;  %v12090_v3 = vpop.f32.mrf.mxu0 }
 0x1d1   : > { %v12092_v10 = vpop.f32.mrf.mxu1  ;;  %v10035_v11 = vpop.eup %10034  ;;  %v9206_v13 = vpack.c.bf16 %v5695_v56, %v5694_v50  ;;  %v5709_v4 = vadd.f32 0.5, %v5034_v48  ;;  %v5035_v16 = vmul.f32 0.5, %v10033_v45  ;;  %10056 = vtanh.f32 %v3730_v7 }
 0x1d2   : > { %v10037_v53 = vpop.eup %10036  ;;  %v9207_v2 = vpack.c.bf16 %v5697_v23, %v5696_v21  ;;  %v5711_v5 = vadd.f32 0.5, %v5036_v37  ;;  %v5037_v27 = vmul.f32 0.5, %v10035_v11  ;;  %10058 = vtanh.f32 %v3732_v30  ;;  %v12095_v55 = vpop.f32.mrf.mxu0  ;;  %2193 = vmatmul.mubr.bf16.vlgmr.msra.gmra.mxu0 %v11112_v57  ;;  %2454 = vmatmul.mubr.bf16.vlgmr.msra.gmra.mxu1 %v11112_v57  ;;  %v9724_v37 = vld [vmem:[%s11464_s30 + $0x288] ss:$60 sps:$4 sm:$0xff]  }
 0x1d3   : > { %v12097_v25 = vpop.f32.mrf.mxu1  ;;  %v10039_v41 = vpop.eup %10038  ;;  %8216 = vst [vmem:[%s11683_s3 + $0x7f8] sm:$0xff] %v9206_v13  ;;  %v5710_v24 = vadd.f32 0.5, %v5035_v16  ;;  %v5049_v40 = vmul.f32 0.5, %v10037_v53  ;;  %v3744_v28 = vmul.f32 0.5, %v12025_v20  ;;  %v3746_v54 = vmul.f32 0.5, %v12027_v26  ;;  %2683 = vmatpush1.bf16.msra.mxu0 %v9716_v32  ;;  %2202 = vmatprep.mubr.bf16.mxu0 %v14150_v0 }
 0x1d4   : > { %v10041_v43 = vpop.eup %10040  ;;  %8217 = vst [vmem:[%s11683_s3 + $0x800] sm:$0xff] %v9207_v2  ;;  %v5712_v29 = vadd.f32 0.5, %v5037_v27  ;;  %v5051_v19 = vmul.f32 0.5, %v10039_v41  ;;  %v3745_v8 = vmul.f32 0.5, %v12031_v1  ;;  %v3747_v35 = vmul.f32 0.5, %v12033_v12  ;;  %v12108_v38 = vpop.f32.mrf.mxu0  ;;  %2463 = vmatprep.mubr.bf16.mxu1 %v14150_v0  ;;  %2684 = vmatprep.subr.bf16.mxu0 %v9722_v9 }
 0x1d5   : > { %v12110_v47 = vpop.f32.mrf.mxu1  ;;  %v9726_v20 = vld [vmem:[%s11464_s30 + $0x28c] ss:$60 sps:$4 sm:$0xff]   ;;  %v10043_v26 = vpop.eup %10042  ;;  %v9214_v60 = vpack.c.bf16 %v5710_v24, %v5709_v4  ;;  %v5724_v44 = vadd.f32 0.5, %v5049_v40  ;;  %v5050_v49 = vmul.f32 0.5, %v10041_v43  ;;  %10060 = vtanh.f32 %v3744_v28  ;;  %v9730_v13 = vld [vmem:[%s11464_s30 + $0x214] ss:$60 sps:$4 sm:$0xff]  }
 0x1d6   : > { %v10045_v50 = vpop.eup %10044  ;;  %v9215_v34 = vpack.c.bf16 %v5712_v29, %v5711_v5  ;;  %v5726_v1 = vadd.f32 0.5, %v5051_v19  ;;  %v5052_v15 = vmul.f32 0.5, %v10043_v26  ;;  %10062 = vtanh.f32 %v3746_v54  ;;  %v1374_v12 = vpop.f32.mrf.mxu0  ;;  %v11113_v5 = vld [vmem:[%s11451_s18 + $0x8] sm:$0xff]  }
 0x1d7   : > { %v1635_v59 = vpop.f32.mrf.mxu1  ;;  %v10047_v21 = vpop.eup %10046  ;;  %8224 = vst [vmem:[%s11683_s3 + $0x834] sm:$0xff] %v9214_v60  ;;  %v5725_v51 = vadd.f32 0.5, %v5050_v49  ;;  %v5064_v61 = vmul.f32 0.5, %v10045_v50  ;;  %10064 = vtanh.f32 %v3745_v8  ;;  %v3759_v56 = vmul.f32 0.5, %v12039_v62  ;;  %2685 = vmatpush1.bf16.msra.mxu0 %v9720_v33 }
 0x1d8   : > { %8225 = vst [vmem:[%s11683_s3 + $0x83c] sm:$0xff] %v9215_v34  ;;  %v5727_v48 = vadd.f32 0.5, %v5052_v15  ;;  %v5066_v7 = vmul.f32 0.5, %v10047_v21  ;;  %10066 = vtanh.f32 %v3747_v35  ;;  %v3761_v32 = vmul.f32 0.5, %v12041_v42  ;;  %v1375_v45 = vpop.f32.mrf.mxu0  ;;  %2686 = vmatprep.subr.bf16.mxu0 %v9726_v20 }
 0x1d9   : > { %v1636_v23 = vpop.f32.mrf.mxu1  ;;  %v9222_v30 = vpack.c.bf16 %v5725_v51, %v5724_v44  ;;  %v5739_v9 = vadd.f32 0.5, %v5064_v61  ;;  %10068 = vtanh.f32 %v3759_v56  ;;  %v3760_v11 = vmul.f32 0.5, %v12048_v52  ;;  %v9732_v51 = vld [vmem:[%s11464_s30 + $0x198] ss:$60 sps:$4 sm:$0xff]  }
 0x1da   : > { %v10049_v62 = vpop.eup %10048  ;;  %v9223_v4 = vpack.c.bf16 %v5727_v48, %v5726_v1  ;;  %v5741_v16 = vadd.f32 0.5, %v5066_v7  ;;  %10070 = vtanh.f32 %v3761_v32  ;;  %v3762_v53 = vmul.f32 0.5, %v12050_v17  ;;  %v12122_v42 = vpop.f32.mrf.mxu0  ;;  %2203 = vmatmul.mubr.bf16.gmra.mxu0 %v11113_v5  ;;  %2464 = vmatmul.mubr.bf16.gmra.mxu1 %v11113_v5  ;;  %v11114_v23 = vld [vmem:[%s11451_s18 + $0x10] sm:$0xff]  }
 0x1db   : > { %v12124_v2 = vpop.f32.mrf.mxu1  ;;  %v10051_v27 = vpop.eup %10050  ;;  %8232 = vst [vmem:[%s11683_s3 + $0x870] sm:$0xff] %v9222_v30  ;;  %v5065_v57 = vmul.f32 0.5, %v10049_v62  ;;  %10072 = vtanh.f32 %v3760_v11  ;;  %v3774_v52 = vmul.f32 0.5, %v12052_v46  ;;  %v3776_v41 = vmul.f32 0.5, %v12054_v6  ;;  %2212 = vmatprep.mubr.bf16.mxu0 %v14150_v0  ;;  %2473 = vmatprep.mubr.bf16.mxu1 %v14150_v0  ;;  %v9728_v46 = vld [vmem:[%s11464_s30 + $0x210] ss:$60 sps:$4 sm:$0xff]  }
 0x1dc   : > { %v10053_v17 = vpop.eup %10052  ;;  %8233 = vst [vmem:[%s11683_s3 + $0x878] sm:$0xff] %v9223_v4  ;;  %v5067_v24 = vmul.f32 0.5, %v10051_v27  ;;  %10074 = vtanh.f32 %v3762_v53  ;;  %v3775_v40 = vmul.f32 0.5, %v12060_v14  ;;  %v3777_v28 = vmul.f32 0.5, %v12062_v18  ;;  %v12135_v54 = vpop.f32.mrf.mxu0  ;;  %2687 = vmatpush1.bf16.msra.mxu0 %v9724_v37  ;;  %v9734_v37 = vld [vmem:[%s11464_s30 + $0x19c] ss:$60 sps:$4 sm:$0xff]  }
 0x1dd   : > { %v12137_v33 = vpop.f32.mrf.mxu1  ;;  %v10055_v43 = vpop.eup %10054  ;;  %v5740_v6 = vadd.f32 0.5, %v5065_v57  ;;  %v5079_v29 = vmul.f32 0.5, %v10053_v17  ;;  %10076 = vtanh.f32 %v3774_v52  ;;  %v3789_v19 = vmul.f32 0.5, %v12064_v58  ;;  %2688 = vmatprep.subr.bf16.mxu0 %v9730_v13 }
 0x1de   : > { %v10057_v8 = vpop.eup %10056  ;;  %v5742_v35 = vadd.f32 0.5, %v5067_v24  ;;  %v5081_v20 = vmul.f32 0.5, %v10055_v43  ;;  %10078 = vtanh.f32 %v3776_v41  ;;  %v3791_v14 = vmul.f32 0.5, %v12066_v31  ;;  %v12142_v18 = vpop.f32.mrf.mxu0 }
 0x1df   : > { %v12144_v26 = vpop.f32.mrf.mxu1  ;;  %v10059_v60 = vpop.eup %10058  ;;  %v9230_v44 = vpack.c.bf16 %v5740_v6, %v5739_v9  ;;  %v5754_v49 = vadd.f32 0.5, %v5079_v29  ;;  %v5080_v50 = vmul.f32 0.5, %v10057_v8  ;;  %10080 = vtanh.f32 %v3775_v40 }
 0x1e0   : > { %v9231_v58 = vpack.c.bf16 %v5742_v35, %v5741_v16  ;;  %v5756_v34 = vadd.f32 0.5, %v5081_v20  ;;  %v5082_v1 = vmul.f32 0.5, %v10059_v60  ;;  %10082 = vtanh.f32 %v3777_v28  ;;  %v12146_v15 = vpop.f32.mrf.mxu0  ;;  %2689 = vmatpush1.bf16.msra.mxu0 %v9728_v46  ;;  %v9719_v60 = vld [vmem:[%s11464_s30 + $0x380] ss:$60 sps:$4 sm:$0xff]  }
 0x1e1   : > { %v12148_v12 = vpop.f32.mrf.mxu1  ;;  %8240 = vst [vmem:[%s11683_s3 + $0x8ac] sm:$0xff] %v9230_v44  ;;  %v5755_v31 = vadd.f32 0.5, %v5080_v50  ;;  %10084 = vtanh.f32 %v3789_v19  ;;  %v3790_v59 = vmul.f32 0.5, %v12077_v39  ;;  %v3792_v21 = vmul.f32 0.5, %v12079_v36  ;;  %2690 = vmatprep.subr.bf16.mxu0 %v9734_v37 }
 0x1e2   : > { %v10061_v61 = vpop.eup %10060  ;;  %8241 = vst [vmem:[%s11683_s3 + $0x8b4] sm:$0xff] %v9231_v58  ;;  %v5757_v56 = vadd.f32 0.5, %v5082_v1  ;;  %10086 = vtanh.f32 %v3791_v14  ;;  %v3804_v48 = vmul.f32 0.5, %v12081_v22  ;;  %v3806_v7 = vmul.f32 0.5, %v12083_v63  ;;  %v12157_v32 = vpop.f32.mrf.mxu0  ;;  %2213 = vmatmul.mubr.bf16.gmra.mxu0 %v11114_v23  ;;  %2474 = vmatmul.mubr.bf16.gmra.mxu1 %v11114_v23 }
 0x1e3   : > { %v12159_v45 = vpop.f32.mrf.mxu1  ;;  %v10063_v39 = vpop.eup %10062  ;;  %v9238_v36 = vpack.c.bf16 %v5755_v31, %v5754_v49  ;;  %v5094_v30 = vmul.f32 0.5, %v10061_v61  ;;  %10088 = vtanh.f32 %v3790_v59  ;;  %v3805_v9 = vmul.f32 0.5, %v12090_v3  ;;  %2222 = vmatprep.mubr.bf16.mxu0 %v14150_v0  ;;  %2483 = vmatprep.mubr.bf16.mxu1 %v14150_v0 }
 0x1e4   : > { %v10065_v22 = vpop.eup %10064  ;;  %v9239_v63 = vpack.c.bf16 %v5757_v56, %v5756_v34  ;;  %v5096_v11 = vmul.f32 0.5, %v10063_v39  ;;  %10090 = vtanh.f32 %v3792_v21  ;;  %v3807_v13 = vmul.f32 0.5, %v12092_v10  ;;  %v12167_v62 = vpop.f32.mrf.mxu0  ;;  %2691 = vmatpush1.bf16.msra.mxu0 %v9732_v51  ;;  %v11115_v34 = vld [vmem:[%s11451_s18 + $0x18] sm:$0xff]  }
 0x1e5   : > { %v12169_v4 = vpop.f32.mrf.mxu1  ;;  %v10067_v16 = vpop.eup %10066  ;;  %8248 = vst [vmem:[%s11683_s3 + $0x8e8] sm:$0xff] %v9238_v36  ;;  %v5769_v53 = vadd.f32 0.5, %v5094_v30  ;;  %v5095_v3 = vmul.f32 0.5, %v10065_v22  ;;  %10092 = vtanh.f32 %v3804_v48  ;;  %v3819_v5 = vmul.f32 0.5, %v12095_v55  ;;  %v9723_v22 = vld [vmem:[%s11464_s30 + $0x308] ss:$60 sps:$4 sm:$0xff]  }
 0x1e6   : > { %v10069_v27 = vpop.eup %10068  ;;  %8249 = vst [vmem:[%s11683_s3 + $0x8f0] sm:$0xff] %v9239_v63  ;;  %v5771_v57 = vadd.f32 0.5, %v5096_v11  ;;  %v5097_v52 = vmul.f32 0.5, %v10067_v16  ;;  %10094 = vtanh.f32 %v3806_v7  ;;  %v3821_v10 = vmul.f32 0.5, %v12097_v25  ;;  %v12175_v41 = vpop.f32.mrf.mxu0 }
 0x1e7   : > { %v12177_v17 = vpop.f32.mrf.mxu1  ;;  %v10071_v24 = vpop.eup %10070  ;;  %v5770_v40 = vadd.f32 0.5, %v5095_v3  ;;  %v5109_v28 = vmul.f32 0.5, %v10069_v27  ;;  %10096 = vtanh.f32 %v3805_v9  ;;  %v3820_v46 = vmul.f32 0.5, %v12108_v38 }
 0x1e8   : > { %v10073_v55 = vpop.eup %10072  ;;  %v5772_v43 = vadd.f32 0.5, %v5097_v52  ;;  %v5111_v6 = vmul.f32 0.5, %v10071_v24  ;;  %10098 = vtanh.f32 %v3807_v13  ;;  %v3822_v29 = vmul.f32 0.5, %v12110_v47  ;;  %v12181_v19 = vpop.f32.mrf.mxu0 }
 0x1e9   : > { %v12183_v25 = vpop.f32.mrf.mxu1  ;;  %v10075_v8 = vpop.eup %10074  ;;  %v9246_v35 = vpack.c.bf16 %v5770_v40, %v5769_v53  ;;  %v5784_v20 = vadd.f32 0.5, %v5109_v28  ;;  %v5110_v14 = vmul.f32 0.5, %v10073_v55  ;;  %10100 = vtanh.f32 %v3819_v5 }
 0x1ea   : > { %v10077_v44 = vpop.eup %10076  ;;  %v9247_v38 = vpack.c.bf16 %v5772_v43, %v5771_v57  ;;  %v5786_v49 = vadd.f32 0.5, %v5111_v6  ;;  %v5112_v50 = vmul.f32 0.5, %v10075_v8  ;;  %10102 = vtanh.f32 %v3821_v10  ;;  %v12186_v58 = vpop.f32.mrf.mxu0  ;;  %2223 = vmatmul.mubr.bf16.gmra.mxu0 %v11115_v34  ;;  %2484 = vmatmul.mubr.bf16.gmra.mxu1 %v11115_v34 }
 0x1eb   : > { %v12188_v47 = vpop.f32.mrf.mxu1  ;;  %v10079_v1 = vpop.eup %10078  ;;  %8256 = vst [vmem:[%s11683_s3 + $0x924] sm:$0xff] %v9246_v35  ;;  %v5785_v31 = vadd.f32 0.5, %v5110_v14  ;;  %v5124_v59 = vmul.f32 0.5, %v10077_v44  ;;  %10104 = vtanh.f32 %v3820_v46  ;;  %2232 = vmatprep.mubr.bf16.mxu0 %v14150_v0  ;;  %2493 = vmatprep.mubr.bf16.mxu1 %v14150_v0  ;;  %v14148_v56 = vmov 0.0  }
 0x1ec   : > { %v10081_v21 = vpop.eup %10080  ;;  %8257 = vst [vmem:[%s11683_s3 + $0x92c] sm:$0xff] %v9247_v38  ;;  %v5787_v51 = vadd.f32 0.5, %v5112_v50  ;;  %v5126_v61 = vmul.f32 0.5, %v10079_v1  ;;  %10106 = vtanh.f32 %v3822_v29  ;;  %9325 = vmatprep.subr.bf16.mxu1 %v14148_v56  ;;  %v3163_v48 = vmul.f32 0.5, %v12122_v42  ;;  %v12197_v7 = vpop.f32.mrf.mxu0 }
 0x1ed   : > { %v12199_v23 = vpop.f32.mrf.mxu1  ;;  %v10083_v37 = vpop.eup %10082  ;;  %v9254_v39 = vpack.c.bf16 %v5785_v31, %v5784_v20  ;;  %v5799_v36 = vadd.f32 0.5, %v5124_v59  ;;  %v5125_v30 = vmul.f32 0.5, %v10081_v21  ;;  %9326 = vmatpush3.bf16.msra.mxu1 %v9719_v60  ;;  %v3165_v9 = vmul.f32 0.5, %v12124_v2  ;;  %v11116_v60 = vld [vmem:[%s11451_s18 + $0x20] sm:$0xff]  }
 0x1ee   : > { %v10085_v63 = vpop.eup %10084  ;;  %v9255_v11 = vpack.c.bf16 %v5787_v51, %v5786_v49  ;;  %v5801_v13 = vadd.f32 0.5, %v5126_v61  ;;  %v5127_v16 = vmul.f32 0.5, %v10083_v37  ;;  %10108 = vtanh.f32 %v3163_v48  ;;  %9327 = vmatprep.subr.bf16.mxu1 %v14148_v56  ;;  %v12204_v42 = vpop.f32.mrf.mxu0 }
 0x1ef   : > { %v12206_v53 = vpop.f32.mrf.mxu1  ;;  %v10087_v3 = vpop.eup %10086  ;;  %8264 = vst [vmem:[%s11683_s3 + $0x960] sm:$0xff] %v9254_v39  ;;  %v5800_v5 = vadd.f32 0.5, %v5125_v30  ;;  %v5139_v27 = vmul.f32 0.5, %v10085_v63  ;;  %10110 = vtanh.f32 %v3165_v9  ;;  %v3164_v2 = vmul.f32 0.5, %v12135_v54  ;;  %v9727_v54 = vld [vmem:[%s11464_s30 + $0x290] ss:$60 sps:$4 sm:$0xff]  }
 0x1f0   : > { %v10089_v57 = vpop.eup %10088  ;;  %8265 = vst [vmem:[%s11683_s3 + $0x968] sm:$0xff] %v9255_v11  ;;  %v5802_v52 = vadd.f32 0.5, %v5127_v16  ;;  %v5141_v10 = vmul.f32 0.5, %v10087_v3  ;;  %v3166_v24 = vmul.f32 0.5, %v12137_v33  ;;  %v3178_v40 = vmul.f32 0.5, %v12142_v18  ;;  %v12213_v28 = vpop.f32.mrf.mxu0 }
 0x1f1   : > { %v12215_v46 = vpop.f32.mrf.mxu1  ;;  %v10091_v55 = vpop.eup %10090  ;;  %v9262_v43 = vpack.c.bf16 %v5800_v5, %v5799_v36  ;;  %v5814_v6 = vadd.f32 0.5, %v5139_v27  ;;  %v5140_v29 = vmul.f32 0.5, %v10089_v57  ;;  %10112 = vtanh.f32 %v3164_v2  ;;  %9328 = vmatpush3.bf16.msra.mxu1 %v9723_v22  ;;  %v9731_v36 = vld [vmem:[%s11464_s30 + $0x218] ss:$60 sps:$4 sm:$0xff]  }
 0x1f2   : > { %v10093_v8 = vpop.eup %10092  ;;  %v9263_v35 = vpack.c.bf16 %v5802_v52, %v5801_v13  ;;  %v5816_v20 = vadd.f32 0.5, %v5141_v10  ;;  %v5142_v14 = vmul.f32 0.5, %v10091_v55  ;;  %10114 = vtanh.f32 %v3166_v24  ;;  %v12218_v33 = vpop.f32.mrf.mxu0  ;;  %2233 = vmatmul.mubr.bf16.gmra.mxu0 %v11116_v60  ;;  %2494 = vmatmul.mubr.bf16.gmra.mxu1 %v11116_v60 }
 0x1f3   : > { %v12220_v18 = vpop.f32.mrf.mxu1  ;;  %v10095_v44 = vpop.eup %10094  ;;  %8272 = vst [vmem:[%s11683_s3 + $0x99c] sm:$0xff] %v9262_v43  ;;  %v5815_v38 = vadd.f32 0.5, %v5140_v29  ;;  %v5154_v49 = vmul.f32 0.5, %v10093_v8  ;;  %10116 = vtanh.f32 %v3178_v40  ;;  %v3180_v50 = vmul.f32 0.5, %v12144_v26  ;;  %2242 = vmatprep.mubr.bf16.mxu0 %v14150_v0  ;;  %2503 = vmatprep.mubr.bf16.mxu1 %v14150_v0 }
 0x1f4   : > { %v10097_v34 = vpop.eup %10096  ;;  %8273 = vst [vmem:[%s11683_s3 + $0x9a4] sm:$0xff] %v9263_v35  ;;  %v5817_v1 = vadd.f32 0.5, %v5142_v14  ;;  %v5156_v31 = vmul.f32 0.5, %v10095_v44  ;;  %v3179_v59 = vmul.f32 0.5, %v12146_v15  ;;  %v3181_v21 = vmul.f32 0.5, %v12148_v12  ;;  %v12230_v51 = vpop.f32.mrf.mxu0  ;;  %9329 = vmatprep.subr.bf16.mxu1 %v14148_v56  ;;  %v11117_v35 = vld [vmem:[%s11451_s18 + $0x28] sm:$0xff]  }
 0x1f5   : > { %v12232_v61 = vpop.f32.mrf.mxu1  ;;  %v10099_v26 = vpop.eup %10098  ;;  %v9270_v48 = vpack.c.bf16 %v5815_v38, %v5814_v6  ;;  %v5829_v37 = vadd.f32 0.5, %v5154_v49  ;;  %v5155_v39 = vmul.f32 0.5, %v10097_v34  ;;  %10118 = vtanh.f32 %v3180_v50  ;;  %9330 = vmatpush3.bf16.msra.mxu1 %v9727_v54  ;;  %v9736_v38 = vld [vmem:[%s11464_s30 + $0x120] ss:$60 sps:$4 sm:$0xff]  }
 0x1f6   : > { %v10101_v30 = vpop.eup %10100  ;;  %v9271_v9 = vpack.c.bf16 %v5817_v1, %v5816_v20  ;;  %v5831_v15 = vadd.f32 0.5, %v5156_v31  ;;  %v5157_v22 = vmul.f32 0.5, %v10099_v26  ;;  %10120 = vtanh.f32 %v3179_v59  ;;  %v12236_v12 = vpop.f32.mrf.mxu0  ;;  %9331 = vmatprep.subr.bf16.mxu1 %v14148_v56 }
 0x1f7   : > { %v12238_v63 = vpop.f32.mrf.mxu1  ;;  %v10103_v11 = vpop.eup %10102  ;;  %8280 = vst [vmem:[%s11683_s3 + $0x9d8] sm:$0xff] %v9270_v48  ;;  %v5830_v13 = vadd.f32 0.5, %v5155_v39  ;;  %v5169_v16 = vmul.f32 0.5, %v10101_v30  ;;  %10122 = vtanh.f32 %v3181_v21  ;;  %v3193_v3 = vmul.f32 0.5, %v12157_v32  ;;  %v9735_v32 = vld [vmem:[%s11464_s30 + $0x1a0] ss:$60 sps:$4 sm:$0xff]  }
 0x1f8   : > { %v10105_v5 = vpop.eup %10104  ;;  %8281 = vst [vmem:[%s11683_s3 + $0x9e0] sm:$0xff] %v9271_v9  ;;  %v5832_v27 = vadd.f32 0.5, %v5157_v22  ;;  %v5171_v2 = vmul.f32 0.5, %v10103_v11  ;;  %v3195_v57 = vmul.f32 0.5, %v12159_v45  ;;  %v3194_v52 = vmul.f32 0.5, %v12167_v62  ;;  %v12246_v10 = vpop.f32.mrf.mxu0 }
 0x1f9   : > { %v12248_v24 = vpop.f32.mrf.mxu1  ;;  %v10107_v40 = vpop.eup %10106  ;;  %v9278_v55 = vpack.c.bf16 %v5830_v13, %v5829_v37  ;;  %v5844_v43 = vadd.f32 0.5, %v5169_v16  ;;  %v5170_v6 = vmul.f32 0.5, %v10105_v5  ;;  %10124 = vtanh.f32 %v3193_v3  ;;  %9332 = vmatpush3.bf16.msra.mxu1 %v9731_v36 }
 0x1fa   : > { %v9279_v29 = vpack.c.bf16 %v5832_v27, %v5831_v15  ;;  %v5846_v54 = vadd.f32 0.5, %v5171_v2  ;;  %v5172_v8 = vmul.f32 0.5, %v10107_v40  ;;  %10126 = vtanh.f32 %v3195_v57  ;;  %v12251_v45 = vpop.f32.mrf.mxu0  ;;  %2243 = vmatmul.mubr.bf16.gmra.mxu0 %v11117_v35  ;;  %2504 = vmatmul.mubr.bf16.gmra.mxu1 %v11117_v35  ;;  %v9739_v27 = vld [vmem:[%s11464_s30 + $0x128] ss:$60 sps:$4 sm:$0xff]  }
 0x1fb   : > { %v12253_v62 = vpop.f32.mrf.mxu1  ;;  %v10109_v20 = vpop.eup %10108  ;;  %8288 = vst [vmem:[%s11683_s3 + $0xa14] sm:$0xff] %v9278_v55  ;;  %v5845_v14 = vadd.f32 0.5, %v5170_v6  ;;  %10128 = vtanh.f32 %v3194_v52  ;;  %v3196_v60 = vmul.f32 0.5, %v12169_v4  ;;  %v3208_v44 = vmul.f32 0.5, %v12175_v41  ;;  %2252 = vmatprep.mubr.bf16.mxu0 %v14150_v0  ;;  %2513 = vmatprep.mubr.bf16.mxu1 %v14150_v0  ;;  %v9738_v4 = vld [vmem:[%s11464_s30 + $0x124] ss:$60 sps:$4 sm:$0xff]  }
 0x1fc   : > { %v10111_v49 = vpop.eup %10110  ;;  %8289 = vst [vmem:[%s11683_s3 + $0xa1c] sm:$0xff] %v9279_v29  ;;  %v5847_v50 = vadd.f32 0.5, %v5172_v8  ;;  %v4513_v34 = vmul.f32 0.5, %v10109_v20  ;;  %v3210_v1 = vmul.f32 0.5, %v12177_v17  ;;  %v3209_v31 = vmul.f32 0.5, %v12181_v19  ;;  %v12265_v59 = vpop.f32.mrf.mxu0  ;;  %9333 = vmatprep.subr.bf16.mxu1 %v14148_v56  ;;  %2692 = vmatprep.subr.bf16.mxu0 %v9738_v4  ;;  %v11118_v6 = vld [vmem:[%s11451_s18 + $0x30] sm:$0xff]  }
 0x1fd   : > { %v12267_v21 = vpop.f32.mrf.mxu1  ;;  %v9286_v41 = vpack.c.bf16 %v5845_v14, %v5844_v43  ;;  %v4515_v26 = vmul.f32 0.5, %v10111_v49  ;;  %10130 = vtanh.f32 %v3196_v60  ;;  %v3211_v48 = vmul.f32 0.5, %v12183_v25  ;;  %9334 = vmatpush3.bf16.msra.mxu1 %v9735_v32  ;;  %2693 = vmatpush1.bf16.msra.mxu0 %v9736_v38 }
 0x1fe   : > { %v10113_v37 = vpop.eup %10112  ;;  %v9287_v39 = vpack.c.bf16 %v5847_v50, %v5846_v54  ;;  %v5188_v17 = vadd.f32 0.5, %v4513_v34  ;;  %10132 = vtanh.f32 %v3208_v44  ;;  %v3223_v19 = vmul.f32 0.5, %v12186_v58  ;;  %v12273_v36 = vpop.f32.mrf.mxu0  ;;  %9335 = vmatprep.subr.bf16.mxu1 %v14148_v56 }
 0x1ff   : > { %v12275_v30 = vpop.f32.mrf.mxu1  ;;  %v10115_v9 = vpop.eup %10114  ;;  %8296 = vst [vmem:[%s11683_s3 + $0xa50] sm:$0xff] %v9286_v41  ;;  %v5190_v15 = vadd.f32 0.5, %v4515_v26  ;;  %v4514_v25 = vmul.f32 0.5, %v10113_v37  ;;  %10134 = vtanh.f32 %v3210_v1  ;;  %v3225_v22 = vmul.f32 0.5, %v12188_v47 }
 0x200   : > { %v10117_v11 = vpop.eup %10116  ;;  %8297 = vst [vmem:[%s11683_s3 + $0xa58] sm:$0xff] %v9287_v39  ;;  %v4516_v13 = vmul.f32 0.5, %v10115_v9  ;;  %10136 = vtanh.f32 %v3209_v31  ;;  %v3224_v58 = vmul.f32 0.5, %v12197_v7  ;;  %v3226_v16 = vmul.f32 0.5, %v12199_v23  ;;  %v12283_v3 = vpop.f32.mrf.mxu0 }
 0x201   : > { %v12285_v5 = vpop.f32.mrf.mxu1  ;;  %v5189_v2 = vadd.f32 0.5, %v4514_v25  ;;  %v4528_v57 = vmul.f32 0.5, %v10117_v11  ;;  %10138 = vtanh.f32 %v3211_v48  ;;  %v3238_v47 = vmul.f32 0.5, %v12204_v42  ;;  %9336 = vmatpush3.bf16.msra.mxu1 %v9739_v27 }
 0x202   : > { %v10119_v52 = vpop.eup %10118  ;;  %v5191_v40 = vadd.f32 0.5, %v4516_v13  ;;  %10140 = vtanh.f32 %v3223_v19  ;;  %v3240_v55 = vmul.f32 0.5, %v12206_v53  ;;  %v3239_v7 = vmul.f32 0.5, %v12213_v28  ;;  %v12291_v43 = vpop.f32.mrf.mxu0  ;;  %2253 = vmatmul.mubr.bf16.gmra.mxu0 %v11118_v6  ;;  %2514 = vmatmul.mubr.bf16.gmra.mxu1 %v11118_v6 }
 0x203   : > { %v12293_v23 = vpop.f32.mrf.mxu1  ;;  %v10121_v32 = vpop.eup %10120  ;;  %v8936_v29 = vpack.c.bf16 %v5189_v2, %v5188_v17  ;;  %v5203_v54 = vadd.f32 0.5, %v4528_v57  ;;  %v4530_v8 = vmul.f32 0.5, %v10119_v52  ;;  %10142 = vtanh.f32 %v3225_v22  ;;  %2262 = vmatprep.mubr.bf16.mxu0 %v14150_v0  ;;  %2523 = vmatprep.mubr.bf16.mxu1 %v14150_v0 }
 0x204   : > { %v10123_v42 = vpop.eup %10122  ;;  %v8937_v53 = vpack.c.bf16 %v5191_v40, %v5190_v15  ;;  %v4529_v28 = vmul.f32 0.5, %v10121_v32  ;;  %10144 = vtanh.f32 %v3224_v58  ;;  %v3241_v35 = vmul.f32 0.5, %v12215_v46  ;;  %v12299_v20 = vpop.f32.mrf.mxu0  ;;  %9337 = vmatprep.subr.bf16.mxu1 %v14148_v56  ;;  %v11119_v58 = vld [vmem:[%s11451_s18 + $0x38] sm:$0xff]  }
 0x205   : > { %v12301_v14 = vpop.f32.mrf.mxu1  ;;  %7946 = vst [vmem:[%s11683_s3 + $0x10] sm:$0xff] %v8936_v29  ;;  %v5205_v60 = vadd.f32 0.5, %v4530_v8  ;;  %v4531_v44 = vmul.f32 0.5, %v10123_v42  ;;  %10146 = vtanh.f32 %v3226_v16  ;;  %v3253_v38 = vmul.f32 0.5, %v12218_v33 }
 0x206   : > { %v10125_v49 = vpop.eup %10124  ;;  %7947 = vst [vmem:[%s11683_s3 + $0x18] sm:$0xff] %v8937_v53  ;;  %v5204_v50 = vadd.f32 0.5, %v4529_v28  ;;  %10148 = vtanh.f32 %v3238_v47  ;;  %v3255_v34 = vmul.f32 0.5, %v12220_v18  ;;  %v3254_v46 = vmul.f32 0.5, %v12230_v51  ;;  %v12309_v1 = vpop.f32.mrf.mxu0 }
 0x207   : > { %v12311_v31 = vpop.f32.mrf.mxu1  ;;  %v10127_v4 = vpop.eup %10126  ;;  %v5206_v41 = vadd.f32 0.5, %v4531_v44  ;;  %v4543_v26 = vmul.f32 0.5, %v10125_v49  ;;  %10150 = vtanh.f32 %v3240_v55  ;;  %v3256_v33 = vmul.f32 0.5, %v12232_v61 }
 0x208   : > { %v10129_v48 = vpop.eup %10128  ;;  %v8944_v37 = vpack.c.bf16 %v5204_v50, %v5203_v54  ;;  %v4545_v39 = vmul.f32 0.5, %v10127_v4  ;;  %10152 = vtanh.f32 %v3239_v7  ;;  %v3268_v18 = vmul.f32 0.5, %v12236_v12  ;;  %v12315_v17 = vpop.f32.mrf.mxu0 }
 0x209   : > { %v12317_v51 = vpop.f32.mrf.mxu1  ;;  %v8945_v19 = vpack.c.bf16 %v5206_v41, %v5205_v60  ;;  %v5218_v9 = vadd.f32 0.5, %v4543_v26  ;;  %v4544_v15 = vmul.f32 0.5, %v10129_v48  ;;  %10154 = vtanh.f32 %v3241_v35 }
 0x20a   : > { %v10131_v25 = vpop.eup %10130  ;;  %7954 = vst [vmem:[%s11683_s3 + $0x4c] sm:$0xff] %v8944_v37  ;;  %v5220_v22 = vadd.f32 0.5, %v4545_v39  ;;  %10156 = vtanh.f32 %v3253_v38  ;;  %v3270_v61 = vmul.f32 0.5, %v12238_v63  ;;  %v3269_v11 = vmul.f32 0.5, %v12246_v10  ;;  %v12322_v13 = vpop.f32.mrf.mxu0  ;;  %2263 = vmatmul.mubr.bf16.gmra.mxu0 %v11119_v58  ;;  %2524 = vmatmul.mubr.bf16.gmra.mxu1 %v11119_v58 }
 0x20b   : > { %v12324_v12 = vpop.f32.mrf.mxu1  ;;  %v10133_v16 = vpop.eup %10132  ;;  %7955 = vst [vmem:[%s11683_s3 + $0x54] sm:$0xff] %v8945_v19  ;;  %v5219_v27 = vadd.f32 0.5, %v4544_v15  ;;  %v4546_v2 = vmul.f32 0.5, %v10131_v25  ;;  %10158 = vtanh.f32 %v3255_v34  ;;  %v3271_v57 = vmul.f32 0.5, %v12248_v24  ;;  %2272 = vmatprep.mubr.bf16.mxu0 %v14150_v0  ;;  %2533 = vmatprep.mubr.bf16.mxu1 %v14150_v0  ;;  %v11120_v19 = vld [vmem:[%s11451_s18 + $0x40] sm:$0xff]  }
 0x20c   : > { %v10135_v63 = vpop.eup %10134  ;;  %v4558_v10 = vmul.f32 0.5, %v10133_v16  ;;  %10160 = vtanh.f32 %v3254_v46  ;;  %v3283_v47 = vmul.f32 0.5, %v12251_v45  ;;  %v3285_v52 = vmul.f32 0.5, %v12253_v62  ;;  %v12333_v40 = vpop.f32.mrf.mxu0 }
 0x20d   : > { %v12335_v55 = vpop.f32.mrf.mxu1  ;;  %v10137_v7 = vpop.eup %10136  ;;  %v8952_v6 = vpack.c.bf16 %v5219_v27, %v5218_v9  ;;  %v5221_v32 = vadd.f32 0.5, %v4546_v2  ;;  %v4560_v24 = vmul.f32 0.5, %v10135_v63  ;;  %10162 = vtanh.f32 %v3256_v33 }
 0x20e   : > { %v10139_v29 = vpop.eup %10138  ;;  %v5233_v54 = vadd.f32 0.5, %v4558_v10  ;;  %v4559_v8 = vmul.f32 0.5, %v10137_v7  ;;  %10164 = vtanh.f32 %v3268_v18  ;;  %v3284_v42 = vmul.f32 0.5, %v12265_v59  ;;  %v12338_v53 = vpop.f32.mrf.mxu0 }
 0x20f   : > { %v12340_v45 = vpop.f32.mrf.mxu1  ;;  %v10141_v62 = vpop.eup %10140  ;;  %7962 = vst [vmem:[%s11683_s3 + $0x88] sm:$0xff] %v8952_v6  ;;  %v8953_v28 = vpack.c.bf16 %v5221_v32, %v5220_v22  ;;  %v5235_v35 = vadd.f32 0.5, %v4560_v24  ;;  %v4561_v60 = vmul.f32 0.5, %v10139_v29  ;;  %10166 = vtanh.f32 %v3270_v61  ;;  %v9742_v29 = vld [vmem:[%s11464_s30 + $0xac] ss:$60 sps:$4 sm:$0xff]  }
 0x210   : > { %v10143_v44 = vpop.eup %10142  ;;  %v5234_v38 = vadd.f32 0.5, %v4559_v8  ;;  %v4573_v49 = vmul.f32 0.5, %v10141_v62  ;;  %10168 = vtanh.f32 %v3269_v11  ;;  %v3286_v50 = vmul.f32 0.5, %v12267_v21  ;;  %v12344_v34 = vpop.f32.mrf.mxu0  ;;  %2694 = vmatprep.subr.bf16.mxu0 %v9742_v29 }
 0x211   : > { %v12346_v59 = vpop.f32.mrf.mxu1  ;;  %v10145_v46 = vpop.eup %10144  ;;  %7963 = vst [vmem:[%s11683_s3 + $0x90] sm:$0xff] %v8953_v28  ;;  %v5236_v4 = vadd.f32 0.5, %v4561_v60  ;;  %v4575_v41 = vmul.f32 0.5, %v10143_v44  ;;  %10170 = vtanh.f32 %v3271_v57  ;;  %v3298_v26 = vmul.f32 0.5, %v12273_v36 }
 0x212   : > { %v10147_v33 = vpop.eup %10146  ;;  %v8960_v48 = vpack.c.bf16 %v5234_v38, %v5233_v54  ;;  %v5248_v37 = vadd.f32 0.5, %v4573_v49  ;;  %v4574_v39 = vmul.f32 0.5, %v10145_v46  ;;  %10172 = vtanh.f32 %v3283_v47  ;;  %v12350_v18 = vpop.f32.mrf.mxu0  ;;  %2273 = vmatmul.mubr.bf16.gmra.mxu0 %v11120_v19  ;;  %2534 = vmatmul.mubr.bf16.gmra.mxu1 %v11120_v19  ;;  %v9740_v47 = vld [vmem:[%s11464_s30 + $0xa8] ss:$60 sps:$4 sm:$0xff]   ;;  %v9743_v54 = vld [vmem:[%s11464_s30 + $0xb0] ss:$60 sps:$4 sm:$0xff]  }
 0x213   : > { %v12352_v21 = vpop.f32.mrf.mxu1  ;;  %v10149_v9 = vpop.eup %10148  ;;  %v8961_v15 = vpack.c.bf16 %v5236_v4, %v5235_v35  ;;  %v5250_v25 = vadd.f32 0.5, %v4575_v41  ;;  %v4576_v22 = vmul.f32 0.5, %v10147_v33  ;;  %10174 = vtanh.f32 %v3285_v52  ;;  %2282 = vmatprep.mubr.bf16.mxu0 %v14150_v0  ;;  %2543 = vmatprep.mubr.bf16.mxu1 %v14150_v0 }
 0x214   : > { %v10151_v36 = vpop.eup %10150  ;;  %7970 = vst [vmem:[%s11683_s3 + $0xc4] sm:$0xff] %v8960_v48  ;;  %v5249_v61 = vadd.f32 0.5, %v4574_v39  ;;  %v4588_v11 = vmul.f32 0.5, %v10149_v9  ;;  %10176 = vtanh.f32 %v3284_v42  ;;  %v3300_v58 = vmul.f32 0.5, %v12275_v30  ;;  %v12359_v16 = vpop.f32.mrf.mxu0  ;;  %9338 = vmatpush3.bf16.msra.mxu1 %v9743_v54  ;;  %2695 = vmatpush1.bf16.msra.mxu0 %v9740_v47  ;;  %v11121_v9 = vld [vmem:[%s11451_s18 + $0x48] sm:$0xff]  }
 0x215   : > { %v12361_v27 = vpop.f32.mrf.mxu1  ;;  %v10153_v2 = vpop.eup %10152  ;;  %7971 = vst [vmem:[%s11683_s3 + $0xcc] sm:$0xff] %v8961_v15  ;;  %v5251_v57 = vadd.f32 0.5, %v4576_v22  ;;  %v4590_v63 = vmul.f32 0.5, %v10151_v36  ;;  %10178 = vtanh.f32 %v3286_v50  ;;  %v3299_v10 = vmul.f32 0.5, %v12283_v3  ;;  %9339 = vmatprep.subr.bf16.mxu1 %v14148_v56 }
 0x216   : > { %v10155_v52 = vpop.eup %10154  ;;  %v8968_v7 = vpack.c.bf16 %v5249_v61, %v5248_v37  ;;  %v5263_v6 = vadd.f32 0.5, %v4588_v11  ;;  %v4589_v32 = vmul.f32 0.5, %v10153_v2  ;;  %10180 = vtanh.f32 %v3298_v26  ;;  %v12366_v30 = vpop.f32.mrf.mxu0 }
 0x217   : > { %v12368_v24 = vpop.f32.mrf.mxu1  ;;  %v10157_v8 = vpop.eup %10156  ;;  %v8969_v42 = vpack.c.bf16 %v5251_v57, %v5250_v25  ;;  %v5265_v62 = vadd.f32 0.5, %v4590_v63  ;;  %v4591_v28 = vmul.f32 0.5, %v10155_v52  ;;  %10182 = vtanh.f32 %v3300_v58 }
 0x218   : > { %v10159_v3 = vpop.eup %10158  ;;  %7978 = vst [vmem:[%s11683_s3 + $0x100] sm:$0xff] %v8968_v7  ;;  %v5264_v35 = vadd.f32 0.5, %v4589_v32  ;;  %v4603_v60 = vmul.f32 0.5, %v10157_v8  ;;  %10184 = vtanh.f32 %v3299_v10  ;;  %v3301_v44 = vmul.f32 0.5, %v12285_v5  ;;  %v12374_v38 = vpop.f32.mrf.mxu0 }
 0x219   : > { %v12376_v49 = vpop.f32.mrf.mxu1  ;;  %v10161_v50 = vpop.eup %10160  ;;  %7979 = vst [vmem:[%s11683_s3 + $0x108] sm:$0xff] %v8969_v42  ;;  %v5266_v46 = vadd.f32 0.5, %v4591_v28  ;;  %v4605_v4 = vmul.f32 0.5, %v10159_v3  ;;  %v3313_v41 = vmul.f32 0.5, %v12291_v43  ;;  %v3315_v26 = vmul.f32 0.5, %v12293_v23 }
 0x21a   : > { %v10163_v33 = vpop.eup %10162  ;;  %v8976_v5 = vpack.c.bf16 %v5264_v35, %v5263_v6  ;;  %v5278_v48 = vadd.f32 0.5, %v4603_v60  ;;  %v4604_v37 = vmul.f32 0.5, %v10161_v50  ;;  %10186 = vtanh.f32 %v3301_v44  ;;  %v12382_v39 = vpop.f32.mrf.mxu0  ;;  %2283 = vmatmul.mubr.bf16.gmra.mxu0 %v11121_v9  ;;  %2544 = vmatmul.mubr.bf16.gmra.mxu1 %v11121_v9 }
 0x21b   : > { %v12384_v19 = vpop.f32.mrf.mxu1  ;;  %v10165_v15 = vpop.eup %10164  ;;  %v8977_v43 = vpack.c.bf16 %v5266_v46, %v5265_v62  ;;  %v5280_v23 = vadd.f32 0.5, %v4605_v4  ;;  %v4606_v25 = vmul.f32 0.5, %v10163_v33  ;;  %10188 = vtanh.f32 %v3313_v41  ;;  %2292 = vmatprep.mubr.bf16.mxu0 %v14150_v0  ;;  %2553 = vmatprep.mubr.bf16.mxu1 %v14150_v0 }
 0x21c   : > { %v10167_v22 = vpop.eup %10166  ;;  %7986 = vst [vmem:[%s11683_s3 + $0x13c] sm:$0xff] %v8976_v5  ;;  %v5279_v36 = vadd.f32 0.5, %v4604_v37  ;;  %v4618_v61 = vmul.f32 0.5, %v10165_v15  ;;  %10190 = vtanh.f32 %v3315_v26  ;;  %v3314_v11 = vmul.f32 0.5, %v12299_v20  ;;  %v12391_v58 = vpop.f32.mrf.mxu0  ;;  %v11122_v15 = vld [vmem:[%s11451_s18 + $0x50] sm:$0xff]  }
 0x21d   : > { %v12393_v2 = vpop.f32.mrf.mxu1  ;;  %v10169_v57 = vpop.eup %10168  ;;  %7987 = vst [vmem:[%s11683_s3 + $0x144] sm:$0xff] %v8977_v43  ;;  %v5281_v63 = vadd.f32 0.5, %v4606_v25  ;;  %v4620_v10 = vmul.f32 0.5, %v10167_v22  ;;  %v3316_v47 = vmul.f32 0.5, %v12301_v14  ;;  %v3328_v52 = vmul.f32 0.5, %v12309_v1 }
 0x21e   : > { %v10171_v7 = vpop.eup %10170  ;;  %v8984_v6 = vpack.c.bf16 %v5279_v36, %v5278_v48  ;;  %v5293_v32 = vadd.f32 0.5, %v4618_v61  ;;  %v4619_v29 = vmul.f32 0.5, %v10169_v57  ;;  %10192 = vtanh.f32 %v3314_v11  ;;  %v12398_v54 = vpop.f32.mrf.mxu0 }
 0x21f   : > { %v12400_v20 = vpop.f32.mrf.mxu1  ;;  %v10173_v8 = vpop.eup %10172  ;;  %v8985_v42 = vpack.c.bf16 %v5281_v63, %v5280_v23  ;;  %v5295_v62 = vadd.f32 0.5, %v4620_v10  ;;  %v4621_v28 = vmul.f32 0.5, %v10171_v7  ;;  %10194 = vtanh.f32 %v3316_v47 }
 0x220   : > { %v10175_v3 = vpop.eup %10174  ;;  %7994 = vst [vmem:[%s11683_s3 + $0x178] sm:$0xff] %v8984_v6  ;;  %v5294_v14 = vadd.f32 0.5, %v4619_v29  ;;  %v4633_v35 = vmul.f32 0.5, %v10173_v8  ;;  %10196 = vtanh.f32 %v3328_v52  ;;  %v3330_v1 = vmul.f32 0.5, %v12311_v31  ;;  %v12404_v60 = vpop.f32.mrf.mxu0 }
 0x221   : > { %v12406_v44 = vpop.f32.mrf.mxu1  ;;  %v10177_v50 = vpop.eup %10176  ;;  %7995 = vst [vmem:[%s11683_s3 + $0x180] sm:$0xff] %v8985_v42  ;;  %v5296_v46 = vadd.f32 0.5, %v4621_v28  ;;  %v4635_v4 = vmul.f32 0.5, %v10175_v3  ;;  %v3329_v41 = vmul.f32 0.5, %v12315_v17  ;;  %v3331_v26 = vmul.f32 0.5, %v12317_v51 }
 0x222   : > { %v10179_v33 = vpop.eup %10178  ;;  %v8992_v5 = vpack.c.bf16 %v5294_v14, %v5293_v32  ;;  %v5308_v48 = vadd.f32 0.5, %v4633_v35  ;;  %v4634_v37 = vmul.f32 0.5, %v10177_v50  ;;  %10198 = vtanh.f32 %v3330_v1  ;;  %v12411_v31 = vpop.f32.mrf.mxu0  ;;  %2293 = vmatmul.mubr.bf16.gmra.mxu0 %v11122_v15  ;;  %2554 = vmatmul.mubr.bf16.gmra.mxu1 %v11122_v15  ;;  %v9746_v15 = vld [vmem:[%s11464_s30 + $0x34] ss:$60 sps:$4 sm:$0xff]  }
 0x223   : > { %v12413_v9 = vpop.f32.mrf.mxu1  ;;  %v10181_v43 = vpop.eup %10180  ;;  %v8993_v23 = vpack.c.bf16 %v5296_v46, %v5295_v62  ;;  %v5310_v25 = vadd.f32 0.5, %v4635_v4  ;;  %v4636_v17 = vmul.f32 0.5, %v10179_v33  ;;  %10200 = vtanh.f32 %v3329_v41  ;;  %2302 = vmatprep.mubr.bf16.mxu0 %v14150_v0  ;;  %2563 = vmatprep.mubr.bf16.mxu1 %v14150_v0 }
 0x224   : > { %v10183_v51 = vpop.eup %10182  ;;  %8002 = vst [vmem:[%s11683_s3 + $0x1b4] sm:$0xff] %v8992_v5  ;;  %v5309_v22 = vadd.f32 0.5, %v4634_v37  ;;  %v4648_v36 = vmul.f32 0.5, %v10181_v43  ;;  %10202 = vtanh.f32 %v3331_v26  ;;  %v3343_v61 = vmul.f32 0.5, %v12322_v13  ;;  %v12420_v11 = vpop.f32.mrf.mxu0  ;;  %v11123_v37 = vld [vmem:[%s11451_s18 + $0x58] sm:$0xff]   ;;  %2696 = vmatprep.subr.bf16.mxu0 %v9746_v15 }
 0x225   : > { %v12422_v57 = vpop.f32.mrf.mxu1  ;;  %v10185_v63 = vpop.eup %10184  ;;  %8003 = vst [vmem:[%s11683_s3 + $0x1bc] sm:$0xff] %v8993_v23  ;;  %v5311_v10 = vadd.f32 0.5, %v4636_v17  ;;  %v4650_v47 = vmul.f32 0.5, %v10183_v51  ;;  %v3345_v52 = vmul.f32 0.5, %v12324_v12  ;;  %v3344_v7 = vmul.f32 0.5, %v12333_v40 }
 0x226   : > { %v9000_v6 = vpack.c.bf16 %v5309_v22, %v5308_v48  ;;  %v5323_v32 = vadd.f32 0.5, %v4648_v36  ;;  %v4649_v29 = vmul.f32 0.5, %v10185_v63  ;;  %10204 = vtanh.f32 %v3343_v61  ;;  %v12427_v8 = vpop.f32.mrf.mxu0 }
 0x227   : > { %v12429_v13 = vpop.f32.mrf.mxu1  ;;  %v10187_v42 = vpop.eup %10186  ;;  %v9001_v62 = vpack.c.bf16 %v5311_v10, %v5310_v25  ;;  %v5325_v28 = vadd.f32 0.5, %v4650_v47  ;;  %10206 = vtanh.f32 %v3345_v52  ;;  %v3346_v3 = vmul.f32 0.5, %v12335_v55  ;;  %v9744_v25 = vld [vmem:[%s11464_s30 + $0x30] ss:$60 sps:$4 sm:$0xff]  }
 0x228   : > { %v10189_v14 = vpop.eup %10188  ;;  %8010 = vst [vmem:[%s11683_s3 + $0x1f0] sm:$0xff] %v9000_v6  ;;  %v5324_v12 = vadd.f32 0.5, %v4649_v29  ;;  %v4651_v35 = vmul.f32 0.5, %v10187_v42  ;;  %10208 = vtanh.f32 %v3344_v7  ;;  %v3358_v40 = vmul.f32 0.5, %v12338_v53  ;;  %v12434_v1 = vpop.f32.mrf.mxu0  ;;  %2697 = vmatpush1.bf16.msra.mxu0 %v9744_v25 }
 0x229   : > { %v12436_v50 = vpop.f32.mrf.mxu1  ;;  %v10191_v46 = vpop.eup %10190  ;;  %8011 = vst [vmem:[%s11683_s3 + $0x1f8] sm:$0xff] %v9001_v62  ;;  %v4663_v4 = vmul.f32 0.5, %v10189_v14  ;;  %10210 = vtanh.f32 %v3346_v3  ;;  %v3360_v41 = vmul.f32 0.5, %v12340_v45  ;;  %v3359_v55 = vmul.f32 0.5, %v12344_v34 }
 0x22a   : > { %v9008_v26 = vpack.c.bf16 %v5324_v12, %v5323_v32  ;;  %v5326_v33 = vadd.f32 0.5, %v4651_v35  ;;  %v4665_v5 = vmul.f32 0.5, %v10191_v46  ;;  %10212 = vtanh.f32 %v3358_v40  ;;  %v12441_v53 = vpop.f32.mrf.mxu0  ;;  %2303 = vmatmul.mubr.bf16.gmra.mxu0 %v11123_v37  ;;  %2564 = vmatmul.mubr.bf16.gmra.mxu1 %v11123_v37  ;;  %v11124_v37 = vld [vmem:[%s11451_s18 + $0x60] sm:$0xff]  }
 0x22b   : > { %v12443_v48 = vpop.f32.mrf.mxu1  ;;  %v10193_v43 = vpop.eup %10192  ;;  %v5338_v23 = vadd.f32 0.5, %v4663_v4  ;;  %10214 = vtanh.f32 %v3360_v41  ;;  %v3361_v45 = vmul.f32 0.5, %v12346_v59  ;;  %v3373_v34 = vmul.f32 0.5, %v12350_v18  ;;  %2312 = vmatprep.mubr.bf16.mxu0 %v14150_v0  ;;  %2573 = vmatprep.mubr.bf16.mxu1 %v14150_v0  ;;  %v9747_v59 = vld [vmem:[%s11464_s30 + $0x38] ss:$60 sps:$4 sm:$0xff]  }
 0x22c   : > { %v10195_v17 = vpop.eup %10194  ;;  %8018 = vst [vmem:[%s11683_s3 + $0x22c] sm:$0xff] %v9008_v26  ;;  %v9009_v51 = vpack.c.bf16 %v5326_v33, %v5325_v28  ;;  %v5340_v22 = vadd.f32 0.5, %v4665_v5  ;;  %v4664_v36 = vmul.f32 0.5, %v10193_v43  ;;  %10216 = vtanh.f32 %v3359_v55  ;;  %v12453_v61 = vpop.f32.mrf.mxu0  ;;  %9340 = vmatpush3.bf16.msra.mxu1 %v9747_v59 }
 0x22d   : > { %v12455_v63 = vpop.f32.mrf.mxu1  ;;  %v10197_v10 = vpop.eup %10196  ;;  %v4666_v18 = vmul.f32 0.5, %v10195_v17  ;;  %10218 = vtanh.f32 %v3361_v45  ;;  %v3375_v47 = vmul.f32 0.5, %v12352_v21  ;;  %v3374_v52 = vmul.f32 0.5, %v12359_v16 }
 0x22e   : > { %8019 = vst [vmem:[%s11683_s3 + $0x234] sm:$0xff] %v9009_v51  ;;  %v5339_v7 = vadd.f32 0.5, %v4664_v36  ;;  %v4678_v6 = vmul.f32 0.5, %v10197_v10  ;;  %10220 = vtanh.f32 %v3373_v34  ;;  %v3376_v32 = vmul.f32 0.5, %v12361_v27  ;;  %v12462_v29 = vpop.f32.mrf.mxu0 }
 0x22f   : > { %v12464_v42 = vpop.f32.mrf.mxu1  ;;  %v10199_v62 = vpop.eup %10198  ;;  %v5341_v28 = vadd.f32 0.5, %v4666_v18  ;;  %10222 = vtanh.f32 %v3375_v47  ;;  %v3388_v21 = vmul.f32 0.5, %v12366_v30  ;;  %v3390_v16 = vmul.f32 0.5, %v12368_v24 }
 0x230   : > { %v10201_v3 = vpop.eup %10200  ;;  %v9016_v14 = vpack.c.bf16 %v5339_v7, %v5338_v23  ;;  %v5353_v12 = vadd.f32 0.5, %v4678_v6  ;;  %v4680_v35 = vmul.f32 0.5, %v10199_v62  ;;  %10224 = vtanh.f32 %v3374_v52  ;;  %v12468_v27 = vpop.f32.mrf.mxu0 }
 0x231   : > { %v12470_v40 = vpop.f32.mrf.mxu1  ;;  %v10203_v46 = vpop.eup %10202  ;;  %v9017_v4 = vpack.c.bf16 %v5341_v28, %v5340_v22  ;;  %v4679_v41 = vmul.f32 0.5, %v10201_v3  ;;  %10226 = vtanh.f32 %v3376_v32  ;;  %v3389_v55 = vmul.f32 0.5, %v12374_v38 }
 0x232   : > { %8026 = vst [vmem:[%s11683_s3 + $0x268] sm:$0xff] %v9016_v14  ;;  %v5355_v30 = vadd.f32 0.5, %v4680_v35  ;;  %v4681_v24 = vmul.f32 0.5, %v10203_v46  ;;  %10228 = vtanh.f32 %v3388_v21  ;;  %v3391_v26 = vmul.f32 0.5, %v12376_v49  ;;  %v12475_v33 = vpop.f32.mrf.mxu0  ;;  %2313 = vmatmul.mubr.bf16.gmra.mxu0 %v11124_v37  ;;  %2574 = vmatmul.mubr.bf16.gmra.mxu1 %v11124_v37 }
 0x233   : > { %v12477_v5 = vpop.f32.mrf.mxu1  ;;  %v10205_v15 = vpop.eup %10204  ;;  %8027 = vst [vmem:[%s11683_s3 + $0x270] sm:$0xff] %v9017_v4  ;;  %v5354_v43 = vadd.f32 0.5, %v4679_v41  ;;  %10230 = vtanh.f32 %v3390_v16  ;;  %v3403_v23 = vmul.f32 0.5, %v12382_v39  ;;  %v3405_v38 = vmul.f32 0.5, %v12384_v19  ;;  %2322 = vmatprep.mubr.bf16.mxu0 %v14150_v0  ;;  %2583 = vmatprep.mubr.bf16.mxu1 %v14150_v0 }
 0x234   : > { %v10207_v49 = vpop.eup %10206  ;;  %v5356_v45 = vadd.f32 0.5, %v4681_v24  ;;  %v4693_v34 = vmul.f32 0.5, %v10205_v15  ;;  %10232 = vtanh.f32 %v3389_v55  ;;  %v3404_v25 = vmul.f32 0.5, %v12391_v58  ;;  %v12486_v17 = vpop.f32.mrf.mxu0 }
 0x235   : > { %v12488_v51 = vpop.f32.mrf.mxu1  ;;  %v10209_v22 = vpop.eup %10208  ;;  %v9024_v36 = vpack.c.bf16 %v5354_v43, %v5353_v12  ;;  %v4695_v39 = vmul.f32 0.5, %v10207_v49  ;;  %10234 = vtanh.f32 %v3391_v26  ;;  %v3406_v19 = vmul.f32 0.5, %v12393_v2 }
 0x236   : > { %v10211_v59 = vpop.eup %10210  ;;  %v9025_v10 = vpack.c.bf16 %v5356_v45, %v5355_v30  ;;  %v5368_v18 = vadd.f32 0.5, %v4693_v34  ;;  %v4694_v47 = vmul.f32 0.5, %v10209_v22  ;;  %10236 = vtanh.f32 %v3403_v23  ;;  %v12491_v52 = vpop.f32.mrf.mxu0 }
 0x237   : > { %v12493_v58 = vpop.f32.mrf.mxu1  ;;  %v10213_v7 = vpop.eup %10212  ;;  %8034 = vst [vmem:[%s11683_s3 + $0x2a4] sm:$0xff] %v9024_v36  ;;  %v5370_v6 = vadd.f32 0.5, %v4695_v39  ;;  %v4696_v32 = vmul.f32 0.5, %v10211_v59  ;;  %10238 = vtanh.f32 %v3405_v38  ;;  %v3418_v62 = vmul.f32 0.5, %v12398_v54 }
 0x238   : > { %v10215_v28 = vpop.eup %10214  ;;  %8035 = vst [vmem:[%s11683_s3 + $0x2ac] sm:$0xff] %v9025_v10  ;;  %v5369_v21 = vadd.f32 0.5, %v4694_v47  ;;  %v4708_v2 = vmul.f32 0.5, %v10213_v7  ;;  %10240 = vtanh.f32 %v3404_v25  ;;  %v3420_v16 = vmul.f32 0.5, %v12400_v20  ;;  %v12499_v3 = vpop.f32.mrf.mxu0  ;;  %v11125_v20 = vld [vmem:[%s11451_s18 + $0x68] sm:$0xff]  }
 0x239   : > { %v12501_v14 = vpop.f32.mrf.mxu1  ;;  %v10217_v12 = vpop.eup %10216  ;;  %v5371_v35 = vadd.f32 0.5, %v4696_v32  ;;  %v4710_v46 = vmul.f32 0.5, %v10215_v28  ;;  %10242 = vtanh.f32 %v3406_v19  ;;  %v3419_v4 = vmul.f32 0.5, %v12404_v60 }
 0x23a   : > { %v10219_v41 = vpop.eup %10218  ;;  %v9032_v54 = vpack.c.bf16 %v5369_v21, %v5368_v18  ;;  %v5383_v55 = vadd.f32 0.5, %v4708_v2  ;;  %v4709_v30 = vmul.f32 0.5, %v10217_v12  ;;  %10244 = vtanh.f32 %v3418_v62  ;;  %v12504_v24 = vpop.f32.mrf.mxu0  ;;  %2323 = vmatmul.mubr.bf16.gmra.mxu0 %v11125_v20  ;;  %2584 = vmatmul.mubr.bf16.gmra.mxu1 %v11125_v20 }
 0x23b   : > { %v12506_v26 = vpop.f32.mrf.mxu1  ;;  %v10221_v37 = vpop.eup %10220  ;;  %v9033_v15 = vpack.c.bf16 %v5371_v35, %v5370_v6  ;;  %v5385_v43 = vadd.f32 0.5, %v4710_v46  ;;  %v4711_v23 = vmul.f32 0.5, %v10219_v41  ;;  %10246 = vtanh.f32 %v3420_v16  ;;  %2332 = vmatprep.mubr.bf16.mxu0 %v14150_v0  ;;  %2593 = vmatprep.mubr.bf16.mxu1 %v14150_v0 }
 0x23c   : > { %v10223_v60 = vpop.eup %10222  ;;  %8042 = vst [vmem:[%s11683_s3 + $0x2e0] sm:$0xff] %v9032_v54  ;;  %v5384_v38 = vadd.f32 0.5, %v4709_v30  ;;  %v4723_v49 = vmul.f32 0.5, %v10221_v37  ;;  %10248 = vtanh.f32 %v3419_v4  ;;  %v3421_v45 = vmul.f32 0.5, %v12406_v44  ;;  %v12513_v34 = vpop.f32.mrf.mxu0 }
 0x23d   : > { %v12515_v25 = vpop.f32.mrf.mxu1  ;;  %v10225_v22 = vpop.eup %10224  ;;  %8043 = vst [vmem:[%s11683_s3 + $0x2e8] sm:$0xff] %v9033_v15  ;;  %v5386_v36 = vadd.f32 0.5, %v4711_v23  ;;  %v4725_v39 = vmul.f32 0.5, %v10223_v60  ;;  %v3433_v19 = vmul.f32 0.5, %v12411_v31  ;;  %v3435_v59 = vmul.f32 0.5, %v12413_v9  ;;  %v11126_v23 = vld [vmem:[%s11451_s18 + $0x70] sm:$0xff]  }
 0x23e   : > { %v10227_v10 = vpop.eup %10226  ;;  %v9040_v18 = vpack.c.bf16 %v5384_v38, %v5383_v55  ;;  %v5398_v47 = vadd.f32 0.5, %v4723_v49  ;;  %v4724_v7 = vmul.f32 0.5, %v10225_v22  ;;  %10250 = vtanh.f32 %v3421_v45  ;;  %v12520_v6 = vpop.f32.mrf.mxu0 }
 0x23f   : > { %v12522_v44 = vpop.f32.mrf.mxu1  ;;  %v10229_v32 = vpop.eup %10228  ;;  %v9041_v62 = vpack.c.bf16 %v5386_v36, %v5385_v43  ;;  %v5400_v28 = vadd.f32 0.5, %v4725_v39  ;;  %v4726_v21 = vmul.f32 0.5, %v10227_v10  ;;  %10252 = vtanh.f32 %v3433_v19 }
 0x240   : > { %v10231_v2 = vpop.eup %10230  ;;  %8050 = vst [vmem:[%s11683_s3 + $0x31c] sm:$0xff] %v9040_v18  ;;  %v5399_v31 = vadd.f32 0.5, %v4724_v7  ;;  %v4738_v16 = vmul.f32 0.5, %v10229_v32  ;;  %10254 = vtanh.f32 %v3435_v59  ;;  %v3434_v9 = vmul.f32 0.5, %v12420_v11  ;;  %v12526_v12 = vpop.f32.mrf.mxu0 }
 0x241   : > { %v12528_v35 = vpop.f32.mrf.mxu1  ;;  %v10233_v46 = vpop.eup %10232  ;;  %8051 = vst [vmem:[%s11683_s3 + $0x324] sm:$0xff] %v9041_v62  ;;  %v5401_v4 = vadd.f32 0.5, %v4726_v21  ;;  %v4740_v41 = vmul.f32 0.5, %v10231_v2  ;;  %v3436_v54 = vmul.f32 0.5, %v12422_v57  ;;  %v3448_v55 = vmul.f32 0.5, %v12427_v8 }
 0x242   : > { %v10235_v30 = vpop.eup %10234  ;;  %v9048_v20 = vpack.c.bf16 %v5399_v31, %v5398_v47  ;;  %v5413_v37 = vadd.f32 0.5, %v4738_v16  ;;  %v4739_v15 = vmul.f32 0.5, %v10233_v46  ;;  %10256 = vtanh.f32 %v3434_v9  ;;  %v12533_v11 = vpop.f32.mrf.mxu0  ;;  %2333 = vmatmul.mubr.bf16.gmra.mxu0 %v11126_v23  ;;  %2594 = vmatmul.mubr.bf16.gmra.mxu1 %v11126_v23 }
 0x243   : > { %v12535_v43 = vpop.f32.mrf.mxu1  ;;  %v10237_v60 = vpop.eup %10236  ;;  %v9049_v38 = vpack.c.bf16 %v5401_v4, %v5400_v28  ;;  %v5415_v49 = vadd.f32 0.5, %v4740_v41  ;;  %v4741_v57 = vmul.f32 0.5, %v10235_v30  ;;  %10258 = vtanh.f32 %v3436_v54  ;;  %2342 = vmatprep.mubr.bf16.mxu0 %v14150_v0  ;;  %2603 = vmatprep.mubr.bf16.mxu1 %v14150_v0 }
 0x244   : > { %v10239_v8 = vpop.eup %10238  ;;  %8058 = vst [vmem:[%s11683_s3 + $0x358] sm:$0xff] %v9048_v20  ;;  %v5414_v45 = vadd.f32 0.5, %v4739_v15  ;;  %v4753_v22 = vmul.f32 0.5, %v10237_v60  ;;  %10260 = vtanh.f32 %v3448_v55  ;;  %v3450_v36 = vmul.f32 0.5, %v12429_v13  ;;  %v12542_v39 = vpop.f32.mrf.mxu0 }
 0x245   : > { %v12544_v19 = vpop.f32.mrf.mxu1  ;;  %v10241_v59 = vpop.eup %10240  ;;  %8059 = vst [vmem:[%s11683_s3 + $0x360] sm:$0xff] %v9049_v38  ;;  %v5416_v10 = vadd.f32 0.5, %v4741_v57  ;;  %v4755_v18 = vmul.f32 0.5, %v10239_v8  ;;  %v3449_v47 = vmul.f32 0.5, %v12434_v1  ;;  %v3451_v7 = vmul.f32 0.5, %v12436_v50  ;;  %v11127_v8 = vld [vmem:[%s11451_s18 + $0x78] sm:$0xff]  }
 0x246   : > { %v10243_v32 = vpop.eup %10242  ;;  %v9056_v62 = vpack.c.bf16 %v5414_v45, %v5413_v37  ;;  %v5428_v28 = vadd.f32 0.5, %v4753_v22  ;;  %v4754_v21 = vmul.f32 0.5, %v10241_v59  ;;  %10262 = vtanh.f32 %v3450_v36  ;;  %v12549_v2 = vpop.f32.mrf.mxu0 }
 0x247   : > { %v12551_v13 = vpop.f32.mrf.mxu1  ;;  %v10245_v31 = vpop.eup %10244  ;;  %v9057_v16 = vpack.c.bf16 %v5416_v10, %v5415_v49  ;;  %v5430_v9 = vadd.f32 0.5, %v4755_v18  ;;  %v4756_v46 = vmul.f32 0.5, %v10243_v32  ;;  %10264 = vtanh.f32 %v3449_v47 }
 0x248   : > { %v10247_v4 = vpop.eup %10246  ;;  %8066 = vst [vmem:[%s11683_s3 + $0x394] sm:$0xff] %v9056_v62  ;;  %v5429_v1 = vadd.f32 0.5, %v4754_v21  ;;  %v4768_v41 = vmul.f32 0.5, %v10245_v31  ;;  %10266 = vtanh.f32 %v3451_v7  ;;  %v3463_v50 = vmul.f32 0.5, %v12441_v53  ;;  %v12555_v54 = vpop.f32.mrf.mxu0 }
 0x249   : > { %v12557_v55 = vpop.f32.mrf.mxu1  ;;  %v10249_v30 = vpop.eup %10248  ;;  %8067 = vst [vmem:[%s11683_s3 + $0x39c] sm:$0xff] %v9057_v16  ;;  %v5431_v20 = vadd.f32 0.5, %v4756_v46  ;;  %v4770_v37 = vmul.f32 0.5, %v10247_v4  ;;  %v3465_v15 = vmul.f32 0.5, %v12443_v48  ;;  %v3464_v23 = vmul.f32 0.5, %v12453_v61 }
 0x24a   : > { %v9064_v60 = vpack.c.bf16 %v5429_v1, %v5428_v28  ;;  %v5443_v38 = vadd.f32 0.5, %v4768_v41  ;;  %v4769_v49 = vmul.f32 0.5, %v10249_v30  ;;  %10268 = vtanh.f32 %v3463_v50  ;;  %v12562_v57 = vpop.f32.mrf.mxu0  ;;  %2343 = vmatmul.mubr.bf16.gmra.mxu0 %v11127_v8  ;;  %2604 = vmatmul.mubr.bf16.gmra.mxu1 %v11127_v8 }
 0x24b   : > { %v12564_v53 = vpop.f32.mrf.mxu1  ;;  %v10251_v45 = vpop.eup %10250  ;;  %v9065_v22 = vpack.c.bf16 %v5431_v20, %v5430_v9  ;;  %v5445_v36 = vadd.f32 0.5, %v4770_v37  ;;  %10270 = vtanh.f32 %v3465_v15  ;;  %v3466_v48 = vmul.f32 0.5, %v12455_v63  ;;  %2352 = vmatprep.mubr.bf16.mxu0 %v14150_v0  ;;  %2613 = vmatprep.mubr.bf16.mxu1 %v14150_v0 }
 0x24c   : > { %v10253_v61 = vpop.eup %10252  ;;  %8074 = vst [vmem:[%s11683_s3 + $0x3d0] sm:$0xff] %v9064_v60  ;;  %v5444_v59 = vadd.f32 0.5, %v4769_v49  ;;  %v4771_v10 = vmul.f32 0.5, %v10251_v45  ;;  %10272 = vtanh.f32 %v3464_v23  ;;  %v3478_v18 = vmul.f32 0.5, %v12462_v29  ;;  %v12572_v47 = vpop.f32.mrf.mxu0 }
 0x24d   : > { %v12574_v7 = vpop.f32.mrf.mxu1  ;;  %v10255_v32 = vpop.eup %10254  ;;  %8075 = vst [vmem:[%s11683_s3 + $0x3d8] sm:$0xff] %v9065_v22  ;;  %v4783_v62 = vmul.f32 0.5, %v10253_v61  ;;  %10274 = vtanh.f32 %v3466_v48  ;;  %v3480_v63 = vmul.f32 0.5, %v12464_v42  ;;  %v3479_v28 = vmul.f32 0.5, %v12468_v27  ;;  %v11128_v22 = vld [vmem:[%s11451_s18 + $0x80] sm:$0xff]  }
 0x24e   : > { %v9072_v21 = vpack.c.bf16 %v5444_v59, %v5443_v38  ;;  %v5446_v31 = vadd.f32 0.5, %v4771_v10  ;;  %v4785_v16 = vmul.f32 0.5, %v10255_v32  ;;  %10276 = vtanh.f32 %v3478_v18  ;;  %v12579_v9 = vpop.f32.mrf.mxu0 }
 0x24f   : > { %v12581_v29 = vpop.f32.mrf.mxu1  ;;  %v10257_v46 = vpop.eup %10256  ;;  %v5458_v4 = vadd.f32 0.5, %v4783_v62  ;;  %10278 = vtanh.f32 %v3480_v63  ;;  %v3481_v1 = vmul.f32 0.5, %v12470_v40  ;;  %v3493_v41 = vmul.f32 0.5, %v12475_v33 }
 0x250   : > { %v10259_v50 = vpop.eup %10258  ;;  %8082 = vst [vmem:[%s11683_s3 + $0x40c] sm:$0xff] %v9072_v21  ;;  %v9073_v42 = vpack.c.bf16 %v5446_v31, %v5445_v36  ;;  %v5460_v27 = vadd.f32 0.5, %v4785_v16  ;;  %v4784_v30 = vmul.f32 0.5, %v10257_v46  ;;  %10280 = vtanh.f32 %v3479_v28  ;;  %v12586_v20 = vpop.f32.mrf.mxu0 }
 0x251   : > { %v12588_v37 = vpop.f32.mrf.mxu1  ;;  %v10261_v15 = vpop.eup %10260  ;;  %v4786_v23 = vmul.f32 0.5, %v10259_v50  ;;  %10282 = vtanh.f32 %v3481_v1  ;;  %v3495_v60 = vmul.f32 0.5, %v12477_v5  ;;  %v3494_v40 = vmul.f32 0.5, %v12486_v17 }
 0x252   : > { %8083 = vst [vmem:[%s11683_s3 + $0x414] sm:$0xff] %v9073_v42  ;;  %v5459_v33 = vadd.f32 0.5, %v4784_v30  ;;  %v4798_v38 = vmul.f32 0.5, %v10261_v15  ;;  %10284 = vtanh.f32 %v3493_v41  ;;  %v3496_v49 = vmul.f32 0.5, %v12488_v51  ;;  %v12594_v8 = vpop.f32.mrf.mxu0  ;;  %2353 = vmatmul.mubr.bf16.gmra.mxu0 %v11128_v22  ;;  %2614 = vmatmul.mubr.bf16.gmra.mxu1 %v11128_v22 }
 0x253   : > { %v12596_v45 = vpop.f32.mrf.mxu1  ;;  %v10263_v36 = vpop.eup %10262  ;;  %v5461_v48 = vadd.f32 0.5, %v4786_v23  ;;  %10286 = vtanh.f32 %v3495_v60  ;;  %v3508_v5 = vmul.f32 0.5, %v12491_v52  ;;  %v3510_v17 = vmul.f32 0.5, %v12493_v58  ;;  %2362 = vmatprep.mubr.bf16.mxu0 %v14150_v0  ;;  %2623 = vmatprep.mubr.bf16.mxu1 %v14150_v0 }
 0x254   : > { %v10265_v51 = vpop.eup %10264  ;;  %v9080_v61 = vpack.c.bf16 %v5459_v33, %v5458_v4  ;;  %v5473_v59 = vadd.f32 0.5, %v4798_v38  ;;  %v4800_v10 = vmul.f32 0.5, %v10263_v36  ;;  %10288 = vtanh.f32 %v3494_v40  ;;  %v12603_v18 = vpop.f32.mrf.mxu0  ;;  %v11129_v36 = vld [vmem:[%s11451_s18 + $0x88] sm:$0xff]  }
 0x255   : > { %v12605_v32 = vpop.f32.mrf.mxu1  ;;  %v10267_v62 = vpop.eup %10266  ;;  %v9081_v63 = vpack.c.bf16 %v5461_v48, %v5460_v27  ;;  %v4799_v52 = vmul.f32 0.5, %v10265_v51  ;;  %10290 = vtanh.f32 %v3496_v49  ;;  %v3509_v58 = vmul.f32 0.5, %v12499_v3 }
 0x256   : > { %8090 = vst [vmem:[%s11683_s3 + $0x448] sm:$0xff] %v9080_v61  ;;  %v5475_v28 = vadd.f32 0.5, %v4800_v10  ;;  %v4801_v21 = vmul.f32 0.5, %v10267_v62  ;;  %10292 = vtanh.f32 %v3508_v5  ;;  %v3511_v31 = vmul.f32 0.5, %v12501_v14  ;;  %v12610_v16 = vpop.f32.mrf.mxu0 }
 0x257   : > { %v12612_v46 = vpop.f32.mrf.mxu1  ;;  %v10269_v4 = vpop.eup %10268  ;;  %8091 = vst [vmem:[%s11683_s3 + $0x450] sm:$0xff] %v9081_v63  ;;  %v5474_v1 = vadd.f32 0.5, %v4799_v52  ;;  %10294 = vtanh.f32 %v3510_v17  ;;  %v3523_v41 = vmul.f32 0.5, %v12504_v24  ;;  %v3525_v50 = vmul.f32 0.5, %v12506_v26 }
 0x258   : > { %v10271_v42 = vpop.eup %10270  ;;  %v5476_v3 = vadd.f32 0.5, %v4801_v21  ;;  %v4813_v27 = vmul.f32 0.5, %v10269_v4  ;;  %10296 = vtanh.f32 %v3509_v58  ;;  %v3524_v30 = vmul.f32 0.5, %v12513_v34  ;;  %v12618_v14 = vpop.f32.mrf.mxu0 }
 0x259   : > { %v12620_v15 = vpop.f32.mrf.mxu1  ;;  %v10273_v23 = vpop.eup %10272  ;;  %v9088_v60 = vpack.c.bf16 %v5474_v1, %v5473_v59  ;;  %v4815_v40 = vmul.f32 0.5, %v10271_v42  ;;  %10298 = vtanh.f32 %v3511_v31  ;;  %v3526_v24 = vmul.f32 0.5, %v12515_v25 }
 0x25a   : > { %v10275_v33 = vpop.eup %10274  ;;  %v9089_v26 = vpack.c.bf16 %v5476_v3, %v5475_v28  ;;  %v5488_v38 = vadd.f32 0.5, %v4813_v27  ;;  %v4814_v49 = vmul.f32 0.5, %v10273_v23  ;;  %10300 = vtanh.f32 %v3523_v41  ;;  %v12623_v22 = vpop.f32.mrf.mxu0  ;;  %2363 = vmatmul.mubr.bf16.gmra.mxu0 %v11129_v36  ;;  %2624 = vmatmul.mubr.bf16.gmra.mxu1 %v11129_v36 }
 0x25b   : > { %v12625_v34 = vpop.f32.mrf.mxu1  ;;  %v10277_v48 = vpop.eup %10276  ;;  %8098 = vst [vmem:[%s11683_s3 + $0x484] sm:$0xff] %v9088_v60  ;;  %v5490_v5 = vadd.f32 0.5, %v4815_v40  ;;  %v4816_v17 = vmul.f32 0.5, %v10275_v33  ;;  %10302 = vtanh.f32 %v3525_v50  ;;  %v3538_v25 = vmul.f32 0.5, %v12520_v6  ;;  %2372 = vmatprep.mubr.bf16.mxu0 %v14150_v0  ;;  %2633 = vmatprep.mubr.bf16.mxu1 %v14150_v0 }
 0x25c   : > { %v10279_v51 = vpop.eup %10278  ;;  %8099 = vst [vmem:[%s11683_s3 + $0x48c] sm:$0xff] %v9089_v26  ;;  %v5489_v61 = vadd.f32 0.5, %v4814_v49  ;;  %v4828_v59 = vmul.f32 0.5, %v10277_v48  ;;  %10304 = vtanh.f32 %v3524_v30  ;;  %v3540_v10 = vmul.f32 0.5, %v12522_v44  ;;  %v12634_v62 = vpop.f32.mrf.mxu0 }
 0x25d   : > { %v12636_v63 = vpop.f32.mrf.mxu1  ;;  %v10281_v52 = vpop.eup %10280  ;;  %v5491_v58 = vadd.f32 0.5, %v4816_v17  ;;  %v4830_v28 = vmul.f32 0.5, %v10279_v51  ;;  %10306 = vtanh.f32 %v3526_v24  ;;  %v3539_v6 = vmul.f32 0.5, %v12526_v12 }
 0x25e   : > { %v10283_v21 = vpop.eup %10282  ;;  %v9096_v31 = vpack.c.bf16 %v5489_v61, %v5488_v38  ;;  %v5503_v4 = vadd.f32 0.5, %v4828_v59  ;;  %v4829_v1 = vmul.f32 0.5, %v10281_v52  ;;  %10308 = vtanh.f32 %v3538_v25  ;;  %v12639_v41 = vpop.f32.mrf.mxu0  ;;  %v11130_v61 = vld [vmem:[%s11451_s18 + $0x90] sm:$0xff]  }
 0x25f   : > { %v12641_v44 = vpop.f32.mrf.mxu1  ;;  %v10285_v50 = vpop.eup %10284  ;;  %v9097_v42 = vpack.c.bf16 %v5491_v58, %v5490_v5  ;;  %v5505_v3 = vadd.f32 0.5, %v4830_v28  ;;  %v4831_v27 = vmul.f32 0.5, %v10283_v21  ;;  %10310 = vtanh.f32 %v3540_v10 }
 0x260   : > { %v10287_v30 = vpop.eup %10286  ;;  %8106 = vst [vmem:[%s11683_s3 + $0x4c0] sm:$0xff] %v9096_v31  ;;  %v5504_v23 = vadd.f32 0.5, %v4829_v1  ;;  %v4843_v60 = vmul.f32 0.5, %v10285_v50  ;;  %10312 = vtanh.f32 %v3539_v6  ;;  %v3541_v12 = vmul.f32 0.5, %v12528_v35  ;;  %v12645_v40 = vpop.f32.mrf.mxu0 }
 0x261   : > { %v12647_v24 = vpop.f32.mrf.mxu1  ;;  %v10289_v33 = vpop.eup %10288  ;;  %8107 = vst [vmem:[%s11683_s3 + $0x4c8] sm:$0xff] %v9097_v42  ;;  %v5506_v26 = vadd.f32 0.5, %v4831_v27  ;;  %v4845_v38 = vmul.f32 0.5, %v10287_v30  ;;  %v3553_v49 = vmul.f32 0.5, %v12533_v11  ;;  %v3555_v36 = vmul.f32 0.5, %v12535_v43 }
 0x262   : > { %v10291_v48 = vpop.eup %10290  ;;  %v9104_v5 = vpack.c.bf16 %v5504_v23, %v5503_v4  ;;  %v5518_v17 = vadd.f32 0.5, %v4843_v60  ;;  %v4844_v25 = vmul.f32 0.5, %v10289_v33  ;;  %10314 = vtanh.f32 %v3541_v12  ;;  %v12652_v35 = vpop.f32.mrf.mxu0  ;;  %2373 = vmatmul.mubr.bf16.gmra.mxu0 %v11130_v61  ;;  %2634 = vmatmul.mubr.bf16.gmra.mxu1 %v11130_v61 }
 0x263   : > { %v12654_v51 = vpop.f32.mrf.mxu1  ;;  %v10293_v59 = vpop.eup %10292  ;;  %v9105_v10 = vpack.c.bf16 %v5506_v26, %v5505_v3  ;;  %v5520_v52 = vadd.f32 0.5, %v4845_v38  ;;  %v4846_v11 = vmul.f32 0.5, %v10291_v48  ;;  %10316 = vtanh.f32 %v3553_v49  ;;  %2382 = vmatprep.mubr.bf16.mxu0 %v14150_v0  ;;  %2643 = vmatprep.mubr.bf16.mxu1 %v14150_v0 }
 0x264   : > { %v10295_v43 = vpop.eup %10294  ;;  %8114 = vst [vmem:[%s11683_s3 + $0x4fc] sm:$0xff] %v9104_v5  ;;  %v5519_v58 = vadd.f32 0.5, %v4844_v25  ;;  %v4858_v28 = vmul.f32 0.5, %v10293_v59  ;;  %10318 = vtanh.f32 %v3555_v36  ;;  %v3554_v6 = vmul.f32 0.5, %v12542_v39  ;;  %v12661_v21 = vpop.f32.mrf.mxu0 }
 0x265   : > { %v12663_v31 = vpop.f32.mrf.mxu1  ;;  %v10297_v4 = vpop.eup %10296  ;;  %8115 = vst [vmem:[%s11683_s3 + $0x504] sm:$0xff] %v9105_v10  ;;  %v5521_v1 = vadd.f32 0.5, %v4846_v11  ;;  %v4860_v50 = vmul.f32 0.5, %v10295_v43  ;;  %v3556_v42 = vmul.f32 0.5, %v12544_v19  ;;  %v3568_v3 = vmul.f32 0.5, %v12549_v2 }
 0x266   : > { %v10299_v27 = vpop.eup %10298  ;;  %v9112_v30 = vpack.c.bf16 %v5519_v58, %v5518_v17  ;;  %v5533_v23 = vadd.f32 0.5, %v4858_v28  ;;  %v4859_v60 = vmul.f32 0.5, %v10297_v4  ;;  %10320 = vtanh.f32 %v3554_v6  ;;  %v12668_v12 = vpop.f32.mrf.mxu0  ;;  %v11131_v4 = vld [vmem:[%s11451_s18 + $0x98] sm:$0xff]  }
 0x267   : > { %v12670_v39 = vpop.f32.mrf.mxu1  ;;  %v10301_v33 = vpop.eup %10300  ;;  %v9113_v26 = vpack.c.bf16 %v5521_v1, %v5520_v52  ;;  %v5535_v38 = vadd.f32 0.5, %v4860_v50  ;;  %v4861_v49 = vmul.f32 0.5, %v10299_v27  ;;  %10322 = vtanh.f32 %v3556_v42 }
 0x268   : > { %v10303_v36 = vpop.eup %10302  ;;  %8122 = vst [vmem:[%s11683_s3 + $0x538] sm:$0xff] %v9112_v30  ;;  %v5534_v19 = vadd.f32 0.5, %v4859_v60  ;;  %v4873_v48 = vmul.f32 0.5, %v10301_v33  ;;  %10324 = vtanh.f32 %v3568_v3  ;;  %v3570_v2 = vmul.f32 0.5, %v12551_v13  ;;  %v12674_v5 = vpop.f32.mrf.mxu0 }
 0x269   : > { %v12676_v17 = vpop.f32.mrf.mxu1  ;;  %v10305_v25 = vpop.eup %10304  ;;  %8123 = vst [vmem:[%s11683_s3 + $0x540] sm:$0xff] %v9113_v26  ;;  %v5536_v61 = vadd.f32 0.5, %v4861_v49  ;;  %v4875_v59 = vmul.f32 0.5, %v10303_v36  ;;  %v3569_v10 = vmul.f32 0.5, %v12555_v54  ;;  %v3571_v52 = vmul.f32 0.5, %v12557_v55 }
 0x26a   : > { %v10307_v11 = vpop.eup %10306  ;;  %v9120_v43 = vpack.c.bf16 %v5534_v19, %v5533_v23  ;;  %v5548_v58 = vadd.f32 0.5, %v4873_v48  ;;  %v4874_v28 = vmul.f32 0.5, %v10305_v25  ;;  %10326 = vtanh.f32 %v3570_v2  ;;  %v12681_v13 = vpop.f32.mrf.mxu0  ;;  %2383 = vmatmul.mubr.bf16.gmra.mxu0 %v11131_v4  ;;  %2644 = vmatmul.mubr.bf16.gmra.mxu1 %v11131_v4 }
 0x26b   : > { %v12683_v6 = vpop.f32.mrf.mxu1  ;;  %v10309_v1 = vpop.eup %10308  ;;  %v9121_v50 = vpack.c.bf16 %v5536_v61, %v5535_v38  ;;  %v5550_v42 = vadd.f32 0.5, %v4875_v59  ;;  %v4876_v54 = vmul.f32 0.5, %v10307_v11  ;;  %10328 = vtanh.f32 %v3569_v10  ;;  %2392 = vmatprep.mubr.bf16.mxu0 %v14150_v0  ;;  %2653 = vmatprep.mubr.bf16.mxu1 %v14150_v0 }
 0x26c   : > { %v10311_v55 = vpop.eup %10310  ;;  %8130 = vst [vmem:[%s11683_s3 + $0x574] sm:$0xff] %v9120_v43  ;;  %v5549_v3 = vadd.f32 0.5, %v4874_v28  ;;  %v4888_v27 = vmul.f32 0.5, %v10309_v1  ;;  %10330 = vtanh.f32 %v3571_v52  ;;  %v3583_v30 = vmul.f32 0.5, %v12562_v57  ;;  %v12690_v23 = vpop.f32.mrf.mxu0 }
 0x26d   : > { %v12692_v60 = vpop.f32.mrf.mxu1  ;;  %v10313_v33 = vpop.eup %10312  ;;  %8131 = vst [vmem:[%s11683_s3 + $0x57c] sm:$0xff] %v9121_v50  ;;  %v5551_v26 = vadd.f32 0.5, %v4876_v54  ;;  %v4890_v38 = vmul.f32 0.5, %v10311_v55  ;;  %v3585_v49 = vmul.f32 0.5, %v12564_v53  ;;  %v3584_v36 = vmul.f32 0.5, %v12572_v47 }
 0x26e   : > { %v9128_v19 = vpack.c.bf16 %v5549_v3, %v5548_v58  ;;  %v5563_v48 = vadd.f32 0.5, %v4888_v27  ;;  %v4889_v2 = vmul.f32 0.5, %v10313_v33  ;;  %10332 = vtanh.f32 %v3583_v30  ;;  %v12697_v25 = vpop.f32.mrf.mxu0  ;;  %v11132_v27 = vld [vmem:[%s11451_s18 + $0xa0] sm:$0xff]  }
 0x26f   : > { %v12699_v57 = vpop.f32.mrf.mxu1  ;;  %v10315_v61 = vpop.eup %10314  ;;  %v9129_v59 = vpack.c.bf16 %v5551_v26, %v5550_v42  ;;  %v5565_v10 = vadd.f32 0.5, %v4890_v38  ;;  %10334 = vtanh.f32 %v3585_v49  ;;  %v3586_v52 = vmul.f32 0.5, %v12574_v7 }
 0x270   : > { %v10317_v11 = vpop.eup %10316  ;;  %8138 = vst [vmem:[%s11683_s3 + $0x5b0] sm:$0xff] %v9128_v19  ;;  %v5564_v53 = vadd.f32 0.5, %v4889_v2  ;;  %v4891_v43 = vmul.f32 0.5, %v10315_v61  ;;  %10336 = vtanh.f32 %v3584_v36  ;;  %v3598_v47 = vmul.f32 0.5, %v12579_v9  ;;  %v12704_v58 = vpop.f32.mrf.mxu0 }
 0x271   : > { %v12706_v28 = vpop.f32.mrf.mxu1  ;;  %v10319_v4 = vpop.eup %10318  ;;  %8139 = vst [vmem:[%s11683_s3 + $0x5b8] sm:$0xff] %v9129_v59  ;;  %v4903_v1 = vmul.f32 0.5, %v10317_v11  ;;  %10338 = vtanh.f32 %v3586_v52  ;;  %v3600_v50 = vmul.f32 0.5, %v12581_v29  ;;  %v3599_v7 = vmul.f32 0.5, %v12586_v20 }
 0x272   : > { %v9136_v42 = vpack.c.bf16 %v5564_v53, %v5563_v48  ;;  %v5566_v54 = vadd.f32 0.5, %v4891_v43  ;;  %v4905_v55 = vmul.f32 0.5, %v10319_v4  ;;  %10340 = vtanh.f32 %v3598_v47  ;;  %v12711_v3 = vpop.f32.mrf.mxu0  ;;  %2393 = vmatmul.mubr.bf16.gmra.mxu0 %v11132_v27  ;;  %2654 = vmatmul.mubr.bf16.gmra.mxu1 %v11132_v27 }
 0x273   : > { %v12713_v9 = vpop.f32.mrf.mxu1  ;;  %v10321_v30 = vpop.eup %10320  ;;  %v5578_v33 = vadd.f32 0.5, %v4903_v1  ;;  %10342 = vtanh.f32 %v3600_v50  ;;  %v3601_v26 = vmul.f32 0.5, %v12588_v37  ;;  %v3613_v29 = vmul.f32 0.5, %v12594_v8  ;;  %2402 = vmatprep.mubr.bf16.mxu0 %v14150_v0  ;;  %2663 = vmatprep.mubr.bf16.mxu1 %v14150_v0 }
 0x274   : > { %v10323_v20 = vpop.eup %10322  ;;  %8146 = vst [vmem:[%s11683_s3 + $0x5ec] sm:$0xff] %v9136_v42  ;;  %v9137_v38 = vpack.c.bf16 %v5566_v54, %v5565_v10  ;;  %v5580_v49 = vadd.f32 0.5, %v4905_v55  ;;  %v4904_v36 = vmul.f32 0.5, %v10321_v30  ;;  %10344 = vtanh.f32 %v3599_v7  ;;  %v12721_v19 = vpop.f32.mrf.mxu0 }
 0x275   : > { %v12723_v48 = vpop.f32.mrf.mxu1  ;;  %v10325_v2 = vpop.eup %10324  ;;  %v4906_v61 = vmul.f32 0.5, %v10323_v20  ;;  %10346 = vtanh.f32 %v3601_v26  ;;  %v3615_v37 = vmul.f32 0.5, %v12596_v45  ;;  %v3614_v8 = vmul.f32 0.5, %v12603_v18  ;;  %v11133_v20 = vld [vmem:[%s11451_s18 + $0xa8] sm:$0xff]  }
 0x276   : > { %8147 = vst [vmem:[%s11683_s3 + $0x5f4] sm:$0xff] %v9137_v38  ;;  %v5579_v59 = vadd.f32 0.5, %v4904_v36  ;;  %v4918_v52 = vmul.f32 0.5, %v10325_v2  ;;  %10348 = vtanh.f32 %v3613_v29  ;;  %v3616_v10 = vmul.f32 0.5, %v12605_v32  ;;  %v12729_v11 = vpop.f32.mrf.mxu0 }
 0x277   : > { %v12731_v53 = vpop.f32.mrf.mxu1  ;;  %v10327_v43 = vpop.eup %10326  ;;  %v5581_v47 = vadd.f32 0.5, %v4906_v61  ;;  %10350 = vtanh.f32 %v3615_v37  ;;  %v3628_v4 = vmul.f32 0.5, %v12610_v16  ;;  %v3630_v45 = vmul.f32 0.5, %v12612_v46 }
 0x278   : > { %v10329_v1 = vpop.eup %10328  ;;  %v9144_v18 = vpack.c.bf16 %v5579_v59, %v5578_v33  ;;  %v5593_v50 = vadd.f32 0.5, %v4918_v52  ;;  %v4920_v7 = vmul.f32 0.5, %v10327_v43  ;;  %10352 = vtanh.f32 %v3614_v8  ;;  %v12735_v42 = vpop.f32.mrf.mxu0 }
 0x279   : > { %v12737_v32 = vpop.f32.mrf.mxu1  ;;  %v10331_v54 = vpop.eup %10330  ;;  %v9145_v55 = vpack.c.bf16 %v5581_v47, %v5580_v49  ;;  %v4919_v27 = vmul.f32 0.5, %v10329_v1  ;;  %10354 = vtanh.f32 %v3616_v10  ;;  %v3629_v30 = vmul.f32 0.5, %v12618_v14 }
 0x27a   : > { %8154 = vst [vmem:[%s11683_s3 + $0x628] sm:$0xff] %v9144_v18  ;;  %v5595_v16 = vadd.f32 0.5, %v4920_v7  ;;  %v4921_v46 = vmul.f32 0.5, %v10331_v54  ;;  %10356 = vtanh.f32 %v3628_v4  ;;  %v3631_v33 = vmul.f32 0.5, %v12620_v15  ;;  %v12742_v26 = vpop.f32.mrf.mxu0  ;;  %2403 = vmatmul.mubr.bf16.gmra.mxu0 %v11133_v20  ;;  %2664 = vmatmul.mubr.bf16.gmra.mxu1 %v11133_v20 }
 0x27b   : > { %v12744_v29 = vpop.f32.mrf.mxu1  ;;  %v10333_v38 = vpop.eup %10332  ;;  %8155 = vst [vmem:[%s11683_s3 + $0x630] sm:$0xff] %v9145_v55  ;;  %v5594_v49 = vadd.f32 0.5, %v4919_v27  ;;  %10358 = vtanh.f32 %v3630_v45  ;;  %v3643_v36 = vmul.f32 0.5, %v12623_v22  ;;  %v3645_v14 = vmul.f32 0.5, %v12625_v34  ;;  %2412 = vmatprep.mubr.bf16.mxu0 %v14150_v0  ;;  %2673 = vmatprep.mubr.bf16.mxu1 %v14150_v0 }
 0x27c   : > { %v10335_v15 = vpop.eup %10334  ;;  %v5596_v2 = vadd.f32 0.5, %v4921_v46  ;;  %v4933_v61 = vmul.f32 0.5, %v10333_v38  ;;  %10360 = vtanh.f32 %v3629_v30  ;;  %v3644_v37 = vmul.f32 0.5, %v12634_v62  ;;  %v12753_v8 = vpop.f32.mrf.mxu0 }
 0x27d   : > { %v12755_v59 = vpop.f32.mrf.mxu1  ;;  %v10337_v52 = vpop.eup %10336  ;;  %v9152_v10 = vpack.c.bf16 %v5594_v49, %v5593_v50  ;;  %v4935_v22 = vmul.f32 0.5, %v10335_v15  ;;  %10362 = vtanh.f32 %v3631_v33  ;;  %v3646_v34 = vmul.f32 0.5, %v12636_v63 }
 0x27e   : > { %v10339_v43 = vpop.eup %10338  ;;  %v9153_v47 = vpack.c.bf16 %v5596_v2, %v5595_v16  ;;  %v5608_v4 = vadd.f32 0.5, %v4933_v61  ;;  %v4934_v45 = vmul.f32 0.5, %v10337_v52  ;;  %10364 = vtanh.f32 %v3643_v36  ;;  %v12758_v1 = vpop.f32.mrf.mxu0 }
 0x27f   : > { %v12760_v62 = vpop.f32.mrf.mxu1  ;;  %v10341_v18 = vpop.eup %10340  ;;  %8162 = vst [vmem:[%s11683_s3 + $0x664] sm:$0xff] %v9152_v10  ;;  %v5610_v7 = vadd.f32 0.5, %v4935_v22  ;;  %v4936_v54 = vmul.f32 0.5, %v10339_v43  ;;  %10366 = vtanh.f32 %v3645_v14  ;;  %v3658_v50 = vmul.f32 0.5, %v12639_v41 }
 0x280   : > { %v10343_v55 = vpop.eup %10342  ;;  %8163 = vst [vmem:[%s11683_s3 + $0x66c] sm:$0xff] %v9153_v47  ;;  %v5609_v27 = vadd.f32 0.5, %v4934_v45  ;;  %v4948_v63 = vmul.f32 0.5, %v10341_v18  ;;  %10368 = vtanh.f32 %v3644_v37  ;;  %v3660_v30 = vmul.f32 0.5, %v12641_v44  ;;  %v12766_v16 = vpop.f32.mrf.mxu0  ;;  %v11134_v44 = vld [vmem:[%s11451_s18 + $0xb0] ss:$0 sps:$4 sm:$0xff]  }
 0x281   : > { %v12768_v46 = vpop.f32.mrf.mxu1  ;;  %v10345_v33 = vpop.eup %10344  ;;  %v5611_v20 = vadd.f32 0.5, %v4936_v54  ;;  %v4950_v38 = vmul.f32 0.5, %v10343_v55  ;;  %10370 = vtanh.f32 %v3646_v34  ;;  %v3659_v49 = vmul.f32 0.5, %v12645_v40 }
 0x282   : > { %v10347_v36 = vpop.eup %10346  ;;  %v9160_v41 = vpack.c.bf16 %v5609_v27, %v5608_v4  ;;  %v5623_v14 = vadd.f32 0.5, %v4948_v63  ;;  %v4949_v15 = vmul.f32 0.5, %v10345_v33  ;;  %10372 = vtanh.f32 %v3658_v50  ;;  %v12771_v2 = vpop.f32.mrf.mxu0  ;;  %2413 = vmatmul.mubr.bf16.gmra.mxu0 %v11134_v44  ;;  %2674 = vmatmul.mubr.bf16.gmra.mxu1 %v11134_v44 }
 0x283   : > { %v12773_v61 = vpop.f32.mrf.mxu1  ;;  %v10349_v37 = vpop.eup %10348  ;;  %v9161_v52 = vpack.c.bf16 %v5611_v20, %v5610_v7  ;;  %v5625_v10 = vadd.f32 0.5, %v4950_v38  ;;  %v4951_v22 = vmul.f32 0.5, %v10347_v36  ;;  %10374 = vtanh.f32 %v3660_v30  ;;  %2714 = vmatprep.mubr.bf16.mxu0 %v14150_v0 }
 0x284   : > { %v10351_v40 = vpop.eup %10350  ;;  %8170 = vst [vmem:[%s11683_s3 + $0x6a0] sm:$0xff] %v9160_v41  ;;  %v5624_v34 = vadd.f32 0.5, %v4949_v15  ;;  %v4963_v43 = vmul.f32 0.5, %v10349_v37  ;;  %10376 = vtanh.f32 %v3659_v49  ;;  %v3661_v47 = vmul.f32 0.5, %v12647_v24  ;;  %v12779_v4 = vpop.f32.mrf.mxu0 }
 0x285   : > { %v12781_v45 = vpop.f32.mrf.mxu1  ;;  %v10353_v18 = vpop.eup %10352  ;;  %8171 = vst [vmem:[%s11683_s3 + $0x6a8] sm:$0xff] %v9161_v52  ;;  %v5626_v54 = vadd.f32 0.5, %v4951_v22  ;;  %v4965_v7 = vmul.f32 0.5, %v10351_v40  ;;  %v3673_v50 = vmul.f32 0.5, %v12652_v35  ;;  %v3675_v55 = vmul.f32 0.5, %v12654_v51 }
 0x286   : > { %v10355_v27 = vpop.eup %10354  ;;  %v9168_v63 = vpack.c.bf16 %v5624_v34, %v5623_v14  ;;  %v5638_v30 = vadd.f32 0.5, %v4963_v43  ;;  %v4964_v33 = vmul.f32 0.5, %v10353_v18  ;;  %10378 = vtanh.f32 %v3661_v47  ;;  %v12786_v20 = vpop.f32.mrf.mxu0 }
 0x287   : > { %v12788_v24 = vpop.f32.mrf.mxu1  ;;  %v10357_v38 = vpop.eup %10356  ;;  %v9169_v49 = vpack.c.bf16 %v5626_v54, %v5625_v10  ;;  %v5640_v36 = vadd.f32 0.5, %v4965_v7  ;;  %v4966_v41 = vmul.f32 0.5, %v10355_v27  ;;  %10380 = vtanh.f32 %v3673_v50  ;;  %v12804_v50 = vld [vmem:[%s11451_s18] sm:$0xff]  }
 0x288   : > { %v10359_v15 = vpop.eup %10358  ;;  %8178 = vst [vmem:[%s11683_s3 + $0x6dc] sm:$0xff] %v9168_v63  ;;  %v5639_v35 = vadd.f32 0.5, %v4964_v33  ;;  %v4978_v44 = vmul.f32 0.5, %v10357_v38  ;;  %10382 = vtanh.f32 %v3675_v55  ;;  %v3674_v51 = vmul.f32 0.5, %v12661_v21  ;;  %v12792_v14 = vpop.f32.mrf.mxu0 }
 0x289   : > { %v12794_v37 = vpop.f32.mrf.mxu1  ;;  %v10361_v52 = vpop.eup %10360  ;;  %8179 = vst [vmem:[%s11683_s3 + $0x6e4] sm:$0xff] %v9169_v49  ;;  %v5641_v22 = vadd.f32 0.5, %v4966_v41  ;;  %v4980_v40 = vmul.f32 0.5, %v10359_v15  ;;  %v3676_v10 = vmul.f32 0.5, %v12663_v31  ;;  %v3688_v34 = vmul.f32 0.5, %v12668_v12 }
 0x28a   : > { %v10363_v43 = vpop.eup %10362  ;;  %v9176_v47 = vpack.c.bf16 %v5639_v35, %v5638_v30  ;;  %v5653_v18 = vadd.f32 0.5, %v4978_v44  ;;  %v4979_v54 = vmul.f32 0.5, %v10361_v52  ;;  %10384 = vtanh.f32 %v3674_v51  ;;  %v12799_v21 = vpop.f32.mrf.mxu0  ;;  %2715 = vmatmul.mubr.bf16.vlgmr.msra.gmra.mxu0 %v12804_v50 }
 0x28b   : > { %v12801_v7 = vpop.f32.mrf.mxu1  ;;  %v10365_v55 = vpop.eup %10364  ;;  %v9177_v27 = vpack.c.bf16 %v5641_v22, %v5640_v36  ;;  %v5655_v31 = vadd.f32 0.5, %v4980_v40  ;;  %v4981_v63 = vmul.f32 0.5, %v10363_v43  ;;  %10386 = vtanh.f32 %v3676_v10  ;;  %2724 = vmatprep.mubr.bf16.mxu0 %v14150_v0 }
 0x28c   : > { %v10367_v12 = vpop.eup %10366  ;;  %8186 = vst [vmem:[%s11683_s3 + $0x718] sm:$0xff] %v9176_v47  ;;  %v5654_v30 = vadd.f32 0.5, %v4979_v54  ;;  %v4993_v33 = vmul.f32 0.5, %v10365_v55  ;;  %10388 = vtanh.f32 %v3688_v34  ;;  %v3690_v38 = vmul.f32 0.5, %v12670_v39  ;;  %v12810_v49 = vpop.f32.mrf.mxu0 }
 0x28d   : > { %v12812_v41 = vpop.f32.mrf.mxu1  ;;  %v10369_v15 = vpop.eup %10368  ;;  %8187 = vst [vmem:[%s11683_s3 + $0x720] sm:$0xff] %v9177_v27  ;;  %v5656_v35 = vadd.f32 0.5, %v4981_v63  ;;  %v4995_v36 = vmul.f32 0.5, %v10367_v12  ;;  %v3689_v44 = vmul.f32 0.5, %v12674_v5  ;;  %v3691_v51 = vmul.f32 0.5, %v12676_v17 }
 0x28e   : > { %v10371_v52 = vpop.eup %10370  ;;  %v9184_v22 = vpack.c.bf16 %v5654_v30, %v5653_v18  ;;  %v5668_v40 = vadd.f32 0.5, %v4993_v33  ;;  %v4994_v10 = vmul.f32 0.5, %v10369_v15  ;;  %10390 = vtanh.f32 %v3690_v38  ;;  %v1896_v34 = vpop.f32.mrf.mxu0 }
 0x28f   : > { %v2157_v39 = vpop.f32.mrf.mxu1  ;;  %v10373_v43 = vpop.eup %10372  ;;  %v9185_v47 = vpack.c.bf16 %v5656_v35, %v5655_v31  ;;  %v5670_v54 = vadd.f32 0.5, %v4995_v36  ;;  %v4996_v55 = vmul.f32 0.5, %v10371_v52  ;;  %10392 = vtanh.f32 %v3689_v44 }
 0x290   : > { %v10375_v27 = vpop.eup %10374  ;;  %8194 = vst [vmem:[%s11683_s3 + $0x754] sm:$0xff] %v9184_v22  ;;  %v5669_v63 = vadd.f32 0.5, %v4994_v10  ;;  %v5008_v12 = vmul.f32 0.5, %v10373_v43  ;;  %10394 = vtanh.f32 %v3691_v51  ;;  %v3703_v5 = vmul.f32 0.5, %v12681_v13  ;;  %v1897_v17 = vpop.f32.mrf.mxu0  ;;  %v12827_v13 = vld [vmem:[%s11451_s18 + $0x8] sm:$0xff]  }
 0x291   : > { %v2158_v18 = vpop.f32.mrf.mxu1  ;;  %v10377_v30 = vpop.eup %10376  ;;  %8195 = vst [vmem:[%s11683_s3 + $0x75c] sm:$0xff] %v9185_v47  ;;  %v5671_v33 = vadd.f32 0.5, %v4996_v55  ;;  %v5010_v38 = vmul.f32 0.5, %v10375_v27  ;;  %v3705_v15 = vmul.f32 0.5, %v12683_v6  ;;  %v3704_v31 = vmul.f32 0.5, %v12690_v23 }
 0x292   : > { %v9192_v35 = vpack.c.bf16 %v5669_v63, %v5668_v40  ;;  %v5683_v36 = vadd.f32 0.5, %v5008_v12  ;;  %v5009_v44 = vmul.f32 0.5, %v10377_v30  ;;  %10396 = vtanh.f32 %v3703_v5  ;;  %v12822_v52 = vpop.f32.mrf.mxu0  ;;  %2725 = vmatmul.mubr.bf16.gmra.mxu0 %v12827_v13 }
 0x293   : > { %v12824_v51 = vpop.f32.mrf.mxu1  ;;  %v10379_v22 = vpop.eup %10378  ;;  %v9193_v10 = vpack.c.bf16 %v5671_v33, %v5670_v54  ;;  %v5685_v34 = vadd.f32 0.5, %v5010_v38  ;;  %10398 = vtanh.f32 %v3705_v15  ;;  %v3706_v6 = vmul.f32 0.5, %v12692_v60  ;;  %2734 = vmatprep.mubr.bf16.mxu0 %v14150_v0 }
 0x294   : > { %v10381_v23 = vpop.eup %10380  ;;  %8202 = vst [vmem:[%s11683_s3 + $0x790] sm:$0xff] %v9192_v35  ;;  %v5684_v40 = vadd.f32 0.5, %v5009_v44  ;;  %v5011_v39 = vmul.f32 0.5, %v10379_v22  ;;  %10400 = vtanh.f32 %v3704_v31  ;;  %v3718_v43 = vmul.f32 0.5, %v12697_v25  ;;  %v12834_v47 = vpop.f32.mrf.mxu0 }
 0x295   : > { %v12836_v55 = vpop.f32.mrf.mxu1  ;;  %v10383_v27 = vpop.eup %10382  ;;  %8203 = vst [vmem:[%s11683_s3 + $0x798] sm:$0xff] %v9193_v10  ;;  %v5023_v54 = vmul.f32 0.5, %v10381_v23  ;;  %10402 = vtanh.f32 %v3706_v6  ;;  %v3720_v60 = vmul.f32 0.5, %v12699_v57  ;;  %v3719_v63 = vmul.f32 0.5, %v12704_v58 }
 0x296   : > { %v9200_v12 = vpack.c.bf16 %v5684_v40, %v5683_v36  ;;  %v5686_v5 = vadd.f32 0.5, %v5011_v39  ;;  %v5025_v17 = vmul.f32 0.5, %v10383_v27  ;;  %10404 = vtanh.f32 %v3718_v43  ;;  %v12841_v18 = vpop.f32.mrf.mxu0  ;;  %v12861_v43 = vld [vmem:[%s11451_s18 + $0x10] sm:$0xff]  }
 0x297   : > { %v12843_v25 = vpop.f32.mrf.mxu1  ;;  %v10385_v30 = vpop.eup %10384  ;;  %v5698_v33 = vadd.f32 0.5, %v5023_v54  ;;  %10406 = vtanh.f32 %v3720_v60  ;;  %v3721_v38 = vmul.f32 0.5, %v12706_v28  ;;  %v3733_v15 = vmul.f32 0.5, %v12711_v3 }
 0x298   : > { %v10387_v31 = vpop.eup %10386  ;;  %8210 = vst [vmem:[%s11683_s3 + $0x7cc] sm:$0xff] %v9200_v12  ;;  %v9201_v57 = vpack.c.bf16 %v5686_v5, %v5685_v34  ;;  %v5700_v58 = vadd.f32 0.5, %v5025_v17  ;;  %v5024_v35 = vmul.f32 0.5, %v10385_v30  ;;  %10408 = vtanh.f32 %v3719_v63  ;;  %v12848_v36 = vpop.f32.mrf.mxu0 }
 0x299   : > { %v12850_v44 = vpop.f32.mrf.mxu1  ;;  %v10389_v22 = vpop.eup %10388  ;;  %v5026_v10 = vmul.f32 0.5, %v10387_v31  ;;  %10410 = vtanh.f32 %v3721_v38  ;;  %v3735_v6 = vmul.f32 0.5, %v12713_v9  ;;  %v3734_v28 = vmul.f32 0.5, %v12721_v19 }
 0x29a   : > { %8211 = vst [vmem:[%s11683_s3 + $0x7d4] sm:$0xff] %v9201_v57  ;;  %v5699_v3 = vadd.f32 0.5, %v5024_v35  ;;  %v5038_v23 = vmul.f32 0.5, %v10389_v22  ;;  %10412 = vtanh.f32 %v3733_v15  ;;  %v3736_v34 = vmul.f32 0.5, %v12723_v48  ;;  %v12856_v40 = vpop.f32.mrf.mxu0  ;;  %2735 = vmatmul.mubr.bf16.gmra.mxu0 %v12861_v43 }
 0x29b   : > { %v12858_v39 = vpop.f32.mrf.mxu1  ;;  %v10391_v27 = vpop.eup %10390  ;;  %v5701_v54 = vadd.f32 0.5, %v5026_v10  ;;  %10414 = vtanh.f32 %v3735_v6  ;;  %v3748_v9 = vmul.f32 0.5, %v12729_v11  ;;  %v3750_v19 = vmul.f32 0.5, %v12731_v53  ;;  %2744 = vmatprep.mubr.bf16.mxu0 %v14150_v0 }
 0x29c   : > { %v10393_v60 = vpop.eup %10392  ;;  %v9208_v48 = vpack.c.bf16 %v5699_v3, %v5698_v33  ;;  %v5713_v63 = vadd.f32 0.5, %v5038_v23  ;;  %v5040_v12 = vmul.f32 0.5, %v10391_v27  ;;  %10416 = vtanh.f32 %v3734_v28  ;;  %v12867_v5 = vpop.f32.mrf.mxu0 }
 0x29d   : > { %v12869_v17 = vpop.f32.mrf.mxu1  ;;  %v10395_v30 = vpop.eup %10394  ;;  %v9209_v38 = vpack.c.bf16 %v5701_v54, %v5700_v58  ;;  %v5039_v15 = vmul.f32 0.5, %v10393_v60  ;;  %10418 = vtanh.f32 %v3736_v34  ;;  %v3749_v11 = vmul.f32 0.5, %v12735_v42 }
 0x29e   : > { %8218 = vst [vmem:[%s11683_s3 + $0x808] sm:$0xff] %v9208_v48  ;;  %v5715_v53 = vadd.f32 0.5, %v5040_v12  ;;  %v5041_v31 = vmul.f32 0.5, %v10395_v30  ;;  %10420 = vtanh.f32 %v3748_v9  ;;  %v3751_v33 = vmul.f32 0.5, %v12737_v32  ;;  %v12874_v57 = vpop.f32.mrf.mxu0  ;;  %v12892_v30 = vld [vmem:[%s11451_s18 + $0x18] sm:$0xff]  }
 0x29f   : > { %v12876_v35 = vpop.f32.mrf.mxu1  ;;  %v10397_v22 = vpop.eup %10396  ;;  %8219 = vst [vmem:[%s11683_s3 + $0x810] sm:$0xff] %v9209_v38  ;;  %v5714_v10 = vadd.f32 0.5, %v5039_v15  ;;  %10422 = vtanh.f32 %v3750_v19  ;;  %v3763_v58 = vmul.f32 0.5, %v12742_v26  ;;  %v3765_v6 = vmul.f32 0.5, %v12744_v29 }
 0x2a0   : > { %v10399_v28 = vpop.eup %10398  ;;  %v5716_v42 = vadd.f32 0.5, %v5041_v31  ;;  %v5053_v3 = vmul.f32 0.5, %v10397_v22  ;;  %10424 = vtanh.f32 %v3749_v11  ;;  %v3764_v23 = vmul.f32 0.5, %v12753_v8  ;;  %v12882_v32 = vpop.f32.mrf.mxu0 }
 0x2a1   : > { %v12884_v34 = vpop.f32.mrf.mxu1  ;;  %v10401_v27 = vpop.eup %10400  ;;  %v9216_v54 = vpack.c.bf16 %v5714_v10, %v5713_v63  ;;  %v5055_v9 = vmul.f32 0.5, %v10399_v28  ;;  %10426 = vtanh.f32 %v3751_v33  ;;  %v3766_v26 = vmul.f32 0.5, %v12755_v59 }
 0x2a2   : > { %v10403_v19 = vpop.eup %10402  ;;  %v9217_v29 = vpack.c.bf16 %v5716_v42, %v5715_v53  ;;  %v5728_v60 = vadd.f32 0.5, %v5053_v3  ;;  %v5054_v48 = vmul.f32 0.5, %v10401_v27  ;;  %10428 = vtanh.f32 %v3763_v58  ;;  %v12887_v12 = vpop.f32.mrf.mxu0  ;;  %2745 = vmatmul.mubr.bf16.gmra.mxu0 %v12892_v30 }
 0x2a3   : > { %v12889_v8 = vpop.f32.mrf.mxu1  ;;  %v10405_v38 = vpop.eup %10404  ;;  %8226 = vst [vmem:[%s11683_s3 + $0x844] sm:$0xff] %v9216_v54  ;;  %v5730_v63 = vadd.f32 0.5, %v5055_v9  ;;  %v5056_v15 = vmul.f32 0.5, %v10403_v19  ;;  %10430 = vtanh.f32 %v3765_v6  ;;  %v3778_v59 = vmul.f32 0.5, %v12758_v1  ;;  %2754 = vmatprep.mubr.bf16.mxu0 %v14150_v0 }
 0x2a4   : > { %v10407_v11 = vpop.eup %10406  ;;  %8227 = vst [vmem:[%s11683_s3 + $0x84c] sm:$0xff] %v9217_v29  ;;  %v5729_v53 = vadd.f32 0.5, %v5054_v48  ;;  %v5068_v31 = vmul.f32 0.5, %v10405_v38  ;;  %10432 = vtanh.f32 %v3764_v23  ;;  %v3780_v33 = vmul.f32 0.5, %v12760_v62  ;;  %v12900_v22 = vpop.f32.mrf.mxu0 }
 0x2a5   : > { %v12902_v10 = vpop.f32.mrf.mxu1  ;;  %v10409_v58 = vpop.eup %10408  ;;  %v5731_v28 = vadd.f32 0.5, %v5056_v15  ;;  %v5070_v42 = vmul.f32 0.5, %v10407_v11  ;;  %10434 = vtanh.f32 %v3766_v26  ;;  %v3779_v1 = vmul.f32 0.5, %v12766_v16 }
 0x2a6   : > { %v10411_v6 = vpop.eup %10410  ;;  %v9224_v3 = vpack.c.bf16 %v5729_v53, %v5728_v60  ;;  %v5743_v27 = vadd.f32 0.5, %v5068_v31  ;;  %v5069_v54 = vmul.f32 0.5, %v10409_v58  ;;  %10436 = vtanh.f32 %v3778_v59  ;;  %v12905_v9 = vpop.f32.mrf.mxu0 }
 0x2a7   : > { %v12907_v62 = vpop.f32.mrf.mxu1  ;;  %v10413_v23 = vpop.eup %10412  ;;  %v9225_v19 = vpack.c.bf16 %v5731_v28, %v5730_v63  ;;  %v5745_v29 = vadd.f32 0.5, %v5070_v42  ;;  %v5071_v48 = vmul.f32 0.5, %v10411_v6  ;;  %10438 = vtanh.f32 %v3780_v33 }
 0x2a8   : > { %v10415_v38 = vpop.eup %10414  ;;  %8234 = vst [vmem:[%s11683_s3 + $0x880] sm:$0xff] %v9224_v3  ;;  %v5744_v26 = vadd.f32 0.5, %v5069_v54  ;;  %v5083_v15 = vmul.f32 0.5, %v10413_v23  ;;  %10440 = vtanh.f32 %v3779_v1  ;;  %v3781_v16 = vmul.f32 0.5, %v12768_v46  ;;  %v12911_v60 = vpop.f32.mrf.mxu0  ;;  %v12923_v3 = vld [vmem:[%s11451_s18 + $0x20] sm:$0xff]  }
 0x2a9   : > { %v12913_v59 = vpop.f32.mrf.mxu1  ;;  %v10417_v11 = vpop.eup %10416  ;;  %8235 = vst [vmem:[%s11683_s3 + $0x888] sm:$0xff] %v9225_v19  ;;  %v5746_v53 = vadd.f32 0.5, %v5071_v48  ;;  %v5085_v31 = vmul.f32 0.5, %v10415_v38  ;;  %v3793_v63 = vmul.f32 0.5, %v12771_v2  ;;  %v3795_v33 = vmul.f32 0.5, %v12773_v61 }
 0x2aa   : > { %v10419_v58 = vpop.eup %10418  ;;  %v9232_v28 = vpack.c.bf16 %v5744_v26, %v5743_v27  ;;  %v5758_v42 = vadd.f32 0.5, %v5083_v15  ;;  %v5084_v1 = vmul.f32 0.5, %v10417_v11  ;;  %10442 = vtanh.f32 %v3781_v16  ;;  %v12918_v46 = vpop.f32.mrf.mxu0  ;;  %2755 = vmatmul.mubr.bf16.gmra.mxu0 %v12923_v3 }
 0x2ab   : > { %v12920_v6 = vpop.f32.mrf.mxu1  ;;  %v10421_v54 = vpop.eup %10420  ;;  %v9233_v23 = vpack.c.bf16 %v5746_v53, %v5745_v29  ;;  %v5760_v2 = vadd.f32 0.5, %v5085_v31  ;;  %v5086_v19 = vmul.f32 0.5, %v10419_v58  ;;  %10444 = vtanh.f32 %v3793_v63  ;;  %2764 = vmatprep.mubr.bf16.mxu0 %v14150_v0 }
 0x2ac   : > { %v10423_v61 = vpop.eup %10422  ;;  %8242 = vst [vmem:[%s11683_s3 + $0x8bc] sm:$0xff] %v9232_v28  ;;  %v5759_v27 = vadd.f32 0.5, %v5084_v1  ;;  %v5098_v48 = vmul.f32 0.5, %v10421_v54  ;;  %10446 = vtanh.f32 %v3795_v33  ;;  %v3794_v38 = vmul.f32 0.5, %v12779_v4  ;;  %v12929_v26 = vpop.f32.mrf.mxu0 }
 0x2ad   : > { %v12931_v15 = vpop.f32.mrf.mxu1  ;;  %v10425_v16 = vpop.eup %10424  ;;  %8243 = vst [vmem:[%s11683_s3 + $0x8c4] sm:$0xff] %v9233_v23  ;;  %v5761_v11 = vadd.f32 0.5, %v5086_v19  ;;  %v5100_v29 = vmul.f32 0.5, %v10423_v61  ;;  %v3796_v53 = vmul.f32 0.5, %v12781_v45  ;;  %v3808_v31 = vmul.f32 0.5, %v12786_v20 }
 0x2ae   : > { %v10427_v63 = vpop.eup %10426  ;;  %v9240_v58 = vpack.c.bf16 %v5759_v27, %v5758_v42  ;;  %v5773_v28 = vadd.f32 0.5, %v5098_v48  ;;  %v5099_v1 = vmul.f32 0.5, %v10425_v16  ;;  %10448 = vtanh.f32 %v3794_v38  ;;  %v12936_v33 = vpop.f32.mrf.mxu0 }
 0x2af   : > { %v12938_v4 = vpop.f32.mrf.mxu1  ;;  %v10429_v54 = vpop.eup %10428  ;;  %v9241_v56 = vpack.c.bf16 %v5761_v11, %v5760_v2  ;;  %v5775_v23 = vadd.f32 0.5, %v5100_v29  ;;  %v5101_v19 = vmul.f32 0.5, %v10427_v63  ;;  %10450 = vtanh.f32 %v3796_v53 }
 0x2b0   : > { %v10431_v61 = vpop.eup %10430  ;;  %8250 = vst [vmem:[%s11683_s3 + $0x8f8] sm:$0xff] %v9240_v58  ;;  %v5774_v45 = vadd.f32 0.5, %v5099_v1  ;;  %v5113_v0 = vmul.f32 0.5, %v10429_v54  ;;  %10452 = vtanh.f32 %v3808_v31  ;;  %v3810_v20 = vmul.f32 0.5, %v12788_v24  ;;  %v12942_v42 = vpop.f32.mrf.mxu0  ;;  %v12954_v1 = vld [vmem:[%s11451_s18 + $0x28] sm:$0xff]  }
 0x2b1   : > { %v12944_v27 = vpop.f32.mrf.mxu1  ;;  %v10433_v48 = vpop.eup %10432  ;;  %8251 = vst [vmem:[%s11683_s3 + $0x900] sm:$0xff] %v9241_v56  ;;  %v5776_v38 = vadd.f32 0.5, %v5101_v19  ;;  %v5115_v16 = vmul.f32 0.5, %v10431_v61  ;;  %v3809_v2 = vmul.f32 0.5, %v12792_v14  ;;  %v3811_v11 = vmul.f32 0.5, %v12794_v37  ;;  %14164 = vst [vmem:[#allocation12_spill] sm:$0xff] %v12954_v1 }
 0x2b2   : > { %v10435_v29 = vpop.eup %10434  ;;  %v9248_v53 = vpack.c.bf16 %v5774_v45, %v5773_v28  ;;  %v5788_v63 = vadd.f32 0.5, %v5113_v0  ;;  %v5114_v31 = vmul.f32 0.5, %v10433_v48  ;;  %10454 = vtanh.f32 %v3810_v20  ;;  %v12949_v24 = vpop.f32.mrf.mxu0  ;;  %2765 = vmatmul.mubr.bf16.gmra.mxu0 %v12954_v1 }
 0x2b3   : > { %v12951_v58 = vpop.f32.mrf.mxu1  ;;  %v10437_v56 = vpop.eup %10436  ;;  %v9249_v54 = vpack.c.bf16 %v5776_v38, %v5775_v23  ;;  %v5790_v14 = vadd.f32 0.5, %v5115_v16  ;;  %v5116_v19 = vmul.f32 0.5, %v10435_v29  ;;  %10456 = vtanh.f32 %v3809_v2 }
 0x2b4   : > { %14163 = vst [vmem:[#allocation11_spill] sm:$0xff] %v12951_v58  ;;  %v14165_v37 = vmov 0   ;;  %v10439_v28 = vpop.eup %10438  ;;  %8258 = vst [vmem:[%s11683_s3 + $0x934] sm:$0xff] %v9248_v53  ;;  %v5789_v0 = vadd.f32 0.5, %v5114_v31  ;;  %v5128_v61 = vmul.f32 0.5, %v10437_v56  ;;  %10458 = vtanh.f32 %v3811_v11  ;;  %v12959_v45 = vpop.f32.mrf.mxu0 }
 0x2b5   : > { %2774 = vmatprep.mubr.bf16.mxu0 %v14165_v37  ;;  %v12961_v20 = vpop.f32.mrf.mxu1  ;;  %v10441_v48 = vpop.eup %10440  ;;  %8259 = vst [vmem:[%s11683_s3 + $0x93c] sm:$0xff] %v9249_v54  ;;  %v5791_v58 = vadd.f32 0.5, %v5116_v19  ;;  %v5130_v1 = vmul.f32 0.5, %v10439_v28  ;;  %v14166_v23 = vmov 0.0   ;;  %v3823_v38 = vmul.f32 0.5, %v12799_v21 }
 0x2b6   : > { %9341 = vmatprep.mubr.msk.bf16.mxu1 %vm11313_vm0, %v14166_v23  ;;  %v3825_v16 = vmul.f32 0.5, %v12801_v7  ;;  %v9256_v2 = vpack.c.bf16 %v5789_v0, %v5788_v63  ;;  %v5803_v29 = vadd.f32 0.5, %v5128_v61  ;;  %v5129_v11 = vmul.f32 0.5, %v10441_v48  ;;  %v12970_v31 = vpop.f32.mrf.mxu0 }
 0x2b7   : > { %9342 = vmatmul.mubr.bf16.vlgmr.msra.gmra.mxu1 %v12804_v50  ;;  %v3824_v53 = vmul.f32 0.5, %v12810_v49  ;;  %v12972_v56 = vpop.f32.mrf.mxu1  ;;  %v10443_v54 = vpop.eup %10442  ;;  %v9257_v19 = vpack.c.bf16 %v5791_v58, %v5790_v14  ;;  %v5805_v28 = vadd.f32 0.5, %v5130_v1  ;;  %10460 = vtanh.f32 %v3823_v38 }
 0x2b8   : > { %v3826_v21 = vmul.f32 0.5, %v12812_v41  ;;  %9345 = vmatprep.mubr.msk.bf16.mxu1 %vm11313_vm0, %v14166_v23  ;;  %v10445_v7 = vpop.eup %10444  ;;  %8266 = vst [vmem:[%s11683_s3 + $0x970] sm:$0xff] %v9256_v2  ;;  %v5804_v63 = vadd.f32 0.5, %v5129_v11  ;;  %v5131_v50 = vmul.f32 0.5, %v10443_v54  ;;  %10462 = vtanh.f32 %v3825_v16  ;;  %v12979_v0 = vpop.f32.mrf.mxu0  ;;  %v12991_v11 = vld [vmem:[%s11451_s18 + $0x30] sm:$0xff]  }
 0x2b9   : > { %v3167_v49 = vmul.f32 0.5, %v12822_v52  ;;  %v12981_v61 = vpop.f32.mrf.mxu1  ;;  %v10447_v58 = vpop.eup %10446  ;;  %8267 = vst [vmem:[%s11683_s3 + $0x978] sm:$0xff] %v9257_v19  ;;  %v5143_v1 = vmul.f32 0.5, %v10445_v7  ;;  %10464 = vtanh.f32 %v3824_v53  ;;  %v3169_v41 = vmul.f32 0.5, %v12824_v51  ;;  %14167 = vst [vmem:[#allocation13_spill] sm:$0xff] %v12991_v11 }
 0x2ba   : > { %v3168_v14 = vmul.f32 0.5, %v12834_v47  ;;  %v9264_v48 = vpack.c.bf16 %v5804_v63, %v5803_v29  ;;  %v5806_v38 = vadd.f32 0.5, %v5131_v50  ;;  %v5145_v2 = vmul.f32 0.5, %v10447_v58  ;;  %v12986_v16 = vpop.f32.mrf.mxu0  ;;  %2775 = vmatmul.mubr.bf16.gmra.mxu0 %v12991_v11 }
 0x2bb   : > { %10466 = vtanh.f32 %v3826_v21  ;;  %v12988_v52 = vpop.f32.mrf.mxu1  ;;  %v10449_v54 = vpop.eup %10448  ;;  %v5818_v19 = vadd.f32 0.5, %v5143_v1  ;;  %v3170_v51 = vmul.f32 0.5, %v12836_v55  ;;  %v3182_v47 = vmul.f32 0.5, %v12841_v18  ;;  %2784 = vmatprep.mubr.bf16.mxu0 %v14165_v37 }
 0x2bc   : > { %10468 = vtanh.f32 %v3167_v49  ;;  %v10451_v29 = vpop.eup %10450  ;;  %8274 = vst [vmem:[%s11683_s3 + $0x9ac] sm:$0xff] %v9264_v48  ;;  %v9265_v53 = vpack.c.bf16 %v5806_v38, %v5805_v28  ;;  %v5820_v21 = vadd.f32 0.5, %v5145_v2  ;;  %v5144_v7 = vmul.f32 0.5, %v10449_v54  ;;  %v12998_v63 = vpop.f32.mrf.mxu0 }
 0x2bd   : > { %10470 = vtanh.f32 %v3169_v41  ;;  %v13000_v50 = vpop.f32.mrf.mxu1  ;;  %v10453_v58 = vpop.eup %10452  ;;  %v5146_v1 = vmul.f32 0.5, %v10451_v29  ;;  %v3184_v55 = vmul.f32 0.5, %v12843_v25  ;;  %v3183_v49 = vmul.f32 0.5, %v12848_v36 }
 0x2be   : > { %10472 = vtanh.f32 %v3168_v14  ;;  %8275 = vst [vmem:[%s11683_s3 + $0x9b4] sm:$0xff] %v9265_v53  ;;  %v5819_v18 = vadd.f32 0.5, %v5144_v7  ;;  %v5158_v11 = vmul.f32 0.5, %v10453_v58  ;;  %v3185_v28 = vmul.f32 0.5, %v12850_v44  ;;  %v13007_v41 = vpop.f32.mrf.mxu0 }
 0x2bf   : > { %9346 = vmatmul.mubr.bf16.gmra.mxu1 %v12827_v13  ;;  %10474 = vtanh.f32 %v3170_v51  ;;  %v13009_v48 = vpop.f32.mrf.mxu1  ;;  %v10455_v38 = vpop.eup %10454  ;;  %v5821_v2 = vadd.f32 0.5, %v5146_v1  ;;  %v3197_v25 = vmul.f32 0.5, %v12856_v40  ;;  %v3199_v36 = vmul.f32 0.5, %v12858_v39 }
 0x2c0   : > { %10476 = vtanh.f32 %v3182_v47  ;;  %9349 = vmatprep.mubr.msk.bf16.mxu1 %vm11313_vm0, %v14166_v23  ;;  %v10457_v14 = vpop.eup %10456  ;;  %v9272_v13 = vpack.c.bf16 %v5819_v18, %v5818_v19  ;;  %v5833_v54 = vadd.f32 0.5, %v5158_v11  ;;  %v5160_v51 = vmul.f32 0.5, %v10455_v38  ;;  %v13015_v44 = vpop.f32.mrf.mxu0 }
 0x2c1   : > { %10478 = vtanh.f32 %v3184_v55  ;;  %v13017_v29 = vpop.f32.mrf.mxu1  ;;  %v10459_v47 = vpop.eup %10458  ;;  %v9273_v53 = vpack.c.bf16 %v5821_v2, %v5820_v21  ;;  %v5159_v7 = vmul.f32 0.5, %v10457_v14  ;;  %v3198_v58 = vmul.f32 0.5, %v12867_v5  ;;  %v13027_v55 = vld [vmem:[%s11451_s18 + $0x38] sm:$0xff]  }
 0x2c2   : > { %10480 = vtanh.f32 %v3183_v49  ;;  %8282 = vst [vmem:[%s11683_s3 + $0x9e8] sm:$0xff] %v9272_v13  ;;  %v5835_v40 = vadd.f32 0.5, %v5160_v51  ;;  %v5161_v39 = vmul.f32 0.5, %v10459_v47  ;;  %v3200_v11 = vmul.f32 0.5, %v12869_v17  ;;  %v13022_v19 = vpop.f32.mrf.mxu0  ;;  %2785 = vmatmul.mubr.bf16.gmra.mxu0 %v13027_v55 }
 0x2c3   : > { %10482 = vtanh.f32 %v3185_v28  ;;  %v13024_v1 = vpop.f32.mrf.mxu1  ;;  %8283 = vst [vmem:[%s11683_s3 + $0x9f0] sm:$0xff] %v9273_v53  ;;  %v5834_v21 = vadd.f32 0.5, %v5159_v7  ;;  %v3212_v49 = vmul.f32 0.5, %v12874_v57  ;;  %v3214_v5 = vmul.f32 0.5, %v12876_v35  ;;  %2794 = vmatprep.mubr.bf16.mxu0 %v14165_v37 }
 0x2c4   : > { %10484 = vtanh.f32 %v3197_v25  ;;  %v10461_v18 = vpop.eup %10460  ;;  %v5836_v28 = vadd.f32 0.5, %v5161_v39  ;;  %v3213_v17 = vmul.f32 0.5, %v12882_v32  ;;  %v3215_v38 = vmul.f32 0.5, %v12884_v34  ;;  %v13036_v2 = vpop.f32.mrf.mxu0 }
 0x2c5   : > { %10486 = vtanh.f32 %v3199_v36  ;;  %v13038_v14 = vpop.f32.mrf.mxu1  ;;  %v10463_v13 = vpop.eup %10462  ;;  %v9280_v25 = vpack.c.bf16 %v5834_v21, %v5833_v54  ;;  %v5173_v51 = vmul.f32 0.5, %v10461_v18  ;;  %v3227_v57 = vmul.f32 0.5, %v12887_v12 }
 0x2c6   : > { %10488 = vtanh.f32 %v3198_v58  ;;  %v10465_v35 = vpop.eup %10464  ;;  %v9281_v47 = vpack.c.bf16 %v5836_v28, %v5835_v40  ;;  %v5175_v53 = vmul.f32 0.5, %v10463_v13  ;;  %v3229_v32 = vmul.f32 0.5, %v12889_v8  ;;  %v13043_v34 = vpop.f32.mrf.mxu0 }
 0x2c7   : > { %9350 = vmatmul.mubr.bf16.gmra.mxu1 %v12861_v43  ;;  %10490 = vtanh.f32 %v3200_v11  ;;  %v13045_v36 = vpop.f32.mrf.mxu1  ;;  %8290 = vst [vmem:[%s11683_s3 + $0xa24] sm:$0xff] %v9280_v25  ;;  %v5848_v54 = vadd.f32 0.5, %v5173_v51  ;;  %v5174_v39 = vmul.f32 0.5, %v10465_v35  ;;  %v3228_v12 = vmul.f32 0.5, %v12900_v22 }
 0x2c8   : > { %v10467_v7 = vpop.eup %10466  ;;  %10492 = vtanh.f32 %v3212_v49  ;;  %9353 = vmatprep.mubr.msk.bf16.mxu1 %vm11313_vm0, %v14166_v23  ;;  %8291 = vst [vmem:[%s11683_s3 + $0xa2c] sm:$0xff] %v9281_v47  ;;  %v5850_v43 = vadd.f32 0.5, %v5175_v53  ;;  %v3230_v8 = vmul.f32 0.5, %v12902_v10  ;;  %v13053_v11 = vpop.f32.mrf.mxu0  ;;  %v3242_v13 = vmul.f32 0.5, %v12905_v9  ;;  %v13064_v10 = vld [vmem:[%s11451_s18 + $0x40] sm:$0xff]  }
 0x2c9   : > { %v10469_v58 = vpop.eup %10468  ;;  %v5176_v40 = vmul.f32 0.5, %v10467_v7  ;;  %10494 = vtanh.f32 %v3214_v5  ;;  %v13055_v21 = vpop.f32.mrf.mxu1  ;;  %v5849_v28 = vadd.f32 0.5, %v5174_v39  ;;  %v3244_v35 = vmul.f32 0.5, %v12907_v62  ;;  %14170 = vst [vmem:[#allocation16_spill] sm:$0xff] %v13064_v10 }
 0x2ca   : > { %v10471_v18 = vpop.eup %10470  ;;  %v4517_v49 = vmul.f32 0.5, %v10469_v58  ;;  %10496 = vtanh.f32 %v3213_v17  ;;  %v13059_v5 = vpop.f32.mrf.mxu0  ;;  %2795 = vmatmul.mubr.bf16.gmra.mxu0 %v13064_v10 }
 0x2cb   : > { %v10473_v25 = vpop.eup %10472  ;;  %v5851_v22 = vadd.f32 0.5, %v5176_v40  ;;  %v4519_v51 = vmul.f32 0.5, %v10471_v18  ;;  %10498 = vtanh.f32 %v3215_v38  ;;  %14168 = vst [vmem:[#allocation14_spill] sm:$0xff] %v13059_v5  ;;  %v13061_v47 = vpop.f32.mrf.mxu1  ;;  %v9288_v7 = vpack.c.bf16 %v5849_v28, %v5848_v54  ;;  %2804 = vmatprep.mubr.bf16.mxu0 %v14165_v37 }
 0x2cc   : > { %14169 = vst [vmem:[#allocation15_spill] sm:$0xff] %v13061_v47  ;;  %v10475_v53 = vpop.eup %10474  ;;  %v5192_v17 = vadd.f32 0.5, %v4517_v49  ;;  %v4518_v39 = vmul.f32 0.5, %v10473_v25  ;;  %10500 = vtanh.f32 %v3227_v57  ;;  %v13068_v40 = vpop.f32.mrf.mxu0  ;;  %v3243_v54 = vmul.f32 0.5, %v12911_v60 }
 0x2cd   : > { %v10477_v9 = vpop.eup %10476  ;;  %v9289_v38 = vpack.c.bf16 %v5851_v22, %v5850_v43  ;;  %v5194_v62 = vadd.f32 0.5, %v4519_v51  ;;  %v4520_v58 = vmul.f32 0.5, %v10475_v53  ;;  %10502 = vtanh.f32 %v3229_v32  ;;  %v13070_v18 = vpop.f32.mrf.mxu1  ;;  %8298 = vst [vmem:[%s11683_s3 + $0xa60] sm:$0xff] %v9288_v7 }
 0x2ce   : > { %v10479_v47 = vpop.eup %10478  ;;  %v5193_v10 = vadd.f32 0.5, %v4518_v39  ;;  %v4532_v5 = vmul.f32 0.5, %v10477_v9  ;;  %10504 = vtanh.f32 %v3228_v12  ;;  %v3245_v32 = vmul.f32 0.5, %v12913_v59  ;;  %v13077_v43 = vpop.f32.mrf.mxu0 }
 0x2cf   : > { %v10481_v57 = vpop.eup %10480  ;;  %8299 = vst [vmem:[%s11683_s3 + $0xa68] sm:$0xff] %v9289_v38  ;;  %v5195_v28 = vadd.f32 0.5, %v4520_v58  ;;  %v4534_v49 = vmul.f32 0.5, %v10479_v47  ;;  %9354 = vmatmul.mubr.bf16.gmra.mxu1 %v12892_v30  ;;  %10506 = vtanh.f32 %v3230_v8  ;;  %v13079_v25 = vpop.f32.mrf.mxu1 }
 0x2d0   : > { %v10483_v22 = vpop.eup %10482  ;;  %v8938_v51 = vpack.c.bf16 %v5193_v10, %v5192_v17  ;;  %v5207_v53 = vadd.f32 0.5, %v4532_v5  ;;  %v4533_v12 = vmul.f32 0.5, %v10481_v57  ;;  %10508 = vtanh.f32 %v3242_v13  ;;  %9357 = vmatprep.mubr.msk.bf16.mxu1 %vm11313_vm0, %v14166_v23  ;;  %v13083_v59 = vpop.f32.mrf.mxu0  ;;  %v13096_v57 = vld [vmem:[%s11451_s18 + $0x48] sm:$0xff]  }
 0x2d1   : > { %v10485_v60 = vpop.eup %10484  ;;  %v8939_v47 = vpack.c.bf16 %v5195_v28, %v5194_v62  ;;  %v5209_v30 = vadd.f32 0.5, %v4534_v49  ;;  %v4535_v8 = vmul.f32 0.5, %v10483_v22  ;;  %10510 = vtanh.f32 %v3244_v35  ;;  %v13085_v7 = vpop.f32.mrf.mxu1 }
 0x2d2   : > { %v10487_v39 = vpop.eup %10486  ;;  %7948 = vst [vmem:[%s11683_s3 + $0x20] sm:$0xff] %v8938_v51  ;;  %v5208_v10 = vadd.f32 0.5, %v4533_v12  ;;  %v4547_v5 = vmul.f32 0.5, %v10485_v60  ;;  %10512 = vtanh.f32 %v3243_v54  ;;  %v3257_v13 = vmul.f32 0.5, %v12918_v46  ;;  %v13091_v35 = vpop.f32.mrf.mxu0  ;;  %2805 = vmatmul.mubr.bf16.gmra.mxu0 %v13096_v57 }
 0x2d3   : > { %v10489_v17 = vpop.eup %10488  ;;  %7949 = vst [vmem:[%s11683_s3 + $0x28] sm:$0xff] %v8939_v47  ;;  %v5210_v9 = vadd.f32 0.5, %v4535_v8  ;;  %v4549_v38 = vmul.f32 0.5, %v10487_v39  ;;  %10514 = vtanh.f32 %v3245_v32  ;;  %v3259_v62 = vmul.f32 0.5, %v12920_v6  ;;  %v13093_v58 = vpop.f32.mrf.mxu1  ;;  %2814 = vmatprep.mubr.bf16.mxu0 %v14165_v37 }
 0x2d4   : > { %v10491_v28 = vpop.eup %10490  ;;  %v8946_v54 = vpack.c.bf16 %v5208_v10, %v5207_v53  ;;  %v5222_v49 = vadd.f32 0.5, %v4547_v5  ;;  %v4548_v46 = vmul.f32 0.5, %v10489_v17  ;;  %10516 = vtanh.f32 %v3257_v13  ;;  %v13100_v12 = vpop.f32.mrf.mxu0 }
 0x2d5   : > { %v10493_v32 = vpop.eup %10492  ;;  %v8947_v22 = vpack.c.bf16 %v5210_v9, %v5209_v30  ;;  %v5224_v6 = vadd.f32 0.5, %v4549_v38  ;;  %v4550_v51 = vmul.f32 0.5, %v10491_v28  ;;  %10518 = vtanh.f32 %v3259_v62  ;;  %v13102_v60 = vpop.f32.mrf.mxu1 }
 0x2d6   : > { %v10495_v47 = vpop.eup %10494  ;;  %7956 = vst [vmem:[%s11683_s3 + $0x5c] sm:$0xff] %v8946_v54  ;;  %v5223_v8 = vadd.f32 0.5, %v4548_v46  ;;  %v4562_v39 = vmul.f32 0.5, %v10493_v32  ;;  %v3258_v53 = vmul.f32 0.5, %v12929_v26  ;;  %v3260_v10 = vmul.f32 0.5, %v12931_v15  ;;  %v13111_v38 = vpop.f32.mrf.mxu0 }
 0x2d7   : > { %v10497_v5 = vpop.eup %10496  ;;  %7957 = vst [vmem:[%s11683_s3 + $0x64] sm:$0xff] %v8947_v22  ;;  %v5225_v13 = vadd.f32 0.5, %v4550_v51  ;;  %v4564_v17 = vmul.f32 0.5, %v10495_v47  ;;  %9358 = vmatmul.mubr.bf16.gmra.mxu1 %v12923_v3  ;;  %v3272_v30 = vmul.f32 0.5, %v12936_v33  ;;  %v3274_v9 = vmul.f32 0.5, %v12938_v4  ;;  %v13113_v62 = vpop.f32.mrf.mxu1 }
 0x2d8   : > { %v10499_v28 = vpop.eup %10498  ;;  %v8954_v54 = vpack.c.bf16 %v5223_v8, %v5222_v49  ;;  %v5237_v26 = vadd.f32 0.5, %v4562_v39  ;;  %v4563_v46 = vmul.f32 0.5, %v10497_v5  ;;  %10520 = vtanh.f32 %v3258_v53  ;;  %9361 = vmatprep.mubr.msk.bf16.mxu1 %vm11313_vm0, %v14166_v23  ;;  %v13117_v4 = vpop.f32.mrf.mxu0 }
 0x2d9   : > { %v10501_v15 = vpop.eup %10500  ;;  %v8955_v3 = vpack.c.bf16 %v5225_v13, %v5224_v6  ;;  %v5239_v32 = vadd.f32 0.5, %v4564_v17  ;;  %v4565_v33 = vmul.f32 0.5, %v10499_v28  ;;  %10522 = vtanh.f32 %v3260_v10  ;;  %v13119_v22 = vpop.f32.mrf.mxu1  ;;  %v13130_v17 = vld [vmem:[%s11451_s18 + $0x50] sm:$0xff]  }
 0x2da   : > { %14171 = vst [vmem:[#allocation17_spill] sm:$0xff] %v13119_v22  ;;  %v10503_v51 = vpop.eup %10502  ;;  %7964 = vst [vmem:[%s11683_s3 + $0x98] sm:$0xff] %v8954_v54  ;;  %v5238_v49 = vadd.f32 0.5, %v4563_v46  ;;  %v4577_v47 = vmul.f32 0.5, %v10501_v15  ;;  %10524 = vtanh.f32 %v3272_v30  ;;  %v3273_v8 = vmul.f32 0.5, %v12942_v42  ;;  %v13125_v10 = vpop.f32.mrf.mxu0  ;;  %2815 = vmatmul.mubr.bf16.gmra.mxu0 %v13130_v17 }
 0x2db   : > { %v10505_v39 = vpop.eup %10504  ;;  %7965 = vst [vmem:[%s11683_s3 + $0xa0] sm:$0xff] %v8955_v3  ;;  %v5240_v53 = vadd.f32 0.5, %v4565_v33  ;;  %v4579_v5 = vmul.f32 0.5, %v10503_v51  ;;  %10526 = vtanh.f32 %v3274_v9  ;;  %v3275_v6 = vmul.f32 0.5, %v12944_v27  ;;  %14172 = vst [vmem:[#allocation18_spill] sm:$0xff] %v13125_v10  ;;  %v13127_v13 = vpop.f32.mrf.mxu1  ;;  %2824 = vmatprep.mubr.bf16.mxu0 %v14165_v37 }
 0x2dc   : > { %14173 = vst [vmem:[#allocation19_spill] sm:$0xff] %v13127_v13  ;;  %v10507_v28 = vpop.eup %10506  ;;  %v8962_v30 = vpack.c.bf16 %v5238_v49, %v5237_v26  ;;  %v5252_v54 = vadd.f32 0.5, %v4577_v47  ;;  %v4578_v42 = vmul.f32 0.5, %v10505_v39  ;;  %10528 = vtanh.f32 %v3273_v8  ;;  %v13134_v3 = vpop.f32.mrf.mxu0  ;;  %v14174_v49 = vld [vmem:[#allocation11_spill] sm:$0xff] }
 0x2dd   : > { %v10509_v9 = vpop.eup %10508  ;;  %v8963_v46 = vpack.c.bf16 %v5240_v53, %v5239_v32  ;;  %v5254_v27 = vadd.f32 0.5, %v4579_v5  ;;  %v4580_v15 = vmul.f32 0.5, %v10507_v28  ;;  %10530 = vtanh.f32 %v3275_v6  ;;  %v13136_v33 = vpop.f32.mrf.mxu1  ;;  %v14175_v32 = vld [vmem:[#allocation12_spill] sm:$0xff] }
 0x2de   : > { %v10511_v51 = vpop.eup %10510  ;;  %7972 = vst [vmem:[%s11683_s3 + $0xd4] sm:$0xff] %v8962_v30  ;;  %v5253_v13 = vadd.f32 0.5, %v4578_v42  ;;  %v4592_v10 = vmul.f32 0.5, %v10509_v9  ;;  %v3287_v26 = vmul.f32 0.5, %v12949_v24  ;;  %v3289_v47 = vmul.f32 0.5, %v14174_v49  ;;  %v13145_v6 = vpop.f32.mrf.mxu0 }
 0x2df   : > { %v10513_v8 = vpop.eup %10512  ;;  %7973 = vst [vmem:[%s11683_s3 + $0xdc] sm:$0xff] %v8963_v46  ;;  %v5255_v39 = vadd.f32 0.5, %v4580_v15  ;;  %v4594_v22 = vmul.f32 0.5, %v10511_v51  ;;  %9362 = vmatmul.mubr.bf16.gmra.mxu1 %v14175_v32  ;;  %v3288_v53 = vmul.f32 0.5, %v12959_v45  ;;  %v3290_v5 = vmul.f32 0.5, %v12961_v20  ;;  %v13147_v28 = vpop.f32.mrf.mxu1 }
 0x2e0   : > { %v10515_v30 = vpop.eup %10514  ;;  %v8970_v42 = vpack.c.bf16 %v5253_v13, %v5252_v54  ;;  %v5267_v24 = vadd.f32 0.5, %v4592_v10  ;;  %v4593_v9 = vmul.f32 0.5, %v10513_v8  ;;  %10532 = vtanh.f32 %v3287_v26  ;;  %9365 = vmatprep.mubr.msk.bf16.mxu1 %vm11313_vm0, %v14166_v23  ;;  %v13151_v20 = vpop.f32.mrf.mxu0 }
 0x2e1   : > { %v10517_v46 = vpop.eup %10516  ;;  %v8971_v15 = vpack.c.bf16 %v5255_v39, %v5254_v27  ;;  %v5269_v51 = vadd.f32 0.5, %v4594_v22  ;;  %v4595_v45 = vmul.f32 0.5, %v10515_v30  ;;  %10534 = vtanh.f32 %v3289_v47  ;;  %v13153_v49 = vpop.f32.mrf.mxu1  ;;  %v13164_v39 = vld [vmem:[%s11451_s18 + $0x58] sm:$0xff]  }
 0x2e2   : > { %v10519_v32 = vpop.eup %10518  ;;  %7980 = vst [vmem:[%s11683_s3 + $0x110] sm:$0xff] %v8970_v42  ;;  %v5268_v13 = vadd.f32 0.5, %v4593_v9  ;;  %v4607_v10 = vmul.f32 0.5, %v10517_v46  ;;  %10536 = vtanh.f32 %v3288_v53  ;;  %v3302_v54 = vmul.f32 0.5, %v12970_v31  ;;  %v13159_v27 = vpop.f32.mrf.mxu0  ;;  %2825 = vmatmul.mubr.bf16.gmra.mxu0 %v13164_v39 }
 0x2e3   : > { %7981 = vst [vmem:[%s11683_s3 + $0x118] sm:$0xff] %v8971_v15  ;;  %v5270_v26 = vadd.f32 0.5, %v4595_v45  ;;  %v4609_v8 = vmul.f32 0.5, %v10519_v32  ;;  %10538 = vtanh.f32 %v3290_v5  ;;  %v3304_v22 = vmul.f32 0.5, %v12972_v56  ;;  %v13161_v47 = vpop.f32.mrf.mxu1  ;;  %2834 = vmatprep.mubr.bf16.mxu0 %v14165_v37 }
 0x2e4   : > { %v8978_v30 = vpack.c.bf16 %v5268_v13, %v5267_v24  ;;  %v5282_v42 = vadd.f32 0.5, %v4607_v10  ;;  %10540 = vtanh.f32 %v3302_v54  ;;  %v3303_v31 = vmul.f32 0.5, %v12979_v0  ;;  %v13170_v46 = vpop.f32.mrf.mxu0 }
 0x2e5   : > { %v10521_v53 = vpop.eup %10520  ;;  %v8979_v5 = vpack.c.bf16 %v5270_v26, %v5269_v51  ;;  %v5284_v56 = vadd.f32 0.5, %v4609_v8  ;;  %10542 = vtanh.f32 %v3304_v22  ;;  %v3305_v9 = vmul.f32 0.5, %v12981_v61  ;;  %v13172_v15 = vpop.f32.mrf.mxu1  ;;  %v14176_v51 = vld [vmem:[#allocation13_spill] sm:$0xff] }
 0x2e6   : > { %v10523_v45 = vpop.eup %10522  ;;  %7988 = vst [vmem:[%s11683_s3 + $0x14c] sm:$0xff] %v8978_v30  ;;  %v4608_v24 = vmul.f32 0.5, %v10521_v53  ;;  %10544 = vtanh.f32 %v3303_v31  ;;  %v3317_v32 = vmul.f32 0.5, %v12986_v16  ;;  %v3319_v0 = vmul.f32 0.5, %v12988_v52  ;;  %v13181_v26 = vpop.f32.mrf.mxu0 }
 0x2e7   : > { %v10525_v13 = vpop.eup %10524  ;;  %7989 = vst [vmem:[%s11683_s3 + $0x154] sm:$0xff] %v8979_v5  ;;  %v4610_v10 = vmul.f32 0.5, %v10523_v45  ;;  %10546 = vtanh.f32 %v3305_v9  ;;  %9366 = vmatmul.mubr.bf16.gmra.mxu1 %v14176_v51  ;;  %v3318_v61 = vmul.f32 0.5, %v12998_v63  ;;  %v3320_v54 = vmul.f32 0.5, %v13000_v50  ;;  %v13183_v8 = vpop.f32.mrf.mxu1 }
 0x2e8   : > { %14177 = vst [vmem:[#allocation11_spill] sm:$0xff] %v13183_v8  ;;  %v10527_v22 = vpop.eup %10526  ;;  %v5283_v30 = vadd.f32 0.5, %v4608_v24  ;;  %v4622_v31 = vmul.f32 0.5, %v10525_v13  ;;  %10548 = vtanh.f32 %v3317_v32  ;;  %v3332_v16 = vmul.f32 0.5, %v13007_v41  ;;  %9369 = vmatprep.mubr.msk.bf16.mxu1 %vm11313_vm0, %v14166_v23  ;;  %v13189_v50 = vpop.f32.mrf.mxu0 }
 0x2e9   : > { %v10529_v52 = vpop.eup %10528  ;;  %v5285_v53 = vadd.f32 0.5, %v4610_v10  ;;  %v4624_v5 = vmul.f32 0.5, %v10527_v22  ;;  %10550 = vtanh.f32 %v3319_v0  ;;  %v3334_v63 = vmul.f32 0.5, %v13009_v48  ;;  %v13191_v9 = vpop.f32.mrf.mxu1  ;;  %v13198_v48 = vld [vmem:[%s11451_s18 + $0x60] sm:$0xff]  }
 0x2ea   : > { %v10531_v45 = vpop.eup %10530  ;;  %v8986_v24 = vpack.c.bf16 %v5283_v30, %v5282_v42  ;;  %v5297_v32 = vadd.f32 0.5, %v4622_v31  ;;  %v4623_v13 = vmul.f32 0.5, %v10529_v52  ;;  %10552 = vtanh.f32 %v3318_v61  ;;  %v13193_v10 = vpop.f32.mrf.mxu0  ;;  %2835 = vmatmul.mubr.bf16.gmra.mxu0 %v13198_v48 }
 0x2eb   : > { %v8987_v41 = vpack.c.bf16 %v5285_v53, %v5284_v56  ;;  %v5299_v51 = vadd.f32 0.5, %v4624_v5  ;;  %v4625_v8 = vmul.f32 0.5, %v10531_v45  ;;  %10554 = vtanh.f32 %v3320_v54  ;;  %v13195_v0 = vpop.f32.mrf.mxu1  ;;  %2844 = vmatprep.mubr.bf16.mxu0 %v14165_v37 }
 0x2ec   : > { %7996 = vst [vmem:[%s11683_s3 + $0x188] sm:$0xff] %v8986_v24  ;;  %v5298_v22 = vadd.f32 0.5, %v4623_v13  ;;  %10556 = vtanh.f32 %v3332_v16  ;;  %v3333_v42 = vmul.f32 0.5, %v13015_v44  ;;  %v3335_v61 = vmul.f32 0.5, %v13017_v29  ;;  %v13208_v52 = vpop.f32.mrf.mxu0 }
 0x2ed   : > { %v10533_v56 = vpop.eup %10532  ;;  %7997 = vst [vmem:[%s11683_s3 + $0x190] sm:$0xff] %v8987_v41  ;;  %v5300_v54 = vadd.f32 0.5, %v4625_v8  ;;  %10558 = vtanh.f32 %v3334_v63  ;;  %v3347_v30 = vmul.f32 0.5, %v13022_v19  ;;  %v3349_v31 = vmul.f32 0.5, %v13024_v1  ;;  %v13210_v53 = vpop.f32.mrf.mxu1 }
 0x2ee   : > { %v10535_v16 = vpop.eup %10534  ;;  %v8994_v5 = vpack.c.bf16 %v5298_v22, %v5297_v32  ;;  %v4637_v44 = vmul.f32 0.5, %v10533_v56  ;;  %10560 = vtanh.f32 %v3333_v42  ;;  %v3348_v29 = vmul.f32 0.5, %v13036_v2  ;;  %v13215_v1 = vpop.f32.mrf.mxu0 }
 0x2ef   : > { %v10537_v45 = vpop.eup %10536  ;;  %v8995_v24 = vpack.c.bf16 %v5300_v54, %v5299_v51  ;;  %v4639_v8 = vmul.f32 0.5, %v10535_v16  ;;  %10562 = vtanh.f32 %v3335_v61  ;;  %9370 = vmatmul.mubr.bf16.gmra.mxu1 %v13027_v55  ;;  %v3350_v19 = vmul.f32 0.5, %v13038_v14  ;;  %v13217_v63 = vpop.f32.mrf.mxu1 }
 0x2f0   : > { %v10539_v13 = vpop.eup %10538  ;;  %8004 = vst [vmem:[%s11683_s3 + $0x1c4] sm:$0xff] %v8994_v5  ;;  %v5312_v32 = vadd.f32 0.5, %v4637_v44  ;;  %v4638_v41 = vmul.f32 0.5, %v10537_v45  ;;  %10564 = vtanh.f32 %v3347_v30  ;;  %v3362_v2 = vmul.f32 0.5, %v13043_v34  ;;  %9373 = vmatprep.mubr.msk.bf16.mxu1 %vm11313_vm0, %v14166_v23  ;;  %v13225_v42 = vpop.f32.mrf.mxu0 }
 0x2f1   : > { %v10541_v51 = vpop.eup %10540  ;;  %8005 = vst [vmem:[%s11683_s3 + $0x1cc] sm:$0xff] %v8995_v24  ;;  %v5314_v22 = vadd.f32 0.5, %v4639_v8  ;;  %v4640_v55 = vmul.f32 0.5, %v10539_v13  ;;  %10566 = vtanh.f32 %v3349_v31  ;;  %v3364_v14 = vmul.f32 0.5, %v13045_v36  ;;  %v13227_v61 = vpop.f32.mrf.mxu1  ;;  %v13236_v36 = vld [vmem:[%s11451_s18 + $0x68] sm:$0xff]  }
 0x2f2   : > { %14178 = vst [vmem:[#allocation12_spill] sm:$0xff] %v13227_v61  ;;  %v10543_v56 = vpop.eup %10542  ;;  %v5313_v54 = vadd.f32 0.5, %v4638_v41  ;;  %v4652_v30 = vmul.f32 0.5, %v10541_v51  ;;  %10568 = vtanh.f32 %v3348_v29  ;;  %v3363_v34 = vmul.f32 0.5, %v13053_v11  ;;  %v13231_v31 = vpop.f32.mrf.mxu0  ;;  %2845 = vmatmul.mubr.bf16.gmra.mxu0 %v13236_v36 }
 0x2f3   : > { %v10545_v16 = vpop.eup %10544  ;;  %v5315_v5 = vadd.f32 0.5, %v4640_v55  ;;  %v4654_v44 = vmul.f32 0.5, %v10543_v56  ;;  %10570 = vtanh.f32 %v3350_v19  ;;  %v3365_v45 = vmul.f32 0.5, %v13055_v21  ;;  %14179 = vst [vmem:[#allocation13_spill] sm:$0xff] %v13231_v31  ;;  %v13233_v24 = vpop.f32.mrf.mxu1  ;;  %2854 = vmatprep.mubr.bf16.mxu0 %v14165_v37 }
 0x2f4   : > { %14180 = vst [vmem:[#allocation20_spill] sm:$0xff] %v13233_v24  ;;  %v10547_v8 = vpop.eup %10546  ;;  %v9002_v13 = vpack.c.bf16 %v5313_v54, %v5312_v32  ;;  %v5327_v29 = vadd.f32 0.5, %v4652_v30  ;;  %v4653_v41 = vmul.f32 0.5, %v10545_v16  ;;  %10572 = vtanh.f32 %v3362_v2  ;;  %v13240_v55 = vpop.f32.mrf.mxu0  ;;  %v14181_v32 = vld [vmem:[#allocation14_spill] sm:$0xff] }
 0x2f5   : > { %v10549_v11 = vpop.eup %10548  ;;  %v9003_v19 = vpack.c.bf16 %v5315_v5, %v5314_v22  ;;  %v5329_v21 = vadd.f32 0.5, %v4654_v44  ;;  %v4655_v51 = vmul.f32 0.5, %v10547_v8  ;;  %10574 = vtanh.f32 %v3364_v14  ;;  %v13242_v56 = vpop.f32.mrf.mxu1  ;;  %v14182_v22 = vld [vmem:[#allocation15_spill] sm:$0xff]  ;;  %v14183_v44 = vld [vmem:[#allocation16_spill] sm:$0xff] }
 0x2f6   : > { %v10551_v24 = vpop.eup %10550  ;;  %8012 = vst [vmem:[%s11683_s3 + $0x200] sm:$0xff] %v9002_v13  ;;  %v5328_v31 = vadd.f32 0.5, %v4653_v41  ;;  %v4667_v61 = vmul.f32 0.5, %v10549_v11  ;;  %10576 = vtanh.f32 %v3363_v34  ;;  %v3377_v54 = vmul.f32 0.5, %v14181_v32  ;;  %v13249_v14 = vpop.f32.mrf.mxu0 }
 0x2f7   : > { %v10553_v2 = vpop.eup %10552  ;;  %8013 = vst [vmem:[%s11683_s3 + $0x208] sm:$0xff] %v9003_v19  ;;  %v5330_v30 = vadd.f32 0.5, %v4655_v51  ;;  %v4669_v16 = vmul.f32 0.5, %v10551_v24  ;;  %10578 = vtanh.f32 %v3365_v45  ;;  %v3379_v5 = vmul.f32 0.5, %v14182_v22  ;;  %9374 = vmatmul.mubr.bf16.gmra.mxu1 %v14183_v44  ;;  %v13251_v8 = vpop.f32.mrf.mxu1 }
 0x2f8   : > { %14184 = vst [vmem:[#allocation14_spill] sm:$0xff] %v13251_v8  ;;  %v10555_v13 = vpop.eup %10554  ;;  %v9010_v41 = vpack.c.bf16 %v5328_v31, %v5327_v29  ;;  %v5342_v11 = vadd.f32 0.5, %v4667_v61  ;;  %v4668_v34 = vmul.f32 0.5, %v10553_v2  ;;  %10580 = vtanh.f32 %v3377_v54  ;;  %9377 = vmatprep.mubr.msk.bf16.mxu1 %vm11313_vm0, %v14166_v23  ;;  %v13255_v32 = vpop.f32.mrf.mxu0 }
 0x2f9   : > { %v10557_v24 = vpop.eup %10556  ;;  %v9011_v45 = vpack.c.bf16 %v5330_v30, %v5329_v21  ;;  %v5344_v19 = vadd.f32 0.5, %v4669_v16  ;;  %v4670_v51 = vmul.f32 0.5, %v10555_v13  ;;  %10582 = vtanh.f32 %v3379_v5  ;;  %14185 = vst [vmem:[#allocation15_spill] sm:$0xff] %v13255_v32  ;;  %v13257_v22 = vpop.f32.mrf.mxu1 }
 0x2fa   : > { %14186 = vst [vmem:[#allocation16_spill] sm:$0xff] %v13257_v22  ;;  %v10559_v44 = vpop.eup %10558  ;;  %8020 = vst [vmem:[%s11683_s3 + $0x23c] sm:$0xff] %v9010_v41  ;;  %v5343_v31 = vadd.f32 0.5, %v4668_v34  ;;  %v4682_v61 = vmul.f32 0.5, %v10557_v24  ;;  %v3378_v29 = vmul.f32 0.5, %v13068_v40  ;;  %v3380_v54 = vmul.f32 0.5, %v13070_v18  ;;  %v13265_v5 = vpop.f32.mrf.mxu0 }
 0x2fb   : > { %v10561_v2 = vpop.eup %10560  ;;  %8021 = vst [vmem:[%s11683_s3 + $0x244] sm:$0xff] %v9011_v45  ;;  %v5345_v8 = vadd.f32 0.5, %v4670_v51  ;;  %v4684_v21 = vmul.f32 0.5, %v10559_v44  ;;  %v3392_v30 = vmul.f32 0.5, %v13077_v43  ;;  %v3394_v16 = vmul.f32 0.5, %v13079_v25  ;;  %14187 = vst [vmem:[#allocation21_spill] sm:$0xff] %v13265_v5  ;;  %v13267_v13 = vpop.f32.mrf.mxu1 }
 0x2fc   : > { %14188 = vst [vmem:[#allocation22_spill] sm:$0xff] %v13267_v13  ;;  %v13270_v22 = vld [vmem:[%s11451_s18 + $0x70] sm:$0xff]   ;;  %v10563_v40 = vpop.eup %10562  ;;  %v9018_v41 = vpack.c.bf16 %v5343_v31, %v5342_v11  ;;  %v5357_v18 = vadd.f32 0.5, %v4682_v61  ;;  %v4683_v34 = vmul.f32 0.5, %v10561_v2  ;;  %10584 = vtanh.f32 %v3378_v29  ;;  %v13274_v51 = vpop.f32.mrf.mxu0 }
 0x2fd   : > { %2855 = vmatmul.mubr.bf16.gmra.mxu0 %v13270_v22  ;;  %v10565_v43 = vpop.eup %10564  ;;  %v9019_v24 = vpack.c.bf16 %v5345_v8, %v5344_v19  ;;  %v5359_v25 = vadd.f32 0.5, %v4684_v21  ;;  %v4685_v45 = vmul.f32 0.5, %v10563_v40  ;;  %10586 = vtanh.f32 %v3380_v54  ;;  %v13276_v44 = vpop.f32.mrf.mxu1 }
 0x2fe   : > { %2864 = vmatprep.mubr.bf16.mxu0 %v14165_v37  ;;  %v10567_v13 = vpop.eup %10566  ;;  %8028 = vst [vmem:[%s11683_s3 + $0x278] sm:$0xff] %v9018_v41  ;;  %v5358_v5 = vadd.f32 0.5, %v4683_v34  ;;  %v4697_v32 = vmul.f32 0.5, %v10565_v43  ;;  %10588 = vtanh.f32 %v3392_v30  ;;  %v3393_v11 = vmul.f32 0.5, %v13083_v59  ;;  %v13283_v19 = vpop.f32.mrf.mxu0 }
 0x2ff   : > { %v10569_v31 = vpop.eup %10568  ;;  %8029 = vst [vmem:[%s11683_s3 + $0x280] sm:$0xff] %v9019_v24  ;;  %v5360_v61 = vadd.f32 0.5, %v4685_v45  ;;  %v4699_v29 = vmul.f32 0.5, %v10567_v13  ;;  %10590 = vtanh.f32 %v3394_v16  ;;  %v3395_v8 = vmul.f32 0.5, %v13085_v7  ;;  %9378 = vmatmul.mubr.bf16.gmra.mxu1 %v13096_v57  ;;  %v13285_v54 = vpop.f32.mrf.mxu1 }
 0x300   : > { %v10571_v2 = vpop.eup %10570  ;;  %v9026_v21 = vpack.c.bf16 %v5358_v5, %v5357_v18  ;;  %v5372_v40 = vadd.f32 0.5, %v4697_v32  ;;  %v4698_v30 = vmul.f32 0.5, %v10569_v31  ;;  %10592 = vtanh.f32 %v3393_v11  ;;  %9381 = vmatprep.mubr.msk.bf16.mxu1 %vm11313_vm0, %v14166_v23  ;;  %v13289_v57 = vpop.f32.mrf.mxu0 }
 0x301   : > { %v10573_v59 = vpop.eup %10572  ;;  %v9027_v16 = vpack.c.bf16 %v5360_v61, %v5359_v25  ;;  %v5374_v13 = vadd.f32 0.5, %v4699_v29  ;;  %v4700_v7 = vmul.f32 0.5, %v10571_v2  ;;  %10594 = vtanh.f32 %v3395_v8  ;;  %v13291_v41 = vpop.f32.mrf.mxu1  ;;  %v13304_v8 = vld [vmem:[%s11451_s18 + $0x78] sm:$0xff]  }
 0x302   : > { %v10575_v34 = vpop.eup %10574  ;;  %8036 = vst [vmem:[%s11683_s3 + $0x2b4] sm:$0xff] %v9026_v21  ;;  %v5373_v5 = vadd.f32 0.5, %v4698_v30  ;;  %v4712_v32 = vmul.f32 0.5, %v10573_v59  ;;  %v3407_v18 = vmul.f32 0.5, %v13091_v35  ;;  %v3409_v43 = vmul.f32 0.5, %v13093_v58  ;;  %v13299_v61 = vpop.f32.mrf.mxu0 }
 0x303   : > { %v10577_v24 = vpop.eup %10576  ;;  %8037 = vst [vmem:[%s11683_s3 + $0x2bc] sm:$0xff] %v9027_v16  ;;  %v5375_v45 = vadd.f32 0.5, %v4700_v7  ;;  %v4714_v25 = vmul.f32 0.5, %v10575_v34  ;;  %v3408_v11 = vmul.f32 0.5, %v13100_v12  ;;  %v3410_v31 = vmul.f32 0.5, %v13102_v60  ;;  %14189 = vst [vmem:[#allocation23_spill] sm:$0xff] %v13299_v61  ;;  %v13301_v29 = vpop.f32.mrf.mxu1 }
 0x304   : > { %14190 = vst [vmem:[#allocation24_spill] sm:$0xff] %v13301_v29  ;;  %v10579_v35 = vpop.eup %10578  ;;  %v9034_v2 = vpack.c.bf16 %v5373_v5, %v5372_v40  ;;  %v5387_v58 = vadd.f32 0.5, %v4712_v32  ;;  %v4713_v21 = vmul.f32 0.5, %v10577_v24  ;;  %10596 = vtanh.f32 %v3407_v18  ;;  %v13308_v16 = vpop.f32.mrf.mxu0 }
 0x305   : > { %2865 = vmatmul.mubr.bf16.gmra.mxu0 %v13304_v8  ;;  %v10581_v12 = vpop.eup %10580  ;;  %v9035_v30 = vpack.c.bf16 %v5375_v45, %v5374_v13  ;;  %v5389_v60 = vadd.f32 0.5, %v4714_v25  ;;  %v4715_v59 = vmul.f32 0.5, %v10579_v35  ;;  %10598 = vtanh.f32 %v3409_v43  ;;  %v13310_v7 = vpop.f32.mrf.mxu1 }
 0x306   : > { %2874 = vmatprep.mubr.bf16.mxu0 %v14165_v37  ;;  %v10583_v34 = vpop.eup %10582  ;;  %8044 = vst [vmem:[%s11683_s3 + $0x2f0] sm:$0xff] %v9034_v2  ;;  %v5388_v29 = vadd.f32 0.5, %v4713_v21  ;;  %v4727_v61 = vmul.f32 0.5, %v10581_v12  ;;  %10600 = vtanh.f32 %v3408_v11  ;;  %v3422_v40 = vmul.f32 0.5, %v13111_v38  ;;  %v13317_v18 = vpop.f32.mrf.mxu0  ;;  %v14193_v21 = vld [vmem:[#allocation19_spill] sm:$0xff] }
 0x307   : > { %8045 = vst [vmem:[%s11683_s3 + $0x2f8] sm:$0xff] %v9035_v30  ;;  %v5390_v5 = vadd.f32 0.5, %v4715_v59  ;;  %v4729_v32 = vmul.f32 0.5, %v10583_v34  ;;  %10602 = vtanh.f32 %v3410_v31  ;;  %v3424_v13 = vmul.f32 0.5, %v13113_v62  ;;  %9382 = vmatmul.mubr.bf16.gmra.mxu1 %v13130_v17  ;;  %v13319_v43 = vpop.f32.mrf.mxu1  ;;  %v14191_v62 = vld [vmem:[#allocation17_spill] sm:$0xff] }
 0x308   : > { %v9042_v24 = vpack.c.bf16 %v5388_v29, %v5387_v58  ;;  %v5402_v45 = vadd.f32 0.5, %v4727_v61  ;;  %10604 = vtanh.f32 %v3422_v40  ;;  %v3423_v25 = vmul.f32 0.5, %v13117_v4  ;;  %9385 = vmatprep.mubr.msk.bf16.mxu1 %vm11313_vm0, %v14166_v23  ;;  %v13325_v35 = vpop.f32.mrf.mxu0  ;;  %v14192_v4 = vld [vmem:[#allocation18_spill] sm:$0xff] }
 0x309   : > { %v10585_v38 = vpop.eup %10584  ;;  %v9043_v11 = vpack.c.bf16 %v5390_v5, %v5389_v60  ;;  %v5404_v31 = vadd.f32 0.5, %v4729_v32  ;;  %10606 = vtanh.f32 %v3424_v13  ;;  %v3425_v17 = vmul.f32 0.5, %v14191_v62  ;;  %v13327_v2 = vpop.f32.mrf.mxu1  ;;  %v13340_v32 = vld [vmem:[%s11451_s18 + $0x80] sm:$0xff]  }
 0x30a   : > { %v10587_v29 = vpop.eup %10586  ;;  %8052 = vst [vmem:[%s11683_s3 + $0x32c] sm:$0xff] %v9042_v24  ;;  %v4728_v61 = vmul.f32 0.5, %v10585_v38  ;;  %10608 = vtanh.f32 %v3423_v25  ;;  %v3437_v58 = vmul.f32 0.5, %v14192_v4  ;;  %v3439_v12 = vmul.f32 0.5, %v14193_v21  ;;  %v13335_v40 = vpop.f32.mrf.mxu0 }
 0x30b   : > { %v10589_v30 = vpop.eup %10588  ;;  %8053 = vst [vmem:[%s11683_s3 + $0x334] sm:$0xff] %v9043_v11  ;;  %v4730_v60 = vmul.f32 0.5, %v10587_v29  ;;  %10610 = vtanh.f32 %v3425_v17  ;;  %v3438_v59 = vmul.f32 0.5, %v13134_v3  ;;  %v3440_v34 = vmul.f32 0.5, %v13136_v33  ;;  %v13337_v5 = vpop.f32.mrf.mxu1 }
 0x30c   : > { %14194 = vst [vmem:[#allocation17_spill] sm:$0xff] %v13337_v5  ;;  %v10591_v13 = vpop.eup %10590  ;;  %v5403_v24 = vadd.f32 0.5, %v4728_v61  ;;  %v4742_v25 = vmul.f32 0.5, %v10589_v30  ;;  %10612 = vtanh.f32 %v3437_v58  ;;  %v3452_v38 = vmul.f32 0.5, %v13145_v6  ;;  %v13346_v17 = vpop.f32.mrf.mxu0 }
 0x30d   : > { %2875 = vmatmul.mubr.bf16.gmra.mxu0 %v13340_v32  ;;  %v10593_v11 = vpop.eup %10592  ;;  %v5405_v3 = vadd.f32 0.5, %v4730_v60  ;;  %v4744_v62 = vmul.f32 0.5, %v10591_v13  ;;  %10614 = vtanh.f32 %v3439_v12  ;;  %v3454_v33 = vmul.f32 0.5, %v13147_v28  ;;  %v13348_v29 = vpop.f32.mrf.mxu1 }
 0x30e   : > { %2884 = vmatprep.mubr.bf16.mxu0 %v14165_v37  ;;  %v10595_v4 = vpop.eup %10594  ;;  %v9050_v21 = vpack.c.bf16 %v5403_v24, %v5402_v45  ;;  %v5417_v61 = vadd.f32 0.5, %v4742_v25  ;;  %v4743_v30 = vmul.f32 0.5, %v10593_v11  ;;  %10616 = vtanh.f32 %v3438_v59  ;;  %v13351_v12 = vpop.f32.mrf.mxu0 }
 0x30f   : > { %v9051_v6 = vpack.c.bf16 %v5405_v3, %v5404_v31  ;;  %v5419_v58 = vadd.f32 0.5, %v4744_v62  ;;  %v4745_v5 = vmul.f32 0.5, %v10595_v4  ;;  %10618 = vtanh.f32 %v3440_v34  ;;  %9386 = vmatmul.mubr.bf16.gmra.mxu1 %v13164_v39  ;;  %v13353_v60 = vpop.f32.mrf.mxu1  ;;  %v13374_v4 = vld [vmem:[%s11451_s18 + $0x88] sm:$0xff]  }
 0x310   : > { %8060 = vst [vmem:[%s11683_s3 + $0x368] sm:$0xff] %v9050_v21  ;;  %v5418_v28 = vadd.f32 0.5, %v4743_v30  ;;  %10620 = vtanh.f32 %v3452_v38  ;;  %v3453_v13 = vmul.f32 0.5, %v13151_v20  ;;  %v3455_v45 = vmul.f32 0.5, %v13153_v49  ;;  %9389 = vmatprep.mubr.msk.bf16.mxu1 %vm11313_vm0, %v14166_v23  ;;  %v13363_v24 = vpop.f32.mrf.mxu0 }
 0x311   : > { %v10597_v31 = vpop.eup %10596  ;;  %8061 = vst [vmem:[%s11683_s3 + $0x370] sm:$0xff] %v9051_v6  ;;  %v5420_v59 = vadd.f32 0.5, %v4745_v5  ;;  %10622 = vtanh.f32 %v3454_v33  ;;  %v3467_v39 = vmul.f32 0.5, %v13159_v27  ;;  %v3469_v34 = vmul.f32 0.5, %v13161_v47  ;;  %v13365_v25 = vpop.f32.mrf.mxu1 }
 0x312   : > { %v10599_v20 = vpop.eup %10598  ;;  %v9058_v38 = vpack.c.bf16 %v5418_v28, %v5417_v61  ;;  %v4757_v49 = vmul.f32 0.5, %v10597_v31  ;;  %10624 = vtanh.f32 %v3453_v13  ;;  %v3468_v11 = vmul.f32 0.5, %v13170_v46  ;;  %v13369_v33 = vpop.f32.mrf.mxu0  ;;  %v14195_v28 = vld [vmem:[#allocation11_spill] sm:$0xff] }
 0x313   : > { %v10601_v3 = vpop.eup %10600  ;;  %v9059_v62 = vpack.c.bf16 %v5420_v59, %v5419_v58  ;;  %v4759_v5 = vmul.f32 0.5, %v10599_v20  ;;  %10626 = vtanh.f32 %v3455_v45  ;;  %v3470_v27 = vmul.f32 0.5, %v13172_v15  ;;  %v13371_v47 = vpop.f32.mrf.mxu1 }
 0x314   : > { %v10603_v21 = vpop.eup %10602  ;;  %8068 = vst [vmem:[%s11683_s3 + $0x3a4] sm:$0xff] %v9058_v38  ;;  %v5432_v61 = vadd.f32 0.5, %v4757_v49  ;;  %v4758_v30 = vmul.f32 0.5, %v10601_v3  ;;  %10628 = vtanh.f32 %v3467_v39  ;;  %v3482_v46 = vmul.f32 0.5, %v13181_v26  ;;  %v13382_v45 = vpop.f32.mrf.mxu0 }
 0x315   : > { %2885 = vmatmul.mubr.bf16.gmra.mxu0 %v13374_v4  ;;  %v10605_v6 = vpop.eup %10604  ;;  %8069 = vst [vmem:[%s11683_s3 + $0x3ac] sm:$0xff] %v9059_v62  ;;  %v5434_v15 = vadd.f32 0.5, %v4759_v5  ;;  %v4760_v58 = vmul.f32 0.5, %v10603_v21  ;;  %10630 = vtanh.f32 %v3469_v34  ;;  %v3484_v13 = vmul.f32 0.5, %v14195_v28  ;;  %v13384_v31 = vpop.f32.mrf.mxu1 }
 0x316   : > { %2894 = vmatprep.mubr.bf16.mxu0 %v14165_v37  ;;  %v10607_v59 = vpop.eup %10606  ;;  %v5433_v20 = vadd.f32 0.5, %v4758_v30  ;;  %v4772_v38 = vmul.f32 0.5, %v10605_v6  ;;  %10632 = vtanh.f32 %v3468_v11  ;;  %v3483_v39 = vmul.f32 0.5, %v13189_v50  ;;  %v13389_v34 = vpop.f32.mrf.mxu0 }
 0x317   : > { %v10609_v26 = vpop.eup %10608  ;;  %v5435_v49 = vadd.f32 0.5, %v4760_v58  ;;  %v4774_v3 = vmul.f32 0.5, %v10607_v59  ;;  %10634 = vtanh.f32 %v3470_v27  ;;  %v3485_v62 = vmul.f32 0.5, %v13191_v9  ;;  %9390 = vmatmul.mubr.bf16.gmra.mxu1 %v13198_v48  ;;  %v13391_v5 = vpop.f32.mrf.mxu1 }
 0x318   : > { %14196 = vst [vmem:[#allocation18_spill] sm:$0xff] %v13391_v5  ;;  %v10611_v21 = vpop.eup %10610  ;;  %v9066_v28 = vpack.c.bf16 %v5433_v20, %v5432_v61  ;;  %v5447_v30 = vadd.f32 0.5, %v4772_v38  ;;  %v4773_v6 = vmul.f32 0.5, %v10609_v26  ;;  %10636 = vtanh.f32 %v3482_v46  ;;  %9393 = vmatprep.mubr.msk.bf16.mxu1 %vm11313_vm0, %v14166_v23  ;;  %v13395_v48 = vpop.f32.mrf.mxu0 }
 0x319   : > { %v10613_v50 = vpop.eup %10612  ;;  %v9067_v11 = vpack.c.bf16 %v5435_v49, %v5434_v15  ;;  %v5449_v27 = vadd.f32 0.5, %v4774_v3  ;;  %v4775_v9 = vmul.f32 0.5, %v10611_v21  ;;  %10638 = vtanh.f32 %v3484_v13  ;;  %v13397_v58 = vpop.f32.mrf.mxu1  ;;  %v13408_v3 = vld [vmem:[%s11451_s18 + $0x90] sm:$0xff]  }
 0x31a   : > { %v10615_v59 = vpop.eup %10614  ;;  %8076 = vst [vmem:[%s11683_s3 + $0x3e0] sm:$0xff] %v9066_v28  ;;  %v5448_v61 = vadd.f32 0.5, %v4773_v6  ;;  %v4787_v20 = vmul.f32 0.5, %v10613_v50  ;;  %10640 = vtanh.f32 %v3483_v39  ;;  %v3497_v46 = vmul.f32 0.5, %v13193_v10  ;;  %v13403_v13 = vpop.f32.mrf.mxu0 }
 0x31b   : > { %v10617_v38 = vpop.eup %10616  ;;  %8077 = vst [vmem:[%s11683_s3 + $0x3e8] sm:$0xff] %v9067_v11  ;;  %v5450_v26 = vadd.f32 0.5, %v4775_v9  ;;  %v4789_v5 = vmul.f32 0.5, %v10615_v59  ;;  %10642 = vtanh.f32 %v3485_v62  ;;  %v3499_v15 = vmul.f32 0.5, %v13195_v0  ;;  %14197 = vst [vmem:[#allocation19_spill] sm:$0xff] %v13403_v13  ;;  %v13405_v49 = vpop.f32.mrf.mxu1 }
 0x31c   : > { %14198 = vst [vmem:[#allocation11_spill] sm:$0xff] %v13405_v49  ;;  %v10619_v21 = vpop.eup %10618  ;;  %v9074_v39 = vpack.c.bf16 %v5448_v61, %v5447_v30  ;;  %v5462_v28 = vadd.f32 0.5, %v4787_v20  ;;  %v4788_v10 = vmul.f32 0.5, %v10617_v38  ;;  %10644 = vtanh.f32 %v3497_v46  ;;  %v13412_v11 = vpop.f32.mrf.mxu0 }
 0x31d   : > { %2895 = vmatmul.mubr.bf16.gmra.mxu0 %v13408_v3  ;;  %v10621_v62 = vpop.eup %10620  ;;  %v9075_v6 = vpack.c.bf16 %v5450_v26, %v5449_v27  ;;  %v5464_v0 = vadd.f32 0.5, %v4789_v5  ;;  %v4790_v50 = vmul.f32 0.5, %v10619_v21  ;;  %10646 = vtanh.f32 %v3499_v15  ;;  %v13414_v9 = vpop.f32.mrf.mxu1 }
 0x31e   : > { %2904 = vmatprep.mubr.bf16.mxu0 %v14165_v37  ;;  %v10623_v59 = vpop.eup %10622  ;;  %8084 = vst [vmem:[%s11683_s3 + $0x41c] sm:$0xff] %v9074_v39  ;;  %v5463_v49 = vadd.f32 0.5, %v4788_v10  ;;  %v4802_v13 = vmul.f32 0.5, %v10621_v62  ;;  %v3498_v30 = vmul.f32 0.5, %v13208_v52  ;;  %v3500_v61 = vmul.f32 0.5, %v13210_v53  ;;  %v13423_v26 = vpop.f32.mrf.mxu0 }
 0x31f   : > { %v10625_v20 = vpop.eup %10624  ;;  %8085 = vst [vmem:[%s11683_s3 + $0x424] sm:$0xff] %v9075_v6  ;;  %v5465_v46 = vadd.f32 0.5, %v4790_v50  ;;  %v4804_v38 = vmul.f32 0.5, %v10623_v59  ;;  %v3512_v5 = vmul.f32 0.5, %v13215_v1  ;;  %v3514_v27 = vmul.f32 0.5, %v13217_v63  ;;  %9394 = vmatmul.mubr.bf16.gmra.mxu1 %v13236_v36  ;;  %v13425_v15 = vpop.f32.mrf.mxu1 }
 0x320   : > { %14199 = vst [vmem:[#allocation25_spill] sm:$0xff] %v13425_v15  ;;  %v10627_v21 = vpop.eup %10626  ;;  %v9082_v39 = vpack.c.bf16 %v5463_v49, %v5462_v28  ;;  %v5477_v52 = vadd.f32 0.5, %v4802_v13  ;;  %v4803_v10 = vmul.f32 0.5, %v10625_v20  ;;  %10648 = vtanh.f32 %v3498_v30  ;;  %9397 = vmatprep.mubr.msk.bf16.mxu1 %vm11313_vm0, %v14166_v23  ;;  %v13429_v36 = vpop.f32.mrf.mxu0 }
 0x321   : > { %v10629_v53 = vpop.eup %10628  ;;  %v9083_v1 = vpack.c.bf16 %v5465_v46, %v5464_v0  ;;  %v5479_v62 = vadd.f32 0.5, %v4804_v38  ;;  %v4805_v63 = vmul.f32 0.5, %v10627_v21  ;;  %10650 = vtanh.f32 %v3500_v61  ;;  %14200 = vst [vmem:[#allocation26_spill] sm:$0xff] %v13429_v36  ;;  %v13431_v6 = vpop.f32.mrf.mxu1  ;;  %v14202_v0 = vld [vmem:[#allocation12_spill] sm:$0xff] }
 0x322   : > { %14201 = vst [vmem:[#allocation27_spill] sm:$0xff] %v13431_v6  ;;  %v10631_v50 = vpop.eup %10630  ;;  %8092 = vst [vmem:[%s11683_s3 + $0x458] sm:$0xff] %v9082_v39  ;;  %v5478_v49 = vadd.f32 0.5, %v4803_v10  ;;  %v4817_v13 = vmul.f32 0.5, %v10629_v53  ;;  %10652 = vtanh.f32 %v3512_v5  ;;  %v3513_v28 = vmul.f32 0.5, %v13225_v42  ;;  %v13437_v61 = vpop.f32.mrf.mxu0  ;;  %v13442_v21 = vld [vmem:[%s11451_s18 + $0x98] sm:$0xff]  }
 0x323   : > { %v10633_v59 = vpop.eup %10632  ;;  %8093 = vst [vmem:[%s11683_s3 + $0x460] sm:$0xff] %v9083_v1  ;;  %v5480_v30 = vadd.f32 0.5, %v4805_v63  ;;  %v4819_v20 = vmul.f32 0.5, %v10631_v50  ;;  %10654 = vtanh.f32 %v3514_v27  ;;  %v3515_v46 = vmul.f32 0.5, %v14202_v0  ;;  %14203 = vst [vmem:[#allocation12_spill] sm:$0xff] %v13437_v61  ;;  %v13439_v38 = vpop.f32.mrf.mxu1 }
 0x324   : > { %14204 = vst [vmem:[#allocation28_spill] sm:$0xff] %v13439_v38  ;;  %v10635_v39 = vpop.eup %10634  ;;  %v9090_v5 = vpack.c.bf16 %v5478_v49, %v5477_v52  ;;  %v5492_v10 = vadd.f32 0.5, %v4817_v13  ;;  %v4818_v42 = vmul.f32 0.5, %v10633_v59  ;;  %10656 = vtanh.f32 %v3513_v28  ;;  %v13446_v50 = vpop.f32.mrf.mxu0  ;;  %v14205_v52 = vld [vmem:[#allocation13_spill] sm:$0xff]  ;;  %v14206_v13 = vld [vmem:[#allocation20_spill] sm:$0xff] }
 0x325   : > { %2905 = vmatmul.mubr.bf16.gmra.mxu0 %v13442_v21  ;;  %v10637_v27 = vpop.eup %10636  ;;  %v9091_v53 = vpack.c.bf16 %v5480_v30, %v5479_v62  ;;  %v5494_v1 = vadd.f32 0.5, %v4819_v20  ;;  %v4820_v63 = vmul.f32 0.5, %v10635_v39  ;;  %10658 = vtanh.f32 %v3515_v46  ;;  %v13448_v0 = vpop.f32.mrf.mxu1 }
 0x326   : > { %2914 = vmatprep.mubr.bf16.mxu0 %v14165_v37  ;;  %v10639_v38 = vpop.eup %10638  ;;  %8100 = vst [vmem:[%s11683_s3 + $0x494] sm:$0xff] %v9090_v5  ;;  %v5493_v61 = vadd.f32 0.5, %v4818_v42  ;;  %v4832_v6 = vmul.f32 0.5, %v10637_v27  ;;  %v3527_v49 = vmul.f32 0.5, %v14205_v52  ;;  %v3529_v28 = vmul.f32 0.5, %v14206_v13  ;;  %v13457_v20 = vpop.f32.mrf.mxu0 }
 0x327   : > { %v10641_v59 = vpop.eup %10640  ;;  %8101 = vst [vmem:[%s11683_s3 + $0x49c] sm:$0xff] %v9091_v53  ;;  %v5495_v36 = vadd.f32 0.5, %v4820_v63  ;;  %v4834_v15 = vmul.f32 0.5, %v10639_v38  ;;  %v3528_v62 = vmul.f32 0.5, %v13240_v55  ;;  %v3530_v30 = vmul.f32 0.5, %v13242_v56  ;;  %9398 = vmatmul.mubr.bf16.gmra.mxu1 %v13270_v22  ;;  %v13459_v46 = vpop.f32.mrf.mxu1 }
 0x328   : > { %v10643_v39 = vpop.eup %10642  ;;  %v9098_v5 = vpack.c.bf16 %v5493_v61, %v5492_v10  ;;  %v5507_v42 = vadd.f32 0.5, %v4832_v6  ;;  %v4833_v27 = vmul.f32 0.5, %v10641_v59  ;;  %10660 = vtanh.f32 %v3527_v49  ;;  %9401 = vmatprep.mubr.msk.bf16.mxu1 %vm11313_vm0, %v14166_v23  ;;  %v13463_v22 = vpop.f32.mrf.mxu0  ;;  %v13476_v59 = vld [vmem:[%s11451_s18 + $0xa0] sm:$0xff]  }
 0x329   : > { %v10645_v38 = vpop.eup %10644  ;;  %v9099_v55 = vpack.c.bf16 %v5495_v36, %v5494_v1  ;;  %v5509_v53 = vadd.f32 0.5, %v4834_v15  ;;  %v4835_v56 = vmul.f32 0.5, %v10643_v39  ;;  %10662 = vtanh.f32 %v3529_v28  ;;  %v13465_v63 = vpop.f32.mrf.mxu1  ;;  %v14208_v36 = vld [vmem:[#allocation14_spill] sm:$0xff] }
 0x32a   : > { %14207 = vst [vmem:[#allocation13_spill] sm:$0xff] %v13465_v63  ;;  %v10647_v52 = vpop.eup %10646  ;;  %8108 = vst [vmem:[%s11683_s3 + $0x4d0] sm:$0xff] %v9098_v5  ;;  %v5508_v61 = vadd.f32 0.5, %v4833_v27  ;;  %v4847_v6 = vmul.f32 0.5, %v10645_v38  ;;  %10664 = vtanh.f32 %v3528_v62  ;;  %v3542_v10 = vmul.f32 0.5, %v13249_v14  ;;  %v13471_v1 = vpop.f32.mrf.mxu0  ;;  %v14211_v62 = vld [vmem:[#allocation15_spill] sm:$0xff] }
 0x32b   : > { %8109 = vst [vmem:[%s11683_s3 + $0x4d8] sm:$0xff] %v9099_v55  ;;  %v5510_v49 = vadd.f32 0.5, %v4835_v56  ;;  %v4849_v13 = vmul.f32 0.5, %v10647_v52  ;;  %10666 = vtanh.f32 %v3530_v30  ;;  %v3544_v15 = vmul.f32 0.5, %v14208_v36  ;;  %14209 = vst [vmem:[#allocation20_spill] sm:$0xff] %v13471_v1  ;;  %v13473_v28 = vpop.f32.mrf.mxu1  ;;  %v14212_v55 = vld [vmem:[#allocation16_spill] sm:$0xff] }
 0x32c   : > { %14210 = vst [vmem:[#allocation14_spill] sm:$0xff] %v13473_v28  ;;  %v9106_v39 = vpack.c.bf16 %v5508_v61, %v5507_v42  ;;  %v5522_v5 = vadd.f32 0.5, %v4847_v6  ;;  %10668 = vtanh.f32 %v3542_v10  ;;  %v3543_v14 = vmul.f32 0.5, %v14211_v62  ;;  %v13482_v52 = vpop.f32.mrf.mxu0  ;;  %v14213_v61 = vld [vmem:[#allocation21_spill] sm:$0xff]  ;;  %v14214_v10 = vld [vmem:[#allocation22_spill] sm:$0xff] }
 0x32d   : > { %2915 = vmatmul.mubr.bf16.gmra.mxu0 %v13476_v59  ;;  %v10649_v30 = vpop.eup %10648  ;;  %v9107_v27 = vpack.c.bf16 %v5510_v49, %v5509_v53  ;;  %v5524_v38 = vadd.f32 0.5, %v4849_v13  ;;  %10670 = vtanh.f32 %v3544_v15  ;;  %v3545_v56 = vmul.f32 0.5, %v14212_v55  ;;  %v13484_v36 = vpop.f32.mrf.mxu1 }
 0x32e   : > { %2924 = vmatprep.mubr.bf16.mxu0 %v14165_v37  ;;  %v10651_v28 = vpop.eup %10650  ;;  %8116 = vst [vmem:[%s11683_s3 + $0x50c] sm:$0xff] %v9106_v39  ;;  %v4848_v42 = vmul.f32 0.5, %v10649_v30  ;;  %10672 = vtanh.f32 %v3543_v14  ;;  %v3557_v6 = vmul.f32 0.5, %v14213_v61  ;;  %v3559_v62 = vmul.f32 0.5, %v14214_v10  ;;  %v13493_v13 = vpop.f32.mrf.mxu0 }
 0x32f   : > { %v10653_v1 = vpop.eup %10652  ;;  %8117 = vst [vmem:[%s11683_s3 + $0x514] sm:$0xff] %v9107_v27  ;;  %v4850_v63 = vmul.f32 0.5, %v10651_v28  ;;  %10674 = vtanh.f32 %v3545_v56  ;;  %v3558_v53 = vmul.f32 0.5, %v13274_v51  ;;  %v3560_v49 = vmul.f32 0.5, %v13276_v44  ;;  %9402 = vmatmul.mubr.bf16.gmra.mxu1 %v13304_v8  ;;  %v13495_v15 = vpop.f32.mrf.mxu1 }
 0x330   : > { %14215 = vst [vmem:[#allocation15_spill] sm:$0xff] %v13495_v15  ;;  %v10655_v39 = vpop.eup %10654  ;;  %v5523_v14 = vadd.f32 0.5, %v4848_v42  ;;  %v4862_v30 = vmul.f32 0.5, %v10653_v1  ;;  %10676 = vtanh.f32 %v3557_v6  ;;  %v3572_v55 = vmul.f32 0.5, %v13283_v19  ;;  %9405 = vmatprep.mubr.msk.bf16.mxu1 %vm11313_vm0, %v14166_v23  ;;  %v13501_v8 = vpop.f32.mrf.mxu0 }
 0x331   : > { %v10657_v28 = vpop.eup %10656  ;;  %v5525_v27 = vadd.f32 0.5, %v4850_v63  ;;  %v4864_v51 = vmul.f32 0.5, %v10655_v39  ;;  %10678 = vtanh.f32 %v3559_v62  ;;  %v3574_v44 = vmul.f32 0.5, %v13285_v54  ;;  %v13503_v56 = vpop.f32.mrf.mxu1  ;;  %v13510_v54 = vld [vmem:[%s11451_s18 + $0xa8] sm:$0xff]  }
 0x332   : > { %v10659_v42 = vpop.eup %10658  ;;  %v9114_v1 = vpack.c.bf16 %v5523_v14, %v5522_v5  ;;  %v5537_v61 = vadd.f32 0.5, %v4862_v30  ;;  %v4863_v6 = vmul.f32 0.5, %v10657_v28  ;;  %10680 = vtanh.f32 %v3558_v53  ;;  %v13505_v63 = vpop.f32.mrf.mxu0  ;;  %v14216_v14 = vld [vmem:[#allocation23_spill] sm:$0xff]  ;;  %v14217_v28 = vld [vmem:[#allocation24_spill] sm:$0xff] }
 0x333   : > { %v9115_v19 = vpack.c.bf16 %v5525_v27, %v5524_v38  ;;  %v5539_v10 = vadd.f32 0.5, %v4864_v51  ;;  %v4865_v15 = vmul.f32 0.5, %v10659_v42  ;;  %10682 = vtanh.f32 %v3560_v49  ;;  %v13507_v62 = vpop.f32.mrf.mxu1 }
 0x334   : > { %8124 = vst [vmem:[%s11683_s3 + $0x548] sm:$0xff] %v9114_v1  ;;  %v5538_v39 = vadd.f32 0.5, %v4863_v6  ;;  %10684 = vtanh.f32 %v3572_v55  ;;  %v3573_v5 = vmul.f32 0.5, %v13289_v57  ;;  %v3575_v53 = vmul.f32 0.5, %v13291_v41  ;;  %v13520_v51 = vpop.f32.mrf.mxu0 }
 0x335   : > { %2925 = vmatmul.mubr.bf16.gmra.mxu0 %v13510_v54  ;;  %v10661_v38 = vpop.eup %10660  ;;  %8125 = vst [vmem:[%s11683_s3 + $0x550] sm:$0xff] %v9115_v19  ;;  %v5540_v49 = vadd.f32 0.5, %v4865_v15  ;;  %10686 = vtanh.f32 %v3574_v44  ;;  %v3587_v30 = vmul.f32 0.5, %v14216_v14  ;;  %v3589_v27 = vmul.f32 0.5, %v14217_v28  ;;  %v13522_v42 = vpop.f32.mrf.mxu1 }
 0x336   : > { %2934 = vmatprep.mubr.bf16.mxu0 %v14165_v37  ;;  %v10663_v55 = vpop.eup %10662  ;;  %v9122_v1 = vpack.c.bf16 %v5538_v39, %v5537_v61  ;;  %v4877_v57 = vmul.f32 0.5, %v10661_v38  ;;  %10688 = vtanh.f32 %v3573_v5  ;;  %v3588_v41 = vmul.f32 0.5, %v13308_v16  ;;  %v13527_v19 = vpop.f32.mrf.mxu0 }
 0x337   : > { %v10665_v37 = vpop.eup %10664  ;;  %v9123_v6 = vpack.c.bf16 %v5540_v49, %v5539_v10  ;;  %v4879_v15 = vmul.f32 0.5, %v10663_v55  ;;  %10690 = vtanh.f32 %v3575_v53  ;;  %v3590_v44 = vmul.f32 0.5, %v13310_v7  ;;  %9406 = vmatmul.mubr.bf16.gmra.mxu1 %v13340_v32  ;;  %v13529_v14 = vpop.f32.mrf.mxu1 }
 0x338   : > { %v10667_v28 = vpop.eup %10666  ;;  %8132 = vst [vmem:[%s11683_s3 + $0x584] sm:$0xff] %v9122_v1  ;;  %v5552_v61 = vadd.f32 0.5, %v4877_v57  ;;  %v4878_v39 = vmul.f32 0.5, %v10665_v37  ;;  %10692 = vtanh.f32 %v3587_v30  ;;  %v3602_v16 = vmul.f32 0.5, %v13317_v18  ;;  %9409 = vmatprep.mubr.msk.bf16.mxu1 %vm11313_vm0, %v14166_v23  ;;  %v13537_v53 = vpop.f32.mrf.mxu0 }
 0x339   : > { %v10669_v10 = vpop.eup %10668  ;;  %8133 = vst [vmem:[%s11683_s3 + $0x58c] sm:$0xff] %v9123_v6  ;;  %v5554_v5 = vadd.f32 0.5, %v4879_v15  ;;  %v4880_v7 = vmul.f32 0.5, %v10667_v28  ;;  %10694 = vtanh.f32 %v3589_v27  ;;  %v3604_v32 = vmul.f32 0.5, %v13319_v43  ;;  %14218 = vst [vmem:[#allocation16_spill] sm:$0xff] %v13537_v53  ;;  %v13539_v38 = vpop.f32.mrf.mxu1 }
 0x33a   : > { %14219 = vst [vmem:[#allocation21_spill] sm:$0xff] %v13539_v38  ;;  %v10671_v49 = vpop.eup %10670  ;;  %v5553_v55 = vadd.f32 0.5, %v4878_v39  ;;  %v4892_v30 = vmul.f32 0.5, %v10669_v10  ;;  %10696 = vtanh.f32 %v3588_v41  ;;  %v3603_v18 = vmul.f32 0.5, %v13325_v35  ;;  %v13543_v27 = vpop.f32.mrf.mxu0  ;;  %v13548_v43 = vld [vmem:[%s11451_s18 + $0xb0] ss:$0 sps:$4 sm:$0xff]  }
 0x33b   : > { %v10673_v1 = vpop.eup %10672  ;;  %v5555_v57 = vadd.f32 0.5, %v4880_v7  ;;  %v4894_v37 = vmul.f32 0.5, %v10671_v49  ;;  %10698 = vtanh.f32 %v3590_v44  ;;  %v3605_v6 = vmul.f32 0.5, %v13327_v2  ;;  %14220 = vst [vmem:[#allocation22_spill] sm:$0xff] %v13543_v27  ;;  %v13545_v15 = vpop.f32.mrf.mxu1  ;;  %s14082_s18 = scalar_lea.sflag [#allocation4], %s188_s28 }
 0x33c   : > { %14221 = vst [vmem:[#allocation23_spill] sm:$0xff] %v13545_v15  ;;  %v10675_v28 = vpop.eup %10674  ;;  %v9130_v39 = vpack.c.bf16 %v5553_v55, %v5552_v61  ;;  %v5567_v41 = vadd.f32 0.5, %v4892_v30  ;;  %v4893_v10 = vmul.f32 0.5, %v10673_v1  ;;  %10700 = vtanh.f32 %v3602_v16  ;;  %v13551_v2 = vpop.f32.mrf.mxu0 }
 0x33d   : > { %2935 = vmatmul.mubr.bf16.gmra.mxu0 %v13548_v43  ;;  %v10677_v35 = vpop.eup %10676  ;;  %v9131_v7 = vpack.c.bf16 %v5555_v57, %v5554_v5  ;;  %v5569_v44 = vadd.f32 0.5, %v4894_v37  ;;  %v4895_v49 = vmul.f32 0.5, %v10675_v28  ;;  %10702 = vtanh.f32 %v3604_v32  ;;  %v13553_v27 = vpop.f32.mrf.mxu1  ;;  %v14222_v5 = vld [vmem:[#allocation17_spill] sm:$0xff] }
 0x33e   : > { %v10679_v15 = vpop.eup %10678  ;;  %8140 = vst [vmem:[%s11683_s3 + $0x5c0] sm:$0xff] %v9130_v39  ;;  %v5568_v38 = vadd.f32 0.5, %v4893_v10  ;;  %v4907_v53 = vmul.f32 0.5, %v10677_v35  ;;  %10704 = vtanh.f32 %v3603_v18  ;;  %v3617_v61 = vmul.f32 0.5, %v13335_v40  ;;  %v13560_v32 = vpop.f32.mrf.mxu0 }
 0x33f   : > { %v10681_v55 = vpop.eup %10680  ;;  %8141 = vst [vmem:[%s11683_s3 + $0x5c8] sm:$0xff] %v9131_v7  ;;  %v5570_v30 = vadd.f32 0.5, %v4895_v49  ;;  %v4909_v16 = vmul.f32 0.5, %v10679_v15  ;;  %10706 = vtanh.f32 %v3605_v6  ;;  %v3619_v1 = vmul.f32 0.5, %v14222_v5  ;;  %9410 = vmatmul.mubr.bf16.gmra.mxu1 %v13374_v4  ;;  %v13562_v57 = vpop.f32.mrf.mxu1 }
 0x340   : > { %v10683_v37 = vpop.eup %10682  ;;  %v9138_v28 = vpack.c.bf16 %v5568_v38, %v5567_v41  ;;  %v5582_v39 = vadd.f32 0.5, %v4907_v53  ;;  %v4908_v18 = vmul.f32 0.5, %v10681_v55  ;;  %10708 = vtanh.f32 %v3617_v61  ;;  %9413 = vmatprep.mubr.msk.bf16.mxu1 %vm11313_vm0, %v14166_v23  ;;  %v13566_v4 = vpop.f32.mrf.mxu0 }
 0x341   : > { %v10685_v40 = vpop.eup %10684  ;;  %v9139_v6 = vpack.c.bf16 %v5570_v30, %v5569_v44  ;;  %v5584_v15 = vadd.f32 0.5, %v4909_v16  ;;  %v4910_v10 = vmul.f32 0.5, %v10683_v37  ;;  %10710 = vtanh.f32 %v3619_v1  ;;  %v13568_v35 = vpop.f32.mrf.mxu1 }
 0x342   : > { %14223 = vst [vmem:[#allocation24_spill] sm:$0xff] %v13568_v35  ;;  %v10687_v7 = vpop.eup %10686  ;;  %8148 = vst [vmem:[%s11683_s3 + $0x5fc] sm:$0xff] %v9138_v28  ;;  %v5583_v49 = vadd.f32 0.5, %v4908_v18  ;;  %v4922_v38 = vmul.f32 0.5, %v10685_v40  ;;  %v3618_v53 = vmul.f32 0.5, %v13346_v17  ;;  %v3620_v41 = vmul.f32 0.5, %v13348_v29  ;;  %v13576_v16 = vpop.f32.mrf.mxu0 }
 0x343   : > { %v10689_v61 = vpop.eup %10688  ;;  %8149 = vst [vmem:[%s11683_s3 + $0x604] sm:$0xff] %v9139_v6  ;;  %v5585_v55 = vadd.f32 0.5, %v4910_v10  ;;  %v4924_v5 = vmul.f32 0.5, %v10687_v7  ;;  %v3632_v44 = vmul.f32 0.5, %v13351_v12  ;;  %v3634_v30 = vmul.f32 0.5, %v13353_v60  ;;  %14224 = vst [vmem:[#allocation17_spill] sm:$0xff] %v13576_v16  ;;  %v13578_v1 = vpop.f32.mrf.mxu1 }
 0x344   : > { %v10691_v37 = vpop.eup %10690  ;;  %v9146_v28 = vpack.c.bf16 %v5583_v49, %v5582_v39  ;;  %v5597_v18 = vadd.f32 0.5, %v4922_v38  ;;  %v4923_v40 = vmul.f32 0.5, %v10689_v61  ;;  %10712 = vtanh.f32 %v3618_v53  ;;  %v13580_v7 = vpop.f32.mrf.mxu0 }
 0x345   : > { %v10693_v17 = vpop.eup %10692  ;;  %v9147_v29 = vpack.c.bf16 %v5585_v55, %v5584_v15  ;;  %v5599_v6 = vadd.f32 0.5, %v4924_v5  ;;  %v4925_v10 = vmul.f32 0.5, %v10691_v37  ;;  %10714 = vtanh.f32 %v3620_v41  ;;  %v13582_v12 = vpop.f32.mrf.mxu1 }
 0x346   : > { %v10695_v60 = vpop.eup %10694  ;;  %8156 = vst [vmem:[%s11683_s3 + $0x638] sm:$0xff] %v9146_v28  ;;  %v5598_v16 = vadd.f32 0.5, %v4923_v40  ;;  %v4937_v35 = vmul.f32 0.5, %v10693_v17  ;;  %10716 = vtanh.f32 %v3632_v44  ;;  %v3633_v39 = vmul.f32 0.5, %v13363_v24  ;;  %v2418_v41 = vpop.f32.mrf.mxu0 }
 0x347   : > { %v10697_v49 = vpop.eup %10696  ;;  %8157 = vst [vmem:[%s11683_s3 + $0x640] sm:$0xff] %v9147_v29  ;;  %v5600_v38 = vadd.f32 0.5, %v4925_v10  ;;  %v4939_v53 = vmul.f32 0.5, %v10695_v60  ;;  %10718 = vtanh.f32 %v3634_v30  ;;  %v3635_v15 = vmul.f32 0.5, %v13365_v25  ;;  %9414 = vmatmul.mubr.bf16.gmra.mxu1 %v13408_v3  ;;  %v2679_v61 = vpop.f32.mrf.mxu1 }
 0x348   : > { %v10699_v55 = vpop.eup %10698  ;;  %v9154_v5 = vpack.c.bf16 %v5598_v16, %v5597_v18  ;;  %v5612_v37 = vadd.f32 0.5, %v4937_v35  ;;  %v4938_v28 = vmul.f32 0.5, %v10697_v49  ;;  %10720 = vtanh.f32 %v3633_v39  ;;  %9417 = vmatprep.mubr.msk.bf16.mxu1 %vm11313_vm0, %v14166_v23  ;;  %v2419_v25 = vpop.f32.mrf.mxu0 }
 0x349   : > { %v10701_v24 = vpop.eup %10700  ;;  %v9155_v44 = vpack.c.bf16 %v5600_v38, %v5599_v6  ;;  %v5614_v40 = vadd.f32 0.5, %v4939_v53  ;;  %v4940_v30 = vmul.f32 0.5, %v10699_v55  ;;  %10722 = vtanh.f32 %v3635_v15  ;;  %v2680_v17 = vpop.f32.mrf.mxu1  ;;  %v14225_v25 = vld [vmem:[#allocation18_spill] sm:$0xff] }
 0x34a   : > { %v10703_v3 = vpop.eup %10702  ;;  %8164 = vst [vmem:[%s11683_s3 + $0x674] sm:$0xff] %v9154_v5  ;;  %v5613_v29 = vadd.f32 0.5, %v4938_v28  ;;  %v4952_v10 = vmul.f32 0.5, %v10701_v24  ;;  %v3647_v16 = vmul.f32 0.5, %v13369_v33  ;;  %v3649_v35 = vmul.f32 0.5, %v13371_v47  ;;  %v13597_v38 = vpop.f32.mrf.mxu0 }
 0x34b   : > { %v10705_v18 = vpop.eup %10704  ;;  %8165 = vst [vmem:[%s11683_s3 + $0x67c] sm:$0xff] %v9155_v44  ;;  %v5615_v60 = vadd.f32 0.5, %v4940_v30  ;;  %v4954_v39 = vmul.f32 0.5, %v10703_v3  ;;  %v3648_v6 = vmul.f32 0.5, %v13382_v45  ;;  %v3650_v49 = vmul.f32 0.5, %v13384_v31 }
 0x34c   : > { %v10707_v53 = vpop.eup %10706  ;;  %v9162_v15 = vpack.c.bf16 %v5613_v29, %v5612_v37  ;;  %v5627_v41 = vadd.f32 0.5, %v4952_v10  ;;  %v4953_v61 = vmul.f32 0.5, %v10705_v18  ;;  %10724 = vtanh.f32 %v3647_v16  ;;  %v13599_v28 = vpop.f32.mrf.mxu0 }
 0x34d   : > { %v10709_v33 = vpop.eup %10708  ;;  %v9163_v55 = vpack.c.bf16 %v5615_v60, %v5614_v40  ;;  %v5629_v47 = vadd.f32 0.5, %v4954_v39  ;;  %v4955_v5 = vmul.f32 0.5, %v10707_v53  ;;  %10726 = vtanh.f32 %v3649_v35  ;;  %v14227_v53 = vld [vmem:[#allocation11_spill] sm:$0xff] }
 0x34e   : > { %v10711_v24 = vpop.eup %10710  ;;  %8172 = vst [vmem:[%s11683_s3 + $0x6b0] sm:$0xff] %v9162_v15  ;;  %v5628_v45 = vadd.f32 0.5, %v4953_v61  ;;  %v4967_v44 = vmul.f32 0.5, %v10709_v33  ;;  %10728 = vtanh.f32 %v3648_v6  ;;  %v3662_v31 = vmul.f32 0.5, %v13389_v34  ;;  %v13606_v40 = vpop.f32.mrf.mxu0  ;;  %v14226_v6 = vld [vmem:[#allocation19_spill] sm:$0xff] }
 0x34f   : > { %8173 = vst [vmem:[%s11683_s3 + $0x6b8] sm:$0xff] %v9163_v55  ;;  %v5630_v37 = vadd.f32 0.5, %v4955_v5  ;;  %v4969_v30 = vmul.f32 0.5, %v10711_v24  ;;  %10730 = vtanh.f32 %v3650_v49  ;;  %v3664_v17 = vmul.f32 0.5, %v14225_v25  ;;  %9418 = vmatmul.mubr.bf16.gmra.mxu1 %v13442_v21 }
 0x350   : > { %v9170_v3 = vpack.c.bf16 %v5628_v45, %v5627_v41  ;;  %v5642_v29 = vadd.f32 0.5, %v4967_v44  ;;  %10732 = vtanh.f32 %v3662_v31  ;;  %v3663_v10 = vmul.f32 0.5, %v13395_v48  ;;  %9421 = vmatprep.mubr.msk.bf16.mxu1 %vm11313_vm0, %v14166_v23  ;;  %v13612_v60 = vpop.f32.mrf.mxu0 }
 0x351   : > { %v10713_v34 = vpop.eup %10712  ;;  %v9171_v16 = vpack.c.bf16 %v5630_v37, %v5629_v47  ;;  %v5644_v35 = vadd.f32 0.5, %v4969_v30  ;;  %10734 = vtanh.f32 %v3664_v17  ;;  %v3665_v18 = vmul.f32 0.5, %v13397_v58  ;;  %v14228_v37 = vld [vmem:[#allocation25_spill] sm:$0xff] }
 0x352   : > { %v10715_v21 = vpop.eup %10714  ;;  %8180 = vst [vmem:[%s11683_s3 + $0x6ec] sm:$0xff] %v9170_v3  ;;  %v4968_v39 = vmul.f32 0.5, %v10713_v34  ;;  %10736 = vtanh.f32 %v3663_v10  ;;  %v3677_v49 = vmul.f32 0.5, %v14226_v6  ;;  %v3679_v15 = vmul.f32 0.5, %v14227_v53  ;;  %v13620_v55 = vpop.f32.mrf.mxu0  ;;  %v14230_v6 = vld [vmem:[#allocation27_spill] sm:$0xff]  ;;  %v14231_v53 = vld [vmem:[#allocation12_spill] sm:$0xff] }
 0x353   : > { %v10717_v48 = vpop.eup %10716  ;;  %8181 = vst [vmem:[%s11683_s3 + $0x6f4] sm:$0xff] %v9171_v16  ;;  %v4970_v41 = vmul.f32 0.5, %v10715_v21  ;;  %10738 = vtanh.f32 %v3665_v18  ;;  %v3678_v61 = vmul.f32 0.5, %v13412_v11  ;;  %v3680_v33 = vmul.f32 0.5, %v13414_v9  ;;  %v14229_v21 = vld [vmem:[#allocation26_spill] sm:$0xff] }
 0x354   : > { %v10719_v58 = vpop.eup %10718  ;;  %v5643_v47 = vadd.f32 0.5, %v4968_v39  ;;  %v4982_v5 = vmul.f32 0.5, %v10717_v48  ;;  %10740 = vtanh.f32 %v3677_v49  ;;  %v3692_v24 = vmul.f32 0.5, %v13423_v26  ;;  %v13624_v25 = vpop.f32.mrf.mxu0 }
 0x355   : > { %v10721_v45 = vpop.eup %10720  ;;  %v5645_v44 = vadd.f32 0.5, %v4970_v41  ;;  %v4984_v31 = vmul.f32 0.5, %v10719_v58  ;;  %10742 = vtanh.f32 %v3679_v15  ;;  %v3694_v30 = vmul.f32 0.5, %v14228_v37 }
 0x356   : > { %v10723_v11 = vpop.eup %10722  ;;  %v9178_v17 = vpack.c.bf16 %v5643_v47, %v5642_v29  ;;  %v5657_v9 = vadd.f32 0.5, %v4982_v5  ;;  %v4983_v3 = vmul.f32 0.5, %v10721_v45  ;;  %10744 = vtanh.f32 %v3678_v61  ;;  %v13627_v26 = vpop.f32.mrf.mxu0 }
 0x357   : > { %v9179_v10 = vpack.c.bf16 %v5645_v44, %v5644_v35  ;;  %v5659_v34 = vadd.f32 0.5, %v4984_v31  ;;  %v4985_v16 = vmul.f32 0.5, %v10723_v11  ;;  %10746 = vtanh.f32 %v3680_v33  ;;  %9422 = vmatmul.mubr.bf16.gmra.mxu1 %v13476_v59  ;;  %v14232_v59 = vld [vmem:[#allocation28_spill] sm:$0xff] }
 0x358   : > { %8188 = vst [vmem:[%s11683_s3 + $0x728] sm:$0xff] %v9178_v17  ;;  %v5658_v18 = vadd.f32 0.5, %v4983_v3  ;;  %10748 = vtanh.f32 %v3692_v24  ;;  %v3693_v39 = vmul.f32 0.5, %v14229_v21  ;;  %v3695_v49 = vmul.f32 0.5, %v14230_v6  ;;  %9425 = vmatprep.mubr.msk.bf16.mxu1 %vm11313_vm0, %v14166_v23  ;;  %v13637_v41 = vpop.f32.mrf.mxu0 }
 0x359   : > { %v10725_v29 = vpop.eup %10724  ;;  %8189 = vst [vmem:[%s11683_s3 + $0x730] sm:$0xff] %v9179_v10  ;;  %v5660_v35 = vadd.f32 0.5, %v4985_v16  ;;  %10750 = vtanh.f32 %v3694_v30  ;;  %v3707_v15 = vmul.f32 0.5, %v14231_v53  ;;  %v3709_v48 = vmul.f32 0.5, %v14232_v59 }
 0x35a   : > { %v10727_v61 = vpop.eup %10726  ;;  %v9186_v33 = vpack.c.bf16 %v5658_v18, %v5657_v9  ;;  %v4997_v58 = vmul.f32 0.5, %v10725_v29  ;;  %10752 = vtanh.f32 %v3693_v39  ;;  %v3708_v47 = vmul.f32 0.5, %v13446_v50  ;;  %v13641_v31 = vpop.f32.mrf.mxu0 }
 0x35b   : > { %v10729_v5 = vpop.eup %10728  ;;  %v9187_v24 = vpack.c.bf16 %v5660_v35, %v5659_v34  ;;  %v4999_v45 = vmul.f32 0.5, %v10727_v61  ;;  %10754 = vtanh.f32 %v3695_v49  ;;  %v3710_v44 = vmul.f32 0.5, %v13448_v0 }
 0x35c   : > { %v10731_v37 = vpop.eup %10730  ;;  %8196 = vst [vmem:[%s11683_s3 + $0x764] sm:$0xff] %v9186_v33  ;;  %v5672_v30 = vadd.f32 0.5, %v4997_v58  ;;  %v4998_v11 = vmul.f32 0.5, %v10729_v5  ;;  %10756 = vtanh.f32 %v3707_v15  ;;  %v3722_v17 = vmul.f32 0.5, %v13457_v20  ;;  %v13647_v34 = vpop.f32.mrf.mxu0  ;;  %v14233_v20 = vld [vmem:[#allocation13_spill] sm:$0xff] }
 0x35d   : > { %v10733_v9 = vpop.eup %10732  ;;  %8197 = vst [vmem:[%s11683_s3 + $0x76c] sm:$0xff] %v9187_v24  ;;  %v5674_v3 = vadd.f32 0.5, %v4999_v45  ;;  %v5000_v10 = vmul.f32 0.5, %v10731_v37  ;;  %10758 = vtanh.f32 %v3709_v48  ;;  %v3724_v50 = vmul.f32 0.5, %v13459_v46  ;;  %v14234_v24 = vld [vmem:[#allocation20_spill] sm:$0xff] }
 0x35e   : > { %v10735_v16 = vpop.eup %10734  ;;  %v5673_v0 = vadd.f32 0.5, %v4998_v11  ;;  %v5012_v18 = vmul.f32 0.5, %v10733_v9  ;;  %10760 = vtanh.f32 %v3708_v47  ;;  %v3723_v21 = vmul.f32 0.5, %v13463_v22  ;;  %v13652_v35 = vpop.f32.mrf.mxu0 }
 0x35f   : > { %v10737_v39 = vpop.eup %10736  ;;  %v5675_v6 = vadd.f32 0.5, %v5000_v10  ;;  %v5014_v49 = vmul.f32 0.5, %v10735_v16  ;;  %10762 = vtanh.f32 %v3710_v44  ;;  %v3725_v29 = vmul.f32 0.5, %v14233_v20  ;;  %9426 = vmatmul.mubr.bf16.gmra.mxu1 %v13510_v54 }
 0x360   : > { %v10739_v46 = vpop.eup %10738  ;;  %v9194_v53 = vpack.c.bf16 %v5673_v0, %v5672_v30  ;;  %v5687_v15 = vadd.f32 0.5, %v5012_v18  ;;  %v5013_v59 = vmul.f32 0.5, %v10737_v39  ;;  %10764 = vtanh.f32 %v3722_v17  ;;  %9429 = vmatprep.mubr.msk.bf16.mxu1 %vm11313_vm0, %v14166_v23  ;;  %v13656_v58 = vpop.f32.mrf.mxu0  ;;  %v14235_v23 = vld [vmem:[#allocation14_spill] sm:$0xff] }
 0x361   : > { %v10741_v22 = vpop.eup %10740  ;;  %v9195_v48 = vpack.c.bf16 %v5675_v6, %v5674_v3  ;;  %v5689_v61 = vadd.f32 0.5, %v5014_v49  ;;  %v5015_v33 = vmul.f32 0.5, %v10739_v46  ;;  %10766 = vtanh.f32 %v3724_v50 }
 0x362   : > { %v10743_v47 = vpop.eup %10742  ;;  %8204 = vst [vmem:[%s11683_s3 + $0x7a0] sm:$0xff] %v9194_v53  ;;  %v5688_v54 = vadd.f32 0.5, %v5013_v59  ;;  %v5027_v5 = vmul.f32 0.5, %v10741_v22  ;;  %10768 = vtanh.f32 %v3723_v21  ;;  %v3737_v45 = vmul.f32 0.5, %v14234_v24  ;;  %v13662_v17 = vpop.f32.mrf.mxu0 }
 0x363   : > { %v10745_v44 = vpop.eup %10744  ;;  %8205 = vst [vmem:[%s11683_s3 + $0x7a8] sm:$0xff] %v9195_v48  ;;  %v5690_v37 = vadd.f32 0.5, %v5015_v33  ;;  %v5029_v30 = vmul.f32 0.5, %v10743_v47  ;;  %10770 = vtanh.f32 %v3725_v29  ;;  %v3739_v11 = vmul.f32 0.5, %v14235_v23  ;;  %v14236_v48 = vld [vmem:[#allocation15_spill] sm:$0xff] }
 0x364   : > { %v10747_v9 = vpop.eup %10746  ;;  %v9202_v3 = vpack.c.bf16 %v5688_v54, %v5687_v15  ;;  %v5702_v10 = vadd.f32 0.5, %v5027_v5  ;;  %v5028_v50 = vmul.f32 0.5, %v10745_v44  ;;  %10772 = vtanh.f32 %v3737_v45  ;;  %v13664_v39 = vpop.f32.mrf.mxu0 }
 0x365   : > { %v10749_v16 = vpop.eup %10748  ;;  %v9203_v0 = vpack.c.bf16 %v5690_v37, %v5689_v61  ;;  %v5704_v18 = vadd.f32 0.5, %v5029_v30  ;;  %v5030_v21 = vmul.f32 0.5, %v10747_v9  ;;  %10774 = vtanh.f32 %v3739_v11 }
 0x366   : > { %v10751_v6 = vpop.eup %10750  ;;  %8212 = vst [vmem:[%s11683_s3 + $0x7dc] sm:$0xff] %v9202_v3  ;;  %v5703_v49 = vadd.f32 0.5, %v5028_v50  ;;  %v5042_v20 = vmul.f32 0.5, %v10749_v16  ;;  %v3738_v29 = vmul.f32 0.5, %v13482_v52  ;;  %v3740_v46 = vmul.f32 0.5, %v13484_v36  ;;  %v13673_v33 = vpop.f32.mrf.mxu0 }
 0x367   : > { %v10753_v53 = vpop.eup %10752  ;;  %8213 = vst [vmem:[%s11683_s3 + $0x7e4] sm:$0xff] %v9203_v0  ;;  %v5705_v15 = vadd.f32 0.5, %v5030_v21  ;;  %v5044_v59 = vmul.f32 0.5, %v10751_v6  ;;  %v3752_v22 = vmul.f32 0.5, %v13493_v13  ;;  %v3754_v61 = vmul.f32 0.5, %v14236_v48  ;;  %9430 = vmatmul.mubr.bf16.gmra.mxu1 %v13548_v43 }
 0x368   : > { %v10755_v47 = vpop.eup %10754  ;;  %v9210_v54 = vpack.c.bf16 %v5703_v49, %v5702_v10  ;;  %v5717_v5 = vadd.f32 0.5, %v5042_v20  ;;  %v5043_v52 = vmul.f32 0.5, %v10753_v53  ;;  %10776 = vtanh.f32 %v3738_v29  ;;  %v13675_v37 = vpop.f32.mrf.mxu0 }
 0x369   : > { %v10757_v36 = vpop.eup %10756  ;;  %v9211_v24 = vpack.c.bf16 %v5705_v15, %v5704_v18  ;;  %v5719_v45 = vadd.f32 0.5, %v5044_v59  ;;  %v5045_v44 = vmul.f32 0.5, %v10755_v47  ;;  %10778 = vtanh.f32 %v3740_v46 }
 0x36a   : > { %v10759_v13 = vpop.eup %10758  ;;  %8220 = vst [vmem:[%s11683_s3 + $0x818] sm:$0xff] %v9210_v54  ;;  %v5718_v30 = vadd.f32 0.5, %v5043_v52  ;;  %v5057_v23 = vmul.f32 0.5, %v10757_v36  ;;  %10780 = vtanh.f32 %v3752_v22  ;;  %v3753_v43 = vmul.f32 0.5, %v13501_v8  ;;  %v13681_v50 = vpop.f32.mrf.mxu0 }
 0x36b   : > { %v10761_v11 = vpop.eup %10760  ;;  %8221 = vst [vmem:[%s11683_s3 + $0x820] sm:$0xff] %v9211_v24  ;;  %v5720_v9 = vadd.f32 0.5, %v5045_v44  ;;  %v5059_v3 = vmul.f32 0.5, %v10759_v13  ;;  %10782 = vtanh.f32 %v3754_v61  ;;  %v3755_v10 = vmul.f32 0.5, %v13503_v56 }
 0x36c   : > { %v10763_v16 = vpop.eup %10762  ;;  %v9218_v0 = vpack.c.bf16 %v5718_v30, %v5717_v5  ;;  %v5732_v18 = vadd.f32 0.5, %v5057_v23  ;;  %v5058_v21 = vmul.f32 0.5, %v10761_v11  ;;  %10784 = vtanh.f32 %v3753_v43  ;;  %v13683_v29 = vpop.f32.mrf.mxu0 }
 0x36d   : > { %v10765_v6 = vpop.eup %10764  ;;  %v9219_v49 = vpack.c.bf16 %v5720_v9, %v5719_v45  ;;  %v5734_v20 = vadd.f32 0.5, %v5059_v3  ;;  %v5060_v8 = vmul.f32 0.5, %v10763_v16  ;;  %10786 = vtanh.f32 %v3755_v10 }
 0x36e   : > { %v10767_v46 = vpop.eup %10766  ;;  %8228 = vst [vmem:[%s11683_s3 + $0x854] sm:$0xff] %v9218_v0  ;;  %v5733_v53 = vadd.f32 0.5, %v5058_v21  ;;  %v5072_v15 = vmul.f32 0.5, %v10765_v6  ;;  %v3767_v56 = vmul.f32 0.5, %v13505_v63  ;;  %v3769_v59 = vmul.f32 0.5, %v13507_v62  ;;  %v13691_v5 = vpop.f32.mrf.mxu0 }
 0x36f   : > { %v10769_v22 = vpop.eup %10768  ;;  %8229 = vst [vmem:[%s11683_s3 + $0x85c] sm:$0xff] %v9219_v49  ;;  %v5735_v48 = vadd.f32 0.5, %v5060_v8  ;;  %v5074_v61 = vmul.f32 0.5, %v10767_v46  ;;  %v3768_v47 = vmul.f32 0.5, %v13520_v51  ;;  %v3770_v54 = vmul.f32 0.5, %v13522_v42 }
 0x370   : > { %v10771_v52 = vpop.eup %10770  ;;  %v9226_v36 = vpack.c.bf16 %v5733_v53, %v5732_v18  ;;  %v5747_v24 = vadd.f32 0.5, %v5072_v15  ;;  %v5073_v45 = vmul.f32 0.5, %v10769_v22  ;;  %10788 = vtanh.f32 %v3767_v56  ;;  %v13693_v30 = vpop.f32.mrf.mxu0  ;;  %v14237_v18 = vld [vmem:[#allocation16_spill] sm:$0xff] }
 0x371   : > { %v10773_v63 = vpop.eup %10772  ;;  %v9227_v44 = vpack.c.bf16 %v5735_v48, %v5734_v20  ;;  %v5749_v62 = vadd.f32 0.5, %v5074_v61  ;;  %v5075_v13 = vmul.f32 0.5, %v10771_v52  ;;  %10790 = vtanh.f32 %v3769_v59  ;;  %v14240_v59 = vld [vmem:[#allocation23_spill] sm:$0xff] }
 0x372   : > { %v10775_v23 = vpop.eup %10774  ;;  %8236 = vst [vmem:[%s11683_s3 + $0x890] sm:$0xff] %v9226_v36  ;;  %v5748_v51 = vadd.f32 0.5, %v5073_v45  ;;  %v5087_v43 = vmul.f32 0.5, %v10773_v63  ;;  %10792 = vtanh.f32 %v3768_v47  ;;  %v3782_v42 = vmul.f32 0.5, %v13527_v19  ;;  %v13699_v10 = vpop.f32.mrf.mxu0  ;;  %v14238_v19 = vld [vmem:[#allocation21_spill] sm:$0xff] }
 0x373   : > { %8237 = vst [vmem:[%s11683_s3 + $0x898] sm:$0xff] %v9227_v44  ;;  %v5750_v11 = vadd.f32 0.5, %v5075_v13  ;;  %v5089_v9 = vmul.f32 0.5, %v10775_v23  ;;  %10794 = vtanh.f32 %v3770_v54  ;;  %v3784_v3 = vmul.f32 0.5, %v13529_v14  ;;  %v14239_v14 = vld [vmem:[#allocation22_spill] sm:$0xff] }
 0x374   : > { %v9234_v16 = vpack.c.bf16 %v5748_v51, %v5747_v24  ;;  %v5762_v0 = vadd.f32 0.5, %v5087_v43  ;;  %10796 = vtanh.f32 %v3782_v42  ;;  %v3783_v21 = vmul.f32 0.5, %v14237_v18  ;;  %v13703_v46 = vpop.f32.mrf.mxu0 }
 0x375   : > { %v10777_v6 = vpop.eup %10776  ;;  %v9235_v49 = vpack.c.bf16 %v5750_v11, %v5749_v62  ;;  %v5764_v20 = vadd.f32 0.5, %v5089_v9  ;;  %10798 = vtanh.f32 %v3784_v3  ;;  %v3785_v8 = vmul.f32 0.5, %v14238_v19 }
 0x376   : > { %v10779_v53 = vpop.eup %10778  ;;  %8244 = vst [vmem:[%s11683_s3 + $0x8cc] sm:$0xff] %v9234_v16  ;;  %v5088_v15 = vmul.f32 0.5, %v10777_v6  ;;  %10800 = vtanh.f32 %v3783_v21  ;;  %v3797_v56 = vmul.f32 0.5, %v14239_v14  ;;  %v3799_v22 = vmul.f32 0.5, %v14240_v59  ;;  %v13711_v36 = vpop.f32.mrf.mxu0 }
 0x377   : > { %v10781_v48 = vpop.eup %10780  ;;  %8245 = vst [vmem:[%s11683_s3 + $0x8d4] sm:$0xff] %v9235_v49  ;;  %v5090_v61 = vmul.f32 0.5, %v10779_v53  ;;  %10802 = vtanh.f32 %v3785_v8  ;;  %v3798_v47 = vmul.f32 0.5, %v13551_v2  ;;  %v3800_v54 = vmul.f32 0.5, %v13553_v27  ;;  %v2977_v52 = vpop.f32.mrf.mxu1  ;;  %v14241_v49 = vld [vmem:[#allocation24_spill] sm:$0xff]  ;;  %v14242_v53 = vld [vmem:[#allocation17_spill] sm:$0xff] }
 0x378   : > { %v10783_v24 = vpop.eup %10782  ;;  %v5763_v45 = vadd.f32 0.5, %v5088_v15  ;;  %v5102_v63 = vmul.f32 0.5, %v10781_v48  ;;  %10804 = vtanh.f32 %v3797_v56  ;;  %v3812_v44 = vmul.f32 0.5, %v13560_v32  ;;  %v13715_v2 = vpop.f32.mrf.mxu0 }
 0x379   : > { %v10785_v62 = vpop.eup %10784  ;;  %v5765_v13 = vadd.f32 0.5, %v5090_v61  ;;  %v5104_v23 = vmul.f32 0.5, %v10783_v24  ;;  %10806 = vtanh.f32 %v3799_v22  ;;  %v3814_v51 = vmul.f32 0.5, %v13562_v57  ;;  %v9343_v43 = vpop.f32.mrf.mxu1 }
 0x37a   : > { %v10787_v27 = vpop.eup %10786  ;;  %v9242_v42 = vpack.c.bf16 %v5763_v45, %v5762_v0  ;;  %v5777_v11 = vadd.f32 0.5, %v5102_v63  ;;  %v5103_v9 = vmul.f32 0.5, %v10785_v62  ;;  %10808 = vtanh.f32 %v3798_v47  ;;  %v13719_v21 = vpop.f32.mrf.mxu0 }
 0x37b   : > { %v9243_v3 = vpack.c.bf16 %v5765_v13, %v5764_v20  ;;  %v5779_v16 = vadd.f32 0.5, %v5104_v23  ;;  %v5105_v18 = vmul.f32 0.5, %v10787_v27  ;;  %10810 = vtanh.f32 %v3800_v54  ;;  %v13717_v32 = vpop.f32.mrf.mxu1 }
 0x37c   : > { %8252 = vst [vmem:[%s11683_s3 + $0x908] sm:$0xff] %v9242_v42  ;;  %v5778_v6 = vadd.f32 0.5, %v5103_v9  ;;  %10812 = vtanh.f32 %v3812_v44  ;;  %v3813_v57 = vmul.f32 0.5, %v13566_v4  ;;  %v3815_v19 = vmul.f32 0.5, %v14241_v49  ;;  %v13727_v56 = vpop.f32.mrf.mxu0 }
 0x37d   : > { %v10789_v0 = vpop.eup %10788  ;;  %8253 = vst [vmem:[%s11683_s3 + $0x910] sm:$0xff] %v9243_v3  ;;  %v5780_v8 = vadd.f32 0.5, %v5105_v18  ;;  %10814 = vtanh.f32 %v3814_v51  ;;  %v3827_v20 = vmul.f32 0.5, %v14242_v53  ;;  %v3829_v15 = vmul.f32 0.5, %v13578_v1  ;;  %v9344_v14 = vpop.f32.mrf.mxu1 }
 0x37e   : > { %v10791_v59 = vpop.eup %10790  ;;  %v9250_v22 = vpack.c.bf16 %v5778_v6, %v5777_v11  ;;  %v5117_v48 = vmul.f32 0.5, %v10789_v0  ;;  %10816 = vtanh.f32 %v3813_v57  ;;  %v3828_v4 = vmul.f32 0.5, %v13580_v7  ;;  %v13733_v1 = vpop.f32.mrf.mxu0 }
 0x37f   : > { %v10793_v61 = vpop.eup %10792  ;;  %v9251_v47 = vpack.c.bf16 %v5780_v8, %v5779_v16  ;;  %v5119_v54 = vmul.f32 0.5, %v10791_v59  ;;  %10818 = vtanh.f32 %v3815_v19  ;;  %v3830_v24 = vmul.f32 0.5, %v13582_v12  ;;  %v13731_v45 = vpop.f32.mrf.mxu1 }
 0x380   : > { %v10795_v63 = vpop.eup %10794  ;;  %8260 = vst [vmem:[%s11683_s3 + $0x944] sm:$0xff] %v9250_v22  ;;  %v5792_v44 = vadd.f32 0.5, %v5117_v48  ;;  %v5118_v62 = vmul.f32 0.5, %v10793_v61  ;;  %10820 = vtanh.f32 %v3827_v20  ;;  %v3171_v13 = vmul.f32 0.5, %v13597_v38  ;;  %v13738_v42 = vpop.f32.mrf.mxu0 }
 0x381   : > { %v10797_v23 = vpop.eup %10796  ;;  %8261 = vst [vmem:[%s11683_s3 + $0x94c] sm:$0xff] %v9251_v47  ;;  %v5794_v7 = vadd.f32 0.5, %v5119_v54  ;;  %v5120_v51 = vmul.f32 0.5, %v10795_v63  ;;  %10822 = vtanh.f32 %v3829_v15  ;;  %v3173_v43 = vmul.f32 0.5, %v2977_v52  ;;  %v9347_v27 = vpop.f32.mrf.mxu1 }
 0x382   : > { %v10799_v12 = vpop.eup %10798  ;;  %v5793_v11 = vadd.f32 0.5, %v5118_v62  ;;  %v5132_v9 = vmul.f32 0.5, %v10797_v23  ;;  %10824 = vtanh.f32 %v3828_v4  ;;  %v3172_v3 = vmul.f32 0.5, %v13599_v28  ;;  %v13744_v49 = vpop.f32.mrf.mxu0 }
 0x383   : > { %v10801_v16 = vpop.eup %10800  ;;  %v5795_v18 = vadd.f32 0.5, %v5120_v51  ;;  %v5134_v6 = vmul.f32 0.5, %v10799_v12  ;;  %10826 = vtanh.f32 %v3830_v24  ;;  %v3186_v38 = vmul.f32 0.5, %v13606_v40  ;;  %v13742_v57 = vpop.f32.mrf.mxu1 }
 0x384   : > { %v10803_v52 = vpop.eup %10802  ;;  %v9258_v19 = vpack.c.bf16 %v5793_v11, %v5792_v44  ;;  %v5807_v0 = vadd.f32 0.5, %v5132_v9  ;;  %v5133_v8 = vmul.f32 0.5, %v10801_v16  ;;  %10828 = vtanh.f32 %v3171_v13  ;;  %v13746_v59 = vpop.f32.mrf.mxu0 }
 0x385   : > { %v10805_v53 = vpop.eup %10804  ;;  %v9259_v20 = vpack.c.bf16 %v5795_v18, %v5794_v7  ;;  %v5809_v28 = vadd.f32 0.5, %v5134_v6  ;;  %v5135_v15 = vmul.f32 0.5, %v10803_v52  ;;  %10830 = vtanh.f32 %v3173_v43  ;;  %v9348_v14 = vpop.f32.mrf.mxu1 }
 0x386   : > { %v10807_v40 = vpop.eup %10806  ;;  %8268 = vst [vmem:[%s11683_s3 + $0x980] sm:$0xff] %v9258_v19  ;;  %v5808_v22 = vadd.f32 0.5, %v5133_v8  ;;  %v5147_v48 = vmul.f32 0.5, %v10805_v53  ;;  %10832 = vtanh.f32 %v3172_v3  ;;  %v3188_v4 = vmul.f32 0.5, %v13717_v32  ;;  %v13754_v44 = vpop.f32.mrf.mxu0 }
 0x387   : > { %v10809_v61 = vpop.eup %10808  ;;  %8269 = vst [vmem:[%s11683_s3 + $0x988] sm:$0xff] %v9259_v20  ;;  %v5810_v47 = vadd.f32 0.5, %v5135_v15  ;;  %v5149_v54 = vmul.f32 0.5, %v10807_v40  ;;  %10834 = vtanh.f32 %v3186_v38  ;;  %v3187_v24 = vmul.f32 0.5, %v13612_v60  ;;  %v13752_v63 = vpop.f32.mrf.mxu1 }
 0x388   : > { %v10811_v62 = vpop.eup %10810  ;;  %v9266_v13 = vpack.c.bf16 %v5808_v22, %v5807_v0  ;;  %v5822_v23 = vadd.f32 0.5, %v5147_v48  ;;  %v5148_v7 = vmul.f32 0.5, %v10809_v61  ;;  %10836 = vtanh.f32 %v3188_v4  ;;  %v13756_v11 = vpop.f32.mrf.mxu0 }
 0x389   : > { %v10813_v51 = vpop.eup %10812  ;;  %v9267_v32 = vpack.c.bf16 %v5810_v47, %v5809_v28  ;;  %v5824_v43 = vadd.f32 0.5, %v5149_v54  ;;  %v5150_v27 = vmul.f32 0.5, %v10811_v62  ;;  %10838 = vtanh.f32 %v3187_v24  ;;  %v9351_v12 = vpop.f32.mrf.mxu1 }
 0x38a   : > { %v10815_v60 = vpop.eup %10814  ;;  %8276 = vst [vmem:[%s11683_s3 + $0x9bc] sm:$0xff] %v9266_v13  ;;  %v5823_v9 = vadd.f32 0.5, %v5148_v7  ;;  %v5162_v3 = vmul.f32 0.5, %v10813_v51  ;;  %v3201_v16 = vmul.f32 0.5, %v13620_v55  ;;  %v3203_v18 = vmul.f32 0.5, %v13731_v45  ;;  %v13766_v53 = vpop.f32.mrf.mxu0 }
 0x38b   : > { %v10817_v6 = vpop.eup %10816  ;;  %8277 = vst [vmem:[%s11683_s3 + $0x9c4] sm:$0xff] %v9267_v32  ;;  %v5825_v38 = vadd.f32 0.5, %v5150_v27  ;;  %v5164_v52 = vmul.f32 0.5, %v10815_v60  ;;  %v3202_v19 = vmul.f32 0.5, %v13624_v25  ;;  %v3216_v0 = vmul.f32 0.5, %v13627_v26  ;;  %v13764_v8 = vpop.f32.mrf.mxu1 }
 0x38c   : > { %v10819_v20 = vpop.eup %10818  ;;  %v9274_v28 = vpack.c.bf16 %v5823_v9, %v5822_v23  ;;  %v5837_v15 = vadd.f32 0.5, %v5162_v3  ;;  %v5163_v14 = vmul.f32 0.5, %v10817_v6  ;;  %10840 = vtanh.f32 %v3201_v16  ;;  %v13768_v25 = vpop.f32.mrf.mxu0 }
 0x38d   : > { %v10821_v55 = vpop.eup %10820  ;;  %v9275_v45 = vpack.c.bf16 %v5825_v38, %v5824_v43  ;;  %v5839_v40 = vadd.f32 0.5, %v5164_v52  ;;  %v5165_v22 = vmul.f32 0.5, %v10819_v20  ;;  %10842 = vtanh.f32 %v3203_v18  ;;  %v9352_v48 = vpop.f32.mrf.mxu1 }
 0x38e   : > { %v10823_v26 = vpop.eup %10822  ;;  %8284 = vst [vmem:[%s11683_s3 + $0x9f8] sm:$0xff] %v9274_v28  ;;  %v5838_v4 = vadd.f32 0.5, %v5163_v14  ;;  %v5177_v61 = vmul.f32 0.5, %v10821_v55  ;;  %10844 = vtanh.f32 %v3202_v19  ;;  %v3218_v47 = vmul.f32 0.5, %v13742_v57  ;;  %v13774_v7 = vpop.f32.mrf.mxu0 }
 0x38f   : > { %v10825_v54 = vpop.eup %10824  ;;  %8285 = vst [vmem:[%s11683_s3 + $0xa00] sm:$0xff] %v9275_v45  ;;  %v5840_v24 = vadd.f32 0.5, %v5165_v22  ;;  %v5179_v62 = vmul.f32 0.5, %v10823_v26  ;;  %10846 = vtanh.f32 %v3216_v0  ;;  %v3217_v13 = vmul.f32 0.5, %v13637_v41  ;;  %v3001_v23 = vpop.f32.mrf.mxu1 }
 0x390   : > { %v10827_v51 = vpop.eup %10826  ;;  %v9282_v32 = vpack.c.bf16 %v5838_v4, %v5837_v15  ;;  %v5852_v43 = vadd.f32 0.5, %v5177_v61  ;;  %v5178_v27 = vmul.f32 0.5, %v10825_v54  ;;  %10848 = vtanh.f32 %v3218_v47  ;;  %v13776_v16 = vpop.f32.mrf.mxu0 }
 0x391   : > { %v10829_v12 = vpop.eup %10828  ;;  %v9283_v60 = vpack.c.bf16 %v5840_v24, %v5839_v40  ;;  %v5854_v57 = vadd.f32 0.5, %v5179_v62  ;;  %v5180_v9 = vmul.f32 0.5, %v10827_v51  ;;  %10850 = vtanh.f32 %v3217_v13  ;;  %v9355_v3 = vpop.f32.mrf.mxu1 }
 0x392   : > { %v10831_v18 = vpop.eup %10830  ;;  %8292 = vst [vmem:[%s11683_s3 + $0xa34] sm:$0xff] %v9282_v32  ;;  %v5853_v41 = vadd.f32 0.5, %v5178_v27  ;;  %v4521_v6 = vmul.f32 0.5, %v10829_v12  ;;  %v3231_v38 = vmul.f32 0.5, %v13641_v31  ;;  %v3233_v52 = vmul.f32 0.5, %v13752_v63  ;;  %v13784_v55 = vpop.f32.mrf.mxu0 }
 0x393   : > { %v10833_v19 = vpop.eup %10832  ;;  %8293 = vst [vmem:[%s11683_s3 + $0xa3c] sm:$0xff] %v9283_v60  ;;  %v5855_v0 = vadd.f32 0.5, %v5180_v9  ;;  %v4523_v20 = vmul.f32 0.5, %v10831_v18  ;;  %v3232_v28 = vmul.f32 0.5, %v13647_v34  ;;  %v3246_v15 = vmul.f32 0.5, %v13652_v35  ;;  %v3004_v14 = vpop.f32.mrf.mxu1 }
 0x394   : > { %v10835_v45 = vpop.eup %10834  ;;  %v9290_v40 = vpack.c.bf16 %v5853_v41, %v5852_v43  ;;  %v5196_v22 = vadd.f32 0.5, %v4521_v6  ;;  %v4522_v48 = vmul.f32 0.5, %v10833_v19  ;;  %10852 = vtanh.f32 %v3231_v38  ;;  %v13786_v47 = vpop.f32.mrf.mxu0 }
 0x395   : > { %v10837_v31 = vpop.eup %10836  ;;  %v9291_v63 = vpack.c.bf16 %v5855_v0, %v5854_v57  ;;  %v5198_v26 = vadd.f32 0.5, %v4523_v20  ;;  %v4536_v4 = vmul.f32 0.5, %v10835_v45  ;;  %10854 = vtanh.f32 %v3233_v52  ;;  %v9356_v61 = vpop.f32.mrf.mxu1 }
 0x396   : > { %v10839_v34 = vpop.eup %10838  ;;  %8300 = vst [vmem:[%s11683_s3 + $0xa70] sm:$0xff] %v9290_v40  ;;  %v5197_v35 = vadd.f32 0.5, %v4522_v48  ;;  %v4538_v54 = vmul.f32 0.5, %v10837_v31  ;;  %10856 = vtanh.f32 %v3232_v28  ;;  %v3248_v24 = vmul.f32 0.5, %v13764_v8  ;;  %v13791_v43 = vpop.f32.mrf.mxu0 }
 0x397   : > { %8301 = vst [vmem:[%s11683_s3 + $0xa78] sm:$0xff] %v9291_v63  ;;  %v8941_v62 = vpack.c.bf16 %v5198_v26, %v5198_v26  ;;  %v5211_v13 = vadd.f32 0.5, %v4536_v4  ;;  %v4537_v51 = vmul.f32 0.5, %v10839_v34  ;;  %10858 = vtanh.f32 %v3246_v15  ;;  %v3009_v32 = vpop.f32.mrf.mxu1 }
 0x398   : > { %v8940_v27 = vpack.c.bf16 %v5197_v35, %v5196_v22  ;;  %v5213_v12 = vadd.f32 0.5, %v4538_v54  ;;  %10860 = vtanh.f32 %v3248_v24  ;;  %v3247_v60 = vmul.f32 0.5, %v13656_v58  ;;  %v13797_v6 = vpop.f32.mrf.mxu0 }
 0x399   : > { %v10841_v57 = vpop.eup %10840  ;;  %7951 = vst [vmem:[%s11683_s3 + $0x38] sm:$0xf] %v8941_v62  ;;  %v5212_v9 = vadd.f32 0.5, %v4537_v51  ;;  %v3261_v3 = vmul.f32 0.5, %v13662_v17  ;;  %v3263_v8 = vmul.f32 0.5, %v3001_v23  ;;  %v3262_v18 = vmul.f32 0.5, %v13664_v39  ;;  %v9359_v41 = vpop.f32.mrf.mxu1 }
 0x39a   : > { %v10843_v38 = vpop.eup %10842  ;;  %7950 = vst [vmem:[%s11683_s3 + $0x30] sm:$0xff] %v8940_v27  ;;  %v8949_v52 = vpack.c.bf16 %v5213_v12, %v5213_v12  ;;  %v4551_v19 = vmul.f32 0.5, %v10841_v57  ;;  %10862 = vtanh.f32 %v3247_v60  ;;  %v3276_v58 = vmul.f32 0.5, %v13673_v33  ;;  %v13801_v15 = vpop.f32.mrf.mxu0 }
 0x39b   : > { %v10845_v0 = vpop.eup %10844  ;;  %v8948_v20 = vpack.c.bf16 %v5212_v9, %v5211_v13  ;;  %v4553_v28 = vmul.f32 0.5, %v10843_v38  ;;  %10864 = vtanh.f32 %v3261_v3  ;;  %v3278_v17 = vmul.f32 0.5, %v3004_v14  ;;  %v3012_v23 = vpop.f32.mrf.mxu1 }
 0x39c   : > { %v10847_v39 = vpop.eup %10846  ;;  %7959 = vst [vmem:[%s11683_s3 + $0x74] sm:$0xf] %v8949_v52  ;;  %v5226_v45 = vadd.f32 0.5, %v4551_v19  ;;  %v4552_v40 = vmul.f32 0.5, %v10845_v0  ;;  %10866 = vtanh.f32 %v3263_v8  ;;  %v3277_v22 = vmul.f32 0.5, %v13675_v37  ;;  %v13807_v4 = vpop.f32.mrf.mxu0 }
 0x39d   : > { %v10849_v48 = vpop.eup %10848  ;;  %7958 = vst [vmem:[%s11683_s3 + $0x6c] sm:$0xff] %v8948_v20  ;;  %v5228_v31 = vadd.f32 0.5, %v4553_v28  ;;  %v4566_v63 = vmul.f32 0.5, %v10847_v39  ;;  %10868 = vtanh.f32 %v3262_v18  ;;  %v3291_v33 = vmul.f32 0.5, %v13681_v50  ;;  %v9360_v26 = vpop.f32.mrf.mxu1 }
 0x39e   : > { %v10851_v14 = vpop.eup %10850  ;;  %v5227_v61 = vadd.f32 0.5, %v4552_v40  ;;  %v4568_v34 = vmul.f32 0.5, %v10849_v48  ;;  %10870 = vtanh.f32 %v3276_v58  ;;  %v3293_v35 = vmul.f32 0.5, %v3009_v32  ;;  %v13809_v13 = vpop.f32.mrf.mxu0 }
 0x39f   : > { %v8957_v54 = vpack.c.bf16 %v5228_v31, %v5228_v31  ;;  %v5241_v24 = vadd.f32 0.5, %v4566_v63  ;;  %v4567_v62 = vmul.f32 0.5, %v10851_v14  ;;  %10872 = vtanh.f32 %v3278_v17  ;;  %v3017_v37 = vpop.f32.mrf.mxu1 }
 0x3a0   : > { %v8956_v51 = vpack.c.bf16 %v5227_v61, %v5226_v45  ;;  %v5243_v27 = vadd.f32 0.5, %v4568_v34  ;;  %10874 = vtanh.f32 %v3277_v22  ;;  %v3292_v50 = vmul.f32 0.5, %v13683_v29  ;;  %v13814_v3 = vpop.f32.mrf.mxu0 }
 0x3a1   : > { %v10853_v12 = vpop.eup %10852  ;;  %7967 = vst [vmem:[%s11683_s3 + $0xb0] sm:$0xf] %v8957_v54  ;;  %v5242_v60 = vadd.f32 0.5, %v4567_v62  ;;  %10876 = vtanh.f32 %v3291_v33  ;;  %v3306_v57 = vmul.f32 0.5, %v13691_v5  ;;  %v3308_v32 = vmul.f32 0.5, %v3012_v23  ;;  %v9363_v9 = vpop.f32.mrf.mxu1 }
 0x3a2   : > { %v10855_v8 = vpop.eup %10854  ;;  %7966 = vst [vmem:[%s11683_s3 + $0xa8] sm:$0xff] %v8956_v51  ;;  %v8965_v18 = vpack.c.bf16 %v5243_v27, %v5243_v27  ;;  %v4581_v41 = vmul.f32 0.5, %v10853_v12  ;;  %10878 = vtanh.f32 %v3293_v35  ;;  %v3307_v38 = vmul.f32 0.5, %v13693_v30  ;;  %v13819_v0 = vpop.f32.mrf.mxu0 }
 0x3a3   : > { %v10857_v29 = vpop.eup %10856  ;;  %v8964_v52 = vpack.c.bf16 %v5242_v60, %v5241_v24  ;;  %v4583_v19 = vmul.f32 0.5, %v10855_v8  ;;  %10880 = vtanh.f32 %v3292_v50  ;;  %v3321_v58 = vmul.f32 0.5, %v13699_v10  ;;  %v3020_v5 = vpop.f32.mrf.mxu1 }
 0x3a4   : > { %v10859_v20 = vpop.eup %10858  ;;  %7975 = vst [vmem:[%s11683_s3 + $0xec] sm:$0xf] %v8965_v18  ;;  %v5256_v28 = vadd.f32 0.5, %v4581_v41  ;;  %v4582_v17 = vmul.f32 0.5, %v10857_v29  ;;  %10882 = vtanh.f32 %v3306_v57  ;;  %v3323_v23 = vmul.f32 0.5, %v3017_v37  ;;  %v13824_v48 = vpop.f32.mrf.mxu0 }
 0x3a5   : > { %v10861_v39 = vpop.eup %10860  ;;  %7974 = vst [vmem:[%s11683_s3 + $0xe4] sm:$0xff] %v8964_v52  ;;  %v5258_v45 = vadd.f32 0.5, %v4583_v19  ;;  %v4596_v40 = vmul.f32 0.5, %v10859_v20  ;;  %10884 = vtanh.f32 %v3308_v32  ;;  %v3322_v30 = vmul.f32 0.5, %v13703_v46  ;;  %v9364_v22 = vpop.f32.mrf.mxu1 }
 0x3a6   : > { %v5257_v10 = vadd.f32 0.5, %v4582_v17  ;;  %v4598_v31 = vmul.f32 0.5, %v10861_v39  ;;  %10886 = vtanh.f32 %v3307_v38  ;;  %v3336_v63 = vmul.f32 0.5, %v13711_v36  ;;  %v13827_v35 = vpop.f32.mrf.mxu0 }
 0x3a7   : > { %v10863_v33 = vpop.eup %10862  ;;  %v8973_v26 = vpack.c.bf16 %v5258_v45, %v5258_v45  ;;  %v5271_v14 = vadd.f32 0.5, %v4596_v40  ;;  %10888 = vtanh.f32 %v3321_v58  ;;  %v3338_v61 = vmul.f32 0.5, %v3020_v5  ;;  %v3025_v34 = vpop.f32.mrf.mxu1 }
 0x3a8   : > { %v10865_v54 = vpop.eup %10864  ;;  %v8972_v46 = vpack.c.bf16 %v5257_v10, %v5256_v28  ;;  %v5273_v24 = vadd.f32 0.5, %v4598_v31  ;;  %v4597_v62 = vmul.f32 0.5, %v10863_v33  ;;  %10890 = vtanh.f32 %v3323_v23  ;;  %v13832_v12 = vpop.f32.mrf.mxu0 }
 0x3a9   : > { %v10867_v37 = vpop.eup %10866  ;;  %7983 = vst [vmem:[%s11683_s3 + $0x128] sm:$0xf] %v8973_v26  ;;  %v4611_v51 = vmul.f32 0.5, %v10865_v54  ;;  %10892 = vtanh.f32 %v3322_v30  ;;  %v3337_v36 = vmul.f32 0.5, %v13715_v2  ;;  %v3351_v27 = vmul.f32 0.5, %v13719_v21  ;;  %v9367_v50 = vpop.f32.mrf.mxu1 }
 0x3aa   : > { %v10869_v60 = vpop.eup %10868  ;;  %7982 = vst [vmem:[%s11683_s3 + $0x120] sm:$0xff] %v8972_v46  ;;  %v8981_v57 = vpack.c.bf16 %v5273_v24, %v5273_v24  ;;  %v5272_v32 = vadd.f32 0.5, %v4597_v62  ;;  %v4613_v9 = vmul.f32 0.5, %v10867_v37  ;;  %10894 = vtanh.f32 %v3336_v63  ;;  %v13835_v2 = vpop.f32.mrf.mxu0 }
 0x3ab   : > { %v10871_v8 = vpop.eup %10870  ;;  %v5286_v18 = vadd.f32 0.5, %v4611_v51  ;;  %v4612_v41 = vmul.f32 0.5, %v10869_v60  ;;  %10896 = vtanh.f32 %v3338_v61  ;;  %v3353_v38 = vmul.f32 0.5, %v3025_v34  ;;  %v3028_v29 = vpop.f32.mrf.mxu1 }
 0x3ac   : > { %v10873_v21 = vpop.eup %10872  ;;  %7991 = vst [vmem:[%s11683_s3 + $0x164] sm:$0xf] %v8981_v57  ;;  %v8980_v52 = vpack.c.bf16 %v5272_v32, %v5271_v14  ;;  %v5288_v19 = vadd.f32 0.5, %v4613_v9  ;;  %v4626_v58 = vmul.f32 0.5, %v10871_v8  ;;  %10898 = vtanh.f32 %v3337_v36  ;;  %v13839_v39 = vpop.f32.mrf.mxu0 }
 0x3ad   : > { %v10875_v5 = vpop.eup %10874  ;;  %v5287_v20 = vadd.f32 0.5, %v4612_v41  ;;  %v4628_v28 = vmul.f32 0.5, %v10873_v21  ;;  %10900 = vtanh.f32 %v3351_v27  ;;  %v3352_v17 = vmul.f32 0.5, %v13727_v56  ;;  %v9368_v23 = vpop.f32.mrf.mxu1 }
 0x3ae   : > { %v10877_v45 = vpop.eup %10876  ;;  %7990 = vst [vmem:[%s11683_s3 + $0x15c] sm:$0xff] %v8980_v52  ;;  %v8989_v40 = vpack.c.bf16 %v5288_v19, %v5288_v19  ;;  %v5301_v30 = vadd.f32 0.5, %v4626_v58  ;;  %v4627_v22 = vmul.f32 0.5, %v10875_v5  ;;  %10902 = vtanh.f32 %v3353_v38  ;;  %v13842_v14 = vpop.f32.mrf.mxu0 }
 0x3af   : > { %v10879_v10 = vpop.eup %10878  ;;  %v8988_v31 = vpack.c.bf16 %v5287_v20, %v5286_v18  ;;  %v5303_v63 = vadd.f32 0.5, %v4628_v28  ;;  %v4641_v33 = vmul.f32 0.5, %v10877_v45  ;;  %10904 = vtanh.f32 %v3352_v17  ;;  %v3033_v26 = vpop.f32.mrf.mxu1 }
 0x3b0   : > { %v10881_v56 = vpop.eup %10880  ;;  %7999 = vst [vmem:[%s11683_s3 + $0x1a0] sm:$0xf] %v8989_v40  ;;  %v5302_v61 = vadd.f32 0.5, %v4627_v22  ;;  %v4643_v34 = vmul.f32 0.5, %v10879_v10  ;;  %v3366_v54 = vmul.f32 0.5, %v13733_v1  ;;  %v3368_v46 = vmul.f32 0.5, %v3028_v29  ;;  %v13848_v50 = vpop.f32.mrf.mxu0 }
 0x3b1   : > { %v10883_v24 = vpop.eup %10882  ;;  %7998 = vst [vmem:[%s11683_s3 + $0x198] sm:$0xff] %v8988_v31  ;;  %v8997_v62 = vpack.c.bf16 %v5303_v63, %v5303_v63  ;;  %v5316_v37 = vadd.f32 0.5, %v4641_v33  ;;  %v4642_v51 = vmul.f32 0.5, %v10881_v56  ;;  %v3367_v36 = vmul.f32 0.5, %v13738_v42  ;;  %v9371_v27 = vpop.f32.mrf.mxu1 }
 0x3b2   : > { %v10885_v60 = vpop.eup %10884  ;;  %v8996_v57 = vpack.c.bf16 %v5302_v61, %v5301_v30  ;;  %v5318_v32 = vadd.f32 0.5, %v4643_v34  ;;  %v4656_v9 = vmul.f32 0.5, %v10883_v24  ;;  %10906 = vtanh.f32 %v3366_v54  ;;  %v13852_v29 = vpop.f32.mrf.mxu0 }
 0x3b3   : > { %v10887_v8 = vpop.eup %10886  ;;  %8007 = vst [vmem:[%s11683_s3 + $0x1dc] sm:$0xf] %v8997_v62  ;;  %v5317_v1 = vadd.f32 0.5, %v4642_v51  ;;  %v4658_v18 = vmul.f32 0.5, %v10885_v60  ;;  %10908 = vtanh.f32 %v3368_v46  ;;  %v3381_v41 = vmul.f32 0.5, %v13744_v49  ;;  %v3036_v38 = vpop.f32.mrf.mxu1 }
 0x3b4   : > { %v10889_v42 = vpop.eup %10888  ;;  %8006 = vst [vmem:[%s11683_s3 + $0x1d4] sm:$0xff] %v8996_v57  ;;  %v9005_v21 = vpack.c.bf16 %v5318_v32, %v5318_v32  ;;  %v5331_v52 = vadd.f32 0.5, %v4656_v9  ;;  %v4657_v19 = vmul.f32 0.5, %v10887_v8  ;;  %10910 = vtanh.f32 %v3367_v36  ;;  %v13855_v23 = vpop.f32.mrf.mxu0 }
 0x3b5   : > { %v10891_v58 = vpop.eup %10890  ;;  %v9004_v5 = vpack.c.bf16 %v5317_v1, %v5316_v37  ;;  %v5333_v20 = vadd.f32 0.5, %v4658_v18  ;;  %v4671_v28 = vmul.f32 0.5, %v10889_v42  ;;  %10912 = vtanh.f32 %v3381_v41  ;;  %v9372_v17 = vpop.f32.mrf.mxu1 }
 0x3b6   : > { %v10893_v49 = vpop.eup %10892  ;;  %8015 = vst [vmem:[%s11683_s3 + $0x218] sm:$0xf] %v9005_v21  ;;  %v5332_v45 = vadd.f32 0.5, %v4657_v19  ;;  %v4673_v40 = vmul.f32 0.5, %v10891_v58  ;;  %v3383_v30 = vmul.f32 0.5, %v3033_v26  ;;  %v3382_v22 = vmul.f32 0.5, %v13746_v59  ;;  %v13861_v34 = vpop.f32.mrf.mxu0 }
 0x3b7   : > { %v10895_v10 = vpop.eup %10894  ;;  %8014 = vst [vmem:[%s11683_s3 + $0x210] sm:$0xff] %v9004_v5  ;;  %v9013_v31 = vpack.c.bf16 %v5333_v20, %v5333_v20  ;;  %v5346_v63 = vadd.f32 0.5, %v4671_v28  ;;  %v4672_v33 = vmul.f32 0.5, %v10893_v49  ;;  %v3396_v56 = vmul.f32 0.5, %v13754_v44  ;;  %v3041_v61 = vpop.f32.mrf.mxu1 }
 0x3b8   : > { %v10897_v54 = vpop.eup %10896  ;;  %v9012_v46 = vpack.c.bf16 %v5332_v45, %v5331_v52  ;;  %v5348_v24 = vadd.f32 0.5, %v4673_v40  ;;  %v4686_v62 = vmul.f32 0.5, %v10895_v10  ;;  %10914 = vtanh.f32 %v3383_v30  ;;  %v13864_v27 = vpop.f32.mrf.mxu0 }
 0x3b9   : > { %v10899_v26 = vpop.eup %10898  ;;  %8023 = vst [vmem:[%s11683_s3 + $0x254] sm:$0xf] %v9013_v31  ;;  %v5347_v37 = vadd.f32 0.5, %v4672_v33  ;;  %v4688_v59 = vmul.f32 0.5, %v10897_v54  ;;  %10916 = vtanh.f32 %v3382_v22  ;;  %v3398_v51 = vmul.f32 0.5, %v3036_v38  ;;  %v9375_v36 = vpop.f32.mrf.mxu1 }
 0x3ba   : > { %v10901_v44 = vpop.eup %10900  ;;  %8022 = vst [vmem:[%s11683_s3 + $0x24c] sm:$0xff] %v9012_v46  ;;  %v9021_v60 = vpack.c.bf16 %v5348_v24, %v5348_v24  ;;  %v5361_v57 = vadd.f32 0.5, %v4686_v62  ;;  %v4687_v32 = vmul.f32 0.5, %v10899_v26  ;;  %10918 = vtanh.f32 %v3396_v56 }
 0x3bb   : > { %v10903_v9 = vpop.eup %10902  ;;  %v9020_v8 = vpack.c.bf16 %v5347_v37, %v5346_v63  ;;  %v5363_v1 = vadd.f32 0.5, %v4688_v59  ;;  %v4701_v18 = vmul.f32 0.5, %v10901_v44  ;;  %10920 = vtanh.f32 %v3398_v51  ;;  %v3044_v41 = vpop.f32.mrf.mxu1 }
 0x3bc   : > { %v10905_v38 = vpop.eup %10904  ;;  %8031 = vst [vmem:[%s11683_s3 + $0x290] sm:$0xf] %v9021_v60  ;;  %v5362_v21 = vadd.f32 0.5, %v4687_v32  ;;  %v4703_v52 = vmul.f32 0.5, %v10903_v9  ;;  %v3397_v19 = vmul.f32 0.5, %v13756_v11  ;;  %v3411_v58 = vmul.f32 0.5, %v13766_v53 }
 0x3bd   : > { %v13867_v42 = vpop.f32.mrf.mxu0  ;;  %8030 = vst [vmem:[%s11683_s3 + $0x288] sm:$0xff] %v9020_v8  ;;  %v9029_v5 = vpack.c.bf16 %v5363_v1, %v5363_v1  ;;  %v5376_v20 = vadd.f32 0.5, %v4701_v18  ;;  %v4702_v28 = vmul.f32 0.5, %v10905_v38  ;;  %v3413_v17 = vmul.f32 0.5, %v3041_v61  ;;  %v9376_v49 = vpop.f32.mrf.mxu1 }
 0x3be   : > { %v9028_v40 = vpack.c.bf16 %v5362_v21, %v5361_v57  ;;  %v5378_v30 = vadd.f32 0.5, %v4703_v52  ;;  %10922 = vtanh.f32 %v3397_v19  ;;  %v3412_v22 = vmul.f32 0.5, %v13768_v25 }
 0x3bf   : > { %v13873_v45 = vpop.f32.mrf.mxu0  ;;  %v10907_v10 = vpop.eup %10906  ;;  %8039 = vst [vmem:[%s11683_s3 + $0x2cc] sm:$0xf] %v9029_v5  ;;  %v5377_v31 = vadd.f32 0.5, %v4702_v28  ;;  %10924 = vtanh.f32 %v3411_v58  ;;  %v3426_v11 = vmul.f32 0.5, %v13774_v7  ;;  %v3428_v53 = vmul.f32 0.5, %v3044_v41 }
 0x3c0   : > { %v3049_v63 = vpop.f32.mrf.mxu1  ;;  %v10909_v56 = vpop.eup %10908  ;;  %8038 = vst [vmem:[%s11683_s3 + $0x2c4] sm:$0xff] %v9028_v40  ;;  %v9037_v61 = vpack.c.bf16 %v5378_v30, %v5378_v30  ;;  %v4716_v54 = vmul.f32 0.5, %v10907_v10  ;;  %10926 = vtanh.f32 %v3413_v17  ;;  %v3427_v46 = vmul.f32 0.5, %v13776_v16 }
 0x3c1   : > { %v13878_v33 = vpop.f32.mrf.mxu0  ;;  %v10911_v25 = vpop.eup %10910  ;;  %v9036_v24 = vpack.c.bf16 %v5377_v31, %v5376_v20  ;;  %v4718_v62 = vmul.f32 0.5, %v10909_v56  ;;  %10928 = vtanh.f32 %v3412_v22  ;;  %v3441_v26 = vmul.f32 0.5, %v13784_v55 }
 0x3c2   : > { %v9379_v7 = vpop.f32.mrf.mxu1  ;;  %v10913_v59 = vpop.eup %10912  ;;  %8047 = vst [vmem:[%s11683_s3 + $0x308] sm:$0xf] %v9037_v61  ;;  %v5391_v51 = vadd.f32 0.5, %v4716_v54  ;;  %v4717_v36 = vmul.f32 0.5, %v10911_v25  ;;  %10930 = vtanh.f32 %v3426_v11  ;;  %v3443_v44 = vmul.f32 0.5, %v3049_v63 }
 0x3c3   : > { %v13883_v37 = vpop.f32.mrf.mxu0  ;;  %8046 = vst [vmem:[%s11683_s3 + $0x300] sm:$0xff] %v9036_v24  ;;  %v5393_v60 = vadd.f32 0.5, %v4718_v62  ;;  %v4731_v57 = vmul.f32 0.5, %v10913_v59  ;;  %10932 = vtanh.f32 %v3428_v53  ;;  %v3442_v16 = vmul.f32 0.5, %v13786_v47 }
 0x3c4   : > { %v3052_v32 = vpop.f32.mrf.mxu1  ;;  %v5392_v8 = vadd.f32 0.5, %v4717_v36  ;;  %10934 = vtanh.f32 %v3427_v46  ;;  %v3456_v55 = vmul.f32 0.5, %v13791_v43  ;;  %v3457_v21 = vmul.f32 0.5, %v13797_v6 }
 0x3c5   : > { %v13888_v9 = vpop.f32.mrf.mxu0  ;;  %v3458_v1 = vmul.f32 0.5, %v3052_v32  ;;  %v10915_v18 = vpop.eup %10914  ;;  %v9045_v41 = vpack.c.bf16 %v5393_v60, %v5393_v60  ;;  %v5406_v38 = vadd.f32 0.5, %v4731_v57  ;;  %10936 = vtanh.f32 %v3441_v26 }
 0x3c6   : > { %v9380_v52 = vpop.f32.mrf.mxu1  ;;  %v10917_v47 = vpop.eup %10916  ;;  %v9044_v58 = vpack.c.bf16 %v5392_v8, %v5391_v51  ;;  %v4733_v5 = vmul.f32 0.5, %v10915_v18  ;;  %10938 = vtanh.f32 %v3443_v44  ;;  %v3471_v20 = vmul.f32 0.5, %v13801_v15 }
 0x3c7   : > { %v13892_v19 = vpop.f32.mrf.mxu0  ;;  %v10919_v28 = vpop.eup %10918  ;;  %8055 = vst [vmem:[%s11683_s3 + $0x344] sm:$0xf] %v9045_v41  ;;  %v4732_v43 = vmul.f32 0.5, %v10917_v47  ;;  %10940 = vtanh.f32 %v3442_v16  ;;  %v3472_v49 = vmul.f32 0.5, %v13807_v4  ;;  %v3486_v40 = vmul.f32 0.5, %v13809_v13 }
 0x3c8   : > { %v3057_v17 = vpop.f32.mrf.mxu1  ;;  %v10921_v30 = vpop.eup %10920  ;;  %8054 = vst [vmem:[%s11683_s3 + $0x33c] sm:$0xff] %v9044_v58  ;;  %v5408_v22 = vadd.f32 0.5, %v4733_v5  ;;  %v4746_v10 = vmul.f32 0.5, %v10919_v28  ;;  %10942 = vtanh.f32 %v3456_v55  ;;  %v3487_v63 = vmul.f32 0.5, %v13814_v3 }
 0x3c9   : > { %v13898_v6 = vpop.f32.mrf.mxu0  ;;  %v3473_v31 = vmul.f32 0.5, %v3057_v17  ;;  %v5407_v11 = vadd.f32 0.5, %v4732_v43  ;;  %v4748_v53 = vmul.f32 0.5, %v10921_v30  ;;  %10944 = vtanh.f32 %v3458_v1 }
 0x3ca   : > { %v9383_v15 = vpop.f32.mrf.mxu1  ;;  %v9053_v4 = vpack.c.bf16 %v5408_v22, %v5408_v22  ;;  %v5421_v61 = vadd.f32 0.5, %v4746_v10  ;;  %10946 = vtanh.f32 %v3457_v21  ;;  %v3501_v13 = vmul.f32 0.5, %v13819_v0 }
 0x3cb   : > { %v13902_v56 = vpop.f32.mrf.mxu0  ;;  %v10923_v54 = vpop.eup %10922  ;;  %v9052_v46 = vpack.c.bf16 %v5407_v11, %v5406_v38  ;;  %v5423_v25 = vadd.f32 0.5, %v4748_v53  ;;  %10948 = vtanh.f32 %v3471_v20  ;;  %v3502_v62 = vmul.f32 0.5, %v13824_v48 }
 0x3cc   : > { %v3060_v24 = vpop.f32.mrf.mxu1  ;;  %v10925_v7 = vpop.eup %10924  ;;  %8063 = vst [vmem:[%s11683_s3 + $0x380] sm:$0xf] %v9053_v4  ;;  %v4747_v3 = vmul.f32 0.5, %v10923_v54  ;;  %10950 = vtanh.f32 %v3473_v31  ;;  %v3516_v51 = vmul.f32 0.5, %v13827_v35  ;;  %v3517_v57 = vmul.f32 0.5, %v13832_v12 }
 0x3cd   : > { %v13906_v26 = vpop.f32.mrf.mxu0  ;;  %v3488_v59 = vmul.f32 0.5, %v3060_v24  ;;  %v10927_v36 = vpop.eup %10926  ;;  %8062 = vst [vmem:[%s11683_s3 + $0x378] sm:$0xff] %v9052_v46  ;;  %v9061_v0 = vpack.c.bf16 %v5423_v25, %v5423_v25  ;;  %v4761_v44 = vmul.f32 0.5, %v10925_v7  ;;  %10952 = vtanh.f32 %v3472_v49 }
 0x3ce   : > { %v9384_v60 = vpop.f32.mrf.mxu1  ;;  %v10929_v48 = vpop.eup %10928  ;;  %v5422_v32 = vadd.f32 0.5, %v4747_v3  ;;  %v4763_v8 = vmul.f32 0.5, %v10927_v36  ;;  %10954 = vtanh.f32 %v3486_v40  ;;  %v3531_v55 = vmul.f32 0.5, %v13835_v2 }
 0x3cf   : > { %v13912_v16 = vpop.f32.mrf.mxu0  ;;  %v10931_v1 = vpop.eup %10930  ;;  %8071 = vst [vmem:[%s11683_s3 + $0x3bc] sm:$0xf] %v9061_v0  ;;  %v5436_v18 = vadd.f32 0.5, %v4761_v44  ;;  %v4762_v35 = vmul.f32 0.5, %v10929_v48  ;;  %10956 = vtanh.f32 %v3488_v59  ;;  %v13917_v38 = vmul.f32 0.5, %v13839_v39 }
 0x3d0   : > { %v3065_v41 = vpop.f32.mrf.mxu1  ;;  %v10933_v12 = vpop.eup %10932  ;;  %v9060_v52 = vpack.c.bf16 %v5422_v32, %v5421_v61  ;;  %v5438_v47 = vadd.f32 0.5, %v4763_v8  ;;  %v4776_v58 = vmul.f32 0.5, %v10931_v1  ;;  %10958 = vtanh.f32 %v3487_v63 }
 0x3d1   : > { %v13919_v21 = vpop.f32.mrf.mxu0  ;;  %v10935_v5 = vpop.eup %10934  ;;  %v5437_v20 = vadd.f32 0.5, %v4762_v35  ;;  %v4778_v2 = vmul.f32 0.5, %v10933_v12  ;;  %10960 = vtanh.f32 %v3501_v13  ;;  %v3503_v28 = vmul.f32 0.5, %v3065_v41 }
 0x3d2   : > { %v9387_v43 = vpop.f32.mrf.mxu1  ;;  %v10937_v49 = vpop.eup %10936  ;;  %8070 = vst [vmem:[%s11683_s3 + $0x3b4] sm:$0xff] %v9060_v52  ;;  %v9069_v39 = vpack.c.bf16 %v5438_v47, %v5438_v47  ;;  %v5451_v40 = vadd.f32 0.5, %v4776_v58  ;;  %v4777_v30 = vmul.f32 0.5, %v10935_v5  ;;  %10962 = vtanh.f32 %v3502_v62 }
 0x3d3   : > { %v13921_v17 = vpop.f32.mrf.mxu0  ;;  %v10939_v22 = vpop.eup %10938  ;;  %v9068_v10 = vpack.c.bf16 %v5437_v20, %v5436_v18  ;;  %v5453_v31 = vadd.f32 0.5, %v4778_v2  ;;  %v4791_v11 = vmul.f32 0.5, %v10937_v49  ;;  %10964 = vtanh.f32 %v3503_v28 }
 0x3d4   : > { %v3068_v53 = vpop.f32.mrf.mxu1  ;;  %v10941_v63 = vpop.eup %10940  ;;  %8079 = vst [vmem:[%s11683_s3 + $0x3f8] sm:$0xf] %v9069_v39  ;;  %v5452_v4 = vadd.f32 0.5, %v4777_v30  ;;  %v4793_v61 = vmul.f32 0.5, %v10939_v22  ;;  %10966 = vtanh.f32 %v3516_v51  ;;  %v3546_v32 = vmul.f32 0.5, %v13842_v14 }
 0x3d5   : > { %v13924_v15 = vpop.f32.mrf.mxu0  ;;  %v3518_v13 = vmul.f32 0.5, %v3068_v53  ;;  %v10943_v54 = vpop.eup %10942  ;;  %8078 = vst [vmem:[%s11683_s3 + $0x3f0] sm:$0xff] %v9068_v10  ;;  %v9077_v46 = vpack.c.bf16 %v5453_v31, %v5453_v31  ;;  %v5466_v25 = vadd.f32 0.5, %v4791_v11  ;;  %v4792_v24 = vmul.f32 0.5, %v10941_v63 }
 0x3d6   : > { %10968 = vtanh.f32 %v3517_v57  ;;  %v9388_v62 = vpop.f32.mrf.mxu1  ;;  %v10945_v3 = vpop.eup %10944  ;;  %v9076_v59 = vpack.c.bf16 %v5452_v4, %v5451_v40  ;;  %v5468_v36 = vadd.f32 0.5, %v4793_v61  ;;  %v4806_v0 = vmul.f32 0.5, %v10943_v54 }
 0x3d7   : > { %v13928_v7 = vpop.f32.mrf.mxu0  ;;  %10970 = vtanh.f32 %v3518_v13  ;;  %v10947_v44 = vpop.eup %10946  ;;  %8087 = vst [vmem:[%s11683_s3 + $0x434] sm:$0xf] %v9077_v46  ;;  %v5467_v51 = vadd.f32 0.5, %v4792_v24  ;;  %v4808_v60 = vmul.f32 0.5, %v10945_v3  ;;  %v3547_v28 = vmul.f32 0.5, %v13848_v50 }
 0x3d8   : > { %10972 = vtanh.f32 %v3531_v55  ;;  %v3073_v48 = vpop.f32.mrf.mxu1  ;;  %v10949_v57 = vpop.eup %10948  ;;  %8086 = vst [vmem:[%s11683_s3 + $0x42c] sm:$0xff] %v9076_v59  ;;  %v9085_v1 = vpack.c.bf16 %v5468_v36, %v5468_v36  ;;  %v5481_v18 = vadd.f32 0.5, %v4806_v0  ;;  %v4807_v35 = vmul.f32 0.5, %v10947_v44 }
 0x3d9   : > { %v13932_v8 = vpop.f32.mrf.mxu0  ;;  %v3533_v41 = vmul.f32 0.5, %v3073_v48  ;;  %v10951_v12 = vpop.eup %10950  ;;  %v9084_v52 = vpack.c.bf16 %v5467_v51, %v5466_v25  ;;  %v5483_v47 = vadd.f32 0.5, %v4808_v60  ;;  %v4821_v58 = vmul.f32 0.5, %v10949_v57 }
 0x3da   : > { %10974 = vtanh.f32 %v13917_v38  ;;  %v9391_v55 = vpop.f32.mrf.mxu1  ;;  %v10953_v14 = vpop.eup %10952  ;;  %8095 = vst [vmem:[%s11683_s3 + $0x470] sm:$0xf] %v9085_v1  ;;  %v5482_v20 = vadd.f32 0.5, %v4807_v35  ;;  %v4823_v2 = vmul.f32 0.5, %v10951_v12  ;;  %v3561_v13 = vmul.f32 0.5, %v13852_v29 }
 0x3db   : > { %v13936_v5 = vpop.f32.mrf.mxu0  ;;  %10976 = vtanh.f32 %v3533_v41  ;;  %v10955_v43 = vpop.eup %10954  ;;  %8094 = vst [vmem:[%s11683_s3 + $0x468] sm:$0xff] %v9084_v52  ;;  %v9093_v49 = vpack.c.bf16 %v5483_v47, %v5483_v47  ;;  %v5496_v39 = vadd.f32 0.5, %v4821_v58  ;;  %v4822_v40 = vmul.f32 0.5, %v10953_v14 }
 0x3dc   : > { %10978 = vtanh.f32 %v3546_v32  ;;  %v3076_v30 = vpop.f32.mrf.mxu1  ;;  %v10957_v22 = vpop.eup %10956  ;;  %v9092_v10 = vpack.c.bf16 %v5482_v20, %v5481_v18  ;;  %v5498_v31 = vadd.f32 0.5, %v4823_v2  ;;  %v4836_v11 = vmul.f32 0.5, %v10955_v43 }
 0x3dd   : > { %v13941_v38 = vpop.f32.mrf.mxu0  ;;  %v3548_v53 = vmul.f32 0.5, %v3076_v30  ;;  %v10959_v63 = vpop.eup %10958  ;;  %8103 = vst [vmem:[%s11683_s3 + $0x4ac] sm:$0xf] %v9093_v49  ;;  %v5497_v4 = vadd.f32 0.5, %v4822_v40  ;;  %v4838_v61 = vmul.f32 0.5, %v10957_v22  ;;  %10980 = vtanh.f32 %v3547_v28 }
 0x3de   : > { %v9392_v50 = vpop.f32.mrf.mxu1  ;;  %v10961_v46 = vpop.eup %10960  ;;  %8102 = vst [vmem:[%s11683_s3 + $0x4a4] sm:$0xff] %v9092_v10  ;;  %v9101_v25 = vpack.c.bf16 %v5498_v31, %v5498_v31  ;;  %v5511_v24 = vadd.f32 0.5, %v4836_v11  ;;  %v4837_v62 = vmul.f32 0.5, %v10959_v63  ;;  %v3562_v57 = vmul.f32 0.5, %v13855_v23 }
 0x3df   : > { %v13945_v54 = vpop.f32.mrf.mxu0  ;;  %10982 = vtanh.f32 %v3548_v53  ;;  %v10963_v3 = vpop.eup %10962  ;;  %v9100_v59 = vpack.c.bf16 %v5497_v4, %v5496_v39  ;;  %v5513_v36 = vadd.f32 0.5, %v4838_v61  ;;  %v4851_v0 = vmul.f32 0.5, %v10961_v46 }
 0x3e0   : > { %10984 = vtanh.f32 %v3561_v13  ;;  %v3081_v44 = vpop.f32.mrf.mxu1  ;;  %v10965_v60 = vpop.eup %10964  ;;  %8111 = vst [vmem:[%s11683_s3 + $0x4e8] sm:$0xf] %v9101_v25  ;;  %v5512_v29 = vadd.f32 0.5, %v4837_v62  ;;  %v4852_v48 = vmul.f32 0.5, %v10963_v3  ;;  %v3576_v52 = vmul.f32 0.5, %v13861_v34 }
 0x3e1   : > { %v13948_v51 = vpop.f32.mrf.mxu0  ;;  %v3563_v32 = vmul.f32 0.5, %v3081_v44  ;;  %v10967_v1 = vpop.eup %10966  ;;  %8110 = vst [vmem:[%s11683_s3 + $0x4e0] sm:$0xff] %v9100_v59  ;;  %v9109_v18 = vpack.c.bf16 %v5513_v36, %v5513_v36  ;;  %v5526_v35 = vadd.f32 0.5, %v4851_v0  ;;  %v4853_v41 = vmul.f32 0.5, %v10965_v60 }
 0x3e2   : > { %v9395_v12 = vpop.f32.mrf.mxu1  ;;  %v9108_v55 = vpack.c.bf16 %v5512_v29, %v5511_v24  ;;  %v5527_v14 = vadd.f32 0.5, %v4852_v48  ;;  %v4866_v20 = vmul.f32 0.5, %v10967_v1  ;;  %v3577_v49 = vmul.f32 0.5, %v13864_v27 }
 0x3e3   : > { %v13954_v47 = vpop.f32.mrf.mxu0  ;;  %v10969_v58 = vpop.eup %10968  ;;  %10986 = vtanh.f32 %v3563_v32  ;;  %8119 = vst [vmem:[%s11683_s3 + $0x524] sm:$0xf] %v9109_v18  ;;  %v5528_v28 = vadd.f32 0.5, %v4853_v41  ;;  %v3591_v27 = vmul.f32 0.5, %v13867_v42  ;;  %v3592_v13 = vmul.f32 0.5, %v13873_v45 }
 0x3e4   : > { %v10971_v2 = vpop.eup %10970  ;;  %v4867_v23 = vmul.f32 0.5, %v10969_v58  ;;  %10988 = vtanh.f32 %v3562_v57  ;;  %v3084_v43 = vpop.f32.mrf.mxu1  ;;  %8118 = vst [vmem:[%s11683_s3 + $0x51c] sm:$0xff] %v9108_v55  ;;  %v9116_v40 = vpack.c.bf16 %v5527_v14, %v5526_v35  ;;  %v5541_v30 = vadd.f32 0.5, %v4866_v20 }
 0x3e5   : > { %v13958_v39 = vpop.f32.mrf.mxu0  ;;  %v10973_v34 = vpop.eup %10972  ;;  %v4868_v22 = vmul.f32 0.5, %v10971_v2  ;;  %10990 = vtanh.f32 %v3576_v52  ;;  %v9117_v10 = vpack.c.bf16 %v5528_v28, %v5528_v28  ;;  %v3578_v53 = vmul.f32 0.5, %v3084_v43 }
 0x3e6   : > { %v5542_v31 = vadd.f32 0.5, %v4867_v23  ;;  %v4881_v11 = vmul.f32 0.5, %v10973_v34  ;;  %v9396_v63 = vpop.f32.mrf.mxu1  ;;  %8126 = vst [vmem:[%s11683_s3 + $0x558] sm:$0xff] %v9116_v40  ;;  %10992 = vtanh.f32 %v3577_v49  ;;  %v3606_v48 = vmul.f32 0.5, %v13878_v33 }
 0x3e7   : > { %v13961_v4 = vpop.f32.mrf.mxu0  ;;  %v10975_v61 = vpop.eup %10974  ;;  %v5543_v50 = vadd.f32 0.5, %v4868_v22  ;;  %8127 = vst [vmem:[%s11683_s3 + $0x560] sm:$0xf] %v9117_v10  ;;  %10994 = vtanh.f32 %v3578_v53  ;;  %v3607_v18 = vmul.f32 0.5, %v13883_v37  ;;  %v3621_v35 = vmul.f32 0.5, %v13888_v9 }
 0x3e8   : > { %v10977_v46 = vpop.eup %10976  ;;  %v9124_v25 = vpack.c.bf16 %v5542_v31, %v5541_v30  ;;  %v5556_v24 = vadd.f32 0.5, %v4881_v11  ;;  %v4882_v62 = vmul.f32 0.5, %v10975_v61  ;;  %v3089_v3 = vpop.f32.mrf.mxu1  ;;  %10996 = vtanh.f32 %v3591_v27 }
 0x3e9   : > { %v13967_v59 = vpop.f32.mrf.mxu0  ;;  %v10979_v36 = vpop.eup %10978  ;;  %v9125_v0 = vpack.c.bf16 %v5543_v50, %v5543_v50  ;;  %v4883_v44 = vmul.f32 0.5, %v10977_v46  ;;  %v3593_v60 = vmul.f32 0.5, %v3089_v3  ;;  %10998 = vtanh.f32 %v3592_v13 }
 0x3ea   : > { %8134 = vst [vmem:[%s11683_s3 + $0x594] sm:$0xff] %v9124_v25  ;;  %v5557_v29 = vadd.f32 0.5, %v4882_v62  ;;  %v4896_v42 = vmul.f32 0.5, %v10979_v36  ;;  %v9399_v45 = vpop.f32.mrf.mxu1  ;;  %v10981_v57 = vpop.eup %10980  ;;  %v3622_v9 = vmul.f32 0.5, %v13892_v19  ;;  %v3636_v40 = vmul.f32 0.5, %v13898_v6 }
 0x3eb   : > { %v13971_v32 = vpop.f32.mrf.mxu0  ;;  %8135 = vst [vmem:[%s11683_s3 + $0x59c] sm:$0xf] %v9125_v0  ;;  %v5558_v1 = vadd.f32 0.5, %v4883_v44  ;;  %11000 = vtanh.f32 %v3593_v60  ;;  %v4897_v58 = vmul.f32 0.5, %v10981_v57  ;;  %v3637_v30 = vmul.f32 0.5, %v13902_v56 }
 0x3ec   : > { %v10983_v41 = vpop.eup %10982  ;;  %v9132_v12 = vpack.c.bf16 %v5557_v29, %v5556_v24  ;;  %v5571_v52 = vadd.f32 0.5, %v4896_v42  ;;  %11002 = vtanh.f32 %v3606_v48  ;;  %v3092_v55 = vpop.f32.mrf.mxu1  ;;  %v3651_v11 = vmul.f32 0.5, %v13906_v26 }
 0x3ed   : > { %v13976_v14 = vpop.f32.mrf.mxu0  ;;  %v10985_v33 = vpop.eup %10984  ;;  %v9133_v20 = vpack.c.bf16 %v5558_v1, %v5558_v1  ;;  %v4898_v2 = vmul.f32 0.5, %v10983_v41  ;;  %v3608_v28 = vmul.f32 0.5, %v3092_v55  ;;  %11004 = vtanh.f32 %v3607_v18 }
 0x3ee   : > { %8142 = vst [vmem:[%s11683_s3 + $0x5d0] sm:$0xff] %v9132_v12  ;;  %v5572_v23 = vadd.f32 0.5, %v4897_v58  ;;  %v4911_v43 = vmul.f32 0.5, %v10985_v33  ;;  %v9400_v37 = vpop.f32.mrf.mxu1  ;;  %11006 = vtanh.f32 %v3621_v35  ;;  %v3652_v56 = vmul.f32 0.5, %v13912_v16 }
 0x3ef   : > { %v13980_v49 = vpop.f32.mrf.mxu0  ;;  %8143 = vst [vmem:[%s11683_s3 + $0x5d8] sm:$0xf] %v9133_v20  ;;  %v5573_v34 = vadd.f32 0.5, %v4898_v2  ;;  %11008 = vtanh.f32 %v3608_v28  ;;  %v3666_v62 = vmul.f32 0.5, %v13919_v21  ;;  %v3667_v44 = vmul.f32 0.5, %v13921_v17 }
 0x3f0   : > { %v10987_v22 = vpop.eup %10986  ;;  %v9140_v10 = vpack.c.bf16 %v5572_v23, %v5571_v52  ;;  %v3097_v31 = vpop.f32.mrf.mxu1  ;;  %11010 = vtanh.f32 %v3622_v9  ;;  %v5586_v13 = vadd.f32 0.5, %v4911_v43  ;;  %v3681_v60 = vmul.f32 0.5, %v13924_v15 }
 0x3f1   : > { %v13986_v53 = vpop.f32.mrf.mxu0  ;;  %v10989_v19 = vpop.eup %10988  ;;  %v9141_v63 = vpack.c.bf16 %v5573_v34, %v5573_v34  ;;  %v4913_v61 = vmul.f32 0.5, %v10987_v22  ;;  %v3623_v50 = vmul.f32 0.5, %v3097_v31  ;;  %11012 = vtanh.f32 %v3636_v40 }
 0x3f2   : > { %v10991_v27 = vpop.eup %10990  ;;  %8150 = vst [vmem:[%s11683_s3 + $0x60c] sm:$0xff] %v9140_v10  ;;  %v4912_v6 = vmul.f32 0.5, %v10989_v19  ;;  %v9403_v46 = vpop.f32.mrf.mxu1  ;;  %11014 = vtanh.f32 %v3637_v30  ;;  %v3682_v57 = vmul.f32 0.5, %v13928_v7  ;;  %v3696_v58 = vmul.f32 0.5, %v13932_v8 }
 0x3f3   : > { %v13990_v25 = vpop.f32.mrf.mxu0  ;;  %8151 = vst [vmem:[%s11683_s3 + $0x614] sm:$0xf] %v9141_v63  ;;  %v5588_v24 = vadd.f32 0.5, %v4913_v61  ;;  %v4926_v26 = vmul.f32 0.5, %v10991_v27  ;;  %11016 = vtanh.f32 %v3623_v50  ;;  %v10993_v3 = vpop.eup %10992  ;;  %v14005_v2 = vmul.f32 0.5, %v13936_v5 }
 0x3f4   : > { %v5587_v36 = vadd.f32 0.5, %v4912_v6  ;;  %v3100_v0 = vpop.f32.mrf.mxu1  ;;  %11018 = vtanh.f32 %v3651_v11  ;;  %v10995_v16 = vpop.eup %10994  ;;  %v4927_v45 = vmul.f32 0.5, %v10993_v3  ;;  %v3711_v63 = vmul.f32 0.5, %v13941_v38 }
 0x3f5   : > { %v13996_v29 = vpop.f32.mrf.mxu0  ;;  %v9149_v42 = vpack.c.bf16 %v5588_v24, %v5588_v24  ;;  %v3638_v48 = vmul.f32 0.5, %v3100_v0  ;;  %v10997_v1 = vpop.eup %10996  ;;  %v5601_v18 = vadd.f32 0.5, %v4926_v26  ;;  %v4928_v35 = vmul.f32 0.5, %v10995_v16 }
 0x3f6   : > { %v9148_v21 = vpack.c.bf16 %v5587_v36, %v5586_v13  ;;  %v9404_v41 = vpop.f32.mrf.mxu1  ;;  %11020 = vtanh.f32 %v3652_v56  ;;  %v10999_v17 = vpop.eup %10998  ;;  %v5602_v15 = vadd.f32 0.5, %v4927_v45  ;;  %v4941_v52 = vmul.f32 0.5, %v10997_v1 }
 0x3f7   : > { %v13999_v12 = vpop.f32.mrf.mxu0  ;;  %8159 = vst [vmem:[%s11683_s3 + $0x650] sm:$0xf] %v9149_v42  ;;  %11022 = vtanh.f32 %v3638_v48  ;;  %v5603_v33 = vadd.f32 0.5, %v4928_v35  ;;  %v4942_v20 = vmul.f32 0.5, %v10999_v17  ;;  %v3712_v16 = vmul.f32 0.5, %v13945_v54 }
 0x3f8   : > { %v11001_v55 = vpop.eup %11000  ;;  %8158 = vst [vmem:[%s11683_s3 + $0x648] sm:$0xff] %v9148_v21  ;;  %v3105_v7 = vpop.f32.mrf.mxu1  ;;  %11024 = vtanh.f32 %v3666_v62  ;;  %v9156_v43 = vpack.c.bf16 %v5602_v15, %v5601_v18  ;;  %v5616_v37 = vadd.f32 0.5, %v4941_v52  ;;  %v3726_v17 = vmul.f32 0.5, %v13948_v51 }
 0x3f9   : > { %v14007_v28 = vpop.f32.mrf.mxu0  ;;  %v11003_v23 = vpop.eup %11002  ;;  %v4943_v9 = vmul.f32 0.5, %v11001_v55  ;;  %v3653_v34 = vmul.f32 0.5, %v3105_v7  ;;  %v9157_v8 = vpack.c.bf16 %v5603_v33, %v5603_v33  ;;  %v5617_v30 = vadd.f32 0.5, %v4942_v20 }
 0x3fa   : > { %v11005_v40 = vpop.eup %11004  ;;  %v4956_v22 = vmul.f32 0.5, %v11003_v23  ;;  %v9407_v10 = vpop.f32.mrf.mxu1  ;;  %11026 = vtanh.f32 %v3667_v44  ;;  %8166 = vst [vmem:[%s11683_s3 + $0x684] sm:$0xff] %v9156_v43  ;;  %v3727_v51 = vmul.f32 0.5, %v13954_v47 }
 0x3fb   : > { %v14009_v31 = vpop.f32.mrf.mxu0  ;;  %v11007_v11 = vpop.eup %11006  ;;  %v5618_v5 = vadd.f32 0.5, %v4943_v9  ;;  %v4957_v19 = vmul.f32 0.5, %v11005_v40  ;;  %11028 = vtanh.f32 %v3653_v34  ;;  %8167 = vst [vmem:[%s11683_s3 + $0x68c] sm:$0xf] %v9157_v8  ;;  %v9164_v50 = vpack.c.bf16 %v5617_v30, %v5616_v37 }
 0x3fc   : > { %v11009_v61 = vpop.eup %11008  ;;  %v5631_v27 = vadd.f32 0.5, %v4956_v22  ;;  %v4971_v13 = vmul.f32 0.5, %v11007_v11  ;;  %v3108_v6 = vpop.f32.mrf.mxu1  ;;  %11030 = vtanh.f32 %v3681_v60  ;;  %v3741_v34 = vmul.f32 0.5, %v13958_v39 }
 0x3fd   : > { %v14014_v46 = vpop.f32.mrf.mxu0  ;;  %v11011_v56 = vpop.eup %11010  ;;  %v9165_v24 = vpack.c.bf16 %v5618_v5, %v5618_v5  ;;  %v4958_v26 = vmul.f32 0.5, %v11009_v61  ;;  %v5632_v62 = vadd.f32 0.5, %v4957_v19  ;;  %v3668_v3 = vmul.f32 0.5, %v3108_v6  ;;  %8174 = vst [vmem:[%s11683_s3 + $0x6c0] sm:$0xff] %v9164_v50 }
 0x3fe   : > { %v11013_v36 = vpop.eup %11012  ;;  %v5646_v0 = vadd.f32 0.5, %v4971_v13  ;;  %v4972_v44 = vmul.f32 0.5, %v11011_v56  ;;  %v9408_v38 = vpop.f32.mrf.mxu1  ;;  %11032 = vtanh.f32 %v3682_v57  ;;  %v3742_v10 = vmul.f32 0.5, %v13961_v4 }
 0x3ff   : > { %v14018_v42 = vpop.f32.mrf.mxu0  ;;  %v11015_v60 = vpop.eup %11014  ;;  %8175 = vst [vmem:[%s11683_s3 + $0x6c8] sm:$0xf] %v9165_v24  ;;  %v5633_v45 = vadd.f32 0.5, %v4958_v26  ;;  %v9172_v48 = vpack.c.bf16 %v5632_v62, %v5631_v27  ;;  %v4986_v1 = vmul.f32 0.5, %v11013_v36  ;;  %11034 = vtanh.f32 %v3668_v3 }
 0x400   : > { %v11017_v21 = vpop.eup %11016  ;;  %v5647_v18 = vadd.f32 0.5, %v4972_v44  ;;  %v4987_v35 = vmul.f32 0.5, %v11015_v60  ;;  %v3113_v41 = vpop.f32.mrf.mxu1  ;;  %11036 = vtanh.f32 %v3696_v58  ;;  %v3757_v4 = vmul.f32 0.5, %v13971_v32 }
 0x401   : > { %v2940_v57 = vpop.f32.mrf.mxu0  ;;  %v11019_v15 = vpop.eup %11018  ;;  %v9173_v54 = vpack.c.bf16 %v5633_v45, %v5633_v45  ;;  %8182 = vst [vmem:[%s11683_s3 + $0x6fc] sm:$0xff] %v9172_v48  ;;  %v4973_v52 = vmul.f32 0.5, %v11017_v21  ;;  %v5661_v55 = vadd.f32 0.5, %v4986_v1  ;;  %v3683_v33 = vmul.f32 0.5, %v3113_v41 }
 0x402   : > { %v9180_v20 = vpack.c.bf16 %v5647_v18, %v5646_v0  ;;  %v5662_v7 = vadd.f32 0.5, %v4987_v35  ;;  %v5001_v23 = vmul.f32 0.5, %v11019_v15  ;;  %v9411_v43 = vpop.f32.mrf.mxu1  ;;  %11038 = vtanh.f32 %v14005_v2 }
 0x403   : > { %v2941_v37 = vpop.f32.mrf.mxu0  ;;  %v11021_v9 = vpop.eup %11020  ;;  %8183 = vst [vmem:[%s11683_s3 + $0x704] sm:$0xf] %v9173_v54  ;;  %v5648_v58 = vadd.f32 0.5, %v4973_v52  ;;  %11040 = vtanh.f32 %v3683_v33  ;;  %v3771_v62 = vmul.f32 0.5, %v13976_v14  ;;  %v3772_v48 = vmul.f32 0.5, %v13980_v49 }
 0x404   : > { %v11023_v40 = vpop.eup %11022  ;;  %8190 = vst [vmem:[%s11683_s3 + $0x738] sm:$0xff] %v9180_v20  ;;  %v9188_v8 = vpack.c.bf16 %v5662_v7, %v5661_v55  ;;  %v5002_v30 = vmul.f32 0.5, %v11021_v9  ;;  %v3116_v22 = vpop.f32.mrf.mxu1  ;;  %11042 = vtanh.f32 %v3711_v63  ;;  %v5676_v61 = vadd.f32 0.5, %v5001_v23 }
 0x405   : > { %v11025_v2 = vpop.eup %11024  ;;  %v9181_v11 = vpack.c.bf16 %v5648_v58, %v5648_v58  ;;  %v4988_v5 = vmul.f32 0.5, %v11023_v40  ;;  %v3698_v19 = vmul.f32 0.5, %v3116_v22  ;;  %11044 = vtanh.f32 %v3712_v16 }
 0x406   : > { %8198 = vst [vmem:[%s11683_s3 + $0x774] sm:$0xff] %v9188_v8  ;;  %v5677_v50 = vadd.f32 0.5, %v5002_v30  ;;  %v5016_v47 = vmul.f32 0.5, %v11025_v2  ;;  %v9412_v27 = vpop.f32.mrf.mxu1  ;;  %11046 = vtanh.f32 %v3726_v17  ;;  %v3756_v63 = vmul.f32 0.5, %v13967_v59 }
 0x407   : > { %v11027_v39 = vpop.eup %11026  ;;  %8191 = vst [vmem:[%s11683_s3 + $0x740] sm:$0xf] %v9181_v11  ;;  %v5663_v13 = vadd.f32 0.5, %v4988_v5  ;;  %11048 = vtanh.f32 %v3698_v19  ;;  %v3786_v14 = vmul.f32 0.5, %v13986_v53  ;;  %v3787_v41 = vmul.f32 0.5, %v13990_v25 }
 0x408   : > { %v11029_v6 = vpop.eup %11028  ;;  %v9196_v56 = vpack.c.bf16 %v5677_v50, %v5676_v61  ;;  %v5017_v24 = vmul.f32 0.5, %v11027_v39  ;;  %v3121_v26 = vpop.f32.mrf.mxu1  ;;  %11050 = vtanh.f32 %v3727_v51  ;;  %v5691_v38 = vadd.f32 0.5, %v5016_v47 }
 0x409   : > { %v11031_v3 = vpop.eup %11030  ;;  %v9189_v36 = vpack.c.bf16 %v5663_v13, %v5663_v13  ;;  %v5003_v0 = vmul.f32 0.5, %v11029_v6  ;;  %v3713_v44 = vmul.f32 0.5, %v3121_v26  ;;  %11052 = vtanh.f32 %v3741_v34 }
 0x40a   : > { %8206 = vst [vmem:[%s11683_s3 + $0x7b0] sm:$0xff] %v9196_v56  ;;  %v5692_v16 = vadd.f32 0.5, %v5017_v24  ;;  %v5031_v60 = vmul.f32 0.5, %v11031_v3  ;;  %v9415_v59 = vpop.f32.mrf.mxu1  ;;  %11054 = vtanh.f32 %v3742_v10  ;;  %v3801_v7 = vmul.f32 0.5, %v13996_v29 }
 0x40b   : > { %v11033_v32 = vpop.eup %11032  ;;  %8199 = vst [vmem:[%s11683_s3 + $0x77c] sm:$0xf] %v9189_v36  ;;  %v5678_v45 = vadd.f32 0.5, %v5003_v0  ;;  %11056 = vtanh.f32 %v3713_v44  ;;  %v3802_v25 = vmul.f32 0.5, %v13999_v12  ;;  %v3816_v58 = vmul.f32 0.5, %v14007_v28 }
 0x40c   : > { %v11035_v1 = vpop.eup %11034  ;;  %v9204_v21 = vpack.c.bf16 %v5692_v16, %v5691_v38  ;;  %v5032_v18 = vmul.f32 0.5, %v11033_v32  ;;  %v3124_v35 = vpop.f32.mrf.mxu1  ;;  %11058 = vtanh.f32 %v3756_v63  ;;  %v5706_v52 = vadd.f32 0.5, %v5031_v60 }
 0x40d   : > { %v11037_v17 = vpop.eup %11036  ;;  %v9197_v57 = vpack.c.bf16 %v5678_v45, %v5678_v45  ;;  %v5018_v15 = vmul.f32 0.5, %v11035_v1  ;;  %v3728_v54 = vmul.f32 0.5, %v3124_v35  ;;  %11060 = vtanh.f32 %v3757_v4 }
 0x40e   : > { %8214 = vst [vmem:[%s11683_s3 + $0x7ec] sm:$0xff] %v9204_v21  ;;  %v5707_v55 = vadd.f32 0.5, %v5032_v18  ;;  %v5046_v33 = vmul.f32 0.5, %v11037_v17  ;;  %v9416_v49 = vpop.f32.mrf.mxu1  ;;  %11062 = vtanh.f32 %v3771_v62  ;;  %v3817_v28 = vmul.f32 0.5, %v14009_v31 }
 0x40f   : > { %v11039_v53 = vpop.eup %11038  ;;  %8207 = vst [vmem:[%s11683_s3 + $0x7b8] sm:$0xf] %v9197_v57  ;;  %v5693_v20 = vadd.f32 0.5, %v5018_v15  ;;  %11064 = vtanh.f32 %v3728_v54  ;;  %v3831_v31 = vmul.f32 0.5, %v14014_v46  ;;  %v3832_v32 = vmul.f32 0.5, %v14018_v42 }
 0x410   : > { %v11041_v23 = vpop.eup %11040  ;;  %v9212_v43 = vpack.c.bf16 %v5707_v55, %v5706_v52  ;;  %v5047_v37 = vmul.f32 0.5, %v11039_v53  ;;  %v3129_v9 = vpop.f32.mrf.mxu1  ;;  %11066 = vtanh.f32 %v3772_v48  ;;  %v5721_v22 = vadd.f32 0.5, %v5046_v33 }
 0x411   : > { %v11043_v51 = vpop.eup %11042  ;;  %v9205_v34 = vpack.c.bf16 %v5693_v20, %v5693_v20  ;;  %v5033_v40 = vmul.f32 0.5, %v11041_v23  ;;  %v3743_v8 = vmul.f32 0.5, %v3129_v9  ;;  %11068 = vtanh.f32 %v3786_v14 }
 0x412   : > { %v11045_v30 = vpop.eup %11044  ;;  %8222 = vst [vmem:[%s11683_s3 + $0x828] sm:$0xff] %v9212_v43  ;;  %v5722_v10 = vadd.f32 0.5, %v5047_v37  ;;  %v5061_v29 = vmul.f32 0.5, %v11043_v51  ;;  %v9419_v2 = vpop.f32.mrf.mxu1  ;;  %11070 = vtanh.f32 %v3787_v41 }
 0x413   : > { %v11047_v12 = vpop.eup %11046  ;;  %8215 = vst [vmem:[%s11683_s3 + $0x7f4] sm:$0xf] %v9205_v34  ;;  %v5708_v11 = vadd.f32 0.5, %v5033_v40  ;;  %v5062_v5 = vmul.f32 0.5, %v11045_v30  ;;  %11072 = vtanh.f32 %v3743_v8 }
 0x414   : > { %v11049_v19 = vpop.eup %11048  ;;  %v9220_v61 = vpack.c.bf16 %v5722_v10, %v5721_v22  ;;  %v5736_v50 = vadd.f32 0.5, %v5061_v29  ;;  %v5076_v47 = vmul.f32 0.5, %v11047_v12  ;;  %v3132_v27 = vpop.f32.mrf.mxu1  ;;  %11074 = vtanh.f32 %v3801_v7 }
 0x415   : > { %v11051_v39 = vpop.eup %11050  ;;  %v9213_v13 = vpack.c.bf16 %v5708_v11, %v5708_v11  ;;  %v5048_v63 = vmul.f32 0.5, %v11049_v19  ;;  %v5737_v4 = vadd.f32 0.5, %v5062_v5  ;;  %v3758_v6 = vmul.f32 0.5, %v3132_v27 }
 0x416   : > { %v11053_v56 = vpop.eup %11052  ;;  %8230 = vst [vmem:[%s11683_s3 + $0x864] sm:$0xff] %v9220_v61  ;;  %v5751_v24 = vadd.f32 0.5, %v5076_v47  ;;  %v5077_v26 = vmul.f32 0.5, %v11051_v39  ;;  %v9420_v62 = vpop.f32.mrf.mxu1  ;;  %11076 = vtanh.f32 %v3802_v25 }
 0x417   : > { %v11055_v3 = vpop.eup %11054  ;;  %8223 = vst [vmem:[%s11683_s3 + $0x830] sm:$0xf] %v9213_v13  ;;  %v5723_v36 = vadd.f32 0.5, %v5048_v63  ;;  %v9228_v0 = vpack.c.bf16 %v5737_v4, %v5736_v50  ;;  %v5091_v44 = vmul.f32 0.5, %v11053_v56  ;;  %11078 = vtanh.f32 %v3758_v6 }
 0x418   : > { %v11057_v38 = vpop.eup %11056  ;;  %v5752_v16 = vadd.f32 0.5, %v5077_v26  ;;  %v5092_v60 = vmul.f32 0.5, %v11055_v3  ;;  %v3137_v59 = vpop.f32.mrf.mxu1  ;;  %11080 = vtanh.f32 %v3816_v58 }
 0x419   : > { %v11059_v45 = vpop.eup %11058  ;;  %v9221_v48 = vpack.c.bf16 %v5723_v36, %v5723_v36  ;;  %v5063_v14 = vmul.f32 0.5, %v11057_v38  ;;  %8238 = vst [vmem:[%s11683_s3 + $0x8a0] sm:$0xff] %v9228_v0  ;;  %v5766_v46 = vadd.f32 0.5, %v5091_v44  ;;  %v3773_v1 = vmul.f32 0.5, %v3137_v59 }
 0x41a   : > { %v11061_v21 = vpop.eup %11060  ;;  %v9236_v18 = vpack.c.bf16 %v5752_v16, %v5751_v24  ;;  %v5767_v35 = vadd.f32 0.5, %v5092_v60  ;;  %v5106_v41 = vmul.f32 0.5, %v11059_v45  ;;  %v9423_v17 = vpop.f32.mrf.mxu1  ;;  %11082 = vtanh.f32 %v3817_v28 }
 0x41b   : > { %v11063_v57 = vpop.eup %11062  ;;  %8231 = vst [vmem:[%s11683_s3 + $0x86c] sm:$0xf] %v9221_v48  ;;  %v5738_v15 = vadd.f32 0.5, %v5063_v14  ;;  %v5107_v54 = vmul.f32 0.5, %v11061_v21  ;;  %11084 = vtanh.f32 %v3773_v1 }
 0x41c   : > { %v11065_v42 = vpop.eup %11064  ;;  %8246 = vst [vmem:[%s11683_s3 + $0x8dc] sm:$0xff] %v9236_v18  ;;  %v9244_v52 = vpack.c.bf16 %v5767_v35, %v5766_v46  ;;  %v5781_v55 = vadd.f32 0.5, %v5106_v41  ;;  %v5121_v33 = vmul.f32 0.5, %v11063_v57  ;;  %v3140_v49 = vpop.f32.mrf.mxu1  ;;  %11086 = vtanh.f32 %v3831_v31 }
 0x41d   : > { %v11067_v53 = vpop.eup %11066  ;;  %v9229_v20 = vpack.c.bf16 %v5738_v15, %v5738_v15  ;;  %v5078_v7 = vmul.f32 0.5, %v11065_v42  ;;  %v5782_v25 = vadd.f32 0.5, %v5107_v54  ;;  %v3788_v23 = vmul.f32 0.5, %v3140_v49 }
 0x41e   : > { %v11069_v43 = vpop.eup %11068  ;;  %8254 = vst [vmem:[%s11683_s3 + $0x918] sm:$0xff] %v9244_v52  ;;  %v5122_v37 = vmul.f32 0.5, %v11067_v53  ;;  %v9424_v9 = vpop.f32.mrf.mxu1  ;;  %11088 = vtanh.f32 %v3832_v32  ;;  %v5796_v30 = vadd.f32 0.5, %v5121_v33 }
 0x41f   : > { %v11071_v58 = vpop.eup %11070  ;;  %8239 = vst [vmem:[%s11683_s3 + $0x8a8] sm:$0xf] %v9229_v20  ;;  %v5753_v51 = vadd.f32 0.5, %v5078_v7  ;;  %v9252_v34 = vpack.c.bf16 %v5782_v25, %v5781_v55  ;;  %v5136_v40 = vmul.f32 0.5, %v11069_v43  ;;  %11090 = vtanh.f32 %v3788_v23 }
 0x420   : > { %v11073_v8 = vpop.eup %11072  ;;  %v5797_v22 = vadd.f32 0.5, %v5122_v37  ;;  %v5137_v10 = vmul.f32 0.5, %v11071_v58  ;;  %v3145_v29 = vpop.f32.mrf.mxu1 }
 0x421   : > { %v11075_v2 = vpop.eup %11074  ;;  %v9237_v12 = vpack.c.bf16 %v5753_v51, %v5753_v51  ;;  %v5093_v11 = vmul.f32 0.5, %v11073_v8  ;;  %8262 = vst [vmem:[%s11683_s3 + $0x954] sm:$0xff] %v9252_v34  ;;  %v3803_v5 = vmul.f32 0.5, %v3145_v29  ;;  %v5811_v19 = vadd.f32 0.5, %v5136_v40 }
 0x422   : > { %v9260_v28 = vpack.c.bf16 %v5797_v22, %v5796_v30  ;;  %v5812_v61 = vadd.f32 0.5, %v5137_v10  ;;  %v5151_v50 = vmul.f32 0.5, %v11075_v2  ;;  %v9427_v47 = vpop.f32.mrf.mxu1 }
 0x423   : > { %v11077_v27 = vpop.eup %11076  ;;  %8247 = vst [vmem:[%s11683_s3 + $0x8e4] sm:$0xf] %v9237_v12  ;;  %v5768_v39 = vadd.f32 0.5, %v5093_v11  ;;  %11092 = vtanh.f32 %v3803_v5 }
 0x424   : > { %v11079_v13 = vpop.eup %11078  ;;  %8270 = vst [vmem:[%s11683_s3 + $0x990] sm:$0xff] %v9260_v28  ;;  %v9268_v63 = vpack.c.bf16 %v5812_v61, %v5811_v19  ;;  %v5152_v4 = vmul.f32 0.5, %v11077_v27  ;;  %v3148_v6 = vpop.f32.mrf.mxu1  ;;  %v5826_v31 = vadd.f32 0.5, %v5151_v50 }
 0x425   : > { %v11081_v56 = vpop.eup %11080  ;;  %v9245_v24 = vpack.c.bf16 %v5768_v39, %v5768_v39  ;;  %v5108_v26 = vmul.f32 0.5, %v11079_v13  ;;  %v3818_v62 = vmul.f32 0.5, %v3148_v6 }
 0x426   : > { %8278 = vst [vmem:[%s11683_s3 + $0x9cc] sm:$0xff] %v9268_v63  ;;  %v5827_v3 = vadd.f32 0.5, %v5152_v4  ;;  %v5166_v36 = vmul.f32 0.5, %v11081_v56  ;;  %v9428_v0 = vpop.f32.mrf.mxu1 }
 0x427   : > { %v11083_v44 = vpop.eup %11082  ;;  %8255 = vst [vmem:[%s11683_s3 + $0x920] sm:$0xf] %v9245_v24  ;;  %v5783_v38 = vadd.f32 0.5, %v5108_v26  ;;  %11094 = vtanh.f32 %v3818_v62 }
 0x428   : > { %v11085_v16 = vpop.eup %11084  ;;  %v9276_v60 = vpack.c.bf16 %v5827_v3, %v5826_v31  ;;  %v5167_v59 = vmul.f32 0.5, %v11083_v44  ;;  %v3153_v32 = vpop.f32.mrf.mxu1  ;;  %v5841_v1 = vadd.f32 0.5, %v5166_v36 }
 0x429   : > { %v11087_v45 = vpop.eup %11086  ;;  %v9253_v48 = vpack.c.bf16 %v5783_v38, %v5783_v38  ;;  %v5123_v14 = vmul.f32 0.5, %v11085_v16  ;;  %v3833_v46 = vmul.f32 0.5, %v3153_v32 }
 0x42a   : > { %8286 = vst [vmem:[%s11683_s3 + $0xa08] sm:$0xff] %v9276_v60  ;;  %v5842_v21 = vadd.f32 0.5, %v5167_v59  ;;  %v5181_v18 = vmul.f32 0.5, %v11087_v45  ;;  %v9431_v35 = vpop.f32.mrf.mxu1 }
 0x42b   : > { %v11089_v41 = vpop.eup %11088  ;;  %8263 = vst [vmem:[%s11683_s3 + $0x95c] sm:$0xf] %v9253_v48  ;;  %v5798_v17 = vadd.f32 0.5, %v5123_v14  ;;  %11096 = vtanh.f32 %v3833_v46 }
 0x42c   : > { %v11091_v57 = vpop.eup %11090  ;;  %v9284_v15 = vpack.c.bf16 %v5842_v21, %v5841_v1  ;;  %v5182_v54 = vmul.f32 0.5, %v11089_v41  ;;  %v3156_v42 = vpop.f32.mrf.mxu1  ;;  %v5856_v33 = vadd.f32 0.5, %v5181_v18 }
 0x42d   : > { %v9261_v52 = vpack.c.bf16 %v5798_v17, %v5798_v17  ;;  %v5138_v55 = vmul.f32 0.5, %v11091_v57 }
 0x42e   : > { %8294 = vst [vmem:[%s11683_s3 + $0xa44] sm:$0xff] %v9284_v15  ;;  %v5857_v49 = vadd.f32 0.5, %v5182_v54  ;;  %v9432_v53 = vpop.f32.mrf.mxu1 }
 0x42f   : > { %8271 = vst [vmem:[%s11683_s3 + $0x998] sm:$0xf] %v9261_v52  ;;  %v5813_v20 = vadd.f32 0.5, %v5138_v55 }
 0x430   : > { %v11093_v7 = vpop.eup %11092  ;;  %v9292_v25 = vpack.c.bf16 %v5857_v49, %v5856_v33 }
 0x431   : > { %v9269_v23 = vpack.c.bf16 %v5813_v20, %v5813_v20  ;;  %v5153_v43 = vmul.f32 0.5, %v11093_v7 }
 0x432   : > { %8302 = vst [vmem:[%s11683_s3 + $0xa80] sm:$0xff] %v9292_v25 }
 0x433   : > { %8279 = vst [vmem:[%s11683_s3 + $0x9d4] sm:$0xf] %v9269_v23  ;;  %v5828_v37 = vadd.f32 0.5, %v5153_v43 }
 0x434   : > { %v11095_v9 = vpop.eup %11094 }
 0x435   : > { %v9277_v58 = vpack.c.bf16 %v5828_v37, %v5828_v37  ;;  %v5168_v51 = vmul.f32 0.5, %v11095_v9 }
 0x437   : > { %8287 = vst [vmem:[%s11683_s3 + $0xa10] sm:$0xf] %v9277_v58  ;;  %v5843_v34 = vadd.f32 0.5, %v5168_v51 }
 0x438   : > { %v11097_v40 = vpop.eup %11096 }
 0x439   : > { %v9285_v8 = vpack.c.bf16 %v5843_v34, %v5843_v34  ;;  %v5183_v30 = vmul.f32 0.5, %v11097_v40 }
 0x43b   : > { %8295 = vst [vmem:[%s11683_s3 + $0xa4c] sm:$0xf] %v9285_v8  ;;  %v5858_v22 = vadd.f32 0.5, %v5183_v30 }
 0x43d   : > { %v9293_v10 = vpack.c.bf16 %v5858_v22, %v5858_v22 }
 0x43f   : > { %8303 = vst [vmem:[%s11683_s3 + $0xa88] sm:$0xf] %v9293_v10 }
 0x440   : > { %11199 = shalt.err (!%p11196_p11)
}
 0x441   : > { %s11200_s30 = scalar_lea.hbm %s14077_s22, 43200  ;;  %s11204_s3 = scalar_lea.hbm %s14144_s2, 259200 }
 0x442   : > { %p11201_p12 = scmp.ne.s32.totalorder %s14077_s22, %s11200_s30  ;;  %p11205_p6 = scmp.lt.s32.totalorder %s14077_s22, %s14144_s2 }
 0x443   : > { %p11206_p7 = scmp.lt.s32.totalorder %s11204_s3, %s11200_s30 }
 0x444   : > { %p11202_p0 = pnand %p11201_p12, %p11422_p13 }
 0x445   : > { %p11207_p8 = por %p11206_p7, %p11205_p6 }
 0x446   : > { %p11203_p1 = pneg %p11202_p0 }
 0x448   : > { %p11208_p4 = pnand %p11207_p8, %p11203_p1 }
 0x44a   : > { %11211 = shalt.err (!%p11208_p4)
}
 0x44b   : > { %s11315_s7 = smov 960   ;;  %s11316_s20 = smov 60  }
 0x44c   : > { %9441 = dma.vmem_to_hbm [thread:$0]  (%p11422_p13), %s14072_s12, 43200, %s14077_s22, %s14082_s18, %s11315_s7, %s11315_s7, %s11316_s20  }
 0x44d PF: > { %p9453_p5 = scmp.ge.s32.totalorder %s11306_s19, 2  ;;  %s8336_s15 = sand.u32 1, %s11266_s9  }
 0x44e   : > { %s8337_s16 = scalar_lea.sflag [#allocation4], %s8336_s15 }
 0x44f   : > { %p9448_p9 = pnand %p9453_p5, %p11427_p2 }
 0x451   : > { %p9449_p10 = pneg %p9448_p9 }
 0x453   : > { %11261 = dma.done.wait (%p9449_p10), %s8337_s16, 43200  }
 0x454   : > { %11263 = vsyncadd (%p9449_p10), %s8337_s16, 4294924096  ;;  %s18_s19 = sadd.s32 1, %s11306_s19   ;;  %s14243_s16 = sld [smem:[#allocation8_spill]] }
 0x455   : > { %p15_p3 = scmp.ge.s32.totalorder %s18_s19, 8   ;;  %s14244_s5 = sld [smem:[#allocation9_spill]] }
 0x456   : > { %s14245_s18 = sld [smem:[#allocation10_spill]]  ;;  %s14246_s9 = smov %s11270_s10 }
 0x457   : > { %s14247_s10 = smov %s11274_s11  ;;  %s14248_s11 = smov %s11420_s4 }
 0x458   : > { %s14249_s12 = smov %s11282_s13  ;;  %s14250_s13 = smov %s11286_s14 }
 0x459   : > { %s14251_s14 = smov %s11406_s27  ;;  %s14252_s15 = smov %s11298_s17 }
 0x45a   :  { %17 = sbr.rel (!%p15_p3) target bundleno = 9 (0x9), region = 76 }
 0x45b   : > { %s14253_s17 = smov %s14244_s5 }
 0x45f   :  { %8342 = vsyncpa [#allocation3], 1 }
 0x460   :  { %8344 = vsyncpa [#allocation3 + $0x1], 1 }
 0x461   :  { %8345 = vsyncpa [#allocation4], 1 }
 0x462   :  { %8347 = vsyncpa [#allocation4 + $0x1], 1 }

</bundles_post_ra>
